<compile_context>
chip_gen: v7x
topology: tpu7x:2x2x1
jax: 0.10.0
libtpu: 0.0.40
codegen_flags: <defaults>
</compile_context>

<pallas_src>
import functools
import math

import jax
import jax.numpy as jnp
from jax.experimental import pallas as pl
from jax.experimental.pallas import tpu as pltpu


# --------------------------------------------------------------------------
# small helpers
# --------------------------------------------------------------------------

def _round_up(a, m):
    return (a + m - 1) // m * m


def _cparams(block_bytes, sem=("parallel",)):
    lim = int(min(60 * 1024 * 1024, max(20 * 1024 * 1024, 3 * int(block_bytes))))
    return pltpu.CompilerParams(dimension_semantics=sem, vmem_limit_bytes=lim)


def _pick_tm(M, width, cap=1024):
    """Row-tile for flattened (M, width) matmuls: big (VMEM-budgeted), padding
    waste bounded by halving."""
    vcap = max(8, ((3 << 20) // max(4 * width, 1)) // 8 * 8)
    TM = min(cap, vcap, _round_up(M, 8))
    while TM > 8 and _round_up(M, TM) - M > TM // 2:
        TM = _round_up(TM // 2, 8)
    return TM


def _apply_act(x, act):
    if act == "relu":
        return jnp.maximum(x, 0.0)
    if act == "sigmoid":
        return jax.nn.sigmoid(x)
    return x


def _row(v):
    return v.reshape(1, -1).astype(jnp.float32)


# --------------------------------------------------------------------------
# Pallas kernels
# --------------------------------------------------------------------------

def _linear_kernel(x_ref, w_ref, b_ref, o_ref, *, act):
    y = jnp.dot(x_ref[...], w_ref[...],
                preferred_element_type=jnp.float32) + b_ref[...]
    o_ref[...] = _apply_act(y, act).astype(o_ref.dtype)


def pallas_linear(x, p, act="none", out_dtype=jnp.float32):
    """y = act(x @ w + b) over the last dim.  VMEM-sized M-tile, bf16 matmul."""
    orig = x.shape
    cin, cout = orig[-1], p["w"].shape[1]
    x2 = x.reshape(-1, cin).astype(jnp.bfloat16)
    M = x2.shape[0]
    TM = _pick_tm(M, cin + cout)
    Mp = _round_up(M, TM)
    if Mp != M:
        x2 = jnp.pad(x2, ((0, Mp - M), (0, 0)))
    blk = TM * (cin + cout) * 8 + cin * cout * 4
    out = pl.pallas_call(
        functools.partial(_linear_kernel, act=act),
        out_shape=jax.ShapeDtypeStruct((Mp, cout), out_dtype),
        grid=(Mp // TM,),
        in_specs=[
            pl.BlockSpec((TM, cin), lambda i: (i, 0)),
            pl.BlockSpec((cin, cout), lambda i: (0, 0)),
            pl.BlockSpec((1, cout), lambda i: (0, 0)),
        ],
        out_specs=pl.BlockSpec((TM, cout), lambda i: (i, 0)),
        compiler_params=_cparams(blk),
    )(x2, p["w"], p["b"])
    return out[:M].reshape(orig[:-1] + (cout,))


def _fc2_kernel(x_ref, w1_ref, b1_ref, w2_ref, b2_ref, o_ref, *, act1, act2):
    h = _apply_act(jnp.dot(x_ref[...], w1_ref[...],
                           preferred_element_type=jnp.float32) + b1_ref[...], act1)
    y = _apply_act(jnp.dot(h.astype(w2_ref.dtype), w2_ref[...],
                           preferred_element_type=jnp.float32) + b2_ref[...], act2)
    o_ref[...] = y.astype(o_ref.dtype)


def pallas_fc2(x, p1, p2, act1="relu", act2="none", out_dtype=jnp.float32):
    """Fused 2-layer FC: intermediate never leaves VMEM/vregs.
    TODO(synk): BatchNorm2d inside the reference FC is treated as identity."""
    orig = x.shape
    cin, cmid, cout = orig[-1], p1["w"].shape[1], p2["w"].shape[1]
    x2 = x.reshape(-1, cin).astype(jnp.bfloat16)
    M = x2.shape[0]
    TM = _pick_tm(M, cin + cmid + cout)
    Mp = _round_up(M, TM)
    if Mp != M:
        x2 = jnp.pad(x2, ((0, Mp - M), (0, 0)))
    blk = TM * (cin + cmid + cout) * 8 + (cin * cmid + cmid * cout) * 4
    out = pl.pallas_call(
        functools.partial(_fc2_kernel, act1=act1, act2=act2),
        out_shape=jax.ShapeDtypeStruct((Mp, cout), out_dtype),
        grid=(Mp // TM,),
        in_specs=[
            pl.BlockSpec((TM, cin), lambda i: (i, 0)),
            pl.BlockSpec((cin, cmid), lambda i: (0, 0)),
            pl.BlockSpec((1, cmid), lambda i: (0, 0)),
            pl.BlockSpec((cmid, cout), lambda i: (0, 0)),
            pl.BlockSpec((1, cout), lambda i: (0, 0)),
        ],
        out_specs=pl.BlockSpec((TM, cout), lambda i: (i, 0)),
        compiler_params=_cparams(blk),
    )(x2, p1["w"], p1["b"], p2["w"], p2["b"])
    return out[:M].reshape(orig[:-1] + (cout,))


def _bmm_kernel(a_ref, b_ref, o_ref):
    o_ref[...] = jnp.einsum("gmk,gkn->gmn", a_ref[...], b_ref[...],
                            preferred_element_type=jnp.float32).astype(o_ref.dtype)


def pallas_bmm(a, b, out_dtype=jnp.float32):
    """Batched matmul (G,M,K)@(G,K,N) -> (G,M,N); group axis padded to the
    chosen block so no degenerate 1-group grids.
    TODO(synk): M/N tiling inside a group is not implemented (fine for the
    small per-batch graphs used here)."""
    G, M, Kd = a.shape
    N = b.shape[2]
    per = (M * Kd + Kd * N) * 2 + M * N * 4
    Gb = max(1, min(G, (4 << 20) // max(per, 1)))
    Gp = _round_up(G, Gb)
    a = a.astype(jnp.bfloat16)
    b = b.astype(jnp.bfloat16)
    if Gp != G:
        a = jnp.pad(a, ((0, Gp - G), (0, 0), (0, 0)))
        b = jnp.pad(b, ((0, Gp - G), (0, 0), (0, 0)))
    out = pl.pallas_call(
        _bmm_kernel,
        out_shape=jax.ShapeDtypeStruct((Gp, M, N), out_dtype),
        grid=(Gp // Gb,),
        in_specs=[
            pl.BlockSpec((Gb, M, Kd), lambda g: (g, 0, 0)),
            pl.BlockSpec((Gb, Kd, N), lambda g: (g, 0, 0)),
        ],
        out_specs=pl.BlockSpec((Gb, M, N), lambda g: (g, 0, 0)),
        compiler_params=_cparams(Gb * per),
    )(a, b)
    return out[:G]


def _self_attn_kernel(x_ref, e_ref, wx_ref, we_ref, bqkv_ref,
                      wo1_ref, bo1_ref, wo2_ref, bo2_ref, o_ref, *, Kh, d, scale):
    """Fused: relu(cat(x,e)@Wqkv + b), multi-head attention over the middle
    axis, then the output FC pair.  Per-head outputs are lane-concatenated so
    the (D,D) output projection is a single full-K matmul."""
    Gb, L, D = x_ref.shape
    x2 = x_ref[...].reshape(Gb * L, D)
    e2 = e_ref[...].reshape(Gb * L, D)
    qkv = (jnp.dot(x2, wx_ref[...], preferred_element_type=jnp.float32)
           + jnp.dot(e2, we_ref[...], preferred_element_type=jnp.float32)
           + bqkv_ref[...])
    qkv = jnp.maximum(qkv, 0.0).astype(jnp.bfloat16).reshape(Gb, L, 3 * D)
    heads = []
    for hh in range(Kh):                        # heads live in the lane dim
        q = qkv[..., hh * d:(hh + 1) * d]
        k = qkv[..., D + hh * d:D + (hh + 1) * d]
        v = qkv[..., 2 * D + hh * d:2 * D + (hh + 1) * d]
        s = jnp.einsum("gqd,gkd->gqk", q, k,
                       preferred_element_type=jnp.float32) * scale
        s = s - jnp.max(s, axis=-1, keepdims=True)
        pr = jnp.exp(s)
        pr = pr * pl.reciprocal(jnp.sum(pr, axis=-1, keepdims=True), approx=True)
        heads.append(jnp.einsum("gqk,gkd->gqd", pr.astype(jnp.bfloat16), v,
                                preferred_element_type=jnp.float32))
    attn = jnp.concatenate(heads, axis=-1).reshape(Gb * L, D).astype(jnp.bfloat16)
    h1 = jnp.maximum(jnp.dot(attn, wo1_ref[...],
                             preferred_element_type=jnp.float32) + bo1_ref[...], 0.0)
    y = jnp.dot(h1.astype(jnp.bfloat16), wo2_ref[...],
                preferred_element_type=jnp.float32) + bo2_ref[...]
    o_ref[...] = y.reshape(Gb, L, D).astype(o_ref.dtype)


def pallas_self_attention_block(x3, e3, p, Kh, d):
    """x3, e3: (G, L, D).  Whole SGA/TEA module in one pallas_call, bf16 out."""
    G, L, D = x3.shape
    per_group = L * D * 24 + L * L * 16                    # rough VMEM bytes
    Gb = max(1, min(G, (8 << 20) // max(per_group, 1)))
    Gp = _round_up(G, Gb)
    x3 = x3.astype(jnp.bfloat16)
    e3 = e3.astype(jnp.bfloat16)
    if Gp != G:
        pad = ((0, Gp - G), (0, 0), (0, 0))
        x3, e3 = jnp.pad(x3, pad), jnp.pad(e3, pad)
    scale = 1.0 / math.sqrt(d)
    blk = Gb * per_group + 10 * D * D * 2
    out = pl.pallas_call(
        functools.partial(_self_attn_kernel, Kh=Kh, d=d, scale=scale),
        out_shape=jax.ShapeDtypeStruct((Gp, L, D), jnp.bfloat16),
        grid=(Gp // Gb,),
        in_specs=[
            pl.BlockSpec((Gb, L, D), lambda i: (i, 0, 0)),
            pl.BlockSpec((Gb, L, D), lambda i: (i, 0, 0)),
            pl.BlockSpec((D, 3 * D), lambda i: (0, 0)),
            pl.BlockSpec((D, 3 * D), lambda i: (0, 0)),
            pl.BlockSpec((1, 3 * D), lambda i: (0, 0)),
            pl.BlockSpec((D, D), lambda i: (0, 0)),
            pl.BlockSpec((1, D), lambda i: (0, 0)),
            pl.BlockSpec((D, D), lambda i: (0, 0)),
            pl.BlockSpec((1, D), lambda i: (0, 0)),
        ],
        out_specs=pl.BlockSpec((Gb, L, D), lambda i: (i, 0, 0)),
        compiler_params=_cparams(blk),
    )(x3, e3, p["wqkv_x"], p["wqkv_e"], p["bqkv"],
      p["wo1"], p["bo1"], p["wo2"], p["bo2"])
    return out[:G]


def _cross_attn_kernel(qs_ref, kv_ref, wq_ref, bq_ref, wkv_ref, bkv_ref,
                       wo1_ref, bo1_ref, wo2_ref, bo2_ref, o_ref, *, Kh, d, scale):
    Gb, Lq, D = qs_ref.shape
    Lk = kv_ref.shape[1]
    q_all = jnp.maximum(
        jnp.dot(qs_ref[...].reshape(Gb * Lq, D), wq_ref[...],
                preferred_element_type=jnp.float32) + bq_ref[...], 0.0
    ).astype(jnp.bfloat16).reshape(Gb, Lq, D)
    kv_all = jnp.maximum(
        jnp.dot(kv_ref[...].reshape(Gb * Lk, D), wkv_ref[...],
                preferred_element_type=jnp.float32) + bkv_ref[...], 0.0
    ).astype(jnp.bfloat16).reshape(Gb, Lk, 2 * D)
    heads = []
    for hh in range(Kh):
        q = q_all[..., hh * d:(hh + 1) * d]
        k = kv_all[..., hh * d:(hh + 1) * d]
        v = kv_all[..., D + hh * d:D + (hh + 1) * d]
        s = jnp.einsum("gqd,gkd->gqk", q, k,
                       preferred_element_type=jnp.float32) * scale
        s = s - jnp.max(s, axis=-1, keepdims=True)
        pr = jnp.exp(s)
        pr = pr * pl.reciprocal(jnp.sum(pr, axis=-1, keepdims=True), approx=True)
        heads.append(jnp.einsum("gqk,gkd->gqd", pr.astype(jnp.bfloat16), v,
                                preferred_element_type=jnp.float32))
    attn = jnp.concatenate(heads, axis=-1).reshape(Gb * Lq, D).astype(jnp.bfloat16)
    h1 = jnp.maximum(jnp.dot(attn, wo1_ref[...],
                             preferred_element_type=jnp.float32) + bo1_ref[...], 0.0)
    y = jnp.dot(h1.astype(jnp.bfloat16), wo2_ref[...],
                preferred_element_type=jnp.float32) + bo2_ref[...]
    o_ref[...] = y.reshape(Gb, Lq, D).astype(o_ref.dtype)


def pallas_cross_attention_block(qsrc, kvsrc, p, Kh, d):
    """qsrc: (G, Lq, D) query source, kvsrc: (G, Lk, D) key/value source."""
    G, Lq, D = qsrc.shape
    Lk = kvsrc.shape[1]
    per_group = (Lq + Lk) * D * 24 + Lq * Lk * 16
    Gb = max(1, min(G, (8 << 20) // max(per_group, 1)))
    Gp = _round_up(G, Gb)
    qsrc = qsrc.astype(jnp.bfloat16)
    kvsrc = kvsrc.astype(jnp.bfloat16)
    if Gp != G:
        pad = ((0, Gp - G), (0, 0), (0, 0))
        qsrc, kvsrc = jnp.pad(qsrc, pad), jnp.pad(kvsrc, pad)
    scale = 1.0 / math.sqrt(d)
    blk = Gb * per_group + 8 * D * D * 2
    out = pl.pallas_call(
        functools.partial(_cross_attn_kernel, Kh=Kh, d=d, scale=scale),
        out_shape=jax.ShapeDtypeStruct((Gp, Lq, D), jnp.bfloat16),
        grid=(Gp // Gb,),
        in_specs=[
            pl.BlockSpec((Gb, Lq, D), lambda i: (i, 0, 0)),
            pl.BlockSpec((Gb, Lk, D), lambda i: (i, 0, 0)),
            pl.BlockSpec((D, D), lambda i: (0, 0)),
            pl.BlockSpec((1, D), lambda i: (0, 0)),
            pl.BlockSpec((D, 2 * D), lambda i: (0, 0)),
            pl.BlockSpec((1, 2 * D), lambda i: (0, 0)),
            pl.BlockSpec((D, D), lambda i: (0, 0)),
            pl.BlockSpec((1, D), lambda i: (0, 0)),
            pl.BlockSpec((D, D), lambda i: (0, 0)),
            pl.BlockSpec((1, D), lambda i: (0, 0)),
        ],
        out_specs=pl.BlockSpec((Gb, Lq, D), lambda i: (i, 0, 0)),
        compiler_params=_cparams(blk),
    )(qsrc, kvsrc, p["wq"], p["bq"], p["wkv"], p["bkv"],
      p["wo1"], p["bo1"], p["wo2"], p["bo2"])
    return out[:G]


def _gate_kernel(x_ref, hs_ref, ht_ref, ws_ref, wt_ref, bg_ref,
                 wo1_ref, bo1_ref, wo2_ref, bo2_ref, wl_ref, bl_ref, o_ref):
    """gatedFusion + its FC pair + SGTLayer linear + residual, fully fused.
    bf16 matmul operands, f32 accumulation + element-wise, bf16 output."""
    hs = hs_ref[...]
    ht = ht_ref[...]
    z = jax.nn.sigmoid(
        jnp.dot(hs, ws_ref[...], preferred_element_type=jnp.float32)
        + jnp.dot(ht, wt_ref[...], preferred_element_type=jnp.float32)
        + bg_ref[...])
    Hm = z * hs.astype(jnp.float32) + (1.0 - z) * ht.astype(jnp.float32)
    h1 = jnp.maximum(jnp.dot(Hm.astype(jnp.bfloat16), wo1_ref[...],
                             preferred_element_type=jnp.float32) + bo1_ref[...], 0.0)
    y = jnp.dot(h1.astype(jnp.bfloat16), wo2_ref[...],
                preferred_element_type=jnp.float32) + bo2_ref[...]
    y = jnp.dot(y.astype(jnp.bfloat16), wl_ref[...],
                preferred_element_type=jnp.float32) + bl_ref[...]
    o_ref[...] = (x_ref[...].astype(jnp.float32) + y).astype(o_ref.dtype)


def pallas_gate_fuse_residual(X, HS, HT, pg):
    shape = X.shape
    D = shape[-1]
    x2 = X.reshape(-1, D).astype(jnp.bfloat16)
    hs2 = HS.reshape(-1, D).astype(jnp.bfloat16)
    ht2 = HT.reshape(-1, D).astype(jnp.bfloat16)
    M = x2.shape[0]
    TM = _pick_tm(M, 4 * D)
    Mp = _round_up(M, TM)
    if Mp != M:
        pad = ((0, Mp - M), (0, 0))
        x2, hs2, ht2 = jnp.pad(x2, pad), jnp.pad(hs2, pad), jnp.pad(ht2, pad)
    mat = pl.BlockSpec((D, D), lambda i: (0, 0))
    vec = pl.BlockSpec((1, D), lambda i: (0, 0))
    act = pl.BlockSpec((TM, D), lambda i: (i, 0))
    blk = TM * D * 32 + 6 * D * D * 2
    out = pl.pallas_call(
        _gate_kernel,
        out_shape=jax.ShapeDtypeStruct((Mp, D), jnp.bfloat16),
        grid=(Mp // TM,),
        in_specs=[act, act, act, mat, mat, vec, mat, vec, mat, vec, mat, vec],
        out_specs=act,
        compiler_params=_cparams(blk),
    )(x2, hs2, ht2,
      pg["ws"], pg["wt"], pg["bg"],
      pg["wo1"], pg["bo1"], pg["wo2"], pg["bo2"], pg["wl"], pg["bl"])
    return out[:M].reshape(shape)


def _msts_kernel(x_ref, g_ref, b_ref, o_ref, acc_ref, *, N):
    """One (3N,3N)@(3N,T*C) graph matmul per (batch, scale) grid step; scales
    are the reduction axis accumulated in VMEM; one lane-dense (N,T*C) store."""
    gi = pl.program_id(1)

    @pl.when(gi == 0)
    def _():
        acc_ref[...] = jnp.zeros_like(acc_ref)

    h = jnp.dot(g_ref[0, 0], x_ref[0, 0], preferred_element_type=jnp.float32)
    b_row = b_ref[pl.ds(gi, 1), :]                         # (1, T*C)
    acc_ref[...] += jnp.maximum(h[N:2 * N] + b_row, 0.0)

    @pl.when(gi == pl.num_programs(1) - 1)
    def _():
        o_ref[0] = acc_ref[...].astype(o_ref.dtype)


# --------------------------------------------------------------------------
# Module building blocks (JAX glue around the Pallas kernels)
# --------------------------------------------------------------------------

def positional_encoding(T, D):
    pos = jnp.arange(T, dtype=jnp.float32)[:, None]
    i = jnp.arange(D, dtype=jnp.float32)[None, :]
    angle = pos / jnp.power(10000.0, (2.0 * jnp.floor(i / 2.0)) / D)
    even = (jnp.arange(D) % 2) == 0
    return jnp.where(even[None, :], jnp.sin(angle), jnp.cos(angle))  # (T, D)


def sgt_layer_apply(X, STE, SSE, lp, Kh, d, Satt=True, Tatt=True):
    B, T, N, D = X.shape
    HS = HT = None
    if Satt:                                   # attention over nodes
        HS = pallas_self_attention_block(
            X.reshape(B * T, N, D), SSE.reshape(B * T, N, D), lp["sga"], Kh, d
        ).reshape(B, T, N, D)
    if Tatt:                                   # attention over time
        # TODO(synk): the (B,T,N,D)->(B*N,T,D) permutation is still a wrapper
        # transpose; folding it into the BlockSpec index_map would save an HBM
        # pass per layer.
        Xt = X.transpose(0, 2, 1, 3).reshape(B * N, T, D)
        Et = STE.transpose(0, 2, 1, 3).reshape(B * N, T, D)
        HT = pallas_self_attention_block(Xt, Et, lp["tea"], Kh, d)
        HT = HT.reshape(B, N, T, D).transpose(0, 2, 1, 3)
    if Satt and Tatt:
        return pallas_gate_fuse_residual(X, HS, HT, lp["gate"])
    H = HT if Tatt else HS                     # dropout = identity (eval)
    H = pallas_linear(H, lp["lin"], "none", out_dtype=jnp.float32)
    return (X.astype(jnp.float32) + H).astype(jnp.bfloat16)


def transform_attention_apply(X, STE_fut, p, Kh, d):
    """EncoderDecoderAttention: query from future embedding, K/V from encoder."""
    B, Th, N, D = X.shape
    Tf = STE_fut.shape[1]
    qsrc = STE_fut.transpose(0, 2, 1, 3).reshape(B * N, Tf, D)
    kvsrc = X.transpose(0, 2, 1, 3).reshape(B * N, Th, D)
    out = pallas_cross_attention_block(qsrc, kvsrc, p, Kh, d)
    return out.reshape(B, N, Tf, D).transpose(0, 2, 1, 3)


def pt_embedding_apply(x_mark, y_mark, poi, p):
    # TODO(synk): PTEmbedding body not provided; GMAN-style ST embedding
    # (poi FC + time-mark FC, broadcast-added) is used instead.
    SE = pallas_fc2(poi, p["se1"], p["se2"])                     # (N, D)
    B = x_mark.shape[0]
    marks = jnp.concatenate([x_mark, y_mark], axis=0)            # one fused call
    TE = pallas_fc2(marks, p["te1"], p["te2"])                   # (2B, T, D)
    E_his = (SE[None, None] + TE[:B, :, None, :]).astype(jnp.bfloat16)
    E_fut = (SE[None, None] + TE[B:, :, None, :]).astype(jnp.bfloat16)
    return E_his, E_fut


def graph_learner_apply(x, pre_graph, p):
    # TODO(synk): AdaptiveGraphLearner body not provided; mean-pooled node
    # features -> projection -> softmax(relu(E E^T) + pre_graph).
    xm = jnp.mean(x, axis=1)                                     # (B, N, in_dim)
    E = pallas_linear(xm, p, "relu", out_dtype=jnp.bfloat16)     # (B, N, d_model)
    logits = pallas_bmm(E, jnp.swapaxes(E, 1, 2))                # (B, N, N) f32
    return jax.nn.softmax(jnp.maximum(logits, 0.0) + pre_graph[None], axis=-1)


def _block3(rows):
    return jnp.concatenate([jnp.concatenate(r, axis=-1) for r in rows], axis=-2)


def graph_construct(A):
    # TODO(synk): construct_adj_local_torch / construct_dynamic_adj_1hop_torch2 /
    # construct_dynamic_adj_lt_optimized bodies not provided; STSGCN-style
    # 3N x 3N block graphs are built instead.
    B, N, _ = A.shape
    A = A.astype(jnp.bfloat16)
    I = jnp.broadcast_to(jnp.eye(N, dtype=A.dtype), (B, N, N))
    Z = jnp.zeros((B, N, N), A.dtype)
    A2 = jnp.clip(pallas_bmm(A, A, out_dtype=jnp.bfloat16), 0.0, 1.0)
    local = _block3([[A, I, Z], [I, A, I], [Z, I, A]])
    hop1 = _block3([[A, A, Z], [A, A, A], [Z, A, A]])
    hop2 = _block3([[A, I, A2], [I, A, I], [A2, I, A]])
    return [local, hop1, hop2]


def msts_gcc_apply(x, graphs, p):
    # TODO(synk): MSTS_GCC_dynamic_graph body not provided; STSGCN-style
    # localized spatio-temporal graph conv per graph scale, summed.
    B, T, N, C = x.shape
    # Pre-apply the per-scale (C,C) FC weight: (G@X)W == G@(XW); the per-scale
    # bias is added after the graph matmul inside the kernel (tiled over T).
    xw = pallas_linear(x, {"w": p["wstack"], "b": p["bstack"]}, "none",
                       out_dtype=jnp.bfloat16)                   # (B,T,N,3C)
    xp = jnp.pad(xw, ((0, 0), (1, 1), (0, 0), (0, 0)))
    win = jnp.concatenate([xp[:, :T], xp[:, 1:T + 1], xp[:, 2:T + 2]], axis=2)
    win = win.transpose(0, 2, 1, 3)                              # (B,3N,T,3C)
    xs = jnp.stack([win[..., gi * C:(gi + 1) * C].reshape(B, 3 * N, T * C)
                    for gi in range(3)], axis=1)                 # (B,3,3N,T*C)
    G3 = jnp.stack(graphs, axis=1).astype(jnp.bfloat16)          # (B,3,3N,3N)
    blk = (3 * N * T * C * 8) + (9 * N * N * 2) + (3 * T * C * 4) + (N * T * C * 6)
    out = pl.pallas_call(
        functools.partial(_msts_kernel, N=N),
        out_shape=jax.ShapeDtypeStruct((B, N, T * C), jnp.bfloat16),
        grid=(B, 3),
        in_specs=[
            pl.BlockSpec((1, 1, 3 * N, T * C), lambda b, g: (b, g, 0, 0)),
            pl.BlockSpec((1, 1, 3 * N, 3 * N), lambda b, g: (b, g, 0, 0)),
            pl.BlockSpec((3, T * C), lambda b, g: (0, 0)),
        ],
        out_specs=pl.BlockSpec((1, N, T * C), lambda b, g: (b, 0, 0)),
        scratch_shapes=[pltpu.VMEM((N, T * C), jnp.float32)],
        compiler_params=_cparams(blk, sem=("parallel", "arbitrary")),
    )(xs, G3, p["btile"])
    return out.reshape(B, N, T, C).transpose(0, 2, 1, 3)         # (B,T,N,C) bf16


def conv1x1_time(x, p, act="none", out_dtype=jnp.bfloat16):
    """nn.Conv2d(Tin, Tout, kernel (1,1)) on NCHW input (B, Tin, N, D)."""
    B, Tin, N, D = x.shape
    Tout = p["w"].shape[1]
    xr = x.transpose(0, 2, 3, 1).reshape(-1, Tin)
    yr = pallas_linear(xr, p, act, out_dtype=out_dtype)
    return yr.reshape(B, N, D, Tout).transpose(0, 3, 1, 2)


# --------------------------------------------------------------------------
# DSGT forward
# --------------------------------------------------------------------------

def dsgt_forward(params, x, x_mark, y_mark, x_meter, poi_embedding, cfg):
    K, d = cfg["K"], cfg["d"]
    N = cfg["nodes"]

    # graph construction on the raw input (as in the reference)
    A = graph_learner_apply(x, params["pre_graph"], params["graph_learner"])
    graphs = graph_construct(A)

    if cfg["meter"]:
        xm5 = jnp.repeat(x_meter[:, :, None, :], N, axis=2)      # (B,T,N,5)
        xc = jnp.concatenate([x, xm5], axis=-1)                  # (B,T,N,in_dim+5)
        h = pallas_linear(xc, params["ed"], "none", out_dtype=jnp.float32)
    else:
        h = pallas_linear(x, params["proj2"], "none", out_dtype=jnp.float32)

    T = h.shape[1]
    h = (h + positional_encoding(T, h.shape[-1])[None, :, None, :]
         ).astype(jnp.bfloat16)

    E_SP = msts_gcc_apply(h, graphs, params["msts"])
    E_AU_his, E_AU_fut = pt_embedding_apply(x_mark, y_mark, poi_embedding,
                                            params["pte"])

    for lp in params["encoder"]:
        h = sgt_layer_apply(h, E_AU_his, E_SP, lp, K, d, cfg["Satt"], cfg["Tatt"])

    h = transform_attention_apply(h, E_AU_fut, params["transform"], K, d)

    for lp in params["decoder"]:
        h = sgt_layer_apply(h, E_AU_fut, E_SP, lp, K, d, cfg["Satt"], cfg["Tatt"])

    h = conv1x1_time(h, params["end_conv"], act="relu", out_dtype=jnp.bfloat16)
    h = pallas_fc2(h, params["fc2_1"], params["fc2_2"], "relu", "none",
                   out_dtype=jnp.float32)                        # FC_2: D->D->1
    return h


# --------------------------------------------------------------------------
# Parameter init (raw, f32) + one-time prep (bf16 casts, concatenations)
# --------------------------------------------------------------------------

def init_params(key, cfg):
    K, d = cfg["K"], cfg["d"]
    D = K * d
    dm = cfg["d_model"]
    in_dim = cfg["in_dim"]
    N, T, P = cfg["nodes"], cfg["seq_len"], cfg["pred_len"]
    keys = list(jax.random.split(key, 512))
    ctr = [0]

    def nk():
        k = keys[ctr[0]]
        ctr[0] += 1
        return k

    def lin(cin, cout, scale=0.1):
        kw, kb = jax.random.split(nk())
        return {"w": scale * jax.random.normal(kw, (cin, cout), jnp.float32),
                "b": scale * jax.random.normal(kb, (cout,), jnp.float32)}

    def attn_block(cin):
        return {"q": lin(cin, D), "k": lin(cin, D), "v": lin(cin, D),
                "o1": lin(D, D), "o2": lin(D, D)}

    def sgt_layer():
        return {"sga": attn_block(2 * D), "tea": attn_block(2 * D),
                "gf": {"ws": 0.1 * jax.random.normal(nk(), (D, D), jnp.float32),
                       "wt": 0.1 * jax.random.normal(nk(), (D, D), jnp.float32),
                       "bt": 0.1 * jax.random.normal(nk(), (D,), jnp.float32),
                       "o1": lin(D, D), "o2": lin(D, D)},
                "lin": lin(D, D)}

    return {
        "pre_graph": 0.1 * jax.random.normal(nk(), (N, N), jnp.float32),
        "graph_learner": lin(in_dim, dm),
        "ed": lin(in_dim + 5, dm),
        "proj2": lin(in_dim, dm),
        "msts": [lin(dm, dm) for _ in range(3)],
        "pte": {"se1": lin(cfg["poi_dim"], D), "se2": lin(D, D),
                "te1": lin(cfg["mark_dim"], D), "te2": lin(D, D)},
        "encoder": [sgt_layer() for _ in range(cfg["n_layers"])],
        "decoder": [sgt_layer() for _ in range(cfg["n_layers"])],
        "transform": {"q": lin(D, D), "k": lin(D, D), "v": lin(D, D),
                      "o1": lin(D, D), "o2": lin(D, D)},
        "end_conv": {"w": 0.1 * jax.random.normal(nk(), (T, P), jnp.float32),
                     "b": 0.1 * jax.random.normal(nk(), (P,), jnp.float32)},
        "fc2_1": lin(D, D),
        "fc2_2": lin(D, 1),
    }


def _prep_lin(p):
    return {"w": p["w"].astype(jnp.bfloat16), "b": _row(p["b"])}


def _prep_attn_self(p):
    D = p["o1"]["w"].shape[0]
    wq, wk, wv = p["q"]["w"], p["k"]["w"], p["v"]["w"]            # (2D, D)
    return {
        "wqkv_x": jnp.concatenate([wq[:D], wk[:D], wv[:D]], axis=1).astype(jnp.bfloat16),
        "wqkv_e": jnp.concatenate([wq[D:], wk[D:], wv[D:]], axis=1).astype(jnp.bfloat16),
        "bqkv": _row(jnp.concatenate([p["q"]["b"], p["k"]["b"], p["v"]["b"]])),
        "wo1": p["o1"]["w"].astype(jnp.bfloat16), "bo1": _row(p["o1"]["b"]),
        "wo2": p["o2"]["w"].astype(jnp.bfloat16), "bo2": _row(p["o2"]["b"]),
    }


def _prep_attn_cross(p):
    return {
        "wq": p["q"]["w"].astype(jnp.bfloat16), "bq": _row(p["q"]["b"]),
        "wkv": jnp.concatenate([p["k"]["w"], p["v"]["w"]], axis=1).astype(jnp.bfloat16),
        "bkv": _row(jnp.concatenate([p["k"]["b"], p["v"]["b"]])),
        "wo1": p["o1"]["w"].astype(jnp.bfloat16), "bo1": _row(p["o1"]["b"]),
        "wo2": p["o2"]["w"].astype(jnp.bfloat16), "bo2": _row(p["o2"]["b"]),
    }


def _prep_gate(pg, plin):
    return {"ws": pg["ws"].astype(jnp.bfloat16), "wt": pg["wt"].astype(jnp.bfloat16),
            "bg": _row(pg["bt"]),
            "wo1": pg["o1"]["w"].astype(jnp.bfloat16), "bo1": _row(pg["o1"]["b"]),
            "wo2": pg["o2"]["w"].astype(jnp.bfloat16), "bo2": _row(pg["o2"]["b"]),
            "wl": plin["w"].astype(jnp.bfloat16), "bl": _row(plin["b"])}


def _prep_sgt_layer(lp):
    return {"sga": _prep_attn_self(lp["sga"]), "tea": _prep_attn_self(lp["tea"]),
            "gate": _prep_gate(lp["gf"], lp["lin"]), "lin": _prep_lin(lp["lin"])}


def prepare_params(raw, cfg):
    """One-time (outside jit) bf16 casts and weight concatenations."""
    T, dm = cfg["seq_len"], cfg["d_model"]
    msts_w = jnp.concatenate([raw["msts"][gi]["w"] for gi in range(3)], axis=1)
    msts_b = jnp.stack([jnp.tile(raw["msts"][gi]["b"], T) for gi in range(3)], axis=0)
    return {
        "pre_graph": raw["pre_graph"].astype(jnp.float32),
        "graph_learner": _prep_lin(raw["graph_learner"]),
        "ed": _prep_lin(raw["ed"]),
        "proj2": _prep_lin(raw["proj2"]),
        "msts": {"wstack": msts_w.astype(jnp.bfloat16),
                 "bstack": jnp.zeros((1, 3 * dm), jnp.float32),
                 "btile": msts_b.astype(jnp.float32)},
        "pte": {"se1": _prep_lin(raw["pte"]["se1"]), "se2": _prep_lin(raw["pte"]["se2"]),
                "te1": _prep_lin(raw["pte"]["te1"]), "te2": _prep_lin(raw["pte"]["te2"])},
        "encoder": [_prep_sgt_layer(lp) for lp in raw["encoder"]],
        "decoder": [_prep_sgt_layer(lp) for lp in raw["decoder"]],
        "transform": _prep_attn_cross(raw["transform"]),
        "end_conv": _prep_lin(raw["end_conv"]),
        "fc2_1": _prep_lin(raw["fc2_1"]),
        "fc2_2": _prep_lin(raw["fc2_2"]),
    }


# --------------------------------------------------------------------------
# Demo
# --------------------------------------------------------------------------

if __name__ == "__main__":
    # d_model equals K*d so that E_SP / X dims line up in SGTLayer; y_mark is
    # given seq_len steps (decoder frame == encoder frame) so that
    # end_conv(in_channels=seq_len) type-checks, as in the reference.
    cfg = dict(K=2, d=8, d_model=16, nodes=8, seq_len=8, pred_len=4, in_dim=1,
               poi_dim=8, mark_dim=5, n_layers=1, meter=True, Satt=True, Tatt=True)

    key = jax.random.PRNGKey(0)
    k1, k2, k3, k4, k5, k6 = jax.random.split(key, 6)
    B, N, T = 2, cfg["nodes"], cfg["seq_len"]

    x = jax.random.normal(k1, (B, T, N, cfg["in_dim"]), jnp.float32)
    x_mark = jax.random.normal(k2, (B, T, cfg["mark_dim"]), jnp.float32)
    y_mark = jax.random.normal(k3, (B, T, cfg["mark_dim"]), jnp.float32)
    x_meter = jax.random.normal(k4, (B, T, 5), jnp.float32)
    poi_embedding = jax.random.normal(k5, (N, cfg["poi_dim"]), jnp.float32)

    params = prepare_params(init_params(k6, cfg), cfg)

    fwd = jax.jit(lambda p, a, b, c, e, f: dsgt_forward(p, a, b, c, e, f, cfg))
    out = fwd(params, x, x_mark, y_mark, x_meter, poi_embedding)
    out = jax.block_until_ready(out)
    assert out.shape == (B, cfg["pred_len"], N, 1), out.shape
    assert bool(jnp.all(jnp.isfinite(out)))
    print("KERNEL_OK")
</pallas_src>

<mosaic_0001>
module attributes {stable_mosaic.version = 11 : i64} {
  func.func @_linear_kernel(%arg0: i32, %arg1: memref<128x6xbf16, #tpu.memory_space<vmem>>, %arg2: memref<6x16xbf16, #tpu.memory_space<vmem>>, %arg3: memref<1x16xf32, #tpu.memory_space<vmem>>, %arg4: memref<128x16xf32, #tpu.memory_space<vmem>>) attributes {dimension_semantics = [#tpu.dimension_semantics<parallel>], iteration_bounds = array<i64: 1>, scalar_prefetch = 0 : i64, scratch_operands = 0 : i64, tpu.core_type = #tpu.core_type<tc>, window_params = [{transform_indices = @transform_0, window_bounds = array<i64: 128, 6>}, {pipeline_mode = #tpu.pipeline_mode<synchronous>, transform_indices = @transform_1, window_bounds = array<i64: 6, 16>}, {pipeline_mode = #tpu.pipeline_mode<synchronous>, transform_indices = @transform_2, window_bounds = array<i64: 1, 16>}, {transform_indices = @transform_3, window_bounds = array<i64: 128, 16>}]} {
    %c0 = arith.constant 0 : index
    %c0_0 = arith.constant 0 : index
    %0 = vector.load %arg1[%c0, %c0_0] : memref<128x6xbf16, #tpu.memory_space<vmem>>, vector<128x6xbf16>
    %c0_1 = arith.constant 0 : index
    %c0_2 = arith.constant 0 : index
    %1 = vector.load %arg2[%c0_1, %c0_2] : memref<6x16xbf16, #tpu.memory_space<vmem>>, vector<6x16xbf16>
    %cst = arith.constant dense<0.000000e+00> : vector<128x16xf32>
    %2 = tpu.matmul %0, %1, %cst {dimension_numbers = #tpu.dot_dimension_numbers<[1], [0], [0], [1], [0, 0, 1, 1], [], []>} : vector<128x6xbf16>, vector<6x16xbf16>, vector<128x16xf32> -> vector<128x16xf32>
    %c0_3 = arith.constant 0 : index
    %c0_4 = arith.constant 0 : index
    %3 = vector.load %arg3[%c0_3, %c0_4] : memref<1x16xf32, #tpu.memory_space<vmem>>, vector<1x16xf32>
    %4 = vector.broadcast %3 : vector<1x16xf32> to vector<128x16xf32>
    %5 = arith.addf %2, %4 : vector<128x16xf32>
    %c0_5 = arith.constant 0 : index
    %c0_6 = arith.constant 0 : index
    %6 = vector.load %arg4[%c0_5, %c0_6] : memref<128x16xf32, #tpu.memory_space<vmem>>, vector<128x16xf32>
    tpu.vector_store %arg4[%c0_5, %c0_6], %5 {strides = array<i32>} : memref<128x16xf32, #tpu.memory_space<vmem>>, vector<128x16xf32>,
    return
  }
  func.func @transform_0(%arg0: i32) -> (i32, i32) {
    %c0_i32 = arith.constant 0 : i32
    %c0_i32_0 = arith.constant 0 : i32
    return %arg0, %c0_i32 : i32, i32
  }
  func.func @transform_1(%arg0: i32) -> (i32, i32) {
    %c0_i32 = arith.constant 0 : i32
    %c0_i32_0 = arith.constant 0 : i32
    %c0_i32_1 = arith.constant 0 : i32
    return %c0_i32, %c0_i32_0 : i32, i32
  }
  func.func @transform_2(%arg0: i32) -> (i32, i32) {
    %c0_i32 = arith.constant 0 : i32
    %c0_i32_0 = arith.constant 0 : i32
    %c0_i32_1 = arith.constant 0 : i32
    return %c0_i32, %c0_i32_0 : i32, i32
  }
  func.func @transform_3(%arg0: i32) -> (i32, i32) {
    %c0_i32 = arith.constant 0 : i32
    %c0_i32_0 = arith.constant 0 : i32
    return %arg0, %c0_i32 : i32, i32
  }
}

module attributes {stable_mosaic.version = 11 : i64} {
  func.func @_linear_kernel(%arg0: i32, %arg1: memref<128x16xbf16, #tpu.memory_space<vmem>>, %arg2: memref<16x48xbf16, #tpu.memory_space<vmem>>, %arg3: memref<1x48xf32, #tpu.memory_space<vmem>>, %arg4: memref<128x48xbf16, #tpu.memory_space<vmem>>) attributes {dimension_semantics = [#tpu.dimension_semantics<parallel>], iteration_bounds = array<i64: 1>, scalar_prefetch = 0 : i64, scratch_operands = 0 : i64, tpu.core_type = #tpu.core_type<tc>, window_params = [{transform_indices = @transform_0, window_bounds = array<i64: 128, 16>}, {pipeline_mode = #tpu.pipeline_mode<synchronous>, transform_indices = @transform_1, window_bounds = array<i64: 16, 48>}, {pipeline_mode = #tpu.pipeline_mode<synchronous>, transform_indices = @transform_2, window_bounds = array<i64: 1, 48>}, {transform_indices = @transform_3, window_bounds = array<i64: 128, 48>}]} {
    %c0 = arith.constant 0 : index
    %c0_0 = arith.constant 0 : index
    %0 = vector.load %arg1[%c0, %c0_0] : memref<128x16xbf16, #tpu.memory_space<vmem>>, vector<128x16xbf16>
    %c0_1 = arith.constant 0 : index
    %c0_2 = arith.constant 0 : index
    %1 = vector.load %arg2[%c0_1, %c0_2] : memref<16x48xbf16, #tpu.memory_space<vmem>>, vector<16x48xbf16>
    %cst = arith.constant dense<0.000000e+00> : vector<128x48xf32>
    %2 = tpu.matmul %0, %1, %cst {dimension_numbers = #tpu.dot_dimension_numbers<[1], [0], [0], [1], [0, 0, 1, 1], [], []>} : vector<128x16xbf16>, vector<16x48xbf16>, vector<128x48xf32> -> vector<128x48xf32>
    %c0_3 = arith.constant 0 : index
    %c0_4 = arith.constant 0 : index
    %3 = vector.load %arg3[%c0_3, %c0_4] : memref<1x48xf32, #tpu.memory_space<vmem>>, vector<1x48xf32>
    %4 = vector.broadcast %3 : vector<1x48xf32> to vector<128x48xf32>
    %5 = arith.addf %2, %4 : vector<128x48xf32>
    %6 = arith.truncf %5 : vector<128x48xf32> to vector<128x48xbf16>
    %c0_5 = arith.constant 0 : index
    %c0_6 = arith.constant 0 : index
    %7 = vector.load %arg4[%c0_5, %c0_6] : memref<128x48xbf16, #tpu.memory_space<vmem>>, vector<128x48xbf16>
    tpu.vector_store %arg4[%c0_5, %c0_6], %6 {strides = array<i32>} : memref<128x48xbf16, #tpu.memory_space<vmem>>, vector<128x48xbf16>,
    return
  }
  func.func @transform_0(%arg0: i32) -> (i32, i32) {
    %c0_i32 = arith.constant 0 : i32
    %c0_i32_0 = arith.constant 0 : i32
    return %arg0, %c0_i32 : i32, i32
  }
  func.func @transform_1(%arg0: i32) -> (i32, i32) {
    %c0_i32 = arith.constant 0 : i32
    %c0_i32_0 = arith.constant 0 : i32
    %c0_i32_1 = arith.constant 0 : i32
    return %c0_i32, %c0_i32_0 : i32, i32
  }
  func.func @transform_2(%arg0: i32) -> (i32, i32) {
    %c0_i32 = arith.constant 0 : i32
    %c0_i32_0 = arith.constant 0 : i32
    %c0_i32_1 = arith.constant 0 : i32
    return %c0_i32, %c0_i32_0 : i32, i32
  }
  func.func @transform_3(%arg0: i32) -> (i32, i32) {
    %c0_i32 = arith.constant 0 : i32
    %c0_i32_0 = arith.constant 0 : i32
    return %arg0, %c0_i32 : i32, i32
  }
}

module attributes {stable_mosaic.version = 11 : i64} {
  func.func @_bmm_kernel(%arg0: i32, %arg1: memref<2x8x16xbf16, #tpu.memory_space<vmem>>, %arg2: memref<2x16x8xbf16, #tpu.memory_space<vmem>>, %arg3: memref<2x8x8xf32, #tpu.memory_space<vmem>>) attributes {dimension_semantics = [#tpu.dimension_semantics<parallel>], iteration_bounds = array<i64: 1>, scalar_prefetch = 0 : i64, scratch_operands = 0 : i64, tpu.core_type = #tpu.core_type<tc>, window_params = [{transform_indices = @transform_0, window_bounds = array<i64: 2, 8, 16>}, {transform_indices = @transform_1, window_bounds = array<i64: 2, 16, 8>}, {transform_indices = @transform_2, window_bounds = array<i64: 2, 8, 8>}]} {
    %c0 = arith.constant 0 : index
    %c0_0 = arith.constant 0 : index
    %c0_1 = arith.constant 0 : index
    %0 = vector.load %arg1[%c0, %c0_0, %c0_1] : memref<2x8x16xbf16, #tpu.memory_space<vmem>>, vector<2x8x16xbf16>
    %c0_2 = arith.constant 0 : index
    %c0_3 = arith.constant 0 : index
    %c0_4 = arith.constant 0 : index
    %1 = vector.load %arg2[%c0_2, %c0_3, %c0_4] : memref<2x16x8xbf16, #tpu.memory_space<vmem>>, vector<2x16x8xbf16>
    "tpu.trace_start"() <{level = 10 : i32, message = "gmk,gkn->gmn"}> : () -> ()
    %cst = arith.constant dense<0.000000e+00> : vector<2x8x8xf32>
    %2 = tpu.matmul %0, %1, %cst {dimension_numbers = #tpu.dot_dimension_numbers<[2], [1], [1], [2], [0, 0, 0, 1, 1, 2], [0], [0]>} : vector<2x8x16xbf16>, vector<2x16x8xbf16>, vector<2x8x8xf32> -> vector<2x8x8xf32>
    "tpu.trace_stop"() : () -> ()
    %c0_5 = arith.constant 0 : index
    %c0_6 = arith.constant 0 : index
    %c0_7 = arith.constant 0 : index
    %3 = vector.load %arg3[%c0_5, %c0_6, %c0_7] : memref<2x8x8xf32, #tpu.memory_space<vmem>>, vector<2x8x8xf32>
    tpu.vector_store %arg3[%c0_5, %c0_6, %c0_7], %2 {strides = array<i32>} : memref<2x8x8xf32, #tpu.memory_space<vmem>>, vector<2x8x8xf32>,
    return
  }
  func.func @transform_0(%arg0: i32) -> (i32, i32, i32) {
    %c0_i32 = arith.constant 0 : i32
    %c0_i32_0 = arith.constant 0 : i32
    %c0_i32_1 = arith.constant 0 : i32
    return %arg0, %c0_i32, %c0_i32_0 : i32, i32, i32
  }
  func.func @transform_1(%arg0: i32) -> (i32, i32, i32) {
    %c0_i32 = arith.constant 0 : i32
    %c0_i32_0 = arith.constant 0 : i32
    %c0_i32_1 = arith.constant 0 : i32
    return %arg0, %c0_i32, %c0_i32_0 : i32, i32, i32
  }
  func.func @transform_2(%arg0: i32) -> (i32, i32, i32) {
    %c0_i32 = arith.constant 0 : i32
    %c0_i32_0 = arith.constant 0 : i32
    %c0_i32_1 = arith.constant 0 : i32
    return %arg0, %c0_i32, %c0_i32_0 : i32, i32, i32
  }
}

module attributes {stable_mosaic.version = 11 : i64} {
  func.func @_bmm_kernel(%arg0: i32, %arg1: memref<2x8x8xbf16, #tpu.memory_space<vmem>>, %arg2: memref<2x8x8xbf16, #tpu.memory_space<vmem>>, %arg3: memref<2x8x8xbf16, #tpu.memory_space<vmem>>) attributes {dimension_semantics = [#tpu.dimension_semantics<parallel>], iteration_bounds = array<i64: 1>, scalar_prefetch = 0 : i64, scratch_operands = 0 : i64, tpu.core_type = #tpu.core_type<tc>, window_params = [{transform_indices = @transform_0, window_bounds = array<i64: 2, 8, 8>}, {transform_indices = @transform_1, window_bounds = array<i64: 2, 8, 8>}, {transform_indices = @transform_2, window_bounds = array<i64: 2, 8, 8>}]} {
    %c0 = arith.constant 0 : index
    %c0_0 = arith.constant 0 : index
    %c0_1 = arith.constant 0 : index
    %0 = vector.load %arg1[%c0, %c0_0, %c0_1] : memref<2x8x8xbf16, #tpu.memory_space<vmem>>, vector<2x8x8xbf16>
    %c0_2 = arith.constant 0 : index
    %c0_3 = arith.constant 0 : index
    %c0_4 = arith.constant 0 : index
    %1 = vector.load %arg2[%c0_2, %c0_3, %c0_4] : memref<2x8x8xbf16, #tpu.memory_space<vmem>>, vector<2x8x8xbf16>
    "tpu.trace_start"() <{level = 10 : i32, message = "gmk,gkn->gmn"}> : () -> ()
    %cst = arith.constant dense<0.000000e+00> : vector<2x8x8xf32>
    %2 = tpu.matmul %0, %1, %cst {dimension_numbers = #tpu.dot_dimension_numbers<[2], [1], [1], [2], [0, 0, 0, 1, 1, 2], [0], [0]>} : vector<2x8x8xbf16>, vector<2x8x8xbf16>, vector<2x8x8xf32> -> vector<2x8x8xf32>
    "tpu.trace_stop"() : () -> ()
    %3 = arith.truncf %2 : vector<2x8x8xf32> to vector<2x8x8xbf16>
    %c0_5 = arith.constant 0 : index
    %c0_6 = arith.constant 0 : index
    %c0_7 = arith.constant 0 : index
    %4 = vector.load %arg3[%c0_5, %c0_6, %c0_7] : memref<2x8x8xbf16, #tpu.memory_space<vmem>>, vector<2x8x8xbf16>
    tpu.vector_store %arg3[%c0_5, %c0_6, %c0_7], %3 {strides = array<i32>} : memref<2x8x8xbf16, #tpu.memory_space<vmem>>, vector<2x8x8xbf16>,
    return
  }
  func.func @transform_0(%arg0: i32) -> (i32, i32, i32) {
    %c0_i32 = arith.constant 0 : i32
    %c0_i32_0 = arith.constant 0 : i32
    %c0_i32_1 = arith.constant 0 : i32
    return %arg0, %c0_i32, %c0_i32_0 : i32, i32, i32
  }
  func.func @transform_1(%arg0: i32) -> (i32, i32, i32) {
    %c0_i32 = arith.constant 0 : i32
    %c0_i32_0 = arith.constant 0 : i32
    %c0_i32_1 = arith.constant 0 : i32
    return %arg0, %c0_i32, %c0_i32_0 : i32, i32, i32
  }
  func.func @transform_2(%arg0: i32) -> (i32, i32, i32) {
    %c0_i32 = arith.constant 0 : i32
    %c0_i32_0 = arith.constant 0 : i32
    %c0_i32_1 = arith.constant 0 : i32
    return %arg0, %c0_i32, %c0_i32_0 : i32, i32, i32
  }
}

module attributes {stable_mosaic.version = 11 : i64} {
  func.func @_linear_kernel(%arg0: i32, %arg1: memref<16x1xbf16, #tpu.memory_space<vmem>>, %arg2: memref<1x16xbf16, #tpu.memory_space<vmem>>, %arg3: memref<1x16xf32, #tpu.memory_space<vmem>>, %arg4: memref<16x16xbf16, #tpu.memory_space<vmem>>) attributes {dimension_semantics = [#tpu.dimension_semantics<parallel>], iteration_bounds = array<i64: 1>, scalar_prefetch = 0 : i64, scratch_operands = 0 : i64, tpu.core_type = #tpu.core_type<tc>, window_params = [{transform_indices = @transform_0, window_bounds = array<i64: 16, 1>}, {pipeline_mode = #tpu.pipeline_mode<synchronous>, transform_indices = @transform_1, window_bounds = array<i64: 1, 16>}, {pipeline_mode = #tpu.pipeline_mode<synchronous>, transform_indices = @transform_2, window_bounds = array<i64: 1, 16>}, {transform_indices = @transform_3, window_bounds = array<i64: 16, 16>}]} {
    %c0 = arith.constant 0 : index
    %c0_0 = arith.constant 0 : index
    %0 = vector.load %arg1[%c0, %c0_0] : memref<16x1xbf16, #tpu.memory_space<vmem>>, vector<16x1xbf16>
    %c0_1 = arith.constant 0 : index
    %c0_2 = arith.constant 0 : index
    %1 = vector.load %arg2[%c0_1, %c0_2] : memref<1x16xbf16, #tpu.memory_space<vmem>>, vector<1x16xbf16>
    %cst = arith.constant dense<0.000000e+00> : vector<16x16xf32>
    %2 = tpu.matmul %0, %1, %cst {dimension_numbers = #tpu.dot_dimension_numbers<[1], [0], [0], [1], [0, 0, 1, 1], [], []>} : vector<16x1xbf16>, vector<1x16xbf16>, vector<16x16xf32> -> vector<16x16xf32>
    %c0_3 = arith.constant 0 : index
    %c0_4 = arith.constant 0 : index
    %3 = vector.load %arg3[%c0_3, %c0_4] : memref<1x16xf32, #tpu.memory_space<vmem>>, vector<1x16xf32>
    %4 = vector.broadcast %3 : vector<1x16xf32> to vector<16x16xf32>
    %5 = arith.addf %2, %4 : vector<16x16xf32>
    %cst_5 = arith.constant 0.000000e+00 : f32
    %6 = vector.broadcast %cst_5 : f32 to vector<16x16xf32>
    %7 = arith.maximumf %5, %6 : vector<16x16xf32>
    %8 = arith.truncf %7 : vector<16x16xf32> to vector<16x16xbf16>
    %c0_6 = arith.constant 0 : index
    %c0_7 = arith.constant 0 : index
    %9 = vector.load %arg4[%c0_6, %c0_7] : memref<16x16xbf16, #tpu.memory_space<vmem>>, vector<16x16xbf16>
    tpu.vector_store %arg4[%c0_6, %c0_7], %8 {strides = array<i32>} : memref<16x16xbf16, #tpu.memory_space<vmem>>, vector<16x16xbf16>,
    return
  }
  func.func @transform_0(%arg0: i32) -> (i32, i32) {
    %c0_i32 = arith.constant 0 : i32
    %c0_i32_0 = arith.constant 0 : i32
    return %arg0, %c0_i32 : i32, i32
  }
  func.func @transform_1(%arg0: i32) -> (i32, i32) {
    %c0_i32 = arith.constant 0 : i32
    %c0_i32_0 = arith.constant 0 : i32
    %c0_i32_1 = arith.constant 0 : i32
    return %c0_i32, %c0_i32_0 : i32, i32
  }
  func.func @transform_2(%arg0: i32) -> (i32, i32) {
    %c0_i32 = arith.constant 0 : i32
    %c0_i32_0 = arith.constant 0 : i32
    %c0_i32_1 = arith.constant 0 : i32
    return %c0_i32, %c0_i32_0 : i32, i32
  }
  func.func @transform_3(%arg0: i32) -> (i32, i32) {
    %c0_i32 = arith.constant 0 : i32
    %c0_i32_0 = arith.constant 0 : i32
    return %arg0, %c0_i32 : i32, i32
  }
}

module attributes {stable_mosaic.version = 11 : i64} {
  func.func @_msts_kernel(%arg0: i32, %arg1: i32, %arg2: memref<1x1x24x128xbf16, #tpu.memory_space<vmem>>, %arg3: memref<1x1x24x24xbf16, #tpu.memory_space<vmem>>, %arg4: memref<3x128xf32, #tpu.memory_space<vmem>>, %arg5: memref<1x8x128xbf16, #tpu.memory_space<vmem>>, %arg6: memref<8x128xf32, #tpu.memory_space<vmem>>) attributes {dimension_semantics = [#tpu.dimension_semantics<parallel>, #tpu.dimension_semantics<arbitrary>], iteration_bounds = array<i64: 2, 3>, scalar_prefetch = 0 : i64, scratch_operands = 1 : i64, tpu.core_type = #tpu.core_type<tc>, window_params = [{transform_indices = @transform_0, window_bounds = array<i64: 1, 1, 24, 128>}, {transform_indices = @transform_1, window_bounds = array<i64: 1, 1, 24, 24>}, {pipeline_mode = #tpu.pipeline_mode<synchronous>, transform_indices = @transform_2, window_bounds = array<i64: 3, 128>}, {transform_indices = @transform_3, window_bounds = array<i64: 1, 8, 128>}]} {
    %c0_i32 = arith.constant 0 : i32
    %0 = arith.cmpi eq, %arg1, %c0_i32 : i32
    %1 = arith.extui %0 : i1 to i32
    %c0_i32_0 = arith.constant 0 : i32
    %2 = arith.cmpi ne, %1, %c0_i32_0 : i32
    scf.if %2 {
      %cst_15 = arith.constant 0.000000e+00 : f32
      %21 = vector.broadcast %cst_15 : f32 to vector<8x128xf32>
      %c0_16 = arith.constant 0 : index
      %c0_17 = arith.constant 0 : index
      %22 = vector.load %arg6[%c0_16, %c0_17] : memref<8x128xf32, #tpu.memory_space<vmem>>, vector<8x128xf32>
      tpu.vector_store %arg6[%c0_16, %c0_17], %21 {strides = array<i32>} : memref<8x128xf32, #tpu.memory_space<vmem>>, vector<8x128xf32>,
    } else {
    }
    %c0 = arith.constant 0 : index
    %c0_1 = arith.constant 0 : index
    %c0_2 = arith.constant 0 : index
    %c0_3 = arith.constant 0 : index
    %3 = vector.load %arg3[%c0, %c0_1, %c0_2, %c0_3] : memref<1x1x24x24xbf16, #tpu.memory_space<vmem>>, vector<1x1x24x24xbf16>
    %4 = vector.shape_cast %3 : vector<1x1x24x24xbf16> to vector<24x24xbf16>
    %c0_4 = arith.constant 0 : index
    %c0_5 = arith.constant 0 : index
    %c0_6 = arith.constant 0 : index
    %c0_7 = arith.constant 0 : index
    %5 = vector.load %arg2[%c0_4, %c0_5, %c0_6, %c0_7] : memref<1x1x24x128xbf16, #tpu.memory_space<vmem>>, vector<1x1x24x128xbf16>
    %6 = vector.shape_cast %5 : vector<1x1x24x128xbf16> to vector<24x128xbf16>
    %cst = arith.constant dense<0.000000e+00> : vector<24x128xf32>
    %7 = tpu.matmul %4, %6, %cst {dimension_numbers = #tpu.dot_dimension_numbers<[1], [0], [0], [1], [0, 0, 1, 1], [], []>} : vector<24x24xbf16>, vector<24x128xbf16>, vector<24x128xf32> -> vector<24x128xf32>
    %8 = arith.index_cast %arg1 : i32 to index
    %c0_8 = arith.constant 0 : index
    %9 = vector.load %arg4[%8, %c0_8] : memref<3x128xf32, #tpu.memory_space<vmem>>, vector<1x128xf32>
    %c0_9 = arith.constant 0 : index
    %c0_10 = arith.constant 0 : index
    %10 = vector.load %arg6[%c0_9, %c0_10] : memref<8x128xf32, #tpu.memory_space<vmem>>, vector<8x128xf32>
    %11 = vector.extract_strided_slice %7 {offsets = [8, 0], sizes = [8, 128], strides = [1, 1]} : vector<24x128xf32> to vector<8x128xf32>
    %12 = vector.broadcast %9 : vector<1x128xf32> to vector<8x128xf32>
    %13 = arith.addf %11, %12 : vector<8x128xf32>
    %cst_11 = arith.constant 0.000000e+00 : f32
    %14 = vector.broadcast %cst_11 : f32 to vector<8x128xf32>
    %15 = arith.maximumf %13, %14 : vector<8x128xf32>
    %16 = arith.addf %10, %15 : vector<8x128xf32>
    %c0_12 = arith.constant 0 : index
    %c0_13 = arith.constant 0 : index
    %17 = vector.load %arg6[%c0_12, %c0_13] : memref<8x128xf32, #tpu.memory_space<vmem>>, vector<8x128xf32>
    tpu.vector_store %arg6[%c0_12, %c0_13], %16 {strides = array<i32>} : memref<8x128xf32, #tpu.memory_space<vmem>>, vector<8x128xf32>,
    %c2_i32 = arith.constant 2 : i32
    %18 = arith.cmpi eq, %arg1, %c2_i32 : i32
    %19 = arith.extui %18 : i1 to i32
    %c0_i32_14 = arith.constant 0 : i32
    %20 = arith.cmpi ne, %19, %c0_i32_14 : i32
    scf.if %20 {
      %c0_15 = arith.constant 0 : index
      %c0_16 = arith.constant 0 : index
      %21 = vector.load %arg6[%c0_15, %c0_16] : memref<8x128xf32, #tpu.memory_space<vmem>>, vector<8x128xf32>
      %22 = arith.truncf %21 : vector<8x128xf32> to vector<8x128xbf16>
      %c0_17 = arith.constant 0 : index
      %c0_18 = arith.constant 0 : index
      %c0_19 = arith.constant 0 : index
      %23 = vector.load %arg5[%c0_17, %c0_18, %c0_19] : memref<1x8x128xbf16, #tpu.memory_space<vmem>>, vector<1x8x128xbf16>
      %24 = vector.shape_cast %23 : vector<1x8x128xbf16> to vector<8x128xbf16>
      %25 = vector.shape_cast %22 : vector<8x128xbf16> to vector<1x8x128xbf16>
      tpu.vector_store %arg5[%c0_17, %c0_18, %c0_19], %25 {strides = array<i32>} : memref<1x8x128xbf16, #tpu.memory_space<vmem>>, vector<1x8x128xbf16>,
    } else {
    }
    return
  }
  func.func @transform_0(%arg0: i32, %arg1: i32) -> (i32, i32, i32, i32) {
    %c0_i32 = arith.constant 0 : i32
    %c0_i32_0 = arith.constant 0 : i32
    %c0_i32_1 = arith.constant 0 : i32
    return %arg0, %arg1, %c0_i32, %c0_i32_0 : i32, i32, i32, i32
  }
  func.func @transform_1(%arg0: i32, %arg1: i32) -> (i32, i32, i32, i32) {
    %c0_i32 = arith.constant 0 : i32
    %c0_i32_0 = arith.constant 0 : i32
    %c0_i32_1 = arith.constant 0 : i32
    return %arg0, %arg1, %c0_i32, %c0_i32_0 : i32, i32, i32, i32
  }
  func.func @transform_2(%arg0: i32, %arg1: i32) -> (i32, i32) {
    %c0_i32 = arith.constant 0 : i32
    %c0_i32_0 = arith.constant 0 : i32
    %c0_i32_1 = arith.constant 0 : i32
    return %c0_i32, %c0_i32_0 : i32, i32
  }
  func.func @transform_3(%arg0: i32, %arg1: i32) -> (i32, i32, i32) {
    %c0_i32 = arith.constant 0 : i32
    %c0_i32_0 = arith.constant 0 : i32
    %c0_i32_1 = arith.constant 0 : i32
    return %arg0, %c0_i32, %c0_i32_0 : i32, i32, i32
  }
}

module attributes {stable_mosaic.version = 11 : i64} {
  func.func @_fc2_kernel(%arg0: i32, %arg1: memref<32x5xbf16, #tpu.memory_space<vmem>>, %arg2: memref<5x16xbf16, #tpu.memory_space<vmem>>, %arg3: memref<1x16xf32, #tpu.memory_space<vmem>>, %arg4: memref<16x16xbf16, #tpu.memory_space<vmem>>, %arg5: memref<1x16xf32, #tpu.memory_space<vmem>>, %arg6: memref<32x16xf32, #tpu.memory_space<vmem>>) attributes {dimension_semantics = [#tpu.dimension_semantics<parallel>], iteration_bounds = array<i64: 1>, scalar_prefetch = 0 : i64, scratch_operands = 0 : i64, tpu.core_type = #tpu.core_type<tc>, window_params = [{transform_indices = @transform_0, window_bounds = array<i64: 32, 5>}, {pipeline_mode = #tpu.pipeline_mode<synchronous>, transform_indices = @transform_1, window_bounds = array<i64: 5, 16>}, {pipeline_mode = #tpu.pipeline_mode<synchronous>, transform_indices = @transform_2, window_bounds = array<i64: 1, 16>}, {pipeline_mode = #tpu.pipeline_mode<synchronous>, transform_indices = @transform_3, window_bounds = array<i64: 16, 16>}, {pipeline_mode = #tpu.pipeline_mode<synchronous>, transform_indices = @transform_4, window_bounds = array<i64: 1, 16>}, {transform_indices = @transform_5, window_bounds = array<i64: 32, 16>}]} {
    %c0 = arith.constant 0 : index
    %c0_0 = arith.constant 0 : index
    %0 = vector.load %arg1[%c0, %c0_0] : memref<32x5xbf16, #tpu.memory_space<vmem>>, vector<32x5xbf16>
    %c0_1 = arith.constant 0 : index
    %c0_2 = arith.constant 0 : index
    %1 = vector.load %arg2[%c0_1, %c0_2] : memref<5x16xbf16, #tpu.memory_space<vmem>>, vector<5x16xbf16>
    %cst = arith.constant dense<0.000000e+00> : vector<32x16xf32>
    %2 = tpu.matmul %0, %1, %cst {dimension_numbers = #tpu.dot_dimension_numbers<[1], [0], [0], [1], [0, 0, 1, 1], [], []>} : vector<32x5xbf16>, vector<5x16xbf16>, vector<32x16xf32> -> vector<32x16xf32>
    %c0_3 = arith.constant 0 : index
    %c0_4 = arith.constant 0 : index
    %3 = vector.load %arg3[%c0_3, %c0_4] : memref<1x16xf32, #tpu.memory_space<vmem>>, vector<1x16xf32>
    %4 = vector.broadcast %3 : vector<1x16xf32> to vector<32x16xf32>
    %5 = arith.addf %2, %4 : vector<32x16xf32>
    %cst_5 = arith.constant 0.000000e+00 : f32
    %6 = vector.broadcast %cst_5 : f32 to vector<32x16xf32>
    %7 = arith.maximumf %5, %6 : vector<32x16xf32>
    %8 = arith.truncf %7 : vector<32x16xf32> to vector<32x16xbf16>
    %c0_6 = arith.constant 0 : index
    %c0_7 = arith.constant 0 : index
    %9 = vector.load %arg4[%c0_6, %c0_7] : memref<16x16xbf16, #tpu.memory_space<vmem>>, vector<16x16xbf16>
    %cst_8 = arith.constant dense<0.000000e+00> : vector<32x16xf32>
    %10 = tpu.matmul %8, %9, %cst_8 {dimension_numbers = #tpu.dot_dimension_numbers<[1], [0], [0], [1], [0, 0, 1, 1], [], []>} : vector<32x16xbf16>, vector<16x16xbf16>, vector<32x16xf32> -> vector<32x16xf32>
    %c0_9 = arith.constant 0 : index
    %c0_10 = arith.constant 0 : index
    %11 = vector.load %arg5[%c0_9, %c0_10] : memref<1x16xf32, #tpu.memory_space<vmem>>, vector<1x16xf32>
    %12 = vector.broadcast %11 : vector<1x16xf32> to vector<32x16xf32>
    %13 = arith.addf %10, %12 : vector<32x16xf32>
    %c0_11 = arith.constant 0 : index
    %c0_12 = arith.constant 0 : index
    %14 = vector.load %arg6[%c0_11, %c0_12] : memref<32x16xf32, #tpu.memory_space<vmem>>, vector<32x16xf32>
    tpu.vector_store %arg6[%c0_11, %c0_12], %13 {strides = array<i32>} : memref<32x16xf32, #tpu.memory_space<vmem>>, vector<32x16xf32>,
    return
  }
  func.func @transform_0(%arg0: i32) -> (i32, i32) {
    %c0_i32 = arith.constant 0 : i32
    %c0_i32_0 = arith.constant 0 : i32
    return %arg0, %c0_i32 : i32, i32
  }
  func.func @transform_1(%arg0: i32) -> (i32, i32) {
    %c0_i32 = arith.constant 0 : i32
    %c0_i32_0 = arith.constant 0 : i32
    %c0_i32_1 = arith.constant 0 : i32
    return %c0_i32, %c0_i32_0 : i32, i32
  }
  func.func @transform_2(%arg0: i32) -> (i32, i32) {
    %c0_i32 = arith.constant 0 : i32
    %c0_i32_0 = arith.constant 0 : i32
    %c0_i32_1 = arith.constant 0 : i32
    return %c0_i32, %c0_i32_0 : i32, i32
  }
  func.func @transform_3(%arg0: i32) -> (i32, i32) {
    %c0_i32 = arith.constant 0 : i32
    %c0_i32_0 = arith.constant 0 : i32
    %c0_i32_1 = arith.constant 0 : i32
    return %c0_i32, %c0_i32_0 : i32, i32
  }
  func.func @transform_4(%arg0: i32) -> (i32, i32) {
    %c0_i32 = arith.constant 0 : i32
    %c0_i32_0 = arith.constant 0 : i32
    %c0_i32_1 = arith.constant 0 : i32
    return %c0_i32, %c0_i32_0 : i32, i32
  }
  func.func @transform_5(%arg0: i32) -> (i32, i32) {
    %c0_i32 = arith.constant 0 : i32
    %c0_i32_0 = arith.constant 0 : i32
    return %arg0, %c0_i32 : i32, i32
  }
}

module attributes {stable_mosaic.version = 11 : i64} {
  func.func @_self_attn_kernel(%arg0: i32, %arg1: memref<16x8x16xbf16, #tpu.memory_space<vmem>>, %arg2: memref<16x8x16xbf16, #tpu.memory_space<vmem>>, %arg3: memref<16x48xbf16, #tpu.memory_space<vmem>>, %arg4: memref<16x48xbf16, #tpu.memory_space<vmem>>, %arg5: memref<1x48xf32, #tpu.memory_space<vmem>>, %arg6: memref<16x16xbf16, #tpu.memory_space<vmem>>, %arg7: memref<1x16xf32, #tpu.memory_space<vmem>>, %arg8: memref<16x16xbf16, #tpu.memory_space<vmem>>, %arg9: memref<1x16xf32, #tpu.memory_space<vmem>>, %arg10: memref<16x8x16xbf16, #tpu.memory_space<vmem>>) attributes {dimension_semantics = [#tpu.dimension_semantics<parallel>], iteration_bounds = array<i64: 1>, scalar_prefetch = 0 : i64, scratch_operands = 0 : i64, tpu.core_type = #tpu.core_type<tc>, window_params = [{transform_indices = @transform_0, window_bounds = array<i64: 16, 8, 16>}, {transform_indices = @transform_1, window_bounds = array<i64: 16, 8, 16>}, {pipeline_mode = #tpu.pipeline_mode<synchronous>, transform_indices = @transform_2, window_bounds = array<i64: 16, 48>}, {pipeline_mode = #tpu.pipeline_mode<synchronous>, transform_indices = @transform_3, window_bounds = array<i64: 16, 48>}, {pipeline_mode = #tpu.pipeline_mode<synchronous>, transform_indices = @transform_4, window_bounds = array<i64: 1, 48>}, {pipeline_mode = #tpu.pipeline_mode<synchronous>, transform_indices = @transform_5, window_bounds = array<i64: 16, 16>}, {pipeline_mode = #tpu.pipeline_mode<synchronous>, transform_indices = @transform_6, window_bounds = array<i64: 1, 16>}, {pipeline_mode = #tpu.pipeline_mode<synchronous>, transform_indices = @transform_7, window_bounds = array<i64: 16, 16>}, {pipeline_mode = #tpu.pipeline_mode<synchronous>, transform_indices = @transform_8, window_bounds = array<i64: 1, 16>}, {transform_indices = @transform_9, window_bounds = array<i64: 16, 8, 16>}]} {
    %c0 = arith.constant 0 : index
    %c0_0 = arith.constant 0 : index
    %c0_1 = arith.constant 0 : index
    %0 = vector.load %arg1[%c0, %c0_0, %c0_1] : memref<16x8x16xbf16, #tpu.memory_space<vmem>>, vector<16x8x16xbf16>
    %1 = vector.shape_cast %0 : vector<16x8x16xbf16> to vector<128x16xbf16>
    %c0_2 = arith.constant 0 : index
    %c0_3 = arith.constant 0 : index
    %c0_4 = arith.constant 0 : index
    %2 = vector.load %arg2[%c0_2, %c0_3, %c0_4] : memref<16x8x16xbf16, #tpu.memory_space<vmem>>, vector<16x8x16xbf16>
    %3 = vector.shape_cast %2 : vector<16x8x16xbf16> to vector<128x16xbf16>
    %c0_5 = arith.constant 0 : index
    %c0_6 = arith.constant 0 : index
    %4 = vector.load %arg3[%c0_5, %c0_6] : memref<16x48xbf16, #tpu.memory_space<vmem>>, vector<16x48xbf16>
    %cst = arith.constant dense<0.000000e+00> : vector<128x48xf32>
    %5 = tpu.matmul %1, %4, %cst {dimension_numbers = #tpu.dot_dimension_numbers<[1], [0], [0], [1], [0, 0, 1, 1], [], []>} : vector<128x16xbf16>, vector<16x48xbf16>, vector<128x48xf32> -> vector<128x48xf32>
    %c0_7 = arith.constant 0 : index
    %c0_8 = arith.constant 0 : index
    %6 = vector.load %arg4[%c0_7, %c0_8] : memref<16x48xbf16, #tpu.memory_space<vmem>>, vector<16x48xbf16>
    %cst_9 = arith.constant dense<0.000000e+00> : vector<128x48xf32>
    %7 = tpu.matmul %3, %6, %cst_9 {dimension_numbers = #tpu.dot_dimension_numbers<[1], [0], [0], [1], [0, 0, 1, 1], [], []>} : vector<128x16xbf16>, vector<16x48xbf16>, vector<128x48xf32> -> vector<128x48xf32>
    %8 = arith.addf %5, %7 : vector<128x48xf32>
    %c0_10 = arith.constant 0 : index
    %c0_11 = arith.constant 0 : index
    %9 = vector.load %arg5[%c0_10, %c0_11] : memref<1x48xf32, #tpu.memory_space<vmem>>, vector<1x48xf32>
    %10 = vector.broadcast %9 : vector<1x48xf32> to vector<128x48xf32>
    %11 = arith.addf %8, %10 : vector<128x48xf32>
    %cst_12 = arith.constant 0.000000e+00 : f32
    %12 = vector.broadcast %cst_12 : f32 to vector<128x48xf32>
    %13 = arith.maximumf %11, %12 : vector<128x48xf32>
    %14 = arith.truncf %13 : vector<128x48xf32> to vector<128x48xbf16>
    %15 = vector.shape_cast %14 : vector<128x48xbf16> to vector<16x8x48xbf16>
    %16 = vector.extract_strided_slice %15 {offsets = [0, 0, 0], sizes = [16, 8, 8], strides = [1, 1, 1]} : vector<16x8x48xbf16> to vector<16x8x8xbf16>
    %17 = vector.extract_strided_slice %15 {offsets = [0, 0, 16], sizes = [16, 8, 8], strides = [1, 1, 1]} : vector<16x8x48xbf16> to vector<16x8x8xbf16>
    %18 = vector.extract_strided_slice %15 {offsets = [0, 0, 32], sizes = [16, 8, 8], strides = [1, 1, 1]} : vector<16x8x48xbf16> to vector<16x8x8xbf16>
    "tpu.trace_start"() <{level = 10 : i32, message = "gqd,gkd->gqk"}> : () -> ()
    %cst_13 = arith.constant dense<0.000000e+00> : vector<16x8x8xf32>
    %19 = tpu.matmul %16, %17, %cst_13 {dimension_numbers = #tpu.dot_dimension_numbers<[2], [2], [1], [1], [0, 0, 0, 1, 1, 1], [0], [0]>} : vector<16x8x8xbf16>, vector<16x8x8xbf16>, vector<16x8x8xf32> -> vector<16x8x8xf32>
    "tpu.trace_stop"() : () -> ()
    %cst_14 = arith.constant 0.353553385 : f32
    %20 = vector.broadcast %cst_14 : f32 to vector<16x8x8xf32>
    %21 = arith.mulf %19, %20 : vector<16x8x8xf32>
    %cst_15 = arith.constant dense<0xFF800000> : vector<16x8xf32>
    %22 = vector.multi_reduction <maximumf>, %21, %cst_15 [2] : vector<16x8x8xf32> to vector<16x8xf32>
    %23 = vector.shape_cast %22 : vector<16x8xf32> to vector<16x8x1xf32>
    %24 = vector.broadcast %23 : vector<16x8x1xf32> to vector<16x8x8xf32>
    %25 = arith.subf %21, %24 : vector<16x8x8xf32>
    %26 = math.exp %25 : vector<16x8x8xf32>
    %cst_16 = arith.constant dense<0.000000e+00> : vector<16x8xf32>
    %27 = vector.multi_reduction <add>, %26, %cst_16 [2] : vector<16x8x8xf32> to vector<16x8xf32>
    %28 = vector.shape_cast %27 : vector<16x8xf32> to vector<16x8x1xf32>
    %29 = tpu.reciprocal %28 {approx = true} : vector<16x8x1xf32> -> vector<16x8x1xf32>
    %30 = vector.broadcast %29 : vector<16x8x1xf32> to vector<16x8x8xf32>
    %31 = arith.mulf %26, %30 : vector<16x8x8xf32>
    %32 = arith.truncf %31 : vector<16x8x8xf32> to vector<16x8x8xbf16>
    "tpu.trace_start"() <{level = 10 : i32, message = "gqk,gkd->gqd"}> : () -> ()
    %cst_17 = arith.constant dense<0.000000e+00> : vector<16x8x8xf32>
    %33 = tpu.matmul %32, %18, %cst_17 {dimension_numbers = #tpu.dot_dimension_numbers<[2], [1], [1], [2], [0, 0, 0, 1, 1, 2], [0], [0]>} : vector<16x8x8xbf16>, vector<16x8x8xbf16>, vector<16x8x8xf32> -> vector<16x8x8xf32>
    "tpu.trace_stop"() : () -> ()
    %34 = vector.extract_strided_slice %15 {offsets = [0, 0, 8], sizes = [16, 8, 8], strides = [1, 1, 1]} : vector<16x8x48xbf16> to vector<16x8x8xbf16>
    %35 = vector.extract_strided_slice %15 {offsets = [0, 0, 24], sizes = [16, 8, 8], strides = [1, 1, 1]} : vector<16x8x48xbf16> to vector<16x8x8xbf16>
    %36 = vector.extract_strided_slice %15 {offsets = [0, 0, 40], sizes = [16, 8, 8], strides = [1, 1, 1]} : vector<16x8x48xbf16> to vector<16x8x8xbf16>
    "tpu.trace_start"() <{level = 10 : i32, message = "gqd,gkd->gqk"}> : () -> ()
    %cst_18 = arith.constant dense<0.000000e+00> : vector<16x8x8xf32>
    %37 = tpu.matmul %34, %35, %cst_18 {dimension_numbers = #tpu.dot_dimension_numbers<[2], [2], [1], [1], [0, 0, 0, 1, 1, 1], [0], [0]>} : vector<16x8x8xbf16>, vector<16x8x8xbf16>, vector<16x8x8xf32> -> vector<16x8x8xf32>
    "tpu.trace_stop"() : () -> ()
    %cst_19 = arith.constant 0.353553385 : f32
    %38 = vector.broadcast %cst_19 : f32 to vector<16x8x8xf32>
    %39 = arith.mulf %37, %38 : vector<16x8x8xf32>
    %cst_20 = arith.constant dense<0xFF800000> : vector<16x8xf32>
    %40 = vector.multi_reduction <maximumf>, %39, %cst_20 [2] : vector<16x8x8xf32> to vector<16x8xf32>
    %41 = vector.shape_cast %40 : vector<16x8xf32> to vector<16x8x1xf32>
    %42 = vector.broadcast %41 : vector<16x8x1xf32> to vector<16x8x8xf32>
    %43 = arith.subf %39, %42 : vector<16x8x8xf32>
    %44 = math.exp %43 : vector<16x8x8xf32>
    %cst_21 = arith.constant dense<0.000000e+00> : vector<16x8xf32>
    %45 = vector.multi_reduction <add>, %44, %cst_21 [2] : vector<16x8x8xf32> to vector<16x8xf32>
    %46 = vector.shape_cast %45 : vector<16x8xf32> to vector<16x8x1xf32>
    %47 = tpu.reciprocal %46 {approx = true} : vector<16x8x1xf32> -> vector<16x8x1xf32>
    %48 = vector.broadcast %47 : vector<16x8x1xf32> to vector<16x8x8xf32>
    %49 = arith.mulf %44, %48 : vector<16x8x8xf32>
    %50 = arith.truncf %49 : vector<16x8x8xf32> to vector<16x8x8xbf16>
    "tpu.trace_start"() <{level = 10 : i32, message = "gqk,gkd->gqd"}> : () -> ()
    %cst_22 = arith.constant dense<0.000000e+00> : vector<16x8x8xf32>
    %51 = tpu.matmul %50, %36, %cst_22 {dimension_numbers = #tpu.dot_dimension_numbers<[2], [1], [1], [2], [0, 0, 0, 1, 1, 2], [0], [0]>} : vector<16x8x8xbf16>, vector<16x8x8xbf16>, vector<16x8x8xf32> -> vector<16x8x8xf32>
    "tpu.trace_stop"() : () -> ()
    %52 = tpu.concatenate %33, %51 in 2 : vector<16x8x8xf32>, vector<16x8x8xf32> -> vector<16x8x16xf32>
    %53 = vector.shape_cast %52 : vector<16x8x16xf32> to vector<128x16xf32>
    %54 = arith.truncf %53 : vector<128x16xf32> to vector<128x16xbf16>
    %c0_23 = arith.constant 0 : index
    %c0_24 = arith.constant 0 : index
    %55 = vector.load %arg6[%c0_23, %c0_24] : memref<16x16xbf16, #tpu.memory_space<vmem>>, vector<16x16xbf16>
    %cst_25 = arith.constant dense<0.000000e+00> : vector<128x16xf32>
    %56 = tpu.matmul %54, %55, %cst_25 {dimension_numbers = #tpu.dot_dimension_numbers<[1], [0], [0], [1], [0, 0, 1, 1], [], []>} : vector<128x16xbf16>, vector<16x16xbf16>, vector<128x16xf32> -> vector<128x16xf32>
    %c0_26 = arith.constant 0 : index
    %c0_27 = arith.constant 0 : index
    %57 = vector.load %arg7[%c0_26, %c0_27] : memref<1x16xf32, #tpu.memory_space<vmem>>, vector<1x16xf32>
    %58 = vector.broadcast %57 : vector<1x16xf32> to vector<128x16xf32>
    %59 = arith.addf %56, %58 : vector<128x16xf32>
    %cst_28 = arith.constant 0.000000e+00 : f32
    %60 = vector.broadcast %cst_28 : f32 to vector<128x16xf32>
    %61 = arith.maximumf %59, %60 : vector<128x16xf32>
    %62 = arith.truncf %61 : vector<128x16xf32> to vector<128x16xbf16>
    %c0_29 = arith.constant 0 : index
    %c0_30 = arith.constant 0 : index
    %63 = vector.load %arg8[%c0_29, %c0_30] : memref<16x16xbf16, #tpu.memory_space<vmem>>, vector<16x16xbf16>
    %cst_31 = arith.constant dense<0.000000e+00> : vector<128x16xf32>
    %64 = tpu.matmul %62, %63, %cst_31 {dimension_numbers = #tpu.dot_dimension_numbers<[1], [0], [0], [1], [0, 0, 1, 1], [], []>} : vector<128x16xbf16>, vector<16x16xbf16>, vector<128x16xf32> -> vector<128x16xf32>
    %c0_32 = arith.constant 0 : index
    %c0_33 = arith.constant 0 : index
    %65 = vector.load %arg9[%c0_32, %c0_33] : memref<1x16xf32, #tpu.memory_space<vmem>>, vector<1x16xf32>
    %66 = vector.broadcast %65 : vector<1x16xf32> to vector<128x16xf32>
    %67 = arith.addf %64, %66 : vector<128x16xf32>
    %68 = vector.shape_cast %67 : vector<128x16xf32> to vector<16x8x16xf32>
    %69 = arith.truncf %68 : vector<16x8x16xf32> to vector<16x8x16xbf16>
    %c0_34 = arith.constant 0 : index
    %c0_35 = arith.constant 0 : index
    %c0_36 = arith.constant 0 : index
    %70 = vector.load %arg10[%c0_34, %c0_35, %c0_36] : memref<16x8x16xbf16, #tpu.memory_space<vmem>>, vector<16x8x16xbf16>
    tpu.vector_store %arg10[%c0_34, %c0_35, %c0_36], %69 {strides = array<i32>} : memref<16x8x16xbf16, #tpu.memory_space<vmem>>, vector<16x8x16xbf16>,
    return
  }
  func.func @transform_0(%arg0: i32) -> (i32, i32, i32) {
    %c0_i32 = arith.constant 0 : i32
    %c0_i32_0 = arith.constant 0 : i32
    %c0_i32_1 = arith.constant 0 : i32
    return %arg0, %c0_i32, %c0_i32_0 : i32, i32, i32
  }
  func.func @transform_1(%arg0: i32) -> (i32, i32, i32) {
    %c0_i32 = arith.constant 0 : i32
    %c0_i32_0 = arith.constant 0 : i32
    %c0_i32_1 = arith.constant 0 : i32
    return %arg0, %c0_i32, %c0_i32_0 : i32, i32, i32
  }
  func.func @transform_2(%arg0: i32) -> (i32, i32) {
    %c0_i32 = arith.constant 0 : i32
    %c0_i32_0 = arith.constant 0 : i32
    %c0_i32_1 = arith.constant 0 : i32
    return %c0_i32, %c0_i32_0 : i32, i32
  }
  func.func @transform_3(%arg0: i32) -> (i32, i32) {
    %c0_i32 = arith.constant 0 : i32
    %c0_i32_0 = arith.constant 0 : i32
    %c0_i32_1 = arith.constant 0 : i32
    return %c0_i32, %c0_i32_0 : i32, i32
  }
  func.func @transform_4(%arg0: i32) -> (i32, i32) {
    %c0_i32 = arith.constant 0 : i32
    %c0_i32_0 = arith.constant 0 : i32
    %c0_i32_1 = arith.constant 0 : i32
    return %c0_i32, %c0_i32_0 : i32, i32
  }
  func.func @transform_5(%arg0: i32) -> (i32, i32) {
    %c0_i32 = arith.constant 0 : i32
    %c0_i32_0 = arith.constant 0 : i32
    %c0_i32_1 = arith.constant 0 : i32
    return %c0_i32, %c0_i32_0 : i32, i32
  }
  func.func @transform_6(%arg0: i32) -> (i32, i32) {
    %c0_i32 = arith.constant 0 : i32
    %c0_i32_0 = arith.constant 0 : i32
    %c0_i32_1 = arith.constant 0 : i32
    return %c0_i32, %c0_i32_0 : i32, i32
  }
  func.func @transform_7(%arg0: i32) -> (i32, i32) {
    %c0_i32 = arith.constant 0 : i32
    %c0_i32_0 = arith.constant 0 : i32
    %c0_i32_1 = arith.constant 0 : i32
    return %c0_i32, %c0_i32_0 : i32, i32
  }
  func.func @transform_8(%arg0: i32) -> (i32, i32) {
    %c0_i32 = arith.constant 0 : i32
    %c0_i32_0 = arith.constant 0 : i32
    %c0_i32_1 = arith.constant 0 : i32
    return %c0_i32, %c0_i32_0 : i32, i32
  }
  func.func @transform_9(%arg0: i32) -> (i32, i32, i32) {
    %c0_i32 = arith.constant 0 : i32
    %c0_i32_0 = arith.constant 0 : i32
    %c0_i32_1 = arith.constant 0 : i32
    return %arg0, %c0_i32, %c0_i32_0 : i32, i32, i32
  }
}

module attributes {stable_mosaic.version = 11 : i64} {
  func.func @_fc2_kernel(%arg0: i32, %arg1: memref<8x8xbf16, #tpu.memory_space<vmem>>, %arg2: memref<8x16xbf16, #tpu.memory_space<vmem>>, %arg3: memref<1x16xf32, #tpu.memory_space<vmem>>, %arg4: memref<16x16xbf16, #tpu.memory_space<vmem>>, %arg5: memref<1x16xf32, #tpu.memory_space<vmem>>, %arg6: memref<8x16xf32, #tpu.memory_space<vmem>>) attributes {dimension_semantics = [#tpu.dimension_semantics<parallel>], iteration_bounds = array<i64: 1>, scalar_prefetch = 0 : i64, scratch_operands = 0 : i64, tpu.core_type = #tpu.core_type<tc>, window_params = [{transform_indices = @transform_0, window_bounds = array<i64: 8, 8>}, {pipeline_mode = #tpu.pipeline_mode<synchronous>, transform_indices = @transform_1, window_bounds = array<i64: 8, 16>}, {pipeline_mode = #tpu.pipeline_mode<synchronous>, transform_indices = @transform_2, window_bounds = array<i64: 1, 16>}, {pipeline_mode = #tpu.pipeline_mode<synchronous>, transform_indices = @transform_3, window_bounds = array<i64: 16, 16>}, {pipeline_mode = #tpu.pipeline_mode<synchronous>, transform_indices = @transform_4, window_bounds = array<i64: 1, 16>}, {transform_indices = @transform_5, window_bounds = array<i64: 8, 16>}]} {
    %c0 = arith.constant 0 : index
    %c0_0 = arith.constant 0 : index
    %0 = vector.load %arg1[%c0, %c0_0] : memref<8x8xbf16, #tpu.memory_space<vmem>>, vector<8x8xbf16>
    %c0_1 = arith.constant 0 : index
    %c0_2 = arith.constant 0 : index
    %1 = vector.load %arg2[%c0_1, %c0_2] : memref<8x16xbf16, #tpu.memory_space<vmem>>, vector<8x16xbf16>
    %cst = arith.constant dense<0.000000e+00> : vector<8x16xf32>
    %2 = tpu.matmul %0, %1, %cst {dimension_numbers = #tpu.dot_dimension_numbers<[1], [0], [0], [1], [0, 0, 1, 1], [], []>} : vector<8x8xbf16>, vector<8x16xbf16>, vector<8x16xf32> -> vector<8x16xf32>
    %c0_3 = arith.constant 0 : index
    %c0_4 = arith.constant 0 : index
    %3 = vector.load %arg3[%c0_3, %c0_4] : memref<1x16xf32, #tpu.memory_space<vmem>>, vector<1x16xf32>
    %4 = vector.broadcast %3 : vector<1x16xf32> to vector<8x16xf32>
    %5 = arith.addf %2, %4 : vector<8x16xf32>
    %cst_5 = arith.constant 0.000000e+00 : f32
    %6 = vector.broadcast %cst_5 : f32 to vector<8x16xf32>
    %7 = arith.maximumf %5, %6 : vector<8x16xf32>
    %8 = arith.truncf %7 : vector<8x16xf32> to vector<8x16xbf16>
    %c0_6 = arith.constant 0 : index
    %c0_7 = arith.constant 0 : index
    %9 = vector.load %arg4[%c0_6, %c0_7] : memref<16x16xbf16, #tpu.memory_space<vmem>>, vector<16x16xbf16>
    %cst_8 = arith.constant dense<0.000000e+00> : vector<8x16xf32>
    %10 = tpu.matmul %8, %9, %cst_8 {dimension_numbers = #tpu.dot_dimension_numbers<[1], [0], [0], [1], [0, 0, 1, 1], [], []>} : vector<8x16xbf16>, vector<16x16xbf16>, vector<8x16xf32> -> vector<8x16xf32>
    %c0_9 = arith.constant 0 : index
    %c0_10 = arith.constant 0 : index
    %11 = vector.load %arg5[%c0_9, %c0_10] : memref<1x16xf32, #tpu.memory_space<vmem>>, vector<1x16xf32>
    %12 = vector.broadcast %11 : vector<1x16xf32> to vector<8x16xf32>
    %13 = arith.addf %10, %12 : vector<8x16xf32>
    %c0_11 = arith.constant 0 : index
    %c0_12 = arith.constant 0 : index
    %14 = vector.load %arg6[%c0_11, %c0_12] : memref<8x16xf32, #tpu.memory_space<vmem>>, vector<8x16xf32>
    tpu.vector_store %arg6[%c0_11, %c0_12], %13 {strides = array<i32>} : memref<8x16xf32, #tpu.memory_space<vmem>>, vector<8x16xf32>,
    return
  }
  func.func @transform_0(%arg0: i32) -> (i32, i32) {
    %c0_i32 = arith.constant 0 : i32
    %c0_i32_0 = arith.constant 0 : i32
    return %arg0, %c0_i32 : i32, i32
  }
  func.func @transform_1(%arg0: i32) -> (i32, i32) {
    %c0_i32 = arith.constant 0 : i32
    %c0_i32_0 = arith.constant 0 : i32
    %c0_i32_1 = arith.constant 0 : i32
    return %c0_i32, %c0_i32_0 : i32, i32
  }
  func.func @transform_2(%arg0: i32) -> (i32, i32) {
    %c0_i32 = arith.constant 0 : i32
    %c0_i32_0 = arith.constant 0 : i32
    %c0_i32_1 = arith.constant 0 : i32
    return %c0_i32, %c0_i32_0 : i32, i32
  }
  func.func @transform_3(%arg0: i32) -> (i32, i32) {
    %c0_i32 = arith.constant 0 : i32
    %c0_i32_0 = arith.constant 0 : i32
    %c0_i32_1 = arith.constant 0 : i32
    return %c0_i32, %c0_i32_0 : i32, i32
  }
  func.func @transform_4(%arg0: i32) -> (i32, i32) {
    %c0_i32 = arith.constant 0 : i32
    %c0_i32_0 = arith.constant 0 : i32
    %c0_i32_1 = arith.constant 0 : i32
    return %c0_i32, %c0_i32_0 : i32, i32
  }
  func.func @transform_5(%arg0: i32) -> (i32, i32) {
    %c0_i32 = arith.constant 0 : i32
    %c0_i32_0 = arith.constant 0 : i32
    return %arg0, %c0_i32 : i32, i32
  }
}

module attributes {stable_mosaic.version = 11 : i64} {
  func.func @_gate_kernel(%arg0: i32, %arg1: memref<128x16xbf16, #tpu.memory_space<vmem>>, %arg2: memref<128x16xbf16, #tpu.memory_space<vmem>>, %arg3: memref<128x16xbf16, #tpu.memory_space<vmem>>, %arg4: memref<16x16xbf16, #tpu.memory_space<vmem>>, %arg5: memref<16x16xbf16, #tpu.memory_space<vmem>>, %arg6: memref<1x16xf32, #tpu.memory_space<vmem>>, %arg7: memref<16x16xbf16, #tpu.memory_space<vmem>>, %arg8: memref<1x16xf32, #tpu.memory_space<vmem>>, %arg9: memref<16x16xbf16, #tpu.memory_space<vmem>>, %arg10: memref<1x16xf32, #tpu.memory_space<vmem>>, %arg11: memref<16x16xbf16, #tpu.memory_space<vmem>>, %arg12: memref<1x16xf32, #tpu.memory_space<vmem>>, %arg13: memref<128x16xbf16, #tpu.memory_space<vmem>>) attributes {dimension_semantics = [#tpu.dimension_semantics<parallel>], iteration_bounds = array<i64: 1>, scalar_prefetch = 0 : i64, scratch_operands = 0 : i64, tpu.core_type = #tpu.core_type<tc>, window_params = [{transform_indices = @transform_0, window_bounds = array<i64: 128, 16>}, {transform_indices = @transform_1, window_bounds = array<i64: 128, 16>}, {transform_indices = @transform_2, window_bounds = array<i64: 128, 16>}, {pipeline_mode = #tpu.pipeline_mode<synchronous>, transform_indices = @transform_3, window_bounds = array<i64: 16, 16>}, {pipeline_mode = #tpu.pipeline_mode<synchronous>, transform_indices = @transform_4, window_bounds = array<i64: 16, 16>}, {pipeline_mode = #tpu.pipeline_mode<synchronous>, transform_indices = @transform_5, window_bounds = array<i64: 1, 16>}, {pipeline_mode = #tpu.pipeline_mode<synchronous>, transform_indices = @transform_6, window_bounds = array<i64: 16, 16>}, {pipeline_mode = #tpu.pipeline_mode<synchronous>, transform_indices = @transform_7, window_bounds = array<i64: 1, 16>}, {pipeline_mode = #tpu.pipeline_mode<synchronous>, transform_indices = @transform_8, window_bounds = array<i64: 16, 16>}, {pipeline_mode = #tpu.pipeline_mode<synchronous>, transform_indices = @transform_9, window_bounds = array<i64: 1, 16>}, {pipeline_mode = #tpu.pipeline_mode<synchronous>, transform_indices = @transform_10, window_bounds = array<i64: 16, 16>}, {pipeline_mode = #tpu.pipeline_mode<synchronous>, transform_indices = @transform_11, window_bounds = array<i64: 1, 16>}, {transform_indices = @transform_12, window_bounds = array<i64: 128, 16>}]} {
    %c0 = arith.constant 0 : index
    %c0_0 = arith.constant 0 : index
    %0 = vector.load %arg2[%c0, %c0_0] : memref<128x16xbf16, #tpu.memory_space<vmem>>, vector<128x16xbf16>
    %c0_1 = arith.constant 0 : index
    %c0_2 = arith.constant 0 : index
    %1 = vector.load %arg3[%c0_1, %c0_2] : memref<128x16xbf16, #tpu.memory_space<vmem>>, vector<128x16xbf16>
    %c0_3 = arith.constant 0 : index
    %c0_4 = arith.constant 0 : index
    %2 = vector.load %arg4[%c0_3, %c0_4] : memref<16x16xbf16, #tpu.memory_space<vmem>>, vector<16x16xbf16>
    %cst = arith.constant dense<0.000000e+00> : vector<128x16xf32>
    %3 = tpu.matmul %0, %2, %cst {dimension_numbers = #tpu.dot_dimension_numbers<[1], [0], [0], [1], [0, 0, 1, 1], [], []>} : vector<128x16xbf16>, vector<16x16xbf16>, vector<128x16xf32> -> vector<128x16xf32>
    %c0_5 = arith.constant 0 : index
    %c0_6 = arith.constant 0 : index
    %4 = vector.load %arg5[%c0_5, %c0_6] : memref<16x16xbf16, #tpu.memory_space<vmem>>, vector<16x16xbf16>
    %cst_7 = arith.constant dense<0.000000e+00> : vector<128x16xf32>
    %5 = tpu.matmul %1, %4, %cst_7 {dimension_numbers = #tpu.dot_dimension_numbers<[1], [0], [0], [1], [0, 0, 1, 1], [], []>} : vector<128x16xbf16>, vector<16x16xbf16>, vector<128x16xf32> -> vector<128x16xf32>
    %6 = arith.addf %3, %5 : vector<128x16xf32>
    %c0_8 = arith.constant 0 : index
    %c0_9 = arith.constant 0 : index
    %7 = vector.load %arg6[%c0_8, %c0_9] : memref<1x16xf32, #tpu.memory_space<vmem>>, vector<1x16xf32>
    %8 = vector.broadcast %7 : vector<1x16xf32> to vector<128x16xf32>
    %9 = arith.addf %6, %8 : vector<128x16xf32>
    %10 = arith.negf %9 : vector<128x16xf32>
    %11 = math.exp %10 : vector<128x16xf32>
    %cst_10 = arith.constant 1.000000e+00 : f32
    %12 = vector.broadcast %cst_10 : f32 to vector<128x16xf32>
    %13 = arith.addf %12, %11 : vector<128x16xf32>
    %14 = arith.divf %12, %13 : vector<128x16xf32>
    %15 = arith.extf %0 : vector<128x16xbf16> to vector<128x16xf32>
    %16 = arith.mulf %14, %15 : vector<128x16xf32>
    %cst_11 = arith.constant 1.000000e+00 : f32
    %17 = vector.broadcast %cst_11 : f32 to vector<128x16xf32>
    %18 = arith.subf %17, %14 : vector<128x16xf32>
    %19 = arith.extf %1 : vector<128x16xbf16> to vector<128x16xf32>
    %20 = arith.mulf %18, %19 : vector<128x16xf32>
    %21 = arith.addf %16, %20 : vector<128x16xf32>
    %22 = arith.truncf %21 : vector<128x16xf32> to vector<128x16xbf16>
    %c0_12 = arith.constant 0 : index
    %c0_13 = arith.constant 0 : index
    %23 = vector.load %arg7[%c0_12, %c0_13] : memref<16x16xbf16, #tpu.memory_space<vmem>>, vector<16x16xbf16>
    %cst_14 = arith.constant dense<0.000000e+00> : vector<128x16xf32>
    %24 = tpu.matmul %22, %23, %cst_14 {dimension_numbers = #tpu.dot_dimension_numbers<[1], [0], [0], [1], [0, 0, 1, 1], [], []>} : vector<128x16xbf16>, vector<16x16xbf16>, vector<128x16xf32> -> vector<128x16xf32>
    %c0_15 = arith.constant 0 : index
    %c0_16 = arith.constant 0 : index
    %25 = vector.load %arg8[%c0_15, %c0_16] : memref<1x16xf32, #tpu.memory_space<vmem>>, vector<1x16xf32>
    %26 = vector.broadcast %25 : vector<1x16xf32> to vector<128x16xf32>
    %27 = arith.addf %24, %26 : vector<128x16xf32>
    %cst_17 = arith.constant 0.000000e+00 : f32
    %28 = vector.broadcast %cst_17 : f32 to vector<128x16xf32>
    %29 = arith.maximumf %27, %28 : vector<128x16xf32>
    %30 = arith.truncf %29 : vector<128x16xf32> to vector<128x16xbf16>
    %c0_18 = arith.constant 0 : index
    %c0_19 = arith.constant 0 : index
    %31 = vector.load %arg9[%c0_18, %c0_19] : memref<16x16xbf16, #tpu.memory_space<vmem>>, vector<16x16xbf16>
    %cst_20 = arith.constant dense<0.000000e+00> : vector<128x16xf32>
    %32 = tpu.matmul %30, %31, %cst_20 {dimension_numbers = #tpu.dot_dimension_numbers<[1], [0], [0], [1], [0, 0, 1, 1], [], []>} : vector<128x16xbf16>, vector<16x16xbf16>, vector<128x16xf32> -> vector<128x16xf32>
    %c0_21 = arith.constant 0 : index
    %c0_22 = arith.constant 0 : index
    %33 = vector.load %arg10[%c0_21, %c0_22] : memref<1x16xf32, #tpu.memory_space<vmem>>, vector<1x16xf32>
    %34 = vector.broadcast %33 : vector<1x16xf32> to vector<128x16xf32>
    %35 = arith.addf %32, %34 : vector<128x16xf32>
    %36 = arith.truncf %35 : vector<128x16xf32> to vector<128x16xbf16>
    %c0_23 = arith.constant 0 : index
    %c0_24 = arith.constant 0 : index
    %37 = vector.load %arg11[%c0_23, %c0_24] : memref<16x16xbf16, #tpu.memory_space<vmem>>, vector<16x16xbf16>
    %cst_25 = arith.constant dense<0.000000e+00> : vector<128x16xf32>
    %38 = tpu.matmul %36, %37, %cst_25 {dimension_numbers = #tpu.dot_dimension_numbers<[1], [0], [0], [1], [0, 0, 1, 1], [], []>} : vector<128x16xbf16>, vector<16x16xbf16>, vector<128x16xf32> -> vector<128x16xf32>
    %c0_26 = arith.constant 0 : index
    %c0_27 = arith.constant 0 : index
    %39 = vector.load %arg12[%c0_26, %c0_27] : memref<1x16xf32, #tpu.memory_space<vmem>>, vector<1x16xf32>
    %40 = vector.broadcast %39 : vector<1x16xf32> to vector<128x16xf32>
    %41 = arith.addf %38, %40 : vector<128x16xf32>
    %c0_28 = arith.constant 0 : index
    %c0_29 = arith.constant 0 : index
    %42 = vector.load %arg1[%c0_28, %c0_29] : memref<128x16xbf16, #tpu.memory_space<vmem>>, vector<128x16xbf16>
    %43 = arith.extf %42 : vector<128x16xbf16> to vector<128x16xf32>
    %44 = arith.addf %43, %41 : vector<128x16xf32>
    %45 = arith.truncf %44 : vector<128x16xf32> to vector<128x16xbf16>
    %c0_30 = arith.constant 0 : index
    %c0_31 = arith.constant 0 : index
    %46 = vector.load %arg13[%c0_30, %c0_31] : memref<128x16xbf16, #tpu.memory_space<vmem>>, vector<128x16xbf16>
    tpu.vector_store %arg13[%c0_30, %c0_31], %45 {strides = array<i32>} : memref<128x16xbf16, #tpu.memory_space<vmem>>, vector<128x16xbf16>,
    return
  }
  func.func @transform_0(%arg0: i32) -> (i32, i32) {
    %c0_i32 = arith.constant 0 : i32
    %c0_i32_0 = arith.constant 0 : i32
    return %arg0, %c0_i32 : i32, i32
  }
  func.func @transform_1(%arg0: i32) -> (i32, i32) {
    %c0_i32 = arith.constant 0 : i32
    %c0_i32_0 = arith.constant 0 : i32
    return %arg0, %c0_i32 : i32, i32
  }
  func.func @transform_2(%arg0: i32) -> (i32, i32) {
    %c0_i32 = arith.constant 0 : i32
    %c0_i32_0 = arith.constant 0 : i32
    return %arg0, %c0_i32 : i32, i32
  }
  func.func @transform_3(%arg0: i32) -> (i32, i32) {
    %c0_i32 = arith.constant 0 : i32
    %c0_i32_0 = arith.constant 0 : i32
    %c0_i32_1 = arith.constant 0 : i32
    return %c0_i32, %c0_i32_0 : i32, i32
  }
  func.func @transform_4(%arg0: i32) -> (i32, i32) {
    %c0_i32 = arith.constant 0 : i32
    %c0_i32_0 = arith.constant 0 : i32
    %c0_i32_1 = arith.constant 0 : i32
    return %c0_i32, %c0_i32_0 : i32, i32
  }
  func.func @transform_5(%arg0: i32) -> (i32, i32) {
    %c0_i32 = arith.constant 0 : i32
    %c0_i32_0 = arith.constant 0 : i32
    %c0_i32_1 = arith.constant 0 : i32
    return %c0_i32, %c0_i32_0 : i32, i32
  }
  func.func @transform_6(%arg0: i32) -> (i32, i32) {
    %c0_i32 = arith.constant 0 : i32
    %c0_i32_0 = arith.constant 0 : i32
    %c0_i32_1 = arith.constant 0 : i32
    return %c0_i32, %c0_i32_0 : i32, i32
  }
  func.func @transform_7(%arg0: i32) -> (i32, i32) {
    %c0_i32 = arith.constant 0 : i32
    %c0_i32_0 = arith.constant 0 : i32
    %c0_i32_1 = arith.constant 0 : i32
    return %c0_i32, %c0_i32_0 : i32, i32
  }
  func.func @transform_8(%arg0: i32) -> (i32, i32) {
    %c0_i32 = arith.constant 0 : i32
    %c0_i32_0 = arith.constant 0 : i32
    %c0_i32_1 = arith.constant 0 : i32
    return %c0_i32, %c0_i32_0 : i32, i32
  }
  func.func @transform_9(%arg0: i32) -> (i32, i32) {
    %c0_i32 = arith.constant 0 : i32
    %c0_i32_0 = arith.constant 0 : i32
    %c0_i32_1 = arith.constant 0 : i32
    return %c0_i32, %c0_i32_0 : i32, i32
  }
  func.func @transform_10(%arg0: i32) -> (i32, i32) {
    %c0_i32 = arith.constant 0 : i32
    %c0_i32_0 = arith.constant 0 : i32
    %c0_i32_1 = arith.constant 0 : i32
    return %c0_i32, %c0_i32_0 : i32, i32
  }
  func.func @transform_11(%arg0: i32) -> (i32, i32) {
    %c0_i32 = arith.constant 0 : i32
    %c0_i32_0 = arith.constant 0 : i32
    %c0_i32_1 = arith.constant 0 : i32
    return %c0_i32, %c0_i32_0 : i32, i32
  }
  func.func @transform_12(%arg0: i32) -> (i32, i32) {
    %c0_i32 = arith.constant 0 : i32
    %c0_i32_0 = arith.constant 0 : i32
    return %arg0, %c0_i32 : i32, i32
  }
}

module attributes {stable_mosaic.version = 11 : i64} {
  func.func @_cross_attn_kernel(%arg0: i32, %arg1: memref<16x8x16xbf16, #tpu.memory_space<vmem>>, %arg2: memref<16x8x16xbf16, #tpu.memory_space<vmem>>, %arg3: memref<16x16xbf16, #tpu.memory_space<vmem>>, %arg4: memref<1x16xf32, #tpu.memory_space<vmem>>, %arg5: memref<16x32xbf16, #tpu.memory_space<vmem>>, %arg6: memref<1x32xf32, #tpu.memory_space<vmem>>, %arg7: memref<16x16xbf16, #tpu.memory_space<vmem>>, %arg8: memref<1x16xf32, #tpu.memory_space<vmem>>, %arg9: memref<16x16xbf16, #tpu.memory_space<vmem>>, %arg10: memref<1x16xf32, #tpu.memory_space<vmem>>, %arg11: memref<16x8x16xbf16, #tpu.memory_space<vmem>>) attributes {dimension_semantics = [#tpu.dimension_semantics<parallel>], iteration_bounds = array<i64: 1>, scalar_prefetch = 0 : i64, scratch_operands = 0 : i64, tpu.core_type = #tpu.core_type<tc>, window_params = [{transform_indices = @transform_0, window_bounds = array<i64: 16, 8, 16>}, {transform_indices = @transform_1, window_bounds = array<i64: 16, 8, 16>}, {pipeline_mode = #tpu.pipeline_mode<synchronous>, transform_indices = @transform_2, window_bounds = array<i64: 16, 16>}, {pipeline_mode = #tpu.pipeline_mode<synchronous>, transform_indices = @transform_3, window_bounds = array<i64: 1, 16>}, {pipeline_mode = #tpu.pipeline_mode<synchronous>, transform_indices = @transform_4, window_bounds = array<i64: 16, 32>}, {pipeline_mode = #tpu.pipeline_mode<synchronous>, transform_indices = @transform_5, window_bounds = array<i64: 1, 32>}, {pipeline_mode = #tpu.pipeline_mode<synchronous>, transform_indices = @transform_6, window_bounds = array<i64: 16, 16>}, {pipeline_mode = #tpu.pipeline_mode<synchronous>, transform_indices = @transform_7, window_bounds = array<i64: 1, 16>}, {pipeline_mode = #tpu.pipeline_mode<synchronous>, transform_indices = @transform_8, window_bounds = array<i64: 16, 16>}, {pipeline_mode = #tpu.pipeline_mode<synchronous>, transform_indices = @transform_9, window_bounds = array<i64: 1, 16>}, {transform_indices = @transform_10, window_bounds = array<i64: 16, 8, 16>}]} {
    %c0 = arith.constant 0 : index
    %c0_0 = arith.constant 0 : index
    %c0_1 = arith.constant 0 : index
    %0 = vector.load %arg1[%c0, %c0_0, %c0_1] : memref<16x8x16xbf16, #tpu.memory_space<vmem>>, vector<16x8x16xbf16>
    %1 = vector.shape_cast %0 : vector<16x8x16xbf16> to vector<128x16xbf16>
    %c0_2 = arith.constant 0 : index
    %c0_3 = arith.constant 0 : index
    %2 = vector.load %arg3[%c0_2, %c0_3] : memref<16x16xbf16, #tpu.memory_space<vmem>>, vector<16x16xbf16>
    %cst = arith.constant dense<0.000000e+00> : vector<128x16xf32>
    %3 = tpu.matmul %1, %2, %cst {dimension_numbers = #tpu.dot_dimension_numbers<[1], [0], [0], [1], [0, 0, 1, 1], [], []>} : vector<128x16xbf16>, vector<16x16xbf16>, vector<128x16xf32> -> vector<128x16xf32>
    %c0_4 = arith.constant 0 : index
    %c0_5 = arith.constant 0 : index
    %4 = vector.load %arg4[%c0_4, %c0_5] : memref<1x16xf32, #tpu.memory_space<vmem>>, vector<1x16xf32>
    %5 = vector.broadcast %4 : vector<1x16xf32> to vector<128x16xf32>
    %6 = arith.addf %3, %5 : vector<128x16xf32>
    %cst_6 = arith.constant 0.000000e+00 : f32
    %7 = vector.broadcast %cst_6 : f32 to vector<128x16xf32>
    %8 = arith.maximumf %6, %7 : vector<128x16xf32>
    %9 = arith.truncf %8 : vector<128x16xf32> to vector<128x16xbf16>
    %10 = vector.shape_cast %9 : vector<128x16xbf16> to vector<16x8x16xbf16>
    %c0_7 = arith.constant 0 : index
    %c0_8 = arith.constant 0 : index
    %c0_9 = arith.constant 0 : index
    %11 = vector.load %arg2[%c0_7, %c0_8, %c0_9] : memref<16x8x16xbf16, #tpu.memory_space<vmem>>, vector<16x8x16xbf16>
    %12 = vector.shape_cast %11 : vector<16x8x16xbf16> to vector<128x16xbf16>
    %c0_10 = arith.constant 0 : index
    %c0_11 = arith.constant 0 : index
    %13 = vector.load %arg5[%c0_10, %c0_11] : memref<16x32xbf16, #tpu.memory_space<vmem>>, vector<16x32xbf16>
    %cst_12 = arith.constant dense<0.000000e+00> : vector<128x32xf32>
    %14 = tpu.matmul %12, %13, %cst_12 {dimension_numbers = #tpu.dot_dimension_numbers<[1], [0], [0], [1], [0, 0, 1, 1], [], []>} : vector<128x16xbf16>, vector<16x32xbf16>, vector<128x32xf32> -> vector<128x32xf32>
    %c0_13 = arith.constant 0 : index
    %c0_14 = arith.constant 0 : index
    %15 = vector.load %arg6[%c0_13, %c0_14] : memref<1x32xf32, #tpu.memory_space<vmem>>, vector<1x32xf32>
    %16 = vector.broadcast %15 : vector<1x32xf32> to vector<128x32xf32>
    %17 = arith.addf %14, %16 : vector<128x32xf32>
    %cst_15 = arith.constant 0.000000e+00 : f32
    %18 = vector.broadcast %cst_15 : f32 to vector<128x32xf32>
    %19 = arith.maximumf %17, %18 : vector<128x32xf32>
    %20 = arith.truncf %19 : vector<128x32xf32> to vector<128x32xbf16>
    %21 = vector.shape_cast %20 : vector<128x32xbf16> to vector<16x8x32xbf16>
    %22 = vector.extract_strided_slice %10 {offsets = [0, 0, 0], sizes = [16, 8, 8], strides = [1, 1, 1]} : vector<16x8x16xbf16> to vector<16x8x8xbf16>
    %23 = vector.extract_strided_slice %21 {offsets = [0, 0, 0], sizes = [16, 8, 8], strides = [1, 1, 1]} : vector<16x8x32xbf16> to vector<16x8x8xbf16>
    %24 = vector.extract_strided_slice %21 {offsets = [0, 0, 16], sizes = [16, 8, 8], strides = [1, 1, 1]} : vector<16x8x32xbf16> to vector<16x8x8xbf16>
    "tpu.trace_start"() <{level = 10 : i32, message = "gqd,gkd->gqk"}> : () -> ()
    %cst_16 = arith.constant dense<0.000000e+00> : vector<16x8x8xf32>
    %25 = tpu.matmul %22, %23, %cst_16 {dimension_numbers = #tpu.dot_dimension_numbers<[2], [2], [1], [1], [0, 0, 0, 1, 1, 1], [0], [0]>} : vector<16x8x8xbf16>, vector<16x8x8xbf16>, vector<16x8x8xf32> -> vector<16x8x8xf32>
    "tpu.trace_stop"() : () -> ()
    %cst_17 = arith.constant 0.353553385 : f32
    %26 = vector.broadcast %cst_17 : f32 to vector<16x8x8xf32>
    %27 = arith.mulf %25, %26 : vector<16x8x8xf32>
    %cst_18 = arith.constant dense<0xFF800000> : vector<16x8xf32>
    %28 = vector.multi_reduction <maximumf>, %27, %cst_18 [2] : vector<16x8x8xf32> to vector<16x8xf32>
    %29 = vector.shape_cast %28 : vector<16x8xf32> to vector<16x8x1xf32>
    %30 = vector.broadcast %29 : vector<16x8x1xf32> to vector<16x8x8xf32>
    %31 = arith.subf %27, %30 : vector<16x8x8xf32>
    %32 = math.exp %31 : vector<16x8x8xf32>
    %cst_19 = arith.constant dense<0.000000e+00> : vector<16x8xf32>
    %33 = vector.multi_reduction <add>, %32, %cst_19 [2] : vector<16x8x8xf32> to vector<16x8xf32>
    %34 = vector.shape_cast %33 : vector<16x8xf32> to vector<16x8x1xf32>
    %35 = tpu.reciprocal %34 {approx = true} : vector<16x8x1xf32> -> vector<16x8x1xf32>
    %36 = vector.broadcast %35 : vector<16x8x1xf32> to vector<16x8x8xf32>
    %37 = arith.mulf %32, %36 : vector<16x8x8xf32>
    %38 = arith.truncf %37 : vector<16x8x8xf32> to vector<16x8x8xbf16>
    "tpu.trace_start"() <{level = 10 : i32, message = "gqk,gkd->gqd"}> : () -> ()
    %cst_20 = arith.constant dense<0.000000e+00> : vector<16x8x8xf32>
    %39 = tpu.matmul %38, %24, %cst_20 {dimension_numbers = #tpu.dot_dimension_numbers<[2], [1], [1], [2], [0, 0, 0, 1, 1, 2], [0], [0]>} : vector<16x8x8xbf16>, vector<16x8x8xbf16>, vector<16x8x8xf32> -> vector<16x8x8xf32>
    "tpu.trace_stop"() : () -> ()
    %40 = vector.extract_strided_slice %10 {offsets = [0, 0, 8], sizes = [16, 8, 8], strides = [1, 1, 1]} : vector<16x8x16xbf16> to vector<16x8x8xbf16>
    %41 = vector.extract_strided_slice %21 {offsets = [0, 0, 8], sizes = [16, 8, 8], strides = [1, 1, 1]} : vector<16x8x32xbf16> to vector<16x8x8xbf16>
    %42 = vector.extract_strided_slice %21 {offsets = [0, 0, 24], sizes = [16, 8, 8], strides = [1, 1, 1]} : vector<16x8x32xbf16> to vector<16x8x8xbf16>
    "tpu.trace_start"() <{level = 10 : i32, message = "gqd,gkd->gqk"}> : () -> ()
    %cst_21 = arith.constant dense<0.000000e+00> : vector<16x8x8xf32>
    %43 = tpu.matmul %40, %41, %cst_21 {dimension_numbers = #tpu.dot_dimension_numbers<[2], [2], [1], [1], [0, 0, 0, 1, 1, 1], [0], [0]>} : vector<16x8x8xbf16>, vector<16x8x8xbf16>, vector<16x8x8xf32> -> vector<16x8x8xf32>
    "tpu.trace_stop"() : () -> ()
    %cst_22 = arith.constant 0.353553385 : f32
    %44 = vector.broadcast %cst_22 : f32 to vector<16x8x8xf32>
    %45 = arith.mulf %43, %44 : vector<16x8x8xf32>
    %cst_23 = arith.constant dense<0xFF800000> : vector<16x8xf32>
    %46 = vector.multi_reduction <maximumf>, %45, %cst_23 [2] : vector<16x8x8xf32> to vector<16x8xf32>
    %47 = vector.shape_cast %46 : vector<16x8xf32> to vector<16x8x1xf32>
    %48 = vector.broadcast %47 : vector<16x8x1xf32> to vector<16x8x8xf32>
    %49 = arith.subf %45, %48 : vector<16x8x8xf32>
    %50 = math.exp %49 : vector<16x8x8xf32>
    %cst_24 = arith.constant dense<0.000000e+00> : vector<16x8xf32>
    %51 = vector.multi_reduction <add>, %50, %cst_24 [2] : vector<16x8x8xf32> to vector<16x8xf32>
    %52 = vector.shape_cast %51 : vector<16x8xf32> to vector<16x8x1xf32>
    %53 = tpu.reciprocal %52 {approx = true} : vector<16x8x1xf32> -> vector<16x8x1xf32>
    %54 = vector.broadcast %53 : vector<16x8x1xf32> to vector<16x8x8xf32>
    %55 = arith.mulf %50, %54 : vector<16x8x8xf32>
    %56 = arith.truncf %55 : vector<16x8x8xf32> to vector<16x8x8xbf16>
    "tpu.trace_start"() <{level = 10 : i32, message = "gqk,gkd->gqd"}> : () -> ()
    %cst_25 = arith.constant dense<0.000000e+00> : vector<16x8x8xf32>
    %57 = tpu.matmul %56, %42, %cst_25 {dimension_numbers = #tpu.dot_dimension_numbers<[2], [1], [1], [2], [0, 0, 0, 1, 1, 2], [0], [0]>} : vector<16x8x8xbf16>, vector<16x8x8xbf16>, vector<16x8x8xf32> -> vector<16x8x8xf32>
    "tpu.trace_stop"() : () -> ()
    %58 = tpu.concatenate %39, %57 in 2 : vector<16x8x8xf32>, vector<16x8x8xf32> -> vector<16x8x16xf32>
    %59 = vector.shape_cast %58 : vector<16x8x16xf32> to vector<128x16xf32>
    %60 = arith.truncf %59 : vector<128x16xf32> to vector<128x16xbf16>
    %c0_26 = arith.constant 0 : index
    %c0_27 = arith.constant 0 : index
    %61 = vector.load %arg7[%c0_26, %c0_27] : memref<16x16xbf16, #tpu.memory_space<vmem>>, vector<16x16xbf16>
    %cst_28 = arith.constant dense<0.000000e+00> : vector<128x16xf32>
    %62 = tpu.matmul %60, %61, %cst_28 {dimension_numbers = #tpu.dot_dimension_numbers<[1], [0], [0], [1], [0, 0, 1, 1], [], []>} : vector<128x16xbf16>, vector<16x16xbf16>, vector<128x16xf32> -> vector<128x16xf32>
    %c0_29 = arith.constant 0 : index
    %c0_30 = arith.constant 0 : index
    %63 = vector.load %arg8[%c0_29, %c0_30] : memref<1x16xf32, #tpu.memory_space<vmem>>, vector<1x16xf32>
    %64 = vector.broadcast %63 : vector<1x16xf32> to vector<128x16xf32>
    %65 = arith.addf %62, %64 : vector<128x16xf32>
    %cst_31 = arith.constant 0.000000e+00 : f32
    %66 = vector.broadcast %cst_31 : f32 to vector<128x16xf32>
    %67 = arith.maximumf %65, %66 : vector<128x16xf32>
    %68 = arith.truncf %67 : vector<128x16xf32> to vector<128x16xbf16>
    %c0_32 = arith.constant 0 : index
    %c0_33 = arith.constant 0 : index
    %69 = vector.load %arg9[%c0_32, %c0_33] : memref<16x16xbf16, #tpu.memory_space<vmem>>, vector<16x16xbf16>
    %cst_34 = arith.constant dense<0.000000e+00> : vector<128x16xf32>
    %70 = tpu.matmul %68, %69, %cst_34 {dimension_numbers = #tpu.dot_dimension_numbers<[1], [0], [0], [1], [0, 0, 1, 1], [], []>} : vector<128x16xbf16>, vector<16x16xbf16>, vector<128x16xf32> -> vector<128x16xf32>
    %c0_35 = arith.constant 0 : index
    %c0_36 = arith.constant 0 : index
    %71 = vector.load %arg10[%c0_35, %c0_36] : memref<1x16xf32, #tpu.memory_space<vmem>>, vector<1x16xf32>
    %72 = vector.broadcast %71 : vector<1x16xf32> to vector<128x16xf32>
    %73 = arith.addf %70, %72 : vector<128x16xf32>
    %74 = vector.shape_cast %73 : vector<128x16xf32> to vector<16x8x16xf32>
    %75 = arith.truncf %74 : vector<16x8x16xf32> to vector<16x8x16xbf16>
    %c0_37 = arith.constant 0 : index
    %c0_38 = arith.constant 0 : index
    %c0_39 = arith.constant 0 : index
    %76 = vector.load %arg11[%c0_37, %c0_38, %c0_39] : memref<16x8x16xbf16, #tpu.memory_space<vmem>>, vector<16x8x16xbf16>
    tpu.vector_store %arg11[%c0_37, %c0_38, %c0_39], %75 {strides = array<i32>} : memref<16x8x16xbf16, #tpu.memory_space<vmem>>, vector<16x8x16xbf16>,
    return
  }
  func.func @transform_0(%arg0: i32) -> (i32, i32, i32) {
    %c0_i32 = arith.constant 0 : i32
    %c0_i32_0 = arith.constant 0 : i32
    %c0_i32_1 = arith.constant 0 : i32
    return %arg0, %c0_i32, %c0_i32_0 : i32, i32, i32
  }
  func.func @transform_1(%arg0: i32) -> (i32, i32, i32) {
    %c0_i32 = arith.constant 0 : i32
    %c0_i32_0 = arith.constant 0 : i32
    %c0_i32_1 = arith.constant 0 : i32
    return %arg0, %c0_i32, %c0_i32_0 : i32, i32, i32
  }
  func.func @transform_2(%arg0: i32) -> (i32, i32) {
    %c0_i32 = arith.constant 0 : i32
    %c0_i32_0 = arith.constant 0 : i32
    %c0_i32_1 = arith.constant 0 : i32
    return %c0_i32, %c0_i32_0 : i32, i32
  }
  func.func @transform_3(%arg0: i32) -> (i32, i32) {
    %c0_i32 = arith.constant 0 : i32
    %c0_i32_0 = arith.constant 0 : i32
    %c0_i32_1 = arith.constant 0 : i32
    return %c0_i32, %c0_i32_0 : i32, i32
  }
  func.func @transform_4(%arg0: i32) -> (i32, i32) {
    %c0_i32 = arith.constant 0 : i32
    %c0_i32_0 = arith.constant 0 : i32
    %c0_i32_1 = arith.constant 0 : i32
    return %c0_i32, %c0_i32_0 : i32, i32
  }
  func.func @transform_5(%arg0: i32) -> (i32, i32) {
    %c0_i32 = arith.constant 0 : i32
    %c0_i32_0 = arith.constant 0 : i32
    %c0_i32_1 = arith.constant 0 : i32
    return %c0_i32, %c0_i32_0 : i32, i32
  }
  func.func @transform_6(%arg0: i32) -> (i32, i32) {
    %c0_i32 = arith.constant 0 : i32
    %c0_i32_0 = arith.constant 0 : i32
    %c0_i32_1 = arith.constant 0 : i32
    return %c0_i32, %c0_i32_0 : i32, i32
  }
  func.func @transform_7(%arg0: i32) -> (i32, i32) {
    %c0_i32 = arith.constant 0 : i32
    %c0_i32_0 = arith.constant 0 : i32
    %c0_i32_1 = arith.constant 0 : i32
    return %c0_i32, %c0_i32_0 : i32, i32
  }
  func.func @transform_8(%arg0: i32) -> (i32, i32) {
    %c0_i32 = arith.constant 0 : i32
    %c0_i32_0 = arith.constant 0 : i32
    %c0_i32_1 = arith.constant 0 : i32
    return %c0_i32, %c0_i32_0 : i32, i32
  }
  func.func @transform_9(%arg0: i32) -> (i32, i32) {
    %c0_i32 = arith.constant 0 : i32
    %c0_i32_0 = arith.constant 0 : i32
    %c0_i32_1 = arith.constant 0 : i32
    return %c0_i32, %c0_i32_0 : i32, i32
  }
  func.func @transform_10(%arg0: i32) -> (i32, i32, i32) {
    %c0_i32 = arith.constant 0 : i32
    %c0_i32_0 = arith.constant 0 : i32
    %c0_i32_1 = arith.constant 0 : i32
    return %arg0, %c0_i32, %c0_i32_0 : i32, i32, i32
  }
}

module attributes {stable_mosaic.version = 11 : i64} {
  func.func @_linear_kernel(%arg0: i32, %arg1: memref<256x8xbf16, #tpu.memory_space<vmem>>, %arg2: memref<8x4xbf16, #tpu.memory_space<vmem>>, %arg3: memref<1x4xf32, #tpu.memory_space<vmem>>, %arg4: memref<256x4xbf16, #tpu.memory_space<vmem>>) attributes {dimension_semantics = [#tpu.dimension_semantics<parallel>], iteration_bounds = array<i64: 1>, scalar_prefetch = 0 : i64, scratch_operands = 0 : i64, tpu.core_type = #tpu.core_type<tc>, window_params = [{transform_indices = @transform_0, window_bounds = array<i64: 256, 8>}, {pipeline_mode = #tpu.pipeline_mode<synchronous>, transform_indices = @transform_1, window_bounds = array<i64: 8, 4>}, {pipeline_mode = #tpu.pipeline_mode<synchronous>, transform_indices = @transform_2, window_bounds = array<i64: 1, 4>}, {transform_indices = @transform_3, window_bounds = array<i64: 256, 4>}]} {
    %c0 = arith.constant 0 : index
    %c0_0 = arith.constant 0 : index
    %0 = vector.load %arg1[%c0, %c0_0] : memref<256x8xbf16, #tpu.memory_space<vmem>>, vector<256x8xbf16>
    %c0_1 = arith.constant 0 : index
    %c0_2 = arith.constant 0 : index
    %1 = vector.load %arg2[%c0_1, %c0_2] : memref<8x4xbf16, #tpu.memory_space<vmem>>, vector<8x4xbf16>
    %cst = arith.constant dense<0.000000e+00> : vector<256x4xf32>
    %2 = tpu.matmul %0, %1, %cst {dimension_numbers = #tpu.dot_dimension_numbers<[1], [0], [0], [1], [0, 0, 1, 1], [], []>} : vector<256x8xbf16>, vector<8x4xbf16>, vector<256x4xf32> -> vector<256x4xf32>
    %c0_3 = arith.constant 0 : index
    %c0_4 = arith.constant 0 : index
    %3 = vector.load %arg3[%c0_3, %c0_4] : memref<1x4xf32, #tpu.memory_space<vmem>>, vector<1x4xf32>
    %4 = vector.broadcast %3 : vector<1x4xf32> to vector<256x4xf32>
    %5 = arith.addf %2, %4 : vector<256x4xf32>
    %cst_5 = arith.constant 0.000000e+00 : f32
    %6 = vector.broadcast %cst_5 : f32 to vector<256x4xf32>
    %7 = arith.maximumf %5, %6 : vector<256x4xf32>
    %8 = arith.truncf %7 : vector<256x4xf32> to vector<256x4xbf16>
    %c0_6 = arith.constant 0 : index
    %c0_7 = arith.constant 0 : index
    %9 = vector.load %arg4[%c0_6, %c0_7] : memref<256x4xbf16, #tpu.memory_space<vmem>>, vector<256x4xbf16>
    tpu.vector_store %arg4[%c0_6, %c0_7], %8 {strides = array<i32>} : memref<256x4xbf16, #tpu.memory_space<vmem>>, vector<256x4xbf16>,
    return
  }
  func.func @transform_0(%arg0: i32) -> (i32, i32) {
    %c0_i32 = arith.constant 0 : i32
    %c0_i32_0 = arith.constant 0 : i32
    return %arg0, %c0_i32 : i32, i32
  }
  func.func @transform_1(%arg0: i32) -> (i32, i32) {
    %c0_i32 = arith.constant 0 : i32
    %c0_i32_0 = arith.constant 0 : i32
    %c0_i32_1 = arith.constant 0 : i32
    return %c0_i32, %c0_i32_0 : i32, i32
  }
  func.func @transform_2(%arg0: i32) -> (i32, i32) {
    %c0_i32 = arith.constant 0 : i32
    %c0_i32_0 = arith.constant 0 : i32
    %c0_i32_1 = arith.constant 0 : i32
    return %c0_i32, %c0_i32_0 : i32, i32
  }
  func.func @transform_3(%arg0: i32) -> (i32, i32) {
    %c0_i32 = arith.constant 0 : i32
    %c0_i32_0 = arith.constant 0 : i32
    return %arg0, %c0_i32 : i32, i32
  }
}

module attributes {stable_mosaic.version = 11 : i64} {
  func.func @_fc2_kernel(%arg0: i32, %arg1: memref<64x16xbf16, #tpu.memory_space<vmem>>, %arg2: memref<16x16xbf16, #tpu.memory_space<vmem>>, %arg3: memref<1x16xf32, #tpu.memory_space<vmem>>, %arg4: memref<16x1xbf16, #tpu.memory_space<vmem>>, %arg5: memref<1x1xf32, #tpu.memory_space<vmem>>, %arg6: memref<64x1xf32, #tpu.memory_space<vmem>>) attributes {dimension_semantics = [#tpu.dimension_semantics<parallel>], iteration_bounds = array<i64: 1>, scalar_prefetch = 0 : i64, scratch_operands = 0 : i64, tpu.core_type = #tpu.core_type<tc>, window_params = [{transform_indices = @transform_0, window_bounds = array<i64: 64, 16>}, {pipeline_mode = #tpu.pipeline_mode<synchronous>, transform_indices = @transform_1, window_bounds = array<i64: 16, 16>}, {pipeline_mode = #tpu.pipeline_mode<synchronous>, transform_indices = @transform_2, window_bounds = array<i64: 1, 16>}, {pipeline_mode = #tpu.pipeline_mode<synchronous>, transform_indices = @transform_3, window_bounds = array<i64: 16, 1>}, {pipeline_mode = #tpu.pipeline_mode<synchronous>, transform_indices = @transform_4, window_bounds = array<i64: 1, 1>}, {transform_indices = @transform_5, window_bounds = array<i64: 64, 1>}]} {
    %c0 = arith.constant 0 : index
    %c0_0 = arith.constant 0 : index
    %0 = vector.load %arg1[%c0, %c0_0] : memref<64x16xbf16, #tpu.memory_space<vmem>>, vector<64x16xbf16>
    %c0_1 = arith.constant 0 : index
    %c0_2 = arith.constant 0 : index
    %1 = vector.load %arg2[%c0_1, %c0_2] : memref<16x16xbf16, #tpu.memory_space<vmem>>, vector<16x16xbf16>
    %cst = arith.constant dense<0.000000e+00> : vector<64x16xf32>
    %2 = tpu.matmul %0, %1, %cst {dimension_numbers = #tpu.dot_dimension_numbers<[1], [0], [0], [1], [0, 0, 1, 1], [], []>} : vector<64x16xbf16>, vector<16x16xbf16>, vector<64x16xf32> -> vector<64x16xf32>
    %c0_3 = arith.constant 0 : index
    %c0_4 = arith.constant 0 : index
    %3 = vector.load %arg3[%c0_3, %c0_4] : memref<1x16xf32, #tpu.memory_space<vmem>>, vector<1x16xf32>
    %4 = vector.broadcast %3 : vector<1x16xf32> to vector<64x16xf32>
    %5 = arith.addf %2, %4 : vector<64x16xf32>
    %cst_5 = arith.constant 0.000000e+00 : f32
    %6 = vector.broadcast %cst_5 : f32 to vector<64x16xf32>
    %7 = arith.maximumf %5, %6 : vector<64x16xf32>
    %8 = arith.truncf %7 : vector<64x16xf32> to vector<64x16xbf16>
    %c0_6 = arith.constant 0 : index
    %c0_7 = arith.constant 0 : index
    %9 = vector.load %arg4[%c0_6, %c0_7] : memref<16x1xbf16, #tpu.memory_space<vmem>>, vector<16x1xbf16>
    %cst_8 = arith.constant dense<0.000000e+00> : vector<64x1xf32>
    %10 = tpu.matmul %8, %9, %cst_8 {dimension_numbers = #tpu.dot_dimension_numbers<[1], [0], [0], [1], [0, 0, 1, 1], [], []>} : vector<64x16xbf16>, vector<16x1xbf16>, vector<64x1xf32> -> vector<64x1xf32>
    %c0_9 = arith.constant 0 : index
    %c0_10 = arith.constant 0 : index
    %11 = vector.load %arg5[%c0_9, %c0_10] : memref<1x1xf32, #tpu.memory_space<vmem>>, vector<1x1xf32>
    %12 = vector.broadcast %11 : vector<1x1xf32> to vector<64x1xf32>
    %13 = arith.addf %10, %12 : vector<64x1xf32>
    %c0_11 = arith.constant 0 : index
    %c0_12 = arith.constant 0 : index
    %14 = vector.load %arg6[%c0_11, %c0_12] : memref<64x1xf32, #tpu.memory_space<vmem>>, vector<64x1xf32>
    tpu.vector_store %arg6[%c0_11, %c0_12], %13 {strides = array<i32>} : memref<64x1xf32, #tpu.memory_space<vmem>>, vector<64x1xf32>,
    return
  }
  func.func @transform_0(%arg0: i32) -> (i32, i32) {
    %c0_i32 = arith.constant 0 : i32
    %c0_i32_0 = arith.constant 0 : i32
    return %arg0, %c0_i32 : i32, i32
  }
  func.func @transform_1(%arg0: i32) -> (i32, i32) {
    %c0_i32 = arith.constant 0 : i32
    %c0_i32_0 = arith.constant 0 : i32
    %c0_i32_1 = arith.constant 0 : i32
    return %c0_i32, %c0_i32_0 : i32, i32
  }
  func.func @transform_2(%arg0: i32) -> (i32, i32) {
    %c0_i32 = arith.constant 0 : i32
    %c0_i32_0 = arith.constant 0 : i32
    %c0_i32_1 = arith.constant 0 : i32
    return %c0_i32, %c0_i32_0 : i32, i32
  }
  func.func @transform_3(%arg0: i32) -> (i32, i32) {
    %c0_i32 = arith.constant 0 : i32
    %c0_i32_0 = arith.constant 0 : i32
    %c0_i32_1 = arith.constant 0 : i32
    return %c0_i32, %c0_i32_0 : i32, i32
  }
  func.func @transform_4(%arg0: i32) -> (i32, i32) {
    %c0_i32 = arith.constant 0 : i32
    %c0_i32_0 = arith.constant 0 : i32
    %c0_i32_1 = arith.constant 0 : i32
    return %c0_i32, %c0_i32_0 : i32, i32
  }
  func.func @transform_5(%arg0: i32) -> (i32, i32) {
    %c0_i32 = arith.constant 0 : i32
    %c0_i32_0 = arith.constant 0 : i32
    return %arg0, %c0_i32 : i32, i32
  }
}

</mosaic_0001>

<bundles_post_ra>
// kernel: _lambda_.20
= control target key start
LH: loop header
LB: loop body
LE: loop exit
PB: predicated region body
PF: predicated region fallthrough
CT: control target
= control target key end

     0   :  { %vm104_vm0 = vcmask 1042432   ;;  %vm79_vm1 = vcmask 48128   ;;  %vm205_vm2 = vcmask 130048   ;;  %s404_s1 = inlined_call_operand.vmem [shape: bf16[6,16], index: 1, kind: input, shape index: {}]   ;;  %s405_s0 = inlined_call_operand.vmem [shape: bf16[128,6], index: 0, kind: input, shape index: {}]   ;;  %s406_s2 = inlined_call_operand.vmem [shape: f32[1,16], index: 2, kind: input, shape index: {}]   ;;  %s407_s3 = inlined_call_operand.vmem [shape: f32[128,16], index: 3, kind: output, shape index: {}]  }
   0x1   :  { %v31_v0 = vld [vmem:[%s404_s1] sm:$0x7]  ;;  %v276_v4 = vld [vmem:[%s405_s0 + $0x8] sm:$0xff]   ;;  %v278_v6 = vld [vmem:[%s405_s0 + $0x10] sm:$0xff]  }
   0x2   :  { %272 = vmatprep.subr.msk.bf16.mxu0 %vm104_vm0, %v31_v0  ;;  %273 = vmatprep.subr.msk.bf16.mxu1 %vm104_vm0, %v31_v0  ;;  %v106_v1 = vsel %vm104_vm0, %v31_v0, 0  ;;  %v274_v2 = vld [vmem:[%s405_s0] sm:$0xff]   ;;  %v277_v5 = vld [vmem:[%s405_s0 + $0x28] sm:$0xff]   ;;  %v279_v7 = vld [vmem:[%s405_s0 + $0x30] sm:$0xff]  }
   0x3   :  { %253 = vmatpush3.bf16.msra.mxu0 %v106_v1  ;;  %271 = vmatpush3.bf16.msra.mxu1 %v106_v1  ;;  %v275_v3 = vld [vmem:[%s405_s0 + $0x20] sm:$0xff]   ;;  %v280_v8 = vld [vmem:[%s405_s0 + $0x18] sm:$0xff]  }
   0x4   :  { %254 = vmatprep.mubr.msk.bf16.mxu0 %vm79_vm1, %v274_v2  ;;  %262 = vmatprep.mubr.msk.bf16.mxu1 %vm79_vm1, %v275_v3  ;;  %v281_v9 = vld [vmem:[%s405_s0 + $0x38] sm:$0xff]   ;;  %v226_v10 = vld [vmem:[%s406_s2] ss:$0 sm:$0xff] }
   0x6   :  { %255 = vmatmul.mubr.msk.bf16.vlgmr.msra.gmra.mrb[0].mxu0 %vm79_vm1, %v276_v4  ;;  %263 = vmatmul.mubr.msk.bf16.vlgmr.msra.gmra.mrb[0].mxu1 %vm79_vm1, %v277_v5 }
   0x7   :  { %258 = vmatprep.mubr.msk.bf16.mxu0 %vm79_vm1, %v278_v6  ;;  %266 = vmatprep.mubr.msk.bf16.mxu1 %vm79_vm1, %v279_v7 }
   0xe   :  { %259 = vmatmul.mubr.msk.bf16.gmra.mrb[4].mxu0 %vm79_vm1, %v280_v8  ;;  %267 = vmatmul.mubr.msk.bf16.gmra.mrb[4].mxu1 %vm79_vm1, %v281_v9 }
  0xd9   :  { %v256_v11 = vpop.f32.mrb[0].mxu0  ;;  %v264_v13 = vpop.f32.mrb[0].mxu1 }
  0xda   :  { %v151_v12 = vadd.f32 %v256_v11, %v226_v10  ;;  %v142_v14 = vpop.f32.mrb[1].mxu0  ;;  %v183_v15 = vadd.f32 %v264_v13, %v226_v10  ;;  %v174_v17 = vpop.f32.mrb[1].mxu1 }
  0xdb   :  { %v143_v16 = vadd.f32 %v226_v10, %v142_v14  ;;  %v257_v18 = vpop.f32.mrb[2].mxu0  ;;  %v175_v19 = vadd.f32 %v226_v10, %v174_v17  ;;  %v265_v21 = vpop.f32.mrb[2].mxu1 }
  0xdc   :  { %208 = vst.msk [vmem:[%s407_s3 + $0x10] sm:$0xff] %vm205_vm2, %v151_v12  ;;  %v154_v20 = vadd.f32 %v257_v18, %v226_v10  ;;  %v145_v22 = vpop.f32.mrb[3].mxu0  ;;  %216 = vst.msk [vmem:[%s407_s3 + $0x50] sm:$0xff] %vm205_vm2, %v183_v15  ;;  %v186_v23 = vadd.f32 %v265_v21, %v226_v10  ;;  %v177_v25 = vpop.f32.mrb[3].mxu1 }
  0xdd   :  { %206 = vst.msk [vmem:[%s407_s3] sm:$0xff] %vm205_vm2, %v143_v16  ;;  %v146_v24 = vadd.f32 %v226_v10, %v145_v22  ;;  %214 = vst.msk [vmem:[%s407_s3 + $0x40] sm:$0xff] %vm205_vm2, %v175_v19  ;;  %v178_v26 = vadd.f32 %v226_v10, %v177_v25 }
  0xde   :  { %209 = vst.msk [vmem:[%s407_s3 + $0x18] sm:$0xff] %vm205_vm2, %v154_v20  ;;  %217 = vst.msk [vmem:[%s407_s3 + $0x58] sm:$0xff] %vm205_vm2, %v186_v23 }
  0xdf   :  { %207 = vst.msk [vmem:[%s407_s3 + $0x8] sm:$0xff] %vm205_vm2, %v146_v24  ;;  %215 = vst.msk [vmem:[%s407_s3 + $0x48] sm:$0xff] %vm205_vm2, %v178_v26 }
  0xe1   :  { %v260_v27 = vpop.f32.mrb[4].mxu0  ;;  %v268_v29 = vpop.f32.mrb[4].mxu1 }
  0xe2   :  { %v167_v28 = vadd.f32 %v260_v27, %v226_v10  ;;  %v158_v30 = vpop.f32.mrb[5].mxu0  ;;  %v199_v31 = vadd.f32 %v268_v29, %v226_v10  ;;  %v190_v33 = vpop.f32.mrb[5].mxu1 }
  0xe3   :  { %v159_v32 = vadd.f32 %v226_v10, %v158_v30  ;;  %v261_v34 = vpop.f32.mrb[6].mxu0  ;;  %v191_v35 = vadd.f32 %v226_v10, %v190_v33  ;;  %v269_v37 = vpop.f32.mrb[6].mxu1 }
  0xe4   :  { %212 = vst.msk [vmem:[%s407_s3 + $0x30] sm:$0xff] %vm205_vm2, %v167_v28  ;;  %v170_v36 = vadd.f32 %v261_v34, %v226_v10  ;;  %v161_v38 = vpop.f32.mrb[7].mxu0  ;;  %220 = vst.msk [vmem:[%s407_s3 + $0x70] sm:$0xff] %vm205_vm2, %v199_v31  ;;  %v202_v39 = vadd.f32 %v269_v37, %v226_v10  ;;  %v193_v41 = vpop.f32.mrb[7].mxu1 }
  0xe5   :  { %210 = vst.msk [vmem:[%s407_s3 + $0x20] sm:$0xff] %vm205_vm2, %v159_v32  ;;  %v162_v40 = vadd.f32 %v226_v10, %v161_v38  ;;  %218 = vst.msk [vmem:[%s407_s3 + $0x60] sm:$0xff] %vm205_vm2, %v191_v35  ;;  %v194_v42 = vadd.f32 %v226_v10, %v193_v41 }
  0xe6   :  { %213 = vst.msk [vmem:[%s407_s3 + $0x38] sm:$0xff] %vm205_vm2, %v170_v36  ;;  %221 = vst.msk [vmem:[%s407_s3 + $0x78] sm:$0xff] %vm205_vm2, %v202_v39 }
  0xe7   :  { %211 = vst.msk [vmem:[%s407_s3 + $0x28] sm:$0xff] %vm205_vm2, %v162_v40  ;;  %219 = vst.msk [vmem:[%s407_s3 + $0x68] sm:$0xff] %vm205_vm2, %v194_v42 }

// kernel: _lambda_.21
= control target key start
LH: loop header
LB: loop body
LE: loop exit
PB: predicated region body
PF: predicated region fallthrough
CT: control target
= control target key end

     0   :  { %vm86_vm0 = vcmask 130048   ;;  %vm272_vm1 = vcmask 388096   ;;  %s503_s1 = inlined_call_operand.vmem [shape: bf16[16,48], index: 1, kind: input, shape index: {}]   ;;  %s504_s0 = inlined_call_operand.vmem [shape: bf16[128,16], index: 0, kind: input, shape index: {}]   ;;  %s505_s2 = inlined_call_operand.vmem [shape: f32[1,48], index: 2, kind: input, shape index: {}]   ;;  %s506_s3 = inlined_call_operand.vmem [shape: bf16[128,48], index: 3, kind: output, shape index: {}]  }
   0x1   :  { %v372_v0 = vld [vmem:[%s503_s1] sm:$0xff]   ;;  %v375_v3 = vld [vmem:[%s504_s0 + $0x8] sm:$0xff]   ;;  %v377_v5 = vld [vmem:[%s504_s0 + $0x10] sm:$0xff]  }
   0x2   :  { %v373_v1 = vld [vmem:[%s504_s0] sm:$0xff]   ;;  %352 = vmatprep.subr.bf16.mxu0 %v372_v0  ;;  %370 = vmatprep.subr.bf16.mxu1 %v372_v0  ;;  %v376_v4 = vld [vmem:[%s504_s0 + $0x28] sm:$0xff]   ;;  %v378_v6 = vld [vmem:[%s504_s0 + $0x30] sm:$0xff]  }
   0x3   :  { %v374_v2 = vld [vmem:[%s504_s0 + $0x20] sm:$0xff]   ;;  %353 = vmatpush3.bf16.msra.mxu0 %v372_v0  ;;  %371 = vmatpush3.bf16.msra.mxu1 %v372_v0  ;;  %v379_v7 = vld [vmem:[%s504_s0 + $0x18] sm:$0xff]  }
   0x4   :  { %354 = vmatprep.mubr.msk.bf16.mxu0 %vm86_vm0, %v373_v1  ;;  %362 = vmatprep.mubr.msk.bf16.mxu1 %vm86_vm0, %v374_v2  ;;  %v380_v8 = vld [vmem:[%s504_s0 + $0x38] sm:$0xff]   ;;  %v293_v9 = vld [vmem:[%s505_s2] ss:$0 sm:$0xff] }
   0x6   :  { %355 = vmatmul.mubr.msk.bf16.vlgmr.msra.gmra.mrb[0].mxu0 %vm86_vm0, %v375_v3  ;;  %363 = vmatmul.mubr.msk.bf16.vlgmr.msra.gmra.mrb[0].mxu1 %vm86_vm0, %v376_v4 }
   0x7   :  { %358 = vmatprep.mubr.msk.bf16.mxu0 %vm86_vm0, %v377_v5  ;;  %366 = vmatprep.mubr.msk.bf16.mxu1 %vm86_vm0, %v378_v6 }
   0xe   :  { %359 = vmatmul.mubr.msk.bf16.gmra.mrb[4].mxu0 %vm86_vm0, %v379_v7  ;;  %367 = vmatmul.mubr.msk.bf16.gmra.mrb[4].mxu1 %vm86_vm0, %v380_v8 }
  0xd9   :  { %v356_v10 = vpop.f32.mrb[0].mxu0  ;;  %v364_v11 = vpop.f32.mrb[0].mxu1 }
  0xda   :  { %v154_v12 = vadd.f32 %v356_v10, %v293_v9  ;;  %v186_v13 = vadd.f32 %v364_v11, %v293_v9  ;;  %v145_v14 = vpop.f32.mrb[1].mxu0  ;;  %v177_v15 = vpop.f32.mrb[1].mxu1 }
  0xdb   :  { %v146_v16 = vadd.f32 %v293_v9, %v145_v14  ;;  %v178_v17 = vadd.f32 %v293_v9, %v177_v15  ;;  %v357_v18 = vpop.f32.mrb[2].mxu0  ;;  %v365_v19 = vpop.f32.mrb[2].mxu1 }
  0xdc   :  { %v329_v20 = vpack.c.bf16 %v154_v12, %v154_v12  ;;  %v337_v21 = vpack.c.bf16 %v186_v13, %v186_v13  ;;  %v157_v22 = vadd.f32 %v357_v18, %v293_v9  ;;  %v189_v23 = vadd.f32 %v365_v19, %v293_v9  ;;  %v148_v24 = vpop.f32.mrb[3].mxu0  ;;  %v180_v25 = vpop.f32.mrb[3].mxu1 }
  0xdd   :  { %v327_v26 = vpack.c.bf16 %v146_v16, %v146_v16  ;;  %v335_v27 = vpack.c.bf16 %v178_v17, %v178_v17  ;;  %v149_v28 = vadd.f32 %v293_v9, %v148_v24  ;;  %v181_v29 = vadd.f32 %v293_v9, %v180_v25 }
  0xde   :  { %275 = vst.msk [vmem:[%s506_s3 + $0x8] sm:$0xf] %vm272_vm1, %v329_v20  ;;  %283 = vst.msk [vmem:[%s506_s3 + $0x28] sm:$0xf] %vm272_vm1, %v337_v21  ;;  %v330_v30 = vpack.c.bf16 %v157_v22, %v157_v22  ;;  %v338_v31 = vpack.c.bf16 %v189_v23, %v189_v23 }
  0xdf   :  { %273 = vst.msk [vmem:[%s506_s3] sm:$0xf] %vm272_vm1, %v327_v26  ;;  %281 = vst.msk [vmem:[%s506_s3 + $0x20] sm:$0xf] %vm272_vm1, %v335_v27  ;;  %v328_v32 = vpack.c.bf16 %v149_v28, %v149_v28  ;;  %v336_v33 = vpack.c.bf16 %v181_v29, %v181_v29 }
  0xe0   :  { %276 = vst.msk [vmem:[%s506_s3 + $0xc] sm:$0xf] %vm272_vm1, %v330_v30  ;;  %284 = vst.msk [vmem:[%s506_s3 + $0x2c] sm:$0xf] %vm272_vm1, %v338_v31 }
  0xe1   :  { %274 = vst.msk [vmem:[%s506_s3 + $0x4] sm:$0xf] %vm272_vm1, %v328_v32  ;;  %282 = vst.msk [vmem:[%s506_s3 + $0x24] sm:$0xf] %vm272_vm1, %v336_v33  ;;  %v360_v34 = vpop.f32.mrb[4].mxu0  ;;  %v368_v35 = vpop.f32.mrb[4].mxu1 }
  0xe2   :  { %v170_v36 = vadd.f32 %v360_v34, %v293_v9  ;;  %v202_v37 = vadd.f32 %v368_v35, %v293_v9  ;;  %v161_v38 = vpop.f32.mrb[5].mxu0  ;;  %v193_v39 = vpop.f32.mrb[5].mxu1 }
  0xe3   :  { %v162_v40 = vadd.f32 %v293_v9, %v161_v38  ;;  %v194_v41 = vadd.f32 %v293_v9, %v193_v39  ;;  %v361_v42 = vpop.f32.mrb[6].mxu0  ;;  %v369_v43 = vpop.f32.mrb[6].mxu1 }
  0xe4   :  { %v333_v44 = vpack.c.bf16 %v170_v36, %v170_v36  ;;  %v341_v45 = vpack.c.bf16 %v202_v37, %v202_v37  ;;  %v173_v46 = vadd.f32 %v361_v42, %v293_v9  ;;  %v205_v47 = vadd.f32 %v369_v43, %v293_v9  ;;  %v164_v48 = vpop.f32.mrb[7].mxu0  ;;  %v196_v49 = vpop.f32.mrb[7].mxu1 }
  0xe5   :  { %v331_v50 = vpack.c.bf16 %v162_v40, %v162_v40  ;;  %v339_v51 = vpack.c.bf16 %v194_v41, %v194_v41  ;;  %v165_v52 = vadd.f32 %v293_v9, %v164_v48  ;;  %v197_v53 = vadd.f32 %v293_v9, %v196_v49 }
  0xe6   :  { %279 = vst.msk [vmem:[%s506_s3 + $0x18] sm:$0xf] %vm272_vm1, %v333_v44  ;;  %287 = vst.msk [vmem:[%s506_s3 + $0x38] sm:$0xf] %vm272_vm1, %v341_v45  ;;  %v334_v54 = vpack.c.bf16 %v173_v46, %v173_v46  ;;  %v342_v55 = vpack.c.bf16 %v205_v47, %v205_v47 }
  0xe7   :  { %277 = vst.msk [vmem:[%s506_s3 + $0x10] sm:$0xf] %vm272_vm1, %v331_v50  ;;  %285 = vst.msk [vmem:[%s506_s3 + $0x30] sm:$0xf] %vm272_vm1, %v339_v51  ;;  %v332_v56 = vpack.c.bf16 %v165_v52, %v165_v52  ;;  %v340_v57 = vpack.c.bf16 %v197_v53, %v197_v53 }
  0xe8   :  { %280 = vst.msk [vmem:[%s506_s3 + $0x1c] sm:$0xf] %vm272_vm1, %v334_v54  ;;  %288 = vst.msk [vmem:[%s506_s3 + $0x3c] sm:$0xf] %vm272_vm1, %v342_v55 }
  0xe9   :  { %278 = vst.msk [vmem:[%s506_s3 + $0x14] sm:$0xf] %vm272_vm1, %v332_v56  ;;  %286 = vst.msk [vmem:[%s506_s3 + $0x34] sm:$0xf] %vm272_vm1, %v340_v57 }

// kernel: _lambda_.19
= control target key start
LH: loop header
LB: loop body
LE: loop exit
PB: predicated region body
PF: predicated region fallthrough
CT: control target
= control target key end

     0   :  { %vm20_vm0 = vcmask 1043456   ;;  %v139_v0 = vmov 0.0   ;;  %vm140_vm1 = vmmov 0   ;;  %vm16_vm2 = vcmask 64512   ;;  %s174_s1 = inlined_call_operand.vmem [shape: bf16[2,8,8], index: 1, kind: input, shape index: {}, may-alias: {0,1}]   ;;  %s175_s0 = inlined_call_operand.vmem [shape: bf16[2,8,8], index: 0, kind: input, shape index: {}, may-alias: {0,1}]   ;;  %s176_s2 = inlined_call_operand.vmem [shape: bf16[2,8,8], index: 2, kind: output, shape index: {}]  }
   0x1   :  { %125 = vmatprep.subr.bf16.mxu0 %v139_v0  ;;  %131 = vmatprep.subr.bf16.mxu1 %v139_v0  ;;  %v14_v1 = vld [vmem:[%s174_s1] sm:$0xf]  ;;  %v15_v2 = vld [vmem:[%s174_s1 + $0x4] sm:$0xf]  ;;  %vm112_vm3 = vcmask 60416  }
   0x2   :  { %v22_v3 = vsel %vm20_vm0, %v14_v1, 0  ;;  %v68_v4 = vsel %vm20_vm0, %v15_v2, 0  ;;  %127 = vmatprep.mubr.msk.bf16.mxu0 %vm140_vm1, %v139_v0  ;;  %133 = vmatprep.mubr.msk.bf16.mxu1 %vm140_vm1, %v139_v0  ;;  %v12_v5 = vld [vmem:[%s175_s0] sm:$0xf]  ;;  %v13_v6 = vld [vmem:[%s175_s0 + $0x4] sm:$0xf] }
   0x3   :  { %126 = vmatpush3.bf16.msra.mxu0 %v22_v3  ;;  %132 = vmatpush3.bf16.msra.mxu1 %v68_v4 }
   0x6   :  { %128 = vmatmul.mubr.msk.bf16.vlgmr.msra.gmra.mrb[0].mxu0 %vm16_vm2, %v12_v5  ;;  %134 = vmatmul.mubr.msk.bf16.vlgmr.msra.gmra.mrb[0].mxu1 %vm16_vm2, %v13_v6 }
  0xd9   :  { %v58_v7 = vpop.f32.mrb[0].mxu0  ;;  %v104_v8 = vpop.f32.mrb[0].mxu1 }
  0xda   :  { %v110_v9 = vpack.c.bf16 %v58_v7, %v58_v7  ;;  %v111_v10 = vpack.c.bf16 %v104_v8, %v104_v8  ;;  %v129_v11 = vpop.f32.mrb[1].mxu0  ;;  %v135_v12 = vpop.f32.mrb[1].mxu1 }
  0xdb   :  { %v61_v13 = vpop.f32.mrb[2].mxu0  ;;  %v107_v14 = vpop.f32.mrb[2].mxu1 }
  0xdc   :  { %113 = vst.msk [vmem:[%s176_s2] sm:$0xf] %vm112_vm3, %v110_v9  ;;  %114 = vst.msk [vmem:[%s176_s2 + $0x4] sm:$0xf] %vm112_vm3, %v111_v10  ;;  %v130_v15 = vpop.f32.mrb[3].mxu0  ;;  %v136_v16 = vpop.f32.mrb[3].mxu1 }

// kernel: _lambda_.18
= control target key start
LH: loop header
LB: loop body
LE: loop exit
PB: predicated region body
PF: predicated region fallthrough
CT: control target
= control target key end

     0   :  { %v148_v0 = vmov 0.0   ;;  %vm149_vm0 = vmmov 0   ;;  %vm24_vm1 = vcmask 130048   ;;  %vm117_vm2 = vcmask 64512   ;;  %s183_s1 = inlined_call_operand.vmem [shape: bf16[2,16,8], index: 1, kind: input, shape index: {}]   ;;  %s184_s0 = inlined_call_operand.vmem [shape: bf16[2,8,16], index: 0, kind: input, shape index: {}]   ;;  %s185_s2 = inlined_call_operand.vmem [shape: f32[2,8,8], index: 2, kind: output, shape index: {}]  }
   0x1   :  { %132 = vmatprep.subr.bf16.mxu0 %v148_v0  ;;  %138 = vmatprep.subr.bf16.mxu1 %v148_v0  ;;  %v146_v1 = vld [vmem:[%s183_s1] sm:$0xff]   ;;  %v147_v2 = vld [vmem:[%s183_s1 + $0x8] sm:$0xff]  }
   0x2   :  { %134 = vmatprep.mubr.msk.bf16.mxu0 %vm149_vm0, %v148_v0  ;;  %140 = vmatprep.mubr.msk.bf16.mxu1 %vm149_vm0, %v148_v0  ;;  %v12_v3 = vld [vmem:[%s184_s0] sm:$0xf]  ;;  %v13_v4 = vld [vmem:[%s184_s0 + $0x4] sm:$0xf] }
   0x3   :  { %133 = vmatpush3.bf16.msra.mxu0 %v146_v1  ;;  %139 = vmatpush3.bf16.msra.mxu1 %v147_v2 }
   0x6   :  { %135 = vmatmul.mubr.msk.bf16.vlgmr.msra.gmra.mrb[0].mxu0 %vm24_vm1, %v12_v3  ;;  %141 = vmatmul.mubr.msk.bf16.vlgmr.msra.gmra.mrb[0].mxu1 %vm24_vm1, %v13_v4 }
  0xd9   :  { %v62_v5 = vpop.f32.mrb[0].mxu0  ;;  %v111_v6 = vpop.f32.mrb[0].mxu1 }
  0xda   :  { %118 = vst.msk [vmem:[%s185_s2] sm:$0xff] %vm117_vm2, %v62_v5  ;;  %v136_v7 = vpop.f32.mrb[1].mxu0  ;;  %119 = vst.msk [vmem:[%s185_s2 + $0x8] sm:$0xff] %vm117_vm2, %v111_v6  ;;  %v142_v8 = vpop.f32.mrb[1].mxu1 }
  0xdb   :  { %v65_v9 = vpop.f32.mrb[2].mxu0  ;;  %v114_v10 = vpop.f32.mrb[2].mxu1 }
  0xdc   :  { %v137_v11 = vpop.f32.mrb[3].mxu0  ;;  %v143_v12 = vpop.f32.mrb[3].mxu1 }

// kernel: _lambda_.17
= control target key start
LH: loop header
LB: loop body
LE: loop exit
PB: predicated region body
PF: predicated region fallthrough
CT: control target
= control target key end

     0   :  { %vm34_vm0 = vcmask 1040384   ;;  %v117_v0 = vmov 0.0   ;;  %v118_v2 = vmov 0   ;;  %vm119_vm1 = vmmov 0   ;;  %s155_s1 = inlined_call_operand.vmem [shape: bf16[1,16], index: 1, kind: input, shape index: {}]   ;;  %s156_s0 = inlined_call_operand.vmem [shape: bf16[16,1], index: 0, kind: input, shape index: {}]   ;;  %s157_s2 = inlined_call_operand.vmem [shape: f32[1,16], index: 2, kind: input, shape index: {}]   ;;  %s158_s3 = inlined_call_operand.vmem [shape: bf16[16,16], index: 3, kind: output, shape index: {}]  }
   0x1   :  { %107 = vmatprep.subr.bf16.mxu0 %v117_v0  ;;  %v17_v1 = vld [vmem:[%s155_s1] sm:$0x1]  ;;  %v36_v3 = vsel %vm34_vm0, 65535, %v118_v2  ;;  %109 = vmatprep.mubr.msk.bf16.mxu0 %vm119_vm1, %v117_v0  ;;  %vm30_vm2 = vcmask 7168   ;;  %vm91_vm3 = vcmask 125952  }
   0x2   :  { %v38_v4 = vand.u32 %v36_v3, %v17_v1  ;;  %v116_v5 = vld [vmem:[%s156_s0] sm:$0xff]  }
   0x3   :  { %v98_v6 = vld [vmem:[%s157_s2] ss:$0 sm:$0xff] }
   0x4   :  { %108 = vmatpush3.bf16.msra.mxu0 %v38_v4 }
   0x7   :  { %110 = vmatmul.mubr.msk.bf16.vlgmr.msra.gmra.mrb[0].mxu0 %vm30_vm2, %v116_v5 }
  0xda   :  { %v74_v7 = vpop.f32.mrb[0].mxu0 }
  0xdb   :  { %v75_v8 = vadd.f32 %v98_v6, %v74_v7  ;;  %v111_v9 = vpop.f32.mrb[1].mxu0 }
  0xdc   :  { %v77_v10 = vpop.f32.mrb[2].mxu0 }
  0xdd   :  { %v81_v11 = vmax.f32 %v75_v8, 0.0  ;;  %v78_v12 = vadd.f32 %v98_v6, %v77_v10  ;;  %v112_v13 = vpop.f32.mrb[3].mxu0 }
  0xdf   :  { %v103_v14 = vpack.c.bf16 %v81_v11, %v81_v11  ;;  %v82_v15 = vmax.f32 %v78_v12, 0.0 }
  0xe1   :  { %92 = vst.msk [vmem:[%s158_s3] sm:$0xf] %vm91_vm3, %v103_v14  ;;  %v104_v16 = vpack.c.bf16 %v82_v15, %v82_v15 }
  0xe3   :  { %93 = vst.msk [vmem:[%s158_s3 + $0x4] sm:$0xf] %vm91_vm3, %v104_v16 }

// kernel: _lambda_.22
= control target key start
LH: loop header
LB: loop body
LE: loop exit
PB: predicated region body
PF: predicated region fallthrough
CT: control target
= control target key end

     0   :  { %s568_s12 = smov 0   ;;  %s570_s13 = smov 0   ;;  %s635_s0 = inlined_call_operand.vmem [shape: bf16[2,3,24,128], index: 0, kind: input, shape index: {}]   ;;  %s636_s1 = inlined_call_operand.vmem [shape: bf16[2,3,24,24], index: 1, kind: input, shape index: {}]   ;;  %s637_s2 = inlined_call_operand.vmem [shape: f32[3,128], index: 2, kind: input, shape index: {}]   ;;  %s638_s3 = inlined_call_operand.vmem [shape: bf16[2,8,128], index: 3, kind: output, shape index: {}]  }
   0x1   :  { %s572_s14 = smov 0   ;;  %s574_s15 = smov 0  }
   0x2   :  { %s576_s16 = smov 0  }
   0x3 LB: > { %s22_s17 = sadd.s32 1, %s537_s14  ;;  %s25_s18 = sadd.s32 1, %s541_s15  ;;  %s545_s16 = sphi %s576_s16, %s13_s16   ;;  %s541_s15 = sphi %s574_s15, %s642_s15   ;;  %s537_s14 = sphi %s572_s14, %s641_s14   ;;  %s533_s13 = sphi %s570_s13, %s640_s13   ;;  %s529_s12 = sphi %s568_s12, %s639_s12  }
   0x4   : > { %p23_p0 = scmp.ge.s32.totalorder %s22_s17, 3  ;;  %p432_p1 = scmp.ge.s32.totalorder %s545_s16, 1 }
   0x5   : > { %p171_p2 = scmp.lt.s32.totalorder %s545_s16, 7 }
   0x6   : > { %s644_s17 = smov (%p23_p0, %s22_s17), 0  ;;  %s646_s18 = smov (!%p23_p0, %s25_s18), %s541_s15 }
   0x7   : > { %p172_p3 = pnand %p432_p1, %p171_p2  ;;  %p27_p4 = scmp.ge.s32.totalorder %s646_s18, 2 }
   0x8   : > { %p207_p5 = scmp.lt.s32.totalorder (!%p172_p3), %s533_s13, 1  ;;  %p209_p6 = scmp.lt.s32.totalorder (!%p172_p3), %s529_s12, 2 }
   0x9   : > { %s648_s18 = smov (%p27_p4, %s646_s18), 0  ;;  %175 = sbr.rel (%p172_p3) target bundleno = 268 (0x10c), region = 32 }
   0xa   : > { %p436_p7 = scmp.ne.s32.totalorder (!%p172_p3), %s529_s12, 0 }
  0x10   : > { %s650_s13 = smov (!%p207_p5, %s533_s13), 1  ;;  %v547_v0 = vmov (!%p436_p7), 0.0  }
  0x11   : > { %s210_s19 = scalar_select %p209_p6, %s529_s12, 2 }
  0x12   : > { %s461_s20 = smul.u32 9, %s650_s13  ;;  %s435_s21 = sshll.u32 %s650_s13, 2  ;;  %234 = vst [vmem:[#allocation2] sm:$0xff] (!%p436_p7), %v547_v0 }
  0x13   : > { %s460_s22 = smul.u32 3, %s210_s19  ;;  %s605_s25 = scalar_lea.vmem %s638_s3, %s435_s21 }
  0x14   : > { %233 = sbr.rel (%p436_p7) target bundleno = 27 (0x1b), region = 36 }
  0x15   : > { %s213_s26 = sadd.s32 %s461_s20, %s460_s22 }
  0x16   : > { %s433_s27 = sshll.u32 %s213_s26, 2 }
  0x17   : > { %s215_s30 = scalar_lea.vmem %s635_s0, %s433_s27  ;;  %s224_s6 = scalar_lea.vmem %s636_s1, %s433_s27 }
  0x1b PF: > { %v503_v1 = vld [vmem:[%s215_s30] sm:$0xff]   ;;  %vm265_vm0 = vcmask 1043456   ;;  %v504_v2 = vld [vmem:[%s215_s30 + $0x8] ss:$0 sps:$4 sm:$0xff]   ;;  %vm258_vm1 = vcmask 195584   ;;  %s315_s9 = scalar_lea.vmem %s637_s2, %s529_s12  ;;  %p444_p8 = scmp.ne.s32.totalorder %s529_s12, 2 }
  0x1c   : > { %451 = vmatprep.subr.bf16.mxu0 %v503_v1  ;;  %v505_v3 = vld [vmem:[%s224_s6] sm:$0xff]   ;;  %v267_v4 = vsel %vm265_vm0, %v504_v2, 0  ;;  %v506_v5 = vld [vmem:[%s224_s6 + $0x8] ss:$0 sps:$4 sm:$0xff]  }
  0x1d   : > { %452 = vmatpush3.bf16.msra.mxu0 %v503_v1  ;;  %455 = vmatprep.mubr.msk.bf16.mxu0 %vm258_vm1, %v505_v3  ;;  %v443_v8 = vld [vmem:[%s315_s9] ss:$0 sm:$0xff] }
  0x1e   : > { %459 = vmatprep.subr.msk.bf16.mxu0 %vm265_vm0, %v504_v2  ;;  %v317_v12 = vld [vmem:[#allocation2] sm:$0xff] }
  0x21   : > { %454 = vmatpush3.bf16.msra.mxu0 %v267_v4 }
  0x24   : > { %456 = vmatmul.mubr.msk.bf16.vlgmr.msra.gmra.mrb[0].mxu0 %vm258_vm1, %v506_v5 }
  0xf7   : > { %v457_v6 = vpop.f32.mrb[0].mxu0 }
  0xf8   : > { %v303_v7 = vpop.f32.mrb[1].mxu0 }
  0xf9   : > { %v458_v9 = vpop.f32.mrb[2].mxu0 }
  0xfa   : > { %v305_v10 = vpop.f32.mrb[3].mxu0 }
  0xfb   : > { %v322_v11 = vadd.f32 %v443_v8, %v305_v10  ;;  %329 = sbr.rel (%p444_p8) target bundleno = 268 (0x10c), region = 40 }
  0xfd   : > { %v323_v13 = vmax.f32 %v322_v11, 0.0 }
  0xff   : > { %v324_v14 = vadd.f32 %v323_v13, %v317_v12 }
 0x101   : > { %325 = vst [vmem:[#allocation2] sm:$0xff] %v324_v14 }
 0x108   : > { %v330_v15 = vld [vmem:[#allocation2] sm:$0xff] }
 0x109   : > { %v331_v16 = vpack.c.bf16 %v330_v15, %v330_v15 }
 0x10b   : > { %332 = vst [vmem:[%s605_s25] sm:$0xf] %v331_v16 }
 0x10c PF: > { %s13_s16 = sadd.s32 1, %s545_s16   ;;  %s639_s12 = smov %s537_s14 }
 0x10d   : > { %p10_p9 = scmp.ge.s32.totalorder %s13_s16, 8   ;;  %s640_s13 = smov %s541_s15 }
 0x10e   : > { %s641_s14 = smov %s644_s17  ;;  %s642_s15 = smov %s648_s18 }
 0x10f   :  { %12 = sbr.rel (!%p10_p9) target bundleno = 3 (0x3), region = 74 }

// kernel: _lambda_.24
= control target key start
LH: loop header
LB: loop body
LE: loop exit
PB: predicated region body
PF: predicated region fallthrough
CT: control target
= control target key end

     0   :  { %vm50_vm0 = vcmask 1041408   ;;  %vm51_vm1 = vcmask 1042432   ;;  %vm43_vm2 = vcmask 39936   ;;  %v222_v1 = vmov 65535   ;;  %s289_s1 = inlined_call_operand.vmem [shape: bf16[5,16], index: 1, kind: input, shape index: {}]   ;;  %s290_s0 = inlined_call_operand.vmem [shape: bf16[32,5], index: 0, kind: input, shape index: {}]   ;;  %s291_s3 = inlined_call_operand.vmem [shape: bf16[16,16], index: 3, kind: input, shape index: {}]   ;;  %s292_s2 = inlined_call_operand.vmem [shape: f32[1,16], index: 2, kind: input, shape index: {}]   ;;  %s293_s4 = inlined_call_operand.vmem [shape: f32[1,16], index: 4, kind: input, shape index: {}]   ;;  %s294_s5 = inlined_call_operand.vmem [shape: f32[32,16], index: 5, kind: output, shape index: {}]  }
   0x1   :  { %v25_v0 = vld [vmem:[%s289_s1] sm:$0x7]  ;;  %v52_v2 = vsel %vm50_vm0, 4294967295, %v222_v1  ;;  %v220_v6 = vld [vmem:[%s290_s0 + $0x8] sm:$0xff]   ;;  %vm127_vm3 = vcmask 130048  }
   0x2   :  { %v219_v3 = vld [vmem:[%s290_s0] sm:$0xff]   ;;  %v53_v4 = vsel %vm51_vm1, %v52_v2, 0 }
   0x3   :  { %v55_v5 = vand.u32 %v53_v4, %v25_v0  ;;  %208 = vmatprep.mubr.msk.bf16.mxu0 %vm43_vm2, %v219_v3  ;;  %v221_v7 = vld [vmem:[%s291_s3] sm:$0xff]  }
   0x4   :  { %212 = vmatprep.subr.bf16.mxu1 %v221_v7  ;;  %v191_v8 = vld [vmem:[%s292_s2] ss:$0 sm:$0xff] }
   0x5   :  { %206 = vmatprep.subr.bf16.mxu0 %v55_v5  ;;  %213 = vmatpush3.bf16.msra.mxu1 %v221_v7  ;;  %v196_v23 = vld [vmem:[%s293_s4] ss:$0 sm:$0xff] }
   0x6   :  { %207 = vmatpush3.bf16.msra.mxu0 %v55_v5 }
   0x9   :  { %209 = vmatmul.mubr.msk.bf16.vlgmr.msra.gmra.mrb[0].mxu0 %vm43_vm2, %v220_v6 }
  0xdc   :  { %v210_v9 = vpop.f32.mrb[0].mxu0 }
  0xdd   :  { %v100_v10 = vadd.f32 %v210_v9, %v191_v8  ;;  %v91_v11 = vpop.f32.mrb[1].mxu0 }
  0xde   :  { %v92_v12 = vadd.f32 %v191_v8, %v91_v11  ;;  %v211_v13 = vpop.f32.mrb[2].mxu0 }
  0xdf   :  { %v103_v14 = vadd.f32 %v211_v13, %v191_v8  ;;  %v94_v15 = vpop.f32.mrb[3].mxu0  ;;  %v108_v17 = vmax.f32 %v100_v10, 0.0 }
  0xe0   :  { %v95_v16 = vadd.f32 %v191_v8, %v94_v15  ;;  %v106_v19 = vmax.f32 %v92_v12, 0.0 }
  0xe1   :  { %v109_v18 = vmax.f32 %v103_v14, 0.0 }
  0xe2   :  { %v107_v20 = vmax.f32 %v95_v16, 0.0 }
  0xe3   :  { %v111_v21 = vpack.c.bf16 %v109_v18, %v108_v17 }
  0xe4   :  { %v110_v22 = vpack.c.bf16 %v107_v20, %v106_v19 }
  0xe6   :  { %214 = vmatprep.mubr.msk.bf16.mxu1 %vm127_vm3, %v110_v22 }
  0xe7   :  { %215 = vmatmul.mubr.msk.bf16.vlgmr.msra.gmra.mrb[0].mxu1 %vm127_vm3, %v111_v21 }
 0x1ba   :  { %v216_v24 = vpop.f32.mrb[0].mxu1 }
 0x1bb   :  { %v177_v25 = vadd.f32 %v216_v24, %v196_v23  ;;  %v168_v26 = vpop.f32.mrb[1].mxu1 }
 0x1bc   :  { %v169_v27 = vadd.f32 %v196_v23, %v168_v26  ;;  %v217_v28 = vpop.f32.mrb[2].mxu1 }
 0x1bd   :  { %185 = vst.msk [vmem:[%s294_s5 + $0x10] sm:$0xff] %vm127_vm3, %v177_v25  ;;  %v180_v29 = vadd.f32 %v217_v28, %v196_v23  ;;  %v171_v30 = vpop.f32.mrb[3].mxu1 }
 0x1be   :  { %183 = vst.msk [vmem:[%s294_s5] sm:$0xff] %vm127_vm3, %v169_v27  ;;  %v172_v31 = vadd.f32 %v196_v23, %v171_v30 }
 0x1bf   :  { %186 = vst.msk [vmem:[%s294_s5 + $0x18] sm:$0xff] %vm127_vm3, %v180_v29 }
 0x1c0   :  { %184 = vst.msk [vmem:[%s294_s5 + $0x8] sm:$0xff] %vm127_vm3, %v172_v31 }

// kernel: _lambda_.23
= control target key start
LH: loop header
LB: loop body
LE: loop exit
PB: predicated region body
PF: predicated region fallthrough
CT: control target
= control target key end

     0   :  { %vm34_vm0 = vcmask 1043456   ;;  %v168_v0 = vmov 0.0   ;;  %vm169_vm1 = vmmov 0   ;;  %vm30_vm2 = vcmask 64512   ;;  %s218_s1 = inlined_call_operand.vmem [shape: bf16[8,16], index: 1, kind: input, shape index: {}]   ;;  %s219_s0 = inlined_call_operand.vmem [shape: bf16[8,8], index: 0, kind: input, shape index: {}]   ;;  %s220_s3 = inlined_call_operand.vmem [shape: bf16[16,16], index: 3, kind: input, shape index: {}]   ;;  %s221_s2 = inlined_call_operand.vmem [shape: f32[1,16], index: 2, kind: input, shape index: {}]   ;;  %s222_s4 = inlined_call_operand.vmem [shape: f32[1,16], index: 4, kind: input, shape index: {}]   ;;  %s223_s5 = inlined_call_operand.vmem [shape: f32[8,16], index: 5, kind: output, shape index: {}]  }
   0x1   :  { %153 = vmatprep.subr.bf16.mxu0 %v168_v0  ;;  %v22_v1 = vld [vmem:[%s218_s1] sm:$0xf]  ;;  %155 = vmatprep.mubr.msk.bf16.mxu0 %vm169_vm1, %v168_v0  ;;  %vm95_vm3 = vcmask 130048  }
   0x2   :  { %v36_v2 = vsel %vm34_vm0, %v22_v1, 0  ;;  %159 = vmatprep.subr.bf16.mxu1 %v168_v0  ;;  %161 = vmatprep.mubr.msk.bf16.mxu1 %vm169_vm1, %v168_v0  ;;  %v21_v3 = vld [vmem:[%s219_s0] sm:$0xf] }
   0x3   :  { %154 = vmatpush3.bf16.msra.mxu0 %v36_v2  ;;  %v167_v4 = vld [vmem:[%s220_s3] sm:$0xff]  }
   0x4   :  { %160 = vmatpush3.bf16.msra.mxu1 %v167_v4  ;;  %v144_v5 = vld [vmem:[%s221_s2] ss:$0 sm:$0xff] }
   0x5   :  { %v146_v13 = vld [vmem:[%s222_s4] ss:$0 sm:$0xff] }
   0x6   :  { %156 = vmatmul.mubr.msk.bf16.vlgmr.msra.gmra.mrb[0].mxu0 %vm30_vm2, %v21_v3 }
  0xd9   :  { %v72_v6 = vpop.f32.mrb[0].mxu0 }
  0xda   :  { %v73_v7 = vadd.f32 %v144_v5, %v72_v6  ;;  %v157_v8 = vpop.f32.mrb[1].mxu0 }
  0xdb   :  { %v75_v9 = vpop.f32.mrb[2].mxu0 }
  0xdc   :  { %v78_v10 = vmax.f32 %v73_v7, 0.0  ;;  %v158_v11 = vpop.f32.mrb[3].mxu0 }
  0xde   :  { %v79_v12 = vpack.c.bf16 %v78_v10, %v78_v10 }
  0xe0   :  { %162 = vmatmul.mubr.msk.bf16.vlgmr.msra.gmra.mrb[0].mxu1 %vm95_vm3, %v79_v12 }
 0x1b3   :  { %v133_v14 = vpop.f32.mrb[0].mxu1 }
 0x1b4   :  { %v134_v15 = vadd.f32 %v146_v13, %v133_v14  ;;  %v163_v16 = vpop.f32.mrb[1].mxu1 }
 0x1b5   :  { %v136_v17 = vpop.f32.mrb[2].mxu1 }
 0x1b6   :  { %139 = vst.msk [vmem:[%s223_s5] sm:$0xff] %vm95_vm3, %v134_v15  ;;  %v164_v18 = vpop.f32.mrb[3].mxu1 }

// kernel: _lambda_.27
= control target key start
LH: loop header
LB: loop body
LE: loop exit
PB: predicated region body
PF: predicated region fallthrough
CT: control target
= control target key end

     0   :  { %vm124_vm0 = vcmask 130048   ;;  %vm1188_vm1 = vcmask 125952   ;;  %s2036_s4 = inlined_call_operand.vmem [shape: bf16[16,16], index: 4, kind: input, shape index: {}]   ;;  %s2037_s2 = inlined_call_operand.vmem [shape: bf16[128,16], index: 2, kind: input, shape index: {}]   ;;  %s2038_s3 = inlined_call_operand.vmem [shape: bf16[16,16], index: 3, kind: input, shape index: {}]   ;;  %s2039_s1 = inlined_call_operand.vmem [shape: bf16[128,16], index: 1, kind: input, shape index: {}]   ;;  %s2040_s6 = inlined_call_operand.vmem [shape: bf16[16,16], index: 6, kind: input, shape index: {}]   ;;  %s2041_s8 = inlined_call_operand.vmem [shape: bf16[16,16], index: 8, kind: input, shape index: {}]   ;;  %s2042_s5 = inlined_call_operand.vmem [shape: f32[1,16], index: 5, kind: input, shape index: {}]   ;;  %s2043_s10 = inlined_call_operand.vmem [shape: bf16[16,16], index: 10, kind: input, shape index: {}]   ;;  %s2044_s7 = inlined_call_operand.vmem [shape: f32[1,16], index: 7, kind: input, shape index: {}]   ;;  %s2045_s9 = inlined_call_operand.vmem [shape: f32[1,16], index: 9, kind: input, shape index: {}]   ;;  %s2046_s0 = inlined_call_operand.vmem [shape: bf16[128,16], index: 0, kind: input, shape index: {}]   ;;  %s2047_s11 = inlined_call_operand.vmem [shape: f32[1,16], index: 11, kind: input, shape index: {}]   ;;  %s2048_s12 = inlined_call_operand.vmem [shape: bf16[128,16], index: 12, kind: output, shape index: {}]  }
   0x1   :  { %v1514_v0 = vld [vmem:[%s2036_s4] sm:$0xff]   ;;  %v1691_v2 = vld [vmem:[%s2037_s2 + $0x8] sm:$0xff]   ;;  %v1699_v4 = vld [vmem:[%s2037_s2 + $0x10] sm:$0xff]  }
   0x2   :  { %v1686_v1 = vld [vmem:[%s2037_s2] sm:$0xff]   ;;  %1406 = vmatprep.subr.bf16.mxu0 %v1514_v0  ;;  %1496 = vmatprep.subr.bf16.mxu1 %v1514_v0  ;;  %v1711_v6 = vld [vmem:[%s2037_s2 + $0x28] sm:$0xff]   ;;  %v1720_v7 = vld [vmem:[%s2037_s2 + $0x18] sm:$0xff]   ;;  %v582_v60 = vunpack.c.l.bf16 %v1691_v2 }
   0x3   :  { %v1517_v3 = vld [vmem:[%s2038_s3] sm:$0xff]   ;;  %1407 = vmatpush3.bf16.msra.mxu0 %v1514_v0  ;;  %1497 = vmatpush3.bf16.msra.mxu1 %v1514_v0  ;;  %v1725_v8 = vld [vmem:[%s2037_s2 + $0x30] sm:$0xff]   ;;  %v1739_v10 = vld [vmem:[%s2037_s2 + $0x38] sm:$0xff]   ;;  %v580_v55 = vunpack.c.l.bf16 %v1686_v1  ;;  %v581_v59 = vunpack.c.h.bf16 %v1686_v1 }
   0x4   :  { %1408 = vmatprep.mubr.msk.bf16.mxu0 %vm124_vm0, %v1686_v1  ;;  %1424 = vmatprep.subr.bf16.mxu0 %v1517_v3  ;;  %v1706_v5 = vld [vmem:[%s2037_s2 + $0x20] sm:$0xff]   ;;  %v1750_v11 = vld [vmem:[%s2039_s1 + $0x8] sm:$0xff]   ;;  %v1755_v12 = vld [vmem:[%s2039_s1 + $0x10] sm:$0xff]  }
   0x5   :  { %v1730_v9 = vld [vmem:[%s2039_s1] sm:$0xff]   ;;  %1416 = vmatprep.mubr.msk.bf16.mxu1 %vm124_vm0, %v1706_v5  ;;  %v1766_v13 = vld [vmem:[%s2039_s1 + $0x18] sm:$0xff]   ;;  %v1780_v15 = vld [vmem:[%s2039_s1 + $0x28] sm:$0xff]  }
   0x6   :  { %1409 = vmatmul.mubr.msk.bf16.vlgmr.msra.gmra.mrb[0].mxu0 %vm124_vm0, %v1691_v2  ;;  %1417 = vmatmul.mubr.msk.bf16.vlgmr.msra.gmra.mrb[0].mxu1 %vm124_vm0, %v1711_v6  ;;  %v1771_v14 = vld [vmem:[%s2039_s1 + $0x20] sm:$0xff]   ;;  %v1785_v16 = vld [vmem:[%s2039_s1 + $0x30] sm:$0xff]   ;;  %v1794_v17 = vld [vmem:[%s2039_s1 + $0x38] sm:$0xff]  }
   0x7   :  { %1425 = vmatpush3.bf16.msra.mxu0 %v1517_v3  ;;  %1412 = vmatprep.mubr.msk.bf16.mxu0 %vm124_vm0, %v1699_v4  ;;  %v1532_v18 = vld [vmem:[%s2040_s6] sm:$0xff]   ;;  %v583_v3 = vunpack.c.h.bf16 %v1691_v2 }
   0x8   :  { %1420 = vmatprep.mubr.msk.bf16.mxu1 %vm124_vm0, %v1725_v8  ;;  %1442 = vmatprep.subr.bf16.mxu1 %v1532_v18  ;;  %v1804_v19 = vld [vmem:[%s2041_s8] sm:$0xff]  }
   0x9   :  { %1443 = vmatpush3.bf16.msra.mxu1 %v1532_v18  ;;  %v1816_v26 = vld [vmem:[%s2042_s5] ss:$0 sm:$0xff] }
   0xa   :  { %1460 = vmatprep.subr.bf16.mxu1 %v1804_v19 }
   0xe   :  { %1413 = vmatmul.mubr.msk.bf16.gmra.mrb[4].mxu0 %vm124_vm0, %v1720_v7  ;;  %1421 = vmatmul.mubr.msk.bf16.gmra.mrb[4].mxu1 %vm124_vm0, %v1739_v10 }
   0xf   :  { %1426 = vmatprep.mubr.msk.bf16.mxu0 %vm124_vm0, %v1730_v9 }
  0x16   :  { %1427 = vmatmul.mubr.msk.bf16.vlgmr.msra.gmra.mrb[0].mxu0 %vm124_vm0, %v1750_v11 }
  0x17   :  { %1430 = vmatprep.mubr.msk.bf16.mxu0 %vm124_vm0, %v1755_v12 }
  0x1e   :  { %1431 = vmatmul.mubr.msk.bf16.gmra.mrb[4].mxu0 %vm124_vm0, %v1766_v13 }
  0x1f   :  { %1434 = vmatprep.mubr.msk.bf16.mxu0 %vm124_vm0, %v1771_v14 }
  0x26   :  { %1435 = vmatmul.mubr.msk.bf16.gmra.mrb[8].mxu0 %vm124_vm0, %v1780_v15 }
  0x27   :  { %1438 = vmatprep.mubr.msk.bf16.mxu0 %vm124_vm0, %v1785_v16 }
  0x2e   :  { %1439 = vmatmul.mubr.msk.bf16.gmra.mrb[12].mxu0 %vm124_vm0, %v1794_v17 }
  0xd9   :  { %v1418_v20 = vpop.f32.mrb[0].mxu1 }
  0xda   :  { %v215_v21 = vpop.f32.mrb[1].mxu1 }
  0xdb   :  { %v1419_v22 = vpop.f32.mrb[2].mxu1 }
  0xdc   :  { %v1807_v23 = vpop.f32.mrb[3].mxu1 }
  0xe1   :  { %v1809_v24 = vpop.f32.mrb[4].mxu1 }
  0xe2   :  { %v1811_v25 = vpop.f32.mrb[5].mxu1 }
  0xe3   :  { %v1818_v27 = vpop.f32.mrb[6].mxu1 }
  0xe4   :  { %v1820_v28 = vpop.f32.mrb[7].mxu1 }
  0xe9   :  { %v1428_v29 = vpop.f32.mrb[0].mxu0 }
  0xea   :  { %v422_v30 = vadd.f32 %v1428_v29, %v1816_v26  ;;  %v350_v31 = vpop.f32.mrb[1].mxu0 }
  0xeb   :  { %v420_v32 = vadd.f32 %v1816_v26, %v350_v31  ;;  %v1429_v33 = vpop.f32.mrb[2].mxu0 }
  0xec   :  { %v1246_v34 = vmul.f32 -1.442695, %v422_v30  ;;  %v423_v35 = vadd.f32 %v1429_v33, %v1816_v26  ;;  %v353_v36 = vpop.f32.mrb[3].mxu0 }
  0xed   :  { %v1244_v37 = vmul.f32 -1.442695, %v420_v32  ;;  %v421_v38 = vadd.f32 %v1816_v26, %v353_v36 }
  0xee   :  { %1551 = vpow2.f32 %v1246_v34  ;;  %v1247_v39 = vmul.f32 -1.442695, %v423_v35  ;;  %v584_v35 = vunpack.c.l.bf16 %v1699_v4 }
  0xef   :  { %1553 = vpow2.f32 %v1244_v37  ;;  %v1245_v40 = vmul.f32 -1.442695, %v421_v38  ;;  %v585_v37 = vunpack.c.h.bf16 %v1699_v4  ;;  %v543_v4 = vunpack.c.h.bf16 %v1780_v15 }
  0xf0   :  { %1555 = vpow2.f32 %v1247_v39  ;;  %v586_v39 = vunpack.c.l.bf16 %v1720_v7 }
  0xf1   :  { %1557 = vpow2.f32 %v1245_v40  ;;  %v1432_v41 = vpop.f32.mrb[4].mxu0  ;;  %v587_v40 = vunpack.c.h.bf16 %v1720_v7  ;;  %v590_v7 = vunpack.c.l.bf16 %v1711_v6 }
  0xf2   :  { %v426_v42 = vadd.f32 %v1432_v41, %v1816_v26  ;;  %v366_v43 = vpop.f32.mrb[5].mxu0 }
  0xf3   :  { %v424_v44 = vadd.f32 %v1816_v26, %v366_v43  ;;  %v1433_v45 = vpop.f32.mrb[6].mxu0  ;;  %v532_v43 = vunpack.c.l.bf16 %v1730_v9 }
  0xf4   :  { %v1250_v46 = vmul.f32 -1.442695, %v426_v42  ;;  %v427_v47 = vadd.f32 %v1433_v45, %v1816_v26  ;;  %v369_v48 = vpop.f32.mrb[7].mxu0 }
  0xf5   :  { %v1248_v49 = vmul.f32 -1.442695, %v424_v44  ;;  %v425_v50 = vadd.f32 %v1816_v26, %v369_v48  ;;  %v533_v44 = vunpack.c.h.bf16 %v1730_v9 }
  0xf6   :  { %1559 = vpow2.f32 %v1250_v46  ;;  %v1251_v51 = vmul.f32 -1.442695, %v427_v47  ;;  %v536_v46 = vunpack.c.l.bf16 %v1755_v12  ;;  %v534_v47 = vunpack.c.l.bf16 %v1750_v11 }
  0xf7   :  { %1561 = vpow2.f32 %v1248_v49  ;;  %v1249_v52 = vmul.f32 -1.442695, %v425_v50 }
  0xf8   :  { %v1552_v53 = vpop.eup %1551  ;;  %1563 = vpow2.f32 %v1251_v51  ;;  %v535_v51 = vunpack.c.h.bf16 %v1750_v11 }
  0xf9   :  { %v1554_v54 = vpop.eup %1553  ;;  %v486_v56 = vadd.f32 1.0, %v1552_v53  ;;  %1565 = vpow2.f32 %v1249_v52  ;;  %v1436_v57 = vpop.f32.mrb[8].mxu0 }
  0xfa   :  { %v1556_v58 = vpop.eup %1555  ;;  %v484_v61 = vadd.f32 1.0, %v1554_v54  ;;  %v391_v62 = vadd.f32 %v1436_v57, %v1418_v20  ;;  %v382_v63 = vpop.f32.mrb[9].mxu0 }
  0xfb   :  { %v1558_v0 = vpop.eup %1557  ;;  %1567 = vrcp.f32 %v486_v56  ;;  %v487_v18 = vadd.f32 1.0, %v1556_v58  ;;  %v383_v29 = vadd.f32 %v382_v63, %v215_v21  ;;  %v1437_v30 = vpop.f32.mrb[10].mxu0 }
  0xfc   :  { %1569 = vrcp.f32 %v484_v61  ;;  %v485_v31 = vadd.f32 1.0, %v1558_v0  ;;  %v430_v32 = vadd.f32 %v1816_v26, %v391_v62  ;;  %v394_v33 = vadd.f32 %v1437_v30, %v1419_v22  ;;  %v385_v34 = vpop.f32.mrb[11].mxu0 }
  0xfd   :  { %1571 = vrcp.f32 %v487_v18  ;;  %v428_v36 = vadd.f32 %v1816_v26, %v383_v29  ;;  %v386_v20 = vadd.f32 %v385_v34, %v1807_v23  ;;  %v538_v29 = vunpack.c.l.bf16 %v1766_v13 }
  0xfe   :  { %1573 = vrcp.f32 %v485_v31  ;;  %v1254_v38 = vmul.f32 -1.442695, %v430_v32  ;;  %v431_v21 = vadd.f32 %v1816_v26, %v394_v33 }
  0xff   :  { %v1252_v41 = vmul.f32 -1.442695, %v428_v36  ;;  %v429_v22 = vadd.f32 %v1816_v26, %v386_v20 }
 0x100   :  { %v1560_v42 = vpop.eup %1559  ;;  %1575 = vpow2.f32 %v1254_v38  ;;  %v1255_v23 = vmul.f32 -1.442695, %v431_v21 }
 0x101   :  { %v1562_v45 = vpop.eup %1561  ;;  %v490_v48 = vadd.f32 1.0, %v1560_v42  ;;  %1577 = vpow2.f32 %v1252_v41  ;;  %v1440_v49 = vpop.f32.mrb[12].mxu0  ;;  %v1253_v57 = vmul.f32 -1.442695, %v429_v22 }
 0x102   :  { %v1564_v50 = vpop.eup %1563  ;;  %v488_v52 = vadd.f32 1.0, %v1562_v45  ;;  %1579 = vpow2.f32 %v1255_v23  ;;  %v407_v53 = vadd.f32 %v1440_v49, %v1809_v24  ;;  %v398_v54 = vpop.f32.mrb[13].mxu0 }
 0x103   :  { %v1566_v56 = vpop.eup %1565  ;;  %1581 = vrcp.f32 %v490_v48  ;;  %v491_v9 = vadd.f32 1.0, %v1564_v50  ;;  %v399_v58 = vadd.f32 %v398_v54, %v1811_v25  ;;  %v1441_v61 = vpop.f32.mrb[14].mxu0 }
 0x104   :  { %1583 = vrcp.f32 %v488_v52  ;;  %v489_v62 = vadd.f32 1.0, %v1566_v56  ;;  %v434_v63 = vadd.f32 %v1816_v26, %v407_v53  ;;  %v410_v0 = vadd.f32 %v1441_v61, %v1818_v27  ;;  %v401_v18 = vpop.f32.mrb[15].mxu0 }
 0x105   :  { %v1568_v11 = vpop.eup %1567  ;;  %1585 = vrcp.f32 %v491_v9  ;;  %v432_v24 = vadd.f32 %v1816_v26, %v399_v58  ;;  %v402_v30 = vadd.f32 %v401_v18, %v1820_v28 }
 0x106   :  { %v1570_v31 = vpop.eup %1569  ;;  %v550_v32 = vmul.f32 %v1568_v11, %v534_v47  ;;  %v566_v33 = vsub.f32 1.0, %v1568_v11  ;;  %1587 = vrcp.f32 %v489_v62  ;;  %v1258_v25 = vmul.f32 -1.442695, %v434_v63 }
 0x107   :  { %v1572_v34 = vpop.eup %1571  ;;  %1589 = vpow2.f32 %v1253_v57  ;;  %v1256_v36 = vmul.f32 -1.442695, %v432_v24  ;;  %v435_v20 = vadd.f32 %v1816_v26, %v410_v0  ;;  %v433_v27 = vadd.f32 %v1816_v26, %v402_v30 }
 0x108   :  { %v1574_v38 = vpop.eup %1573  ;;  %v598_v21 = vmul.f32 %v582_v60, %v566_v33  ;;  %v551_v41 = vmul.f32 %v1572_v34, %v535_v51  ;;  %v567_v22 = vsub.f32 1.0, %v1572_v34  ;;  %1591 = vpow2.f32 %v1258_v25 }
 0x109   :  { %1593 = vpow2.f32 %v1256_v36  ;;  %v1259_v28 = vmul.f32 -1.442695, %v435_v20  ;;  %v1257_v42 = vmul.f32 -1.442695, %v433_v27  ;;  %v548_v23 = vmul.f32 %v1570_v31, %v532_v43 }
 0x10a   :  { %v1576_v45 = vpop.eup %1575  ;;  %v614_v47 = vadd.f32 %v598_v21, %v550_v32  ;;  %v599_v48 = vmul.f32 %v583_v3, %v567_v22  ;;  %v549_v49 = vmul.f32 %v1574_v38, %v533_v44  ;;  %v564_v50 = vsub.f32 1.0, %v1570_v31 }
 0x10b   :  { %v1578_v52 = vpop.eup %1577  ;;  %v539_v26 = vunpack.c.h.bf16 %v1766_v13  ;;  %v494_v53 = vadd.f32 1.0, %v1576_v45  ;;  %1595 = vpow2.f32 %v1259_v28  ;;  %v565_v60 = vsub.f32 1.0, %v1574_v38 }
 0x10c   :  { %v1580_v51 = vpop.eup %1579  ;;  %v615_v54 = vadd.f32 %v599_v48, %v551_v41  ;;  %v492_v56 = vadd.f32 1.0, %v1578_v52  ;;  %1597 = vpow2.f32 %v1257_v42  ;;  %v596_v43 = vmul.f32 %v580_v55, %v564_v50 }
 0x10d   :  { %v1582_v9 = vpop.eup %1581  ;;  %v537_v57 = vunpack.c.h.bf16 %v1755_v12  ;;  %1599 = vrcp.f32 %v494_v53  ;;  %v495_v2 = vadd.f32 1.0, %v1580_v51  ;;  %v597_v3 = vmul.f32 %v581_v59, %v565_v60 }
 0x10e   :  { %v1584_v44 = vpop.eup %1583  ;;  %1601 = vrcp.f32 %v492_v56  ;;  %v612_v13 = vadd.f32 %v596_v43, %v548_v23  ;;  %v629_v58 = vpack.c.bf16 %v615_v54, %v614_v47  ;;  %v554_v61 = vmul.f32 %v1582_v9, %v538_v29 }
 0x10f   :  { %v1586_v62 = vpop.eup %1585  ;;  %1603 = vrcp.f32 %v495_v2  ;;  %v613_v63 = vadd.f32 %v597_v3, %v549_v49  ;;  %v552_v0 = vmul.f32 %v1584_v44, %v536_v46  ;;  %v568_v55 = vsub.f32 1.0, %v1584_v44 }
 0x110   :  { %v1588_v18 = vpop.eup %1587  ;;  %v555_v11 = vmul.f32 %v1586_v62, %v539_v26  ;;  %v570_v24 = vsub.f32 1.0, %v1582_v9  ;;  %v571_v30 = vsub.f32 1.0, %v1586_v62  ;;  %v542_v36 = vunpack.c.l.bf16 %v1780_v15 }
 0x111   :  { %v1590_v31 = vpop.eup %1589  ;;  %v628_v32 = vpack.c.bf16 %v613_v63, %v612_v13  ;;  %v553_v1 = vmul.f32 %v1588_v18, %v537_v57  ;;  %v569_v59 = vsub.f32 1.0, %v1588_v18  ;;  %v600_v33 = vmul.f32 %v584_v35, %v568_v55 }
 0x112   :  { %v1592_v25 = vpop.eup %1591  ;;  %v493_v29 = vadd.f32 1.0, %v1590_v31  ;;  %v602_v34 = vmul.f32 %v586_v39, %v570_v24  ;;  %v603_v12 = vmul.f32 %v587_v40, %v571_v30  ;;  %v540_v40 = vunpack.c.l.bf16 %v1771_v14 }
 0x113   :  { %v1594_v46 = vpop.eup %1593  ;;  %v498_v20 = vadd.f32 1.0, %v1592_v25  ;;  %1444 = vmatprep.mubr.msk.bf16.mxu1 %vm124_vm0, %v628_v32  ;;  %v601_v27 = vmul.f32 %v585_v37, %v569_v59  ;;  %v616_v38 = vadd.f32 %v600_v33, %v552_v0  ;;  %v588_v45 = vunpack.c.l.bf16 %v1706_v5 }
 0x114   :  { %1605 = vrcp.f32 %v493_v29  ;;  %v496_v35 = vadd.f32 1.0, %v1594_v46  ;;  %1445 = vmatmul.mubr.msk.bf16.vlgmr.msra.gmra.mrb[8].mxu1 %vm124_vm0, %v629_v58  ;;  %v618_v21 = vadd.f32 %v602_v34, %v554_v61  ;;  %v619_v41 = vadd.f32 %v603_v12, %v555_v11 }
 0x115   :  { %v1596_v39 = vpop.eup %1595  ;;  %1607 = vrcp.f32 %v498_v20  ;;  %v617_v22 = vadd.f32 %v601_v27, %v553_v1  ;;  %1461 = vmatpush3.bf16.msra.mxu1 %v1804_v19  ;;  %v591_v50 = vunpack.c.h.bf16 %v1711_v6  ;;  %v541_v56 = vunpack.c.h.bf16 %v1771_v14 }
 0x116   :  { %v1598_v28 = vpop.eup %1597  ;;  %1609 = vrcp.f32 %v496_v35  ;;  %v499_v37 = vadd.f32 1.0, %v1596_v39  ;;  %v631_v42 = vpack.c.bf16 %v619_v41, %v618_v21  ;;  %v546_v9 = vunpack.c.l.bf16 %v1794_v17 }
 0x117   :  { %v1600_v23 = vpop.eup %1599  ;;  %v497_v47 = vadd.f32 1.0, %v1598_v28  ;;  %v630_v48 = vpack.c.bf16 %v617_v22, %v616_v38  ;;  %v589_v2 = vunpack.c.h.bf16 %v1706_v5  ;;  %v544_v3 = vunpack.c.l.bf16 %v1785_v16  ;;  %v1260_v22 = vld [vmem:[%s2044_s7] ss:$0 sm:$0xff] }
 0x118   :  { %v1602_v49 = vpop.eup %1601  ;;  %1611 = vrcp.f32 %v499_v37  ;;  %v558_v52 = vmul.f32 %v1600_v23, %v542_v36  ;;  %v574_v26 = vsub.f32 1.0, %v1600_v23  ;;  %v594_v58 = vunpack.c.l.bf16 %v1739_v10 }
 0x119   :  { %v1604_v53 = vpop.eup %1603  ;;  %1613 = vrcp.f32 %v497_v47  ;;  %1448 = vmatprep.mubr.msk.bf16.mxu1 %vm124_vm0, %v630_v48  ;;  %v556_v19 = vmul.f32 %v1602_v49, %v540_v40  ;;  %v572_v15 = vsub.f32 1.0, %v1602_v49  ;;  %v592_v63 = vunpack.c.l.bf16 %v1725_v8  ;;  %v1534_v40 = vld [vmem:[%s2043_s10] sm:$0xff]  }
 0x11a   :  { %v559_v60 = vmul.f32 %v1604_v53, %v543_v4  ;;  %v575_v51 = vsub.f32 1.0, %v1604_v53  ;;  %v606_v54 = vmul.f32 %v590_v7, %v574_v26  ;;  %v547_v14 = vunpack.c.h.bf16 %v1794_v17  ;;  %1478 = vmatprep.subr.bf16.mxu0 %v1534_v40 }
 0x11b   :  { %v604_v43 = vmul.f32 %v588_v45, %v572_v15  ;;  %v545_v11 = vunpack.c.h.bf16 %v1785_v16  ;;  %v595_v31 = vunpack.c.h.bf16 %v1739_v10  ;;  %v593_v25 = vunpack.c.h.bf16 %v1725_v8  ;;  %1479 = vmatpush3.bf16.msra.mxu0 %v1534_v40 }
 0x11c   :  { %1449 = vmatmul.mubr.msk.bf16.gmra.mrb[12].mxu1 %vm124_vm0, %v631_v42  ;;  %v607_v6 = vmul.f32 %v591_v50, %v575_v51  ;;  %v622_v57 = vadd.f32 %v606_v54, %v558_v52 }
 0x11d   :  { %v620_v44 = vadd.f32 %v604_v43, %v556_v19 }
 0x11e   :  { %v1606_v13 = vpop.eup %1605  ;;  %v623_v61 = vadd.f32 %v607_v6, %v559_v60 }
 0x11f   :  { %v1608_v62 = vpop.eup %1607  ;;  %v557_v0 = vmul.f32 %v1606_v13, %v541_v56  ;;  %v573_v55 = vsub.f32 1.0, %v1606_v13 }
 0x120   :  { %v1610_v18 = vpop.eup %1609  ;;  %v633_v24 = vpack.c.bf16 %v623_v61, %v622_v57  ;;  %v562_v30 = vmul.f32 %v1608_v62, %v546_v9  ;;  %v578_v5 = vsub.f32 1.0, %v1608_v62 }
 0x121   :  { %v605_v32 = vmul.f32 %v589_v2, %v573_v55  ;;  %v560_v1 = vmul.f32 %v1610_v18, %v544_v3  ;;  %v576_v59 = vsub.f32 1.0, %v1610_v18 }
 0x122   :  { %v1612_v33 = vpop.eup %1611  ;;  %v610_v29 = vmul.f32 %v594_v58, %v578_v5 }
 0x123   :  { %v1614_v34 = vpop.eup %1613  ;;  %v621_v12 = vadd.f32 %v605_v32, %v557_v0  ;;  %v608_v17 = vmul.f32 %v592_v63, %v576_v59  ;;  %v563_v46 = vmul.f32 %v1612_v33, %v547_v14  ;;  %v579_v36 = vsub.f32 1.0, %v1612_v33 }
 0x124   :  { %v561_v20 = vmul.f32 %v1614_v34, %v545_v11  ;;  %v577_v27 = vsub.f32 1.0, %v1614_v34  ;;  %v626_v16 = vadd.f32 %v610_v29, %v562_v30 }
 0x125   :  { %v632_v38 = vpack.c.bf16 %v621_v12, %v620_v44  ;;  %v624_v35 = vadd.f32 %v608_v17, %v560_v1  ;;  %v611_v21 = vmul.f32 %v595_v31, %v579_v36 }
 0x126   :  { %v609_v41 = vmul.f32 %v593_v25, %v577_v27 }
 0x127   :  { %1452 = vmatprep.mubr.msk.bf16.mxu1 %vm124_vm0, %v632_v38  ;;  %v627_v10 = vadd.f32 %v611_v21, %v563_v46 }
 0x128   :  { %1453 = vmatmul.mubr.msk.bf16.gmra.mrb[16].mxu1 %vm124_vm0, %v633_v24  ;;  %v625_v39 = vadd.f32 %v609_v41, %v561_v20  ;;  %v1270_v41 = vld [vmem:[%s2045_s9] ss:$0 sm:$0xff] }
 0x129   :  { %v635_v8 = vpack.c.bf16 %v627_v10, %v626_v16 }
 0x12a   :  { %v634_v7 = vpack.c.bf16 %v625_v39, %v624_v35 }
 0x12c   :  { %1456 = vmatprep.mubr.msk.bf16.mxu1 %vm124_vm0, %v634_v7 }
 0x130   :  { %1457 = vmatmul.mubr.msk.bf16.gmra.mrb[20].mxu1 %vm124_vm0, %v635_v8 }
 0x1e7   :  { %v1446_v28 = vpop.f32.mrb[8].mxu1 }
 0x1e8   :  { %v718_v4 = vadd.f32 %v1446_v28, %v1260_v22  ;;  %v709_v37 = vpop.f32.mrb[9].mxu1 }
 0x1e9   :  { %v710_v42 = vadd.f32 %v1260_v22, %v709_v37  ;;  %v1447_v23 = vpop.f32.mrb[10].mxu1 }
 0x1ea   :  { %v721_v45 = vadd.f32 %v1447_v23, %v1260_v22  ;;  %v712_v47 = vpop.f32.mrb[11].mxu1  ;;  %v774_v49 = vmax.f32 %v718_v4, 0.0 }
 0x1eb   :  { %v713_v48 = vadd.f32 %v1260_v22, %v712_v47  ;;  %v772_v52 = vmax.f32 %v710_v42, 0.0 }
 0x1ec   :  { %v775_v50 = vmax.f32 %v721_v45, 0.0 }
 0x1ed   :  { %v773_v26 = vmax.f32 %v713_v48, 0.0 }
 0x1ee   :  { %v789_v53 = vpack.c.bf16 %v775_v50, %v774_v49 }
 0x1ef   :  { %v788_v19 = vpack.c.bf16 %v773_v26, %v772_v52  ;;  %v1450_v15 = vpop.f32.mrb[12].mxu1 }
 0x1f0   :  { %v734_v60 = vadd.f32 %v1450_v15, %v1260_v22  ;;  %v725_v51 = vpop.f32.mrb[13].mxu1 }
 0x1f1   :  { %v726_v54 = vadd.f32 %v1260_v22, %v725_v51  ;;  %v1451_v56 = vpop.f32.mrb[14].mxu1  ;;  %1462 = vmatprep.mubr.msk.bf16.mxu1 %vm124_vm0, %v788_v19 }
 0x1f2   :  { %v737_v43 = vadd.f32 %v1451_v56, %v1260_v22  ;;  %v728_v9 = vpop.f32.mrb[15].mxu1  ;;  %1463 = vmatmul.mubr.msk.bf16.vlgmr.msra.gmra.mrb[24].mxu1 %vm124_vm0, %v789_v53  ;;  %v778_v57 = vmax.f32 %v734_v60, 0.0 }
 0x1f3   :  { %v729_v6 = vadd.f32 %v1260_v22, %v728_v9  ;;  %v776_v3 = vmax.f32 %v726_v54, 0.0 }
 0x1f4   :  { %v779_v2 = vmax.f32 %v737_v43, 0.0 }
 0x1f5   :  { %v777_v44 = vmax.f32 %v729_v6, 0.0 }
 0x1f6   :  { %v791_v13 = vpack.c.bf16 %v779_v2, %v778_v57 }
 0x1f7   :  { %v790_v58 = vpack.c.bf16 %v777_v44, %v776_v3 }
 0x1f9   :  { %1466 = vmatprep.mubr.msk.bf16.mxu1 %vm124_vm0, %v790_v58 }
 0x1fa   :  { %1467 = vmatmul.mubr.msk.bf16.gmra.mrb[28].mxu1 %vm124_vm0, %v791_v13 }
 0x1fb   :  { %v1454_v61 = vpop.f32.mrb[16].mxu1 }
 0x1fc   :  { %v750_v62 = vadd.f32 %v1454_v61, %v1260_v22  ;;  %v741_v63 = vpop.f32.mrb[17].mxu1 }
 0x1fd   :  { %v742_v14 = vadd.f32 %v1260_v22, %v741_v63  ;;  %v1455_v0 = vpop.f32.mrb[18].mxu1 }
 0x1fe   :  { %v753_v55 = vadd.f32 %v1455_v0, %v1260_v22  ;;  %v744_v18 = vpop.f32.mrb[19].mxu1  ;;  %v782_v24 = vmax.f32 %v750_v62, 0.0 }
 0x1ff   :  { %v745_v11 = vadd.f32 %v1260_v22, %v744_v18  ;;  %v780_v5 = vmax.f32 %v742_v14, 0.0  ;;  %v1323_v18 = vld [vmem:[%s2046_s0] sm:$0xff]  }
 0x200   :  { %v783_v30 = vmax.f32 %v753_v55, 0.0  ;;  %v1354_v55 = vld [vmem:[%s2046_s0 + $0x8] sm:$0xff]  }
 0x201   :  { %v781_v31 = vmax.f32 %v745_v11, 0.0  ;;  %v1936_v11 = vld [vmem:[%s2047_s11] ss:$0 sm:$0xff] }
 0x202   :  { %v793_v32 = vpack.c.bf16 %v783_v30, %v782_v24  ;;  %v1328_v24 = vunpack.c.l.bf16 %v1354_v55 }
 0x203   :  { %v792_v1 = vpack.c.bf16 %v781_v31, %v780_v5  ;;  %v1458_v59 = vpop.f32.mrb[20].mxu1  ;;  %v1324_v5 = vunpack.c.l.bf16 %v1323_v18 }
 0x204   :  { %v766_v33 = vadd.f32 %v1458_v59, %v1260_v22  ;;  %v757_v25 = vpop.f32.mrb[21].mxu1 }
 0x205   :  { %v758_v29 = vadd.f32 %v1260_v22, %v757_v25  ;;  %v1459_v34 = vpop.f32.mrb[22].mxu1  ;;  %1470 = vmatprep.mubr.msk.bf16.mxu1 %vm124_vm0, %v792_v1  ;;  %v1329_v1 = vunpack.c.h.bf16 %v1354_v55  ;;  %v1325_v25 = vunpack.c.h.bf16 %v1323_v18  ;;  %v1359_v55 = vld [vmem:[%s2046_s0 + $0x30] sm:$0xff]  }
 0x206   :  { %v769_v12 = vadd.f32 %v1459_v34, %v1260_v22  ;;  %v760_v17 = vpop.f32.mrb[23].mxu1  ;;  %1471 = vmatmul.mubr.msk.bf16.gmra.mrb[32].mxu1 %vm124_vm0, %v793_v32  ;;  %v786_v36 = vmax.f32 %v766_v33, 0.0 }
 0x207   :  { %v761_v46 = vadd.f32 %v1260_v22, %v760_v17  ;;  %v784_v27 = vmax.f32 %v758_v29, 0.0 }
 0x208   :  { %v787_v20 = vmax.f32 %v769_v12, 0.0 }
 0x209   :  { %v785_v16 = vmax.f32 %v761_v46, 0.0 }
 0x20a   :  { %v795_v38 = vpack.c.bf16 %v787_v20, %v786_v36  ;;  %v1356_v36 = vld [vmem:[%s2046_s0 + $0x18] sm:$0xff]  }
 0x20b   :  { %v794_v35 = vpack.c.bf16 %v785_v16, %v784_v27  ;;  %v1355_v16 = vld [vmem:[%s2046_s0 + $0x10] sm:$0xff]  }
 0x20d   :  { %1474 = vmatprep.mubr.msk.bf16.mxu1 %vm124_vm0, %v794_v35 }
 0x20e   :  { %1475 = vmatmul.mubr.msk.bf16.gmra.mrb[36].mxu1 %vm124_vm0, %v795_v38 }
 0x2c5   :  { %v1464_v21 = vpop.f32.mrb[24].mxu1 }
 0x2c6   :  { %v869_v10 = vpop.f32.mrb[25].mxu1  ;;  %v878_v8 = vadd.f32 %v1464_v21, %v1270_v41 }
 0x2c7   :  { %v1465_v39 = vpop.f32.mrb[26].mxu1  ;;  %v870_v22 = vadd.f32 %v1270_v41, %v869_v10 }
 0x2c8   :  { %v881_v7 = vadd.f32 %v1465_v39, %v1270_v41  ;;  %v872_v40 = vpop.f32.mrb[27].mxu1 }
 0x2c9   :  { %v873_v28 = vadd.f32 %v1270_v41, %v872_v40 }
 0x2ca   :  { %v933_v4 = vpack.c.bf16 %v881_v7, %v878_v8  ;;  %v1332_v8 = vunpack.c.l.bf16 %v1355_v16 }
 0x2cb   :  { %v932_v37 = vpack.c.bf16 %v873_v28, %v870_v22  ;;  %v1337_v22 = vunpack.c.h.bf16 %v1356_v36 }
 0x2cd   :  { %v1468_v42 = vpop.f32.mrb[28].mxu1  ;;  %1480 = vmatprep.mubr.msk.bf16.mxu0 %vm124_vm0, %v932_v37  ;;  %v1333_v37 = vunpack.c.h.bf16 %v1355_v16 }
 0x2ce   :  { %v885_v23 = vpop.f32.mrb[29].mxu1  ;;  %1481 = vmatmul.mubr.msk.bf16.vlgmr.msra.gmra.mrb[16].mxu0 %vm124_vm0, %v933_v4  ;;  %v894_v47 = vadd.f32 %v1468_v42, %v1270_v41 }
 0x2cf   :  { %v1469_v45 = vpop.f32.mrb[30].mxu1  ;;  %v886_v50 = vadd.f32 %v1270_v41, %v885_v23 }
 0x2d0   :  { %v897_v48 = vadd.f32 %v1469_v45, %v1270_v41  ;;  %v888_v49 = vpop.f32.mrb[31].mxu1 }
 0x2d1   :  { %v889_v52 = vadd.f32 %v1270_v41, %v888_v49 }
 0x2d2   :  { %v935_v26 = vpack.c.bf16 %v897_v48, %v894_v47 }
 0x2d3   :  { %v934_v53 = vpack.c.bf16 %v889_v52, %v886_v50 }
 0x2d5   :  { %1484 = vmatprep.mubr.msk.bf16.mxu0 %vm124_vm0, %v934_v53 }
 0x2d6   :  { %1485 = vmatmul.mubr.msk.bf16.gmra.mrb[20].mxu0 %vm124_vm0, %v935_v26 }
 0x2d9   :  { %v1472_v19 = vpop.f32.mrb[32].mxu1 }
 0x2da   :  { %v901_v15 = vpop.f32.mrb[33].mxu1  ;;  %v910_v51 = vadd.f32 %v1472_v19, %v1270_v41 }
 0x2db   :  { %v1473_v60 = vpop.f32.mrb[34].mxu1  ;;  %v902_v43 = vadd.f32 %v1270_v41, %v901_v15  ;;  %v1358_v15 = vld [vmem:[%s2046_s0 + $0x28] sm:$0xff]  }
 0x2dc   :  { %v913_v54 = vadd.f32 %v1473_v60, %v1270_v41  ;;  %v904_v56 = vpop.f32.mrb[35].mxu1  ;;  %v1357_v60 = vld [vmem:[%s2046_s0 + $0x20] sm:$0xff]  }
 0x2dd   :  { %v905_v9 = vadd.f32 %v1270_v41, %v904_v56  ;;  %v1340_v56 = vunpack.c.l.bf16 %v1357_v60 }
 0x2de   :  { %v937_v6 = vpack.c.bf16 %v913_v54, %v910_v51  ;;  %v1344_v51 = vunpack.c.l.bf16 %v1358_v15 }
 0x2df   :  { %v936_v57 = vpack.c.bf16 %v905_v9, %v902_v43 }
 0x2e1   :  { %v1476_v2 = vpop.f32.mrb[36].mxu1  ;;  %1488 = vmatprep.mubr.msk.bf16.mxu0 %vm124_vm0, %v936_v57 }
 0x2e2   :  { %v917_v3 = vpop.f32.mrb[37].mxu1  ;;  %1489 = vmatmul.mubr.msk.bf16.gmra.mrb[24].mxu0 %vm124_vm0, %v937_v6  ;;  %v926_v13 = vadd.f32 %v1476_v2, %v1270_v41  ;;  %v1345_v6 = vunpack.c.h.bf16 %v1358_v15 }
 0x2e3   :  { %v1477_v44 = vpop.f32.mrb[38].mxu1  ;;  %v918_v62 = vadd.f32 %v1270_v41, %v917_v3  ;;  %v1341_v3 = vunpack.c.h.bf16 %v1357_v60 }
 0x2e4   :  { %v929_v58 = vadd.f32 %v1477_v44, %v1270_v41  ;;  %v920_v61 = vpop.f32.mrb[39].mxu1 }
 0x2e5   :  { %v921_v63 = vadd.f32 %v1270_v41, %v920_v61  ;;  %v1336_v41 = vunpack.c.l.bf16 %v1356_v36 }
 0x2e6   :  { %v939_v14 = vpack.c.bf16 %v929_v58, %v926_v13 }
 0x2e7   :  { %v938_v0 = vpack.c.bf16 %v921_v63, %v918_v62  ;;  %v1360_v63 = vld [vmem:[%s2046_s0 + $0x38] sm:$0xff]  }
 0x2e9   :  { %1492 = vmatprep.mubr.msk.bf16.mxu0 %vm124_vm0, %v938_v0 }
 0x2ea   :  { %1493 = vmatmul.mubr.msk.bf16.gmra.mrb[28].mxu0 %vm124_vm0, %v939_v14 }
 0x3a1   :  { %v1482_v30 = vpop.f32.mrb[16].mxu0 }
 0x3a2   :  { %v1022_v31 = vadd.f32 %v1482_v30, %v1936_v11  ;;  %v1013_v32 = vpop.f32.mrb[17].mxu0 }
 0x3a3   :  { %v1014_v59 = vadd.f32 %v1936_v11, %v1013_v32  ;;  %v1483_v33 = vpop.f32.mrb[18].mxu0 }
 0x3a4   :  { %v1110_v29 = vadd.f32 %v1328_v24, %v1022_v31  ;;  %v1025_v34 = vadd.f32 %v1483_v33, %v1936_v11  ;;  %v1016_v12 = vpop.f32.mrb[19].mxu0 }
 0x3a5   :  { %v1108_v17 = vadd.f32 %v1324_v5, %v1014_v59  ;;  %v1017_v46 = vadd.f32 %v1936_v11, %v1016_v12  ;;  %v1352_v5 = vunpack.c.l.bf16 %v1360_v63  ;;  %v1349_v12 = vunpack.c.h.bf16 %v1359_v55 }
 0x3a6   :  { %v1308_v20 = vpack.c.bf16 %v1110_v29, %v1110_v29  ;;  %v1111_v27 = vadd.f32 %v1329_v1, %v1025_v34  ;;  %v1348_v1 = vunpack.c.l.bf16 %v1359_v55 }
 0x3a7   :  { %v1306_v38 = vpack.c.bf16 %v1108_v17, %v1108_v17  ;;  %v1109_v35 = vadd.f32 %v1325_v25, %v1017_v46  ;;  %v1353_v25 = vunpack.c.h.bf16 %v1360_v63 }
 0x3a8   :  { %1191 = vst.msk [vmem:[%s2048_s12 + $0x8] sm:$0xf] %vm1188_vm1, %v1308_v20  ;;  %v1309_v21 = vpack.c.bf16 %v1111_v27, %v1111_v27 }
 0x3a9   :  { %1189 = vst.msk [vmem:[%s2048_s12] sm:$0xf] %vm1188_vm1, %v1306_v38  ;;  %v1307_v10 = vpack.c.bf16 %v1109_v35, %v1109_v35  ;;  %v1486_v39 = vpop.f32.mrb[20].mxu0 }
 0x3aa   :  { %1192 = vst.msk [vmem:[%s2048_s12 + $0xc] sm:$0xf] %vm1188_vm1, %v1309_v21  ;;  %v1038_v7 = vadd.f32 %v1486_v39, %v1936_v11  ;;  %v1029_v40 = vpop.f32.mrb[21].mxu0 }
 0x3ab   :  { %1190 = vst.msk [vmem:[%s2048_s12 + $0x4] sm:$0xf] %vm1188_vm1, %v1307_v10  ;;  %v1030_v28 = vadd.f32 %v1936_v11, %v1029_v40  ;;  %v1487_v4 = vpop.f32.mrb[22].mxu0 }
 0x3ac   :  { %v1114_v42 = vadd.f32 %v1336_v41, %v1038_v7  ;;  %v1041_v23 = vadd.f32 %v1487_v4, %v1936_v11  ;;  %v1032_v45 = vpop.f32.mrb[23].mxu0 }
 0x3ad   :  { %v1112_v47 = vadd.f32 %v1332_v8, %v1030_v28  ;;  %v1033_v48 = vadd.f32 %v1936_v11, %v1032_v45 }
 0x3ae   :  { %v1312_v49 = vpack.c.bf16 %v1114_v42, %v1114_v42  ;;  %v1115_v50 = vadd.f32 %v1337_v22, %v1041_v23 }
 0x3af   :  { %v1310_v52 = vpack.c.bf16 %v1112_v47, %v1112_v47  ;;  %v1113_v26 = vadd.f32 %v1333_v37, %v1033_v48 }
 0x3b0   :  { %1195 = vst.msk [vmem:[%s2048_s12 + $0x18] sm:$0xf] %vm1188_vm1, %v1312_v49  ;;  %v1313_v53 = vpack.c.bf16 %v1115_v50, %v1115_v50 }
 0x3b1   :  { %1193 = vst.msk [vmem:[%s2048_s12 + $0x10] sm:$0xf] %vm1188_vm1, %v1310_v52  ;;  %v1311_v19 = vpack.c.bf16 %v1113_v26, %v1113_v26 }
 0x3b2   :  { %1196 = vst.msk [vmem:[%s2048_s12 + $0x1c] sm:$0xf] %vm1188_vm1, %v1313_v53 }
 0x3b3   :  { %1194 = vst.msk [vmem:[%s2048_s12 + $0x14] sm:$0xf] %vm1188_vm1, %v1311_v19 }
 0x3b5   :  { %v1490_v54 = vpop.f32.mrb[24].mxu0 }
 0x3b6   :  { %v1054_v43 = vadd.f32 %v1490_v54, %v1936_v11  ;;  %v1045_v9 = vpop.f32.mrb[25].mxu0 }
 0x3b7   :  { %v1046_v57 = vadd.f32 %v1936_v11, %v1045_v9  ;;  %v1491_v2 = vpop.f32.mrb[26].mxu0 }
 0x3b8   :  { %v1118_v44 = vadd.f32 %v1344_v51, %v1054_v43  ;;  %v1057_v13 = vadd.f32 %v1491_v2, %v1936_v11  ;;  %v1048_v58 = vpop.f32.mrb[27].mxu0 }
 0x3b9   :  { %v1116_v61 = vadd.f32 %v1340_v56, %v1046_v57  ;;  %v1049_v62 = vadd.f32 %v1936_v11, %v1048_v58 }
 0x3ba   :  { %v1316_v14 = vpack.c.bf16 %v1118_v44, %v1118_v44  ;;  %v1119_v0 = vadd.f32 %v1345_v6, %v1057_v13 }
 0x3bb   :  { %v1314_v18 = vpack.c.bf16 %v1116_v61, %v1116_v61  ;;  %v1117_v24 = vadd.f32 %v1341_v3, %v1049_v62 }
 0x3bc   :  { %1199 = vst.msk [vmem:[%s2048_s12 + $0x28] sm:$0xf] %vm1188_vm1, %v1316_v14  ;;  %v1317_v30 = vpack.c.bf16 %v1119_v0, %v1119_v0 }
 0x3bd   :  { %1197 = vst.msk [vmem:[%s2048_s12 + $0x20] sm:$0xf] %vm1188_vm1, %v1314_v18  ;;  %v1315_v31 = vpack.c.bf16 %v1117_v24, %v1117_v24  ;;  %v1494_v32 = vpop.f32.mrb[28].mxu0 }
 0x3be   :  { %1200 = vst.msk [vmem:[%s2048_s12 + $0x2c] sm:$0xf] %vm1188_vm1, %v1317_v30  ;;  %v1070_v59 = vadd.f32 %v1494_v32, %v1936_v11  ;;  %v1061_v33 = vpop.f32.mrb[29].mxu0 }
 0x3bf   :  { %1198 = vst.msk [vmem:[%s2048_s12 + $0x24] sm:$0xf] %vm1188_vm1, %v1315_v31  ;;  %v1062_v29 = vadd.f32 %v1936_v11, %v1061_v33  ;;  %v1495_v34 = vpop.f32.mrb[30].mxu0 }
 0x3c0   :  { %v1122_v17 = vadd.f32 %v1352_v5, %v1070_v59  ;;  %v1073_v46 = vadd.f32 %v1495_v34, %v1936_v11  ;;  %v1064_v36 = vpop.f32.mrb[31].mxu0 }
 0x3c1   :  { %v1120_v20 = vadd.f32 %v1348_v1, %v1062_v29  ;;  %v1065_v27 = vadd.f32 %v1936_v11, %v1064_v36 }
 0x3c2   :  { %v1320_v16 = vpack.c.bf16 %v1122_v17, %v1122_v17  ;;  %v1123_v38 = vadd.f32 %v1353_v25, %v1073_v46 }
 0x3c3   :  { %v1318_v35 = vpack.c.bf16 %v1120_v20, %v1120_v20  ;;  %v1121_v21 = vadd.f32 %v1349_v12, %v1065_v27 }
 0x3c4   :  { %1203 = vst.msk [vmem:[%s2048_s12 + $0x38] sm:$0xf] %vm1188_vm1, %v1320_v16  ;;  %v1321_v41 = vpack.c.bf16 %v1123_v38, %v1123_v38 }
 0x3c5   :  { %1201 = vst.msk [vmem:[%s2048_s12 + $0x30] sm:$0xf] %vm1188_vm1, %v1318_v35  ;;  %v1319_v10 = vpack.c.bf16 %v1121_v21, %v1121_v21 }
 0x3c6   :  { %1204 = vst.msk [vmem:[%s2048_s12 + $0x3c] sm:$0xf] %vm1188_vm1, %v1321_v41 }
 0x3c7   :  { %1202 = vst.msk [vmem:[%s2048_s12 + $0x34] sm:$0xf] %vm1188_vm1, %v1319_v10 }

// kernel: _lambda_.32
= control target key start
LH: loop header
LB: loop body
LE: loop exit
PB: predicated region body
PF: predicated region fallthrough
CT: control target
= control target key end

     0   :  { %vm184_vm0 = vcmask 1043456   ;;  %vm135_vm1 = vcmask 64512   ;;  %vm509_vm2 = vcmask 27648   ;;  %s966_s1 = inlined_call_operand.vmem [shape: bf16[8,4], index: 1, kind: input, shape index: {}]   ;;  %s967_s0 = inlined_call_operand.vmem [shape: bf16[256,8], index: 0, kind: input, shape index: {}]   ;;  %s968_s2 = inlined_call_operand.vmem [shape: f32[1,4], index: 2, kind: input, shape index: {}]   ;;  %s969_s3 = inlined_call_operand.vmem [shape: bf16[256,4], index: 3, kind: output, shape index: {}]  }
   0x1   :  { %v47_v0 = vld [vmem:[%s966_s1] sm:$0xf]  ;;  %v700_v4 = vld [vmem:[%s967_s0 + $0x8] sm:$0xff]   ;;  %v702_v6 = vld [vmem:[%s967_s0 + $0x10] sm:$0xff]  }
   0x2   :  { %696 = vmatprep.subr.msk.bf16.mxu0 %vm184_vm0, %v47_v0  ;;  %697 = vmatprep.subr.msk.bf16.mxu1 %vm184_vm0, %v47_v0  ;;  %v186_v1 = vsel %vm184_vm0, %v47_v0, 0  ;;  %v698_v2 = vld [vmem:[%s967_s0] sm:$0xff]   ;;  %v701_v5 = vld [vmem:[%s967_s0 + $0x48] sm:$0xff]   ;;  %v703_v7 = vld [vmem:[%s967_s0 + $0x50] sm:$0xff]  }
   0x3   :  { %661 = vmatpush3.bf16.msra.mxu0 %v186_v1  ;;  %695 = vmatpush3.bf16.msra.mxu1 %v186_v1  ;;  %v699_v3 = vld [vmem:[%s967_s0 + $0x40] sm:$0xff]   ;;  %v704_v8 = vld [vmem:[%s967_s0 + $0x18] sm:$0xff]   ;;  %v708_v12 = vld [vmem:[%s967_s0 + $0x28] sm:$0xff]  }
   0x4   :  { %662 = vmatprep.mubr.msk.bf16.mxu0 %vm135_vm1, %v698_v2  ;;  %678 = vmatprep.mubr.msk.bf16.mxu1 %vm135_vm1, %v699_v3  ;;  %v705_v9 = vld [vmem:[%s967_s0 + $0x58] sm:$0xff]   ;;  %v706_v10 = vld [vmem:[%s967_s0 + $0x20] sm:$0xff]   ;;  %v709_v13 = vld [vmem:[%s967_s0 + $0x68] sm:$0xff]  }
   0x5   :  { %v707_v11 = vld [vmem:[%s967_s0 + $0x60] sm:$0xff]   ;;  %v710_v14 = vld [vmem:[%s967_s0 + $0x30] sm:$0xff]   ;;  %v712_v16 = vld [vmem:[%s967_s0 + $0x38] sm:$0xff]  }
   0x6   :  { %663 = vmatmul.mubr.msk.bf16.vlgmr.msra.gmra.mrb[0].mxu0 %vm135_vm1, %v700_v4  ;;  %679 = vmatmul.mubr.msk.bf16.vlgmr.msra.gmra.mrb[0].mxu1 %vm135_vm1, %v701_v5  ;;  %v711_v15 = vld [vmem:[%s967_s0 + $0x70] sm:$0xff]   ;;  %v713_v17 = vld [vmem:[%s967_s0 + $0x78] sm:$0xff]   ;;  %v804_v18 = vld [vmem:[%s968_s2] ss:$0 sm:$0xff] }
   0x7   :  { %666 = vmatprep.mubr.msk.bf16.mxu0 %vm135_vm1, %v702_v6  ;;  %682 = vmatprep.mubr.msk.bf16.mxu1 %vm135_vm1, %v703_v7 }
   0xe   :  { %667 = vmatmul.mubr.msk.bf16.gmra.mrb[4].mxu0 %vm135_vm1, %v704_v8  ;;  %683 = vmatmul.mubr.msk.bf16.gmra.mrb[4].mxu1 %vm135_vm1, %v705_v9 }
   0xf   :  { %670 = vmatprep.mubr.msk.bf16.mxu0 %vm135_vm1, %v706_v10  ;;  %686 = vmatprep.mubr.msk.bf16.mxu1 %vm135_vm1, %v707_v11 }
  0x16   :  { %671 = vmatmul.mubr.msk.bf16.gmra.mrb[8].mxu0 %vm135_vm1, %v708_v12  ;;  %687 = vmatmul.mubr.msk.bf16.gmra.mrb[8].mxu1 %vm135_vm1, %v709_v13 }
  0x17   :  { %674 = vmatprep.mubr.msk.bf16.mxu0 %vm135_vm1, %v710_v14  ;;  %690 = vmatprep.mubr.msk.bf16.mxu1 %vm135_vm1, %v711_v15 }
  0x1e   :  { %675 = vmatmul.mubr.msk.bf16.gmra.mrb[12].mxu0 %vm135_vm1, %v712_v16  ;;  %691 = vmatmul.mubr.msk.bf16.gmra.mrb[12].mxu1 %vm135_vm1, %v713_v17 }
  0xd9   :  { %v664_v19 = vpop.f32.mrb[0].mxu0  ;;  %v680_v21 = vpop.f32.mrb[0].mxu1 }
  0xda   :  { %v231_v20 = vadd.f32 %v664_v19, %v804_v18  ;;  %v222_v22 = vpop.f32.mrb[1].mxu0  ;;  %v295_v23 = vadd.f32 %v680_v21, %v804_v18  ;;  %v286_v25 = vpop.f32.mrb[1].mxu1 }
  0xdb   :  { %v223_v24 = vadd.f32 %v804_v18, %v222_v22  ;;  %v665_v26 = vpop.f32.mrb[2].mxu0  ;;  %v287_v28 = vadd.f32 %v804_v18, %v286_v25  ;;  %v681_v30 = vpop.f32.mrb[2].mxu1 }
  0xdc   :  { %v351_v27 = vmax.f32 %v231_v20, 0.0  ;;  %v234_v29 = vadd.f32 %v665_v26, %v804_v18  ;;  %v225_v31 = vpop.f32.mrb[3].mxu0  ;;  %v367_v32 = vmax.f32 %v295_v23, 0.0  ;;  %v298_v34 = vadd.f32 %v681_v30, %v804_v18  ;;  %v289_v36 = vpop.f32.mrb[3].mxu1 }
  0xdd   :  { %v349_v33 = vmax.f32 %v223_v24, 0.0  ;;  %v226_v35 = vadd.f32 %v804_v18, %v225_v31  ;;  %v365_v38 = vmax.f32 %v287_v28, 0.0  ;;  %v290_v40 = vadd.f32 %v804_v18, %v289_v36 }
  0xde   :  { %v613_v37 = vpack.c.bf16 %v351_v27, %v351_v27  ;;  %v352_v39 = vmax.f32 %v234_v29, 0.0  ;;  %v629_v41 = vpack.c.bf16 %v367_v32, %v367_v32  ;;  %v368_v43 = vmax.f32 %v298_v34, 0.0 }
  0xdf   :  { %v611_v42 = vpack.c.bf16 %v349_v33, %v349_v33  ;;  %v350_v44 = vmax.f32 %v226_v35, 0.0  ;;  %v627_v45 = vpack.c.bf16 %v365_v38, %v365_v38  ;;  %v366_v47 = vmax.f32 %v290_v40, 0.0 }
  0xe0   :  { %512 = vst.msk [vmem:[%s969_s3 + $0x8] sm:$0xf] %vm509_vm2, %v613_v37  ;;  %v614_v46 = vpack.c.bf16 %v352_v39, %v352_v39  ;;  %528 = vst.msk [vmem:[%s969_s3 + $0x48] sm:$0xf] %vm509_vm2, %v629_v41  ;;  %v630_v48 = vpack.c.bf16 %v368_v43, %v368_v43 }
  0xe1   :  { %510 = vst.msk [vmem:[%s969_s3] sm:$0xf] %vm509_vm2, %v611_v42  ;;  %v612_v49 = vpack.c.bf16 %v350_v44, %v350_v44  ;;  %v668_v50 = vpop.f32.mrb[4].mxu0  ;;  %526 = vst.msk [vmem:[%s969_s3 + $0x40] sm:$0xf] %vm509_vm2, %v627_v45  ;;  %v628_v51 = vpack.c.bf16 %v366_v47, %v366_v47  ;;  %v684_v53 = vpop.f32.mrb[4].mxu1 }
  0xe2   :  { %513 = vst.msk [vmem:[%s969_s3 + $0xc] sm:$0xf] %vm509_vm2, %v614_v46  ;;  %v247_v52 = vadd.f32 %v668_v50, %v804_v18  ;;  %v238_v54 = vpop.f32.mrb[5].mxu0  ;;  %529 = vst.msk [vmem:[%s969_s3 + $0x4c] sm:$0xf] %vm509_vm2, %v630_v48  ;;  %v311_v55 = vadd.f32 %v684_v53, %v804_v18  ;;  %v302_v57 = vpop.f32.mrb[5].mxu1 }
  0xe3   :  { %511 = vst.msk [vmem:[%s969_s3 + $0x4] sm:$0xf] %vm509_vm2, %v612_v49  ;;  %v239_v56 = vadd.f32 %v804_v18, %v238_v54  ;;  %v669_v58 = vpop.f32.mrb[6].mxu0  ;;  %527 = vst.msk [vmem:[%s969_s3 + $0x44] sm:$0xf] %vm509_vm2, %v628_v51  ;;  %v303_v60 = vadd.f32 %v804_v18, %v302_v57  ;;  %v685_v62 = vpop.f32.mrb[6].mxu1 }
  0xe4   :  { %v355_v59 = vmax.f32 %v247_v52, 0.0  ;;  %v250_v61 = vadd.f32 %v669_v58, %v804_v18  ;;  %v241_v63 = vpop.f32.mrb[7].mxu0  ;;  %v371_v0 = vmax.f32 %v311_v55, 0.0  ;;  %v314_v2 = vadd.f32 %v685_v62, %v804_v18  ;;  %v305_v4 = vpop.f32.mrb[7].mxu1 }
  0xe5   :  { %v353_v1 = vmax.f32 %v239_v56, 0.0  ;;  %v242_v3 = vadd.f32 %v804_v18, %v241_v63  ;;  %v369_v6 = vmax.f32 %v303_v60, 0.0  ;;  %v306_v8 = vadd.f32 %v804_v18, %v305_v4 }
  0xe6   :  { %v617_v5 = vpack.c.bf16 %v355_v59, %v355_v59  ;;  %v356_v7 = vmax.f32 %v250_v61, 0.0  ;;  %v633_v9 = vpack.c.bf16 %v371_v0, %v371_v0  ;;  %v372_v11 = vmax.f32 %v314_v2, 0.0 }
  0xe7   :  { %v615_v10 = vpack.c.bf16 %v353_v1, %v353_v1  ;;  %v354_v12 = vmax.f32 %v242_v3, 0.0  ;;  %v631_v13 = vpack.c.bf16 %v369_v6, %v369_v6  ;;  %v370_v15 = vmax.f32 %v306_v8, 0.0 }
  0xe8   :  { %516 = vst.msk [vmem:[%s969_s3 + $0x18] sm:$0xf] %vm509_vm2, %v617_v5  ;;  %v618_v14 = vpack.c.bf16 %v356_v7, %v356_v7  ;;  %532 = vst.msk [vmem:[%s969_s3 + $0x58] sm:$0xf] %vm509_vm2, %v633_v9  ;;  %v634_v16 = vpack.c.bf16 %v372_v11, %v372_v11 }
  0xe9   :  { %514 = vst.msk [vmem:[%s969_s3 + $0x10] sm:$0xf] %vm509_vm2, %v615_v10  ;;  %v616_v17 = vpack.c.bf16 %v354_v12, %v354_v12  ;;  %v672_v19 = vpop.f32.mrb[8].mxu0  ;;  %530 = vst.msk [vmem:[%s969_s3 + $0x50] sm:$0xf] %vm509_vm2, %v631_v13  ;;  %v632_v20 = vpack.c.bf16 %v370_v15, %v370_v15  ;;  %v688_v22 = vpop.f32.mrb[8].mxu1 }
  0xea   :  { %517 = vst.msk [vmem:[%s969_s3 + $0x1c] sm:$0xf] %vm509_vm2, %v618_v14  ;;  %v263_v21 = vadd.f32 %v672_v19, %v804_v18  ;;  %v254_v23 = vpop.f32.mrb[9].mxu0  ;;  %533 = vst.msk [vmem:[%s969_s3 + $0x5c] sm:$0xf] %vm509_vm2, %v634_v16  ;;  %v327_v24 = vadd.f32 %v688_v22, %v804_v18  ;;  %v318_v26 = vpop.f32.mrb[9].mxu1 }
  0xeb   :  { %515 = vst.msk [vmem:[%s969_s3 + $0x14] sm:$0xf] %vm509_vm2, %v616_v17  ;;  %v255_v25 = vadd.f32 %v804_v18, %v254_v23  ;;  %v673_v27 = vpop.f32.mrb[10].mxu0  ;;  %531 = vst.msk [vmem:[%s969_s3 + $0x54] sm:$0xf] %vm509_vm2, %v632_v20  ;;  %v319_v29 = vadd.f32 %v804_v18, %v318_v26  ;;  %v689_v31 = vpop.f32.mrb[10].mxu1 }
  0xec   :  { %v359_v28 = vmax.f32 %v263_v21, 0.0  ;;  %v266_v30 = vadd.f32 %v673_v27, %v804_v18  ;;  %v257_v32 = vpop.f32.mrb[11].mxu0  ;;  %v375_v33 = vmax.f32 %v327_v24, 0.0  ;;  %v330_v35 = vadd.f32 %v689_v31, %v804_v18  ;;  %v321_v37 = vpop.f32.mrb[11].mxu1 }
  0xed   :  { %v357_v34 = vmax.f32 %v255_v25, 0.0  ;;  %v258_v36 = vadd.f32 %v804_v18, %v257_v32  ;;  %v373_v39 = vmax.f32 %v319_v29, 0.0  ;;  %v322_v41 = vadd.f32 %v804_v18, %v321_v37 }
  0xee   :  { %v621_v38 = vpack.c.bf16 %v359_v28, %v359_v28  ;;  %v360_v40 = vmax.f32 %v266_v30, 0.0  ;;  %v637_v42 = vpack.c.bf16 %v375_v33, %v375_v33  ;;  %v376_v44 = vmax.f32 %v330_v35, 0.0 }
  0xef   :  { %v619_v43 = vpack.c.bf16 %v357_v34, %v357_v34  ;;  %v358_v45 = vmax.f32 %v258_v36, 0.0  ;;  %v635_v46 = vpack.c.bf16 %v373_v39, %v373_v39  ;;  %v374_v48 = vmax.f32 %v322_v41, 0.0 }
  0xf0   :  { %520 = vst.msk [vmem:[%s969_s3 + $0x28] sm:$0xf] %vm509_vm2, %v621_v38  ;;  %v622_v47 = vpack.c.bf16 %v360_v40, %v360_v40  ;;  %536 = vst.msk [vmem:[%s969_s3 + $0x68] sm:$0xf] %vm509_vm2, %v637_v42  ;;  %v638_v49 = vpack.c.bf16 %v376_v44, %v376_v44 }
  0xf1   :  { %518 = vst.msk [vmem:[%s969_s3 + $0x20] sm:$0xf] %vm509_vm2, %v619_v43  ;;  %v620_v50 = vpack.c.bf16 %v358_v45, %v358_v45  ;;  %v676_v51 = vpop.f32.mrb[12].mxu0  ;;  %534 = vst.msk [vmem:[%s969_s3 + $0x60] sm:$0xf] %vm509_vm2, %v635_v46  ;;  %v636_v52 = vpack.c.bf16 %v374_v48, %v374_v48  ;;  %v692_v54 = vpop.f32.mrb[12].mxu1 }
  0xf2   :  { %521 = vst.msk [vmem:[%s969_s3 + $0x2c] sm:$0xf] %vm509_vm2, %v622_v47  ;;  %v279_v53 = vadd.f32 %v676_v51, %v804_v18  ;;  %v270_v55 = vpop.f32.mrb[13].mxu0  ;;  %537 = vst.msk [vmem:[%s969_s3 + $0x6c] sm:$0xf] %vm509_vm2, %v638_v49  ;;  %v343_v56 = vadd.f32 %v692_v54, %v804_v18  ;;  %v334_v58 = vpop.f32.mrb[13].mxu1 }
  0xf3   :  { %519 = vst.msk [vmem:[%s969_s3 + $0x24] sm:$0xf] %vm509_vm2, %v620_v50  ;;  %v271_v57 = vadd.f32 %v804_v18, %v270_v55  ;;  %v677_v59 = vpop.f32.mrb[14].mxu0  ;;  %535 = vst.msk [vmem:[%s969_s3 + $0x64] sm:$0xf] %vm509_vm2, %v636_v52  ;;  %v335_v61 = vadd.f32 %v804_v18, %v334_v58  ;;  %v693_v63 = vpop.f32.mrb[14].mxu1 }
  0xf4   :  { %v363_v60 = vmax.f32 %v279_v53, 0.0  ;;  %v282_v62 = vadd.f32 %v677_v59, %v804_v18  ;;  %v273_v0 = vpop.f32.mrb[15].mxu0  ;;  %v379_v1 = vmax.f32 %v343_v56, 0.0  ;;  %v346_v3 = vadd.f32 %v693_v63, %v804_v18  ;;  %v337_v5 = vpop.f32.mrb[15].mxu1 }
  0xf5   :  { %v361_v2 = vmax.f32 %v271_v57, 0.0  ;;  %v274_v4 = vadd.f32 %v804_v18, %v273_v0  ;;  %v377_v7 = vmax.f32 %v335_v61, 0.0  ;;  %v338_v9 = vadd.f32 %v804_v18, %v337_v5 }
  0xf6   :  { %v625_v6 = vpack.c.bf16 %v363_v60, %v363_v60  ;;  %v364_v8 = vmax.f32 %v282_v62, 0.0  ;;  %v641_v10 = vpack.c.bf16 %v379_v1, %v379_v1  ;;  %v380_v12 = vmax.f32 %v346_v3, 0.0 }
  0xf7   :  { %v623_v11 = vpack.c.bf16 %v361_v2, %v361_v2  ;;  %v362_v13 = vmax.f32 %v274_v4, 0.0  ;;  %v639_v14 = vpack.c.bf16 %v377_v7, %v377_v7  ;;  %v378_v16 = vmax.f32 %v338_v9, 0.0 }
  0xf8   :  { %524 = vst.msk [vmem:[%s969_s3 + $0x38] sm:$0xf] %vm509_vm2, %v625_v6  ;;  %v626_v15 = vpack.c.bf16 %v364_v8, %v364_v8  ;;  %540 = vst.msk [vmem:[%s969_s3 + $0x78] sm:$0xf] %vm509_vm2, %v641_v10  ;;  %v642_v18 = vpack.c.bf16 %v380_v12, %v380_v12 }
  0xf9   :  { %522 = vst.msk [vmem:[%s969_s3 + $0x30] sm:$0xf] %vm509_vm2, %v623_v11  ;;  %v624_v17 = vpack.c.bf16 %v362_v13, %v362_v13  ;;  %538 = vst.msk [vmem:[%s969_s3 + $0x70] sm:$0xf] %vm509_vm2, %v639_v14  ;;  %v640_v19 = vpack.c.bf16 %v378_v16, %v378_v16 }
  0xfa   :  { %525 = vst.msk [vmem:[%s969_s3 + $0x3c] sm:$0xf] %vm509_vm2, %v626_v15  ;;  %541 = vst.msk [vmem:[%s969_s3 + $0x7c] sm:$0xf] %vm509_vm2, %v642_v18 }
  0xfb   :  { %523 = vst.msk [vmem:[%s969_s3 + $0x34] sm:$0xf] %vm509_vm2, %v624_v17  ;;  %539 = vst.msk [vmem:[%s969_s3 + $0x74] sm:$0xf] %vm509_vm2, %v640_v19 }

// kernel: _lambda_.25
= control target key start
LH: loop header
LB: loop body
LE: loop exit
PB: predicated region body
PF: predicated region fallthrough
CT: control target
= control target key end

     0   :  { %vm115_vm0 = vcmask 130048   ;;  %v5417_v18 = vmov 0.0   ;;  %vm5418_vm1 = vmmov 0   ;;  %vm493_vm2 = vcmask 64512   ;;  %s5422_s22 = smov 120   ;;  %s5423_s23 = smov 88   ;;  %s6629_s3 = inlined_call_operand.vmem [shape: bf16[16,48], index: 3, kind: input, shape index: {}]   ;;  %s6630_s1 = inlined_call_operand.vmem [shape: bf16[16,8,16], index: 1, kind: input, shape index: {}]   ;;  %s6631_s2 = inlined_call_operand.vmem [shape: bf16[16,48], index: 2, kind: input, shape index: {}]   ;;  %s6632_s0 = inlined_call_operand.vmem [shape: bf16[16,8,16], index: 0, kind: input, shape index: {}]   ;;  %s6633_s4 = inlined_call_operand.vmem [shape: f32[1,48], index: 4, kind: input, shape index: {}]   ;;  %s6634_s5 = inlined_call_operand.vmem [shape: bf16[16,16], index: 5, kind: input, shape index: {}]   ;;  %s6635_s7 = inlined_call_operand.vmem [shape: bf16[16,16], index: 7, kind: input, shape index: {}]   ;;  %s6636_s6 = inlined_call_operand.vmem [shape: f32[1,16], index: 6, kind: input, shape index: {}]   ;;  %s6637_s8 = inlined_call_operand.vmem [shape: f32[1,16], index: 8, kind: input, shape index: {}]   ;;  %s6638_s9 = inlined_call_operand.vmem [shape: bf16[16,8,16], index: 9, kind: output, shape index: {}]  }
   0x1   :  { %v5269_v0 = vld [vmem:[%s6629_s3] sm:$0xff]   ;;  %v5271_v2 = vld [vmem:[%s6630_s1 + $0x8] sm:$0xff]   ;;  %v5273_v4 = vld [vmem:[%s6630_s1 + $0x10] sm:$0xff]   ;;  %4785 = vmatprep.subr.bf16.mxu1 %v5417_v18  ;;  %4787 = vmatprep.mubr.msk.bf16.mxu1 %vm5418_vm1, %v5417_v18  ;;  %vm1473_vm3 = vcmask 1043456   ;;  %s5424_s26 = smov 8   ;;  %vm4413_vm4 = vcmask 125952  }
   0x2   :  { %v5270_v1 = vld [vmem:[%s6630_s1] sm:$0xff]   ;;  %4749 = vmatprep.subr.bf16.mxu0 %v5269_v0  ;;  %v5274_v5 = vld [vmem:[%s6630_s1 + $0x18] sm:$0xff]   ;;  %v5276_v7 = vld [vmem:[%s6630_s1 + $0x28] sm:$0xff]  }
   0x3   :  { %4750 = vmatpush3.bf16.msra.mxu0 %v5269_v0  ;;  %4751 = vmatprep.mubr.msk.bf16.mxu0 %vm115_vm0, %v5270_v1  ;;  %v5272_v3 = vld [vmem:[%s6631_s2] sm:$0xff]   ;;  %v5277_v8 = vld [vmem:[%s6630_s1 + $0x30] sm:$0xff]   ;;  %v5278_v9 = vld [vmem:[%s6630_s1 + $0x38] sm:$0xff]   ;;  %s5421_s2 = smov 104  }
   0x4   :  { %4767 = vmatprep.subr.bf16.mxu0 %v5272_v3  ;;  %v5275_v6 = vld [vmem:[%s6630_s1 + $0x20] sm:$0xff]   ;;  %v5280_v11 = vld [vmem:[%s6632_s0 + $0x8] sm:$0xff]   ;;  %v5281_v12 = vld [vmem:[%s6632_s0 + $0x10] sm:$0xff]  }
   0x5   :  { %v5279_v10 = vld [vmem:[%s6632_s0] sm:$0xff]   ;;  %v5282_v13 = vld [vmem:[%s6632_s0 + $0x18] sm:$0xff]   ;;  %v5284_v15 = vld [vmem:[%s6632_s0 + $0x28] sm:$0xff]  }
   0x6   :  { %4752 = vmatmul.mubr.msk.bf16.vlgmr.msra.gmra.mrb[0].mxu0 %vm115_vm0, %v5271_v2  ;;  %v5283_v14 = vld [vmem:[%s6632_s0 + $0x20] sm:$0xff]   ;;  %v5285_v16 = vld [vmem:[%s6632_s0 + $0x30] sm:$0xff]   ;;  %v5286_v17 = vld [vmem:[%s6632_s0 + $0x38] sm:$0xff]   ;;  %s5419_s0 = smov 112  }
   0x7   :  { %4768 = vmatpush3.bf16.msra.mxu0 %v5272_v3  ;;  %4755 = vmatprep.mubr.msk.bf16.mxu0 %vm115_vm0, %v5273_v4  ;;  %v5550_v19 = vld [vmem:[%s6633_s4] ss:$0 sm:$0xff]  ;;  %s5420_s4 = smov 96  }
   0x8   :  { %4833 = vmatprep.subr.bf16.mxu0 %v5417_v18 }
   0xe   :  { %4756 = vmatmul.mubr.msk.bf16.gmra.mrb[4].mxu0 %vm115_vm0, %v5274_v5 }
   0xf   :  { %4759 = vmatprep.mubr.msk.bf16.mxu0 %vm115_vm0, %v5275_v6 }
  0x16   :  { %4760 = vmatmul.mubr.msk.bf16.gmra.mrb[8].mxu0 %vm115_vm0, %v5276_v7 }
  0x17   :  { %4763 = vmatprep.mubr.msk.bf16.mxu0 %vm115_vm0, %v5277_v8 }
  0x1e   :  { %4764 = vmatmul.mubr.msk.bf16.gmra.mrb[12].mxu0 %vm115_vm0, %v5278_v9 }
  0x1f   :  { %4769 = vmatprep.mubr.msk.bf16.mxu0 %vm115_vm0, %v5279_v10 }
  0x26   :  { %4770 = vmatmul.mubr.msk.bf16.vlgmr.msra.gmra.mrb[0].mxu0 %vm115_vm0, %v5280_v11 }
  0x27   :  { %4773 = vmatprep.mubr.msk.bf16.mxu0 %vm115_vm0, %v5281_v12 }
  0x2e   :  { %4774 = vmatmul.mubr.msk.bf16.gmra.mrb[4].mxu0 %vm115_vm0, %v5282_v13 }
  0x2f   :  { %4777 = vmatprep.mubr.msk.bf16.mxu0 %vm115_vm0, %v5283_v14 }
  0x36   :  { %4778 = vmatmul.mubr.msk.bf16.gmra.mrb[8].mxu0 %vm115_vm0, %v5284_v15 }
  0x37   :  { %4781 = vmatprep.mubr.msk.bf16.mxu0 %vm115_vm0, %v5285_v16 }
  0x3e   :  { %4782 = vmatmul.mubr.msk.bf16.gmra.mrb[12].mxu0 %vm115_vm0, %v5286_v17 }
  0x3f   :  { %4835 = vmatprep.mubr.msk.bf16.mxu0 %vm5418_vm1, %v5417_v18 }
  0xf9   :  { %v4771_v20 = vpop.f32.mrb[0].mxu0 }
  0xfa   :  { %v413_v21 = vadd.f32 %v4771_v20, %v5550_v19  ;;  %v341_v22 = vpop.f32.mrb[1].mxu0 }
  0xfb   :  { %v411_v23 = vadd.f32 %v5550_v19, %v341_v22  ;;  %v4772_v24 = vpop.f32.mrb[2].mxu0 }
  0xfc   :  { %v429_v25 = vmax.f32 %v413_v21, 0.0  ;;  %v414_v26 = vadd.f32 %v4772_v24, %v5550_v19  ;;  %v344_v27 = vpop.f32.mrb[3].mxu0 }
  0xfd   :  { %v427_v28 = vmax.f32 %v411_v23, 0.0  ;;  %v412_v29 = vadd.f32 %v5550_v19, %v344_v27 }
  0xfe   :  { %v5560_v30 = vpack.c.bf16 %v429_v25, %v429_v25  ;;  %v430_v31 = vmax.f32 %v414_v26, 0.0 }
  0xff   :  { %v5562_v32 = vpack.c.bf16 %v427_v28, %v427_v28  ;;  %v428_v33 = vmax.f32 %v412_v29, 0.0 }
 0x100   :  { %588 = vrot.lane.b32.xlu1 %v5560_v30, %s5419_s0  ;;  %v5568_v35 = vpack.c.bf16 %v430_v31, %v430_v31 }
 0x101   :  { %491 = vrot.lane.b32.xlu0 %v5562_v32, %s5419_s0  ;;  %v4775_v34 = vpop.f32.mrb[4].mxu0  ;;  %v5570_v37 = vpack.c.bf16 %v428_v33, %v428_v33 }
 0x102   :  { %v357_v36 = vpop.f32.mrb[5].mxu0  ;;  %v417_v38 = vadd.f32 %v4775_v34, %v5550_v19 }
 0x103   :  { %v415_v39 = vadd.f32 %v5550_v19, %v357_v36  ;;  %v4776_v40 = vpop.f32.mrb[6].mxu0 }
 0x104   :  { %636 = vrot.lane.b32.xlu1 %v5568_v35, %s5419_s0  ;;  %v360_v41 = vpop.f32.mrb[7].mxu0  ;;  %v418_v43 = vadd.f32 %v4776_v40, %v5550_v19  ;;  %v433_v45 = vmax.f32 %v417_v38, 0.0 }
 0x105   :  { %v431_v42 = vmax.f32 %v415_v39, 0.0  ;;  %v416_v44 = vadd.f32 %v5550_v19, %v360_v41  ;;  %540 = vrot.lane.b32.xlu0 %v5570_v37, %s5419_s0 }
 0x106   :  { %v434_v48 = vmax.f32 %v418_v43, 0.0  ;;  %v5586_v52 = vpack.c.bf16 %v433_v45, %v433_v45 }
 0x107   :  { %v5580_v46 = vpack.c.bf16 %v431_v42, %v431_v42  ;;  %v432_v47 = vmax.f32 %v416_v44, 0.0 }
 0x108   :  { %v5592_v57 = vpack.c.bf16 %v434_v48, %v434_v48 }
 0x109   :  { %v5582_v49 = vpack.c.bf16 %v432_v47, %v432_v47  ;;  %684 = vrot.lane.b32.xlu0 %v5580_v46, %s5419_s0  ;;  %v4779_v50 = vpop.f32.mrb[8].mxu0 }
 0x10a   :  { %v373_v51 = vpop.f32.mrb[9].mxu0  ;;  %v421_v53 = vadd.f32 %v4779_v50, %v5550_v19 }
 0x10b   :  { %v419_v54 = vadd.f32 %v5550_v19, %v373_v51  ;;  %732 = vrot.lane.b32.xlu1 %v5582_v49, %s5419_s0  ;;  %v4780_v55 = vpop.f32.mrb[10].mxu0 }
 0x10c   :  { %v376_v56 = vpop.f32.mrb[11].mxu0  ;;  %v422_v59 = vadd.f32 %v4780_v55, %v5550_v19  ;;  %v437_v61 = vmax.f32 %v421_v53, 0.0 }
 0x10d   :  { %v435_v58 = vmax.f32 %v419_v54, 0.0  ;;  %v420_v60 = vadd.f32 %v5550_v19, %v376_v56  ;;  %780 = vrot.lane.b32.xlu0 %v5586_v52, %s5419_s0 }
 0x10e   :  { %v438_v0 = vmax.f32 %v422_v59, 0.0  ;;  %v5606_v4 = vpack.c.bf16 %v437_v61, %v437_v61 }
 0x10f   :  { %v5598_v62 = vpack.c.bf16 %v435_v58, %v435_v58  ;;  %v436_v63 = vmax.f32 %v420_v60, 0.0  ;;  %828 = vrot.lane.b32.xlu1 %v5592_v57, %s5419_s0 }
 0x110   :  { %v5612_v9 = vpack.c.bf16 %v438_v0, %v438_v0 }
 0x111   :  { %v5602_v1 = vpack.c.bf16 %v436_v63, %v436_v63  ;;  %876 = vrot.lane.b32.xlu0 %v5598_v62, %s5419_s0  ;;  %v4783_v2 = vpop.f32.mrb[12].mxu0 }
 0x112   :  { %v389_v3 = vpop.f32.mrb[13].mxu0  ;;  %v425_v5 = vadd.f32 %v4783_v2, %v5550_v19 }
 0x113   :  { %v423_v6 = vadd.f32 %v5550_v19, %v389_v3  ;;  %924 = vrot.lane.b32.xlu1 %v5602_v1, %s5419_s0  ;;  %v4784_v7 = vpop.f32.mrb[14].mxu0 }
 0x114   :  { %v392_v8 = vpop.f32.mrb[15].mxu0  ;;  %v426_v11 = vadd.f32 %v4784_v7, %v5550_v19  ;;  %v441_v13 = vmax.f32 %v425_v5, 0.0 }
 0x115   :  { %v439_v10 = vmax.f32 %v423_v6, 0.0  ;;  %v424_v12 = vadd.f32 %v5550_v19, %v392_v8  ;;  %972 = vrot.lane.b32.xlu0 %v5606_v4, %s5419_s0 }
 0x116   :  { %v442_v16 = vmax.f32 %v426_v11, 0.0  ;;  %v5626_v20 = vpack.c.bf16 %v441_v13, %v441_v13 }
 0x117   :  { %v5618_v14 = vpack.c.bf16 %v439_v10, %v439_v10  ;;  %v440_v15 = vmax.f32 %v424_v12, 0.0  ;;  %1020 = vrot.lane.b32.xlu1 %v5612_v9, %s5419_s0 }
 0x118   :  { %v5630_v19 = vpack.c.bf16 %v442_v16, %v442_v16 }
 0x119   :  { %v5622_v17 = vpack.c.bf16 %v440_v15, %v440_v15  ;;  %1068 = vrot.lane.b32.xlu0 %v5618_v14, %s5419_s0 }
 0x11b   :  { %1116 = vrot.lane.b32.xlu1 %v5622_v17, %s5419_s0 }
 0x11d   :  { %1164 = vrot.lane.b32.xlu0 %v5626_v20, %s5419_s0 }
 0x11f   :  { %1212 = vrot.lane.b32.xlu1 %v5630_v19, %s5419_s0 }
 0x121   :  { %1517 = vrot.lane.b32.xlu0 %v5570_v37, %s5420_s4 }
 0x123   :  { %1468 = vrot.lane.b32.xlu1 %v5562_v32, %s5420_s4 }
 0x125   :  { %1613 = vrot.lane.b32.xlu0 %v5568_v35, %s5420_s4 }
 0x127   :  { %1565 = vrot.lane.b32.xlu1 %v5560_v30, %s5420_s4 }
 0x172   :  { %v589_v21 = vpop.permute.xlu1 %588 }
 0x173   :  { %v492_v22 = vpop.permute.xlu0 %491  ;;  %v594_v34 = vsel %vm493_vm2, %v589_v21, 0 }
 0x174   :  { %v498_v23 = vsel %vm493_vm2, %v492_v22, 0 }
 0x175   :  { %4786 = vmatpush3.bf16.xpose.msra.mxu1 %v498_v23 }
 0x176   :  { %4791 = vmatprep.subr.bf16.mxu1 %v5417_v18  ;;  %v637_v25 = vpop.permute.xlu1 %636 }
 0x177   :  { %v541_v24 = vpop.permute.xlu0 %540  ;;  %v642_v40 = vsel %vm493_vm2, %v637_v25, 0 }
 0x178   :  { %v546_v27 = vsel %vm493_vm2, %v541_v24, 0 }
 0x17b   :  { %v685_v26 = vpop.permute.xlu0 %684 }
 0x17c   :  { %4788 = vmatmul.mubr.msk.bf16.vlgmr.msra.gmra.mrb[0].mxu1 %vm493_vm2, %v5562_v32  ;;  %v690_v44 = vsel %vm493_vm2, %v685_v26, 0 }
 0x17d   :  { %4792 = vmatpush3.bf16.xpose.msra.mxu1 %v546_v27  ;;  %v733_v28 = vpop.permute.xlu1 %732  ;;  %4793 = vmatprep.mubr.msk.bf16.mxu1 %vm5418_vm1, %v5417_v18 }
 0x17e   :  { %4797 = vmatprep.subr.bf16.mxu1 %v5417_v18  ;;  %v738_v51 = vsel %vm493_vm2, %v733_v28, 0 }
 0x17f   :  { %v781_v29 = vpop.permute.xlu0 %780 }
 0x180   :  { %v786_v55 = vsel %vm493_vm2, %v781_v29, 0 }
 0x181   :  { %v829_v31 = vpop.permute.xlu1 %828 }
 0x182   :  { %v834_v58 = vsel %vm493_vm2, %v829_v31, 0 }
 0x183   :  { %v877_v33 = vpop.permute.xlu0 %876 }
 0x184   :  { %v882_v36 = vsel %vm493_vm2, %v877_v33, 0  ;;  %4794 = vmatmul.mubr.msk.bf16.vlgmr.msra.gmra.mrb[4].mxu1 %vm493_vm2, %v5570_v37 }
 0x185   :  { %4798 = vmatpush3.bf16.xpose.msra.mxu1 %v594_v34  ;;  %4834 = vmatpush3.bf16.xpose.msra.mxu0 %v882_v36  ;;  %v925_v38 = vpop.permute.xlu1 %924 }
 0x186   :  { %4799 = vmatprep.mubr.msk.bf16.mxu1 %vm5418_vm1, %v5417_v18  ;;  %4803 = vmatprep.subr.bf16.mxu1 %v5417_v18  ;;  %v930_v59 = vsel %vm493_vm2, %v925_v38, 0 }
 0x187   :  { %4845 = vmatprep.subr.bf16.mxu0 %v5417_v18  ;;  %v973_v39 = vpop.permute.xlu0 %972 }
 0x188   :  { %v978_v41 = vsel %vm493_vm2, %v973_v39, 0 }
 0x189   :  { %v1021_v42 = vpop.permute.xlu1 %1020 }
 0x18a   :  { %v1026_v60 = vsel %vm493_vm2, %v1021_v42, 0 }
 0x18b   :  { %v1069_v43 = vpop.permute.xlu0 %1068 }
 0x18c   :  { %4800 = vmatmul.mubr.msk.bf16.vlgmr.msra.gmra.mrb[8].mxu1 %vm493_vm2, %v5560_v30  ;;  %4836 = vmatmul.mubr.msk.bf16.vlgmr.msra.gmra.mrb[16].mxu0 %vm493_vm2, %v5598_v62  ;;  %v1074_v45 = vsel %vm493_vm2, %v1069_v43, 0 }
 0x18d   :  { %4804 = vmatpush3.bf16.xpose.msra.mxu1 %v642_v40  ;;  %4846 = vmatpush3.bf16.xpose.msra.mxu0 %v978_v41  ;;  %v1117_v47 = vpop.permute.xlu1 %1116 }
 0x18e   :  { %4805 = vmatprep.mubr.msk.bf16.mxu1 %vm5418_vm1, %v5417_v18  ;;  %4847 = vmatprep.mubr.msk.bf16.mxu0 %vm5418_vm1, %v5417_v18  ;;  %v1122_v61 = vsel %vm493_vm2, %v1117_v47, 0 }
 0x18f   :  { %4809 = vmatprep.subr.bf16.mxu1 %v5417_v18  ;;  %4857 = vmatprep.subr.bf16.mxu0 %v5417_v18  ;;  %v1165_v48 = vpop.permute.xlu0 %1164 }
 0x190   :  { %v1170_v53 = vsel %vm493_vm2, %v1165_v48, 0 }
 0x191   :  { %v1213_v50 = vpop.permute.xlu1 %1212 }
 0x192   :  { %v1218_v63 = vsel %vm493_vm2, %v1213_v50, 0 }
 0x193   :  { %v1518_v0 = vpop.permute.xlu0 %1517 }
 0x194   :  { %4806 = vmatmul.mubr.msk.bf16.vlgmr.msra.gmra.mrb[12].mxu1 %vm493_vm2, %v5568_v35  ;;  %4848 = vmatmul.mubr.msk.bf16.vlgmr.msra.gmra.mrb[20].mxu0 %vm493_vm2, %v5606_v4  ;;  %v1523_v2 = vsel %vm1473_vm3, %v1518_v0, 0 }
 0x195   :  { %4810 = vmatpush3.bf16.xpose.msra.mxu1 %v690_v44  ;;  %4858 = vmatpush3.bf16.xpose.msra.mxu0 %v1074_v45  ;;  %v1469_v54 = vpop.permute.xlu1 %1468 }
 0x196   :  { %4811 = vmatprep.mubr.msk.bf16.mxu1 %vm5418_vm1, %v5417_v18  ;;  %4859 = vmatprep.mubr.msk.bf16.mxu0 %vm5418_vm1, %v5417_v18  ;;  %v1475_v56 = vsel %vm1473_vm3, %v1469_v54, 0 }
 0x197   :  { %4815 = vmatprep.subr.bf16.mxu1 %v5417_v18  ;;  %4869 = vmatprep.subr.bf16.mxu0 %v5417_v18 }
 0x19c   :  { %4812 = vmatmul.mubr.msk.bf16.vlgmr.msra.gmra.mrb[16].mxu1 %vm493_vm2, %v5580_v46  ;;  %4860 = vmatmul.mubr.msk.bf16.vlgmr.msra.gmra.mrb[24].mxu0 %vm493_vm2, %v5618_v14 }
 0x19d   :  { %4816 = vmatpush3.bf16.xpose.msra.mxu1 %v738_v51  ;;  %4870 = vmatpush3.bf16.xpose.msra.mxu0 %v1170_v53 }
 0x19e   :  { %4817 = vmatprep.mubr.msk.bf16.mxu1 %vm5418_vm1, %v5417_v18  ;;  %4871 = vmatprep.mubr.msk.bf16.mxu0 %vm5418_vm1, %v5417_v18 }
 0x19f   :  { %4821 = vmatprep.subr.bf16.mxu1 %v5417_v18  ;;  %4881 = vmatprep.subr.bf16.mxu0 %v5417_v18 }
 0x1a4   :  { %4818 = vmatmul.mubr.msk.bf16.vlgmr.msra.gmra.mrb[20].mxu1 %vm493_vm2, %v5582_v49  ;;  %4872 = vmatmul.mubr.msk.bf16.vlgmr.msra.gmra.mrb[28].mxu0 %vm493_vm2, %v5626_v20 }
 0x1a5   :  { %4822 = vmatpush3.bf16.xpose.msra.mxu1 %v786_v55  ;;  %4882 = vmatpush3.bf16.msra.mxu0 %v1475_v56 }
 0x1a6   :  { %4823 = vmatprep.mubr.msk.bf16.mxu1 %vm5418_vm1, %v5417_v18  ;;  %4827 = vmatprep.subr.bf16.mxu1 %v5417_v18 }
 0x1a7   :  { %4883 = vmatprep.mubr.msk.bf16.mxu0 %vm5418_vm1, %v5417_v18  ;;  %4893 = vmatprep.subr.bf16.mxu0 %v5417_v18 }
 0x1ac   :  { %4824 = vmatmul.mubr.msk.bf16.vlgmr.msra.gmra.mrb[24].mxu1 %vm493_vm2, %v5586_v52 }
 0x1ad   :  { %4828 = vmatpush3.bf16.xpose.msra.mxu1 %v834_v58  ;;  %4829 = vmatprep.mubr.msk.bf16.mxu1 %vm5418_vm1, %v5417_v18 }
 0x1ae   :  { %4839 = vmatprep.subr.bf16.mxu1 %v5417_v18 }
 0x1b4   :  { %4830 = vmatmul.mubr.msk.bf16.vlgmr.msra.gmra.mrb[28].mxu1 %vm493_vm2, %v5592_v57 }
 0x1b5   :  { %4840 = vmatpush3.bf16.xpose.msra.mxu1 %v930_v59  ;;  %4841 = vmatprep.mubr.msk.bf16.mxu1 %vm5418_vm1, %v5417_v18 }
 0x1b6   :  { %4851 = vmatprep.subr.bf16.mxu1 %v5417_v18 }
 0x1bc   :  { %4842 = vmatmul.mubr.msk.bf16.vlgmr.msra.gmra.mrb[32].mxu1 %vm493_vm2, %v5602_v1 }
 0x1bd   :  { %4852 = vmatpush3.bf16.xpose.msra.mxu1 %v1026_v60  ;;  %4853 = vmatprep.mubr.msk.bf16.mxu1 %vm5418_vm1, %v5417_v18 }
 0x1be   :  { %4863 = vmatprep.subr.bf16.mxu1 %v5417_v18 }
 0x1c4   :  { %4854 = vmatmul.mubr.msk.bf16.vlgmr.msra.gmra.mrb[36].mxu1 %vm493_vm2, %v5612_v9 }
 0x1c5   :  { %4864 = vmatpush3.bf16.xpose.msra.mxu1 %v1122_v61  ;;  %4865 = vmatprep.mubr.msk.bf16.mxu1 %vm5418_vm1, %v5417_v18 }
 0x1c6   :  { %4875 = vmatprep.subr.bf16.mxu1 %v5417_v18 }
 0x1cc   :  { %4866 = vmatmul.mubr.msk.bf16.vlgmr.msra.gmra.mrb[40].mxu1 %vm493_vm2, %v5622_v17 }
 0x1cd   :  { %4876 = vmatpush3.bf16.xpose.msra.mxu1 %v1218_v63  ;;  %4877 = vmatprep.mubr.msk.bf16.mxu1 %vm5418_vm1, %v5417_v18 }
 0x1ce   :  { %4887 = vmatprep.subr.bf16.mxu1 %v5417_v18 }
 0x1d4   :  { %4878 = vmatmul.mubr.msk.bf16.vlgmr.msra.gmra.mrb[44].mxu1 %vm493_vm2, %v5630_v19 }
 0x1d5   :  { %4888 = vmatpush3.bf16.msra.mxu1 %v1523_v2  ;;  %4889 = vmatprep.mubr.msk.bf16.mxu1 %vm5418_vm1, %v5417_v18 }
 0x1d6   :  { %4899 = vmatprep.subr.bf16.mxu1 %v5417_v18 }
 0x24f   :  { %v534_v3 = vpop.f32.mrb[0].mxu1 }
 0x250   :  { %v5744_v5 = vmul.f32 0.35355338, %v534_v3  ;;  %v4789_v6 = vpop.f32.mrb[1].mxu1 }
 0x251   :  { %v537_v7 = vpop.f32.mrb[2].mxu1 }
 0x252   :  { %v4790_v8 = vpop.f32.mrb[3].mxu1  ;;  %v1276_v10 = vsel %vm493_vm2, %v5744_v5, -inf }
 0x253   :  { %1277 = vmax.xlane.f32.xlu0 %v1276_v10 }
 0x257   :  { %v582_v11 = vpop.f32.mrb[4].mxu1 }
 0x258   :  { %v5748_v12 = vmul.f32 0.35355338, %v582_v11  ;;  %v4795_v13 = vpop.f32.mrb[5].mxu1 }
 0x259   :  { %v585_v15 = vpop.f32.mrb[6].mxu1 }
 0x25a   :  { %v4796_v16 = vpop.f32.mrb[7].mxu1  ;;  %v1279_v21 = vsel %vm493_vm2, %v5748_v12, -inf }
 0x25b   :  { %1280 = vmax.xlane.f32.xlu1 %v1279_v21 }
 0x25f   :  { %v630_v22 = vpop.f32.mrb[8].mxu1  ;;  %v918_v23 = vpop.f32.mrb[16].mxu0 }
 0x260   :  { %v5752_v24 = vmul.f32 0.35355338, %v630_v22  ;;  %v5754_v25 = vmul.f32 0.35355338, %v918_v23  ;;  %v4801_v26 = vpop.f32.mrb[9].mxu1  ;;  %v4837_v27 = vpop.f32.mrb[17].mxu0 }
 0x261   :  { %v633_v28 = vpop.f32.mrb[10].mxu1  ;;  %v921_v29 = vpop.f32.mrb[18].mxu0 }
 0x262   :  { %v4802_v31 = vpop.f32.mrb[11].mxu1  ;;  %v4838_v33 = vpop.f32.mrb[19].mxu0  ;;  %v1282_v34 = vsel %vm493_vm2, %v5752_v24, -inf  ;;  %v1300_v36 = vsel %vm493_vm2, %v5754_v25, -inf }
 0x263   :  { %1283 = vmax.xlane.f32.xlu0 %v1282_v34  ;;  %1301 = vmax.xlane.f32.xlu1 %v1300_v36 }
 0x267   :  { %v678_v38 = vpop.f32.mrb[12].mxu1  ;;  %v1014_v39 = vpop.f32.mrb[20].mxu0 }
 0x268   :  { %v5760_v40 = vmul.f32 0.35355338, %v678_v38  ;;  %v5762_v41 = vmul.f32 0.35355338, %v1014_v39  ;;  %v4807_v42 = vpop.f32.mrb[13].mxu1  ;;  %v4849_v43 = vpop.f32.mrb[21].mxu0 }
 0x269   :  { %v681_v44 = vpop.f32.mrb[14].mxu1  ;;  %v1017_v45 = vpop.f32.mrb[22].mxu0 }
 0x26a   :  { %v4808_v47 = vpop.f32.mrb[15].mxu1  ;;  %v4850_v48 = vpop.f32.mrb[23].mxu0  ;;  %v1285_v50 = vsel %vm493_vm2, %v5760_v40, -inf  ;;  %v1306_v51 = vsel %vm493_vm2, %v5762_v41, -inf }
 0x26b   :  { %1286 = vmax.xlane.f32.xlu0 %v1285_v50  ;;  %1307 = vmax.xlane.f32.xlu1 %v1306_v51 }
 0x26f   :  { %v726_v53 = vpop.f32.mrb[16].mxu1  ;;  %v1110_v54 = vpop.f32.mrb[24].mxu0 }
 0x270   :  { %v5768_v55 = vmul.f32 0.35355338, %v726_v53  ;;  %v4813_v56 = vpop.f32.mrb[17].mxu1  ;;  %v4861_v58 = vpop.f32.mrb[25].mxu0  ;;  %v5770_v61 = vmul.f32 0.35355338, %v1110_v54 }
 0x271   :  { %v729_v59 = vpop.f32.mrb[18].mxu1  ;;  %v1113_v60 = vpop.f32.mrb[26].mxu0 }
 0x272   :  { %v4814_v63 = vpop.f32.mrb[19].mxu1  ;;  %v4862_v0 = vpop.f32.mrb[27].mxu0  ;;  %v1288_v2 = vsel %vm493_vm2, %v5768_v55, -inf  ;;  %v1312_v3 = vsel %vm493_vm2, %v5770_v61, -inf }
 0x273   :  { %1289 = vmax.xlane.f32.xlu1 %v1288_v2 }
 0x277   :  { %v774_v6 = vpop.f32.mrb[20].mxu1  ;;  %v1206_v7 = vpop.f32.mrb[28].mxu0  ;;  %1313 = vmax.xlane.f32.xlu1 %v1312_v3 }
 0x278   :  { %v5776_v8 = vmul.f32 0.35355338, %v774_v6  ;;  %v5778_v10 = vmul.f32 0.35355338, %v1206_v7  ;;  %v4819_v11 = vpop.f32.mrb[21].mxu1  ;;  %v4873_v13 = vpop.f32.mrb[29].mxu0 }
 0x279   :  { %v777_v15 = vpop.f32.mrb[22].mxu1  ;;  %v1209_v16 = vpop.f32.mrb[30].mxu0 }
 0x27a   :  { %v4820_v21 = vpop.f32.mrb[23].mxu1  ;;  %v4874_v22 = vpop.f32.mrb[31].mxu0  ;;  %v1291_v23 = vsel %vm493_vm2, %v5776_v8, -inf  ;;  %v1318_v26 = vsel %vm493_vm2, %v5778_v10, -inf }
 0x27b   :  { %1292 = vmax.xlane.f32.xlu0 %v1291_v23  ;;  %1319 = vmax.xlane.f32.xlu1 %v1318_v26  ;;  %v5816_v26 = vpop.permute.xlu0 %1613 }
 0x27f   :  { %v822_v27 = vpop.f32.mrb[24].mxu1 }
 0x280   :  { %v5784_v28 = vmul.f32 0.35355338, %v822_v27  ;;  %v4825_v29 = vpop.f32.mrb[25].mxu1 }
 0x281   :  { %v825_v31 = vpop.f32.mrb[26].mxu1 }
 0x282   :  { %v4826_v33 = vpop.f32.mrb[27].mxu1  ;;  %v1294_v34 = vsel %vm493_vm2, %v5784_v28, -inf }
 0x283   :  { %1295 = vmax.xlane.f32.xlu1 %v1294_v34  ;;  %v5819_v33 = vpop.permute.xlu1 %1565 }
 0x287   :  { %v870_v36 = vpop.f32.mrb[28].mxu1 }
 0x288   :  { %v4831_v38 = vpop.f32.mrb[29].mxu1  ;;  %v5796_v3 = vmul.f32 0.35355338, %v870_v36 }
 0x289   :  { %v873_v39 = vpop.f32.mrb[30].mxu1 }
 0x28a   :  { %v4832_v42 = vpop.f32.mrb[31].mxu1  ;;  %v1297_v7 = vsel %vm493_vm2, %v5796_v3, -inf }
 0x28f   :  { %v966_v43 = vpop.f32.mrb[32].mxu1 }
 0x290   :  { %v4843_v44 = vpop.f32.mrb[33].mxu1  ;;  %v5798_v6 = vmul.f32 0.35355338, %v966_v43 }
 0x291   :  { %v969_v45 = vpop.f32.mrb[34].mxu1  ;;  %1709 = vrot.lane.b32.xlu0 %v5582_v49, %s5420_s4 }
 0x292   :  { %v4844_v47 = vpop.f32.mrb[35].mxu1  ;;  %v1303_v13 = vsel %vm493_vm2, %v5798_v6, -inf }
 0x294   :  { %1661 = vrot.lane.b32.xlu1 %v5580_v46, %s5420_s4 }
 0x295   :  { %1805 = vrot.lane.b32.xlu0 %v5592_v57, %s5420_s4 }
 0x297   :  { %v1062_v48 = vpop.f32.mrb[36].mxu1 }
 0x298   :  { %v4855_v50 = vpop.f32.mrb[37].mxu1  ;;  %1757 = vrot.lane.b32.xlu1 %v5586_v52, %s5420_s4  ;;  %v5802_v11 = vmul.f32 0.35355338, %v1062_v48 }
 0x299   :  { %v1065_v51 = vpop.f32.mrb[38].mxu1 }
 0x29a   :  { %v4856_v53 = vpop.f32.mrb[39].mxu1  ;;  %v1309_v16 = vsel %vm493_vm2, %v5802_v11, -inf }
 0x29f   :  { %v1158_v54 = vpop.f32.mrb[40].mxu1 }
 0x2a0   :  { %v4867_v56 = vpop.f32.mrb[41].mxu1  ;;  %v5806_v15 = vmul.f32 0.35355338, %v1158_v54 }
 0x2a1   :  { %v1161_v58 = vpop.f32.mrb[42].mxu1 }
 0x2a2   :  { %v4868_v59 = vpop.f32.mrb[43].mxu1  ;;  %v1315_v22 = vsel %vm493_vm2, %v5806_v15, -inf }
 0x2a7   :  { %v1254_v60 = vpop.f32.mrb[44].mxu1 }
 0x2a8   :  { %v4879_v63 = vpop.f32.mrb[45].mxu1  ;;  %v5810_v21 = vmul.f32 0.35355338, %v1254_v60 }
 0x2a9   :  { %v1257_v0 = vpop.f32.mrb[46].mxu1 }
 0x2aa   :  { %v4880_v2 = vpop.f32.mrb[47].mxu1  ;;  %v1321_v23 = vsel %vm493_vm2, %v5810_v21, -inf }
 0x2b4   :  { %1298 = vmax.xlane.f32.xlu0 %v1297_v7 }
 0x2b8   :  { %1304 = vmax.xlane.f32.xlu0 %v1303_v13 }
 0x2bc   :  { %1310 = vmax.xlane.f32.xlu0 %v1309_v16 }
 0x2c0   :  { %1316 = vmax.xlane.f32.xlu0 %v1315_v22 }
 0x2c4   :  { %1322 = vmax.xlane.f32.xlu0 %v1321_v23 }
 0x2e0   :  { %v1278_v27 = vpop.xlane.xlu0 %1277 }
 0x2e1   :  { %v1324_v29 = vsub.f32 %v5744_v5, %v1278_v27 }
 0x2e3   :  { %v1340_v31 = vmul.f32 1.442695, %v1324_v29 }
 0x2e5   :  { %5289 = vpow2.f32 %v1340_v31 }
 0x2e8   :  { %v1281_v34 = vpop.xlane.xlu1 %1280 }
 0x2e9   :  { %v1325_v36 = vsub.f32 %v5748_v12, %v1281_v34 }
 0x2eb   :  { %v1342_v38 = vmul.f32 1.442695, %v1325_v36 }
 0x2ed   :  { %5291 = vpow2.f32 %v1342_v38 }
 0x2ef   :  { %v5822_v39 = vpop.eup %5289 }
 0x2f0   :  { %v1284_v42 = vpop.xlane.xlu0 %1283  ;;  %v1302_v43 = vpop.xlane.xlu1 %1301  ;;  %v1372_v44 = vsel %vm493_vm2, %v5822_v39, 0.0 }
 0x2f1   :  { %v1326_v45 = vsub.f32 %v5752_v24, %v1284_v42  ;;  %v1332_v5 = vsub.f32 %v5754_v25, %v1302_v43  ;;  %1373 = vadd.xlane.f32.xlu1 %v1372_v44 }
 0x2f3   :  { %v1344_v47 = vmul.f32 1.442695, %v1326_v45  ;;  %v1356_v48 = vmul.f32 1.442695, %v1332_v5 }
 0x2f5   :  { %5293 = vpow2.f32 %v1344_v47 }
 0x2f6   :  { %5295 = vpow2.f32 %v1356_v48 }
 0x2f7   :  { %v5828_v50 = vpop.eup %5291 }
 0x2f8   :  { %v1287_v12 = vpop.xlane.xlu0 %1286  ;;  %v1308_v51 = vpop.xlane.xlu1 %1307  ;;  %v1375_v53 = vsel %vm493_vm2, %v5828_v50, 0.0 }
 0x2f9   :  { %v1327_v54 = vsub.f32 %v5760_v40, %v1287_v12  ;;  %v1334_v56 = vsub.f32 %v5762_v41, %v1308_v51  ;;  %1376 = vadd.xlane.f32.xlu0 %v1375_v53 }
 0x2fb   :  { %v1346_v24 = vmul.f32 1.442695, %v1327_v54  ;;  %v1360_v58 = vmul.f32 1.442695, %v1334_v56 }
 0x2fd   :  { %5297 = vpow2.f32 %v1346_v24 }
 0x2fe   :  { %5299 = vpow2.f32 %v1360_v58 }
 0x2ff   :  { %v5834_v25 = vpop.eup %5293 }
 0x300   :  { %v1290_v59 = vpop.xlane.xlu1 %1289  ;;  %v1378_v60 = vsel %vm493_vm2, %v5834_v25, 0.0  ;;  %v5838_v63 = vpop.eup %5295 }
 0x301   :  { %v1328_v0 = vsub.f32 %v5768_v55, %v1290_v59  ;;  %1379 = vadd.xlane.f32.xlu1 %v1378_v60  ;;  %v1396_v41 = vsel %vm493_vm2, %v5838_v63, 0.0 }
 0x303   :  { %v1348_v2 = vmul.f32 1.442695, %v1328_v0 }
 0x304   :  { %v1314_v40 = vpop.xlane.xlu1 %1313 }
 0x305   :  { %5301 = vpow2.f32 %v1348_v2  ;;  %v1336_v7 = vsub.f32 %v5770_v61, %v1314_v40  ;;  %1397 = vadd.xlane.f32.xlu1 %v1396_v41 }
 0x307   :  { %v5844_v13 = vpop.eup %5297  ;;  %v1364_v16 = vmul.f32 1.442695, %v1336_v7 }
 0x308   :  { %v5846_v22 = vpop.eup %5299  ;;  %v1293_v23 = vpop.xlane.xlu0 %1292  ;;  %v1381_v55 = vsel %vm493_vm2, %v5844_v13, 0.0 }
 0x309   :  { %v1320_v27 = vpop.xlane.xlu1 %1319  ;;  %5303 = vpow2.f32 %v1364_v16  ;;  %v1329_v29 = vsub.f32 %v5776_v8, %v1293_v23  ;;  %1382 = vadd.xlane.f32.xlu0 %v1381_v55  ;;  %v1402_v61 = vsel %vm493_vm2, %v5846_v22, 0.0 }
 0x30a   :  { %v1338_v31 = vsub.f32 %v5778_v10, %v1320_v27  ;;  %1403 = vadd.xlane.f32.xlu1 %v1402_v61 }
 0x30b   :  { %v1350_v34 = vmul.f32 1.442695, %v1329_v29 }
 0x30c   :  { %v1368_v36 = vmul.f32 1.442695, %v1338_v31  ;;  %v5883_v53 = vpop.permute.xlu0 %1709 }
 0x30d   :  { %5305 = vpow2.f32 %v1350_v34 }
 0x30e   :  { %5307 = vpow2.f32 %v1368_v36 }
 0x30f   :  { %v5854_v38 = vpop.eup %5301 }
 0x310   :  { %v1296_v42 = vpop.xlane.xlu1 %1295  ;;  %v1384_v43 = vsel %vm493_vm2, %v5854_v38, 0.0  ;;  %v5887_v54 = vpop.permute.xlu0 %1805 }
 0x311   :  { %v1330_v44 = vsub.f32 %v5784_v28, %v1296_v42  ;;  %1385 = vadd.xlane.f32.xlu1 %v1384_v43 }
 0x313   :  { %v5859_v8 = vpop.eup %5303  ;;  %v1352_v10 = vmul.f32 1.442695, %v1330_v44 }
 0x314   :  { %v1408_v45 = vsel %vm493_vm2, %v5859_v8, 0.0  ;;  %v1662_v61 = vpop.permute.xlu1 %1661 }
 0x315   :  { %5309 = vpow2.f32 %v1352_v10  ;;  %1409 = vadd.xlane.f32.xlu1 %v1408_v45 }
 0x317   :  { %v5863_v5 = vpop.eup %5305 }
 0x318   :  { %v5865_v47 = vpop.eup %5307  ;;  %v1387_v48 = vsel %vm493_vm2, %v5863_v5, 0.0  ;;  %v5941_v34 = vpop.permute.xlu1 %1757 }
 0x319   :  { %1388 = vadd.xlane.f32.xlu0 %v1387_v48  ;;  %v1414_v28 = vsel %vm493_vm2, %v5865_v47, 0.0 }
 0x31a   :  { %1415 = vadd.xlane.f32.xlu1 %v1414_v28  ;;  %v1571_v28 = vsel %vm1473_vm3, %v5819_v33, 0 }
 0x31f   :  { %v5871_v12 = vpop.eup %5309 }
 0x320   :  { %v1390_v51 = vsel %vm493_vm2, %v5871_v12, 0.0 }
 0x321   :  { %1391 = vadd.xlane.f32.xlu1 %v1390_v51 }
 0x32f   :  { %1901 = vrot.lane.b32.xlu0 %v5602_v1, %s5420_s4 }
 0x332   :  { %1853 = vrot.lane.b32.xlu1 %v5598_v62, %s5420_s4 }
 0x333   :  { %2045 = vrot.lane.b32.xlu0 %v5618_v14, %s5420_s4 }
 0x336   :  { %1949 = vrot.lane.b32.xlu1 %v5606_v4, %s5420_s4 }
 0x33a   :  { %1997 = vrot.lane.b32.xlu1 %v5612_v9, %s5420_s4 }
 0x33e   :  { %2093 = vrot.lane.b32.xlu1 %v5622_v17, %s5420_s4 }
 0x341   :  { %v1299_v56 = vpop.xlane.xlu0 %1298 }
 0x342   :  { %v1331_v24 = vsub.f32 %v5796_v3, %v1299_v56  ;;  %2189 = vrot.lane.b32.xlu1 %v5630_v19, %s5420_s4 }
 0x344   :  { %v1354_v58 = vmul.f32 1.442695, %v1331_v24 }
 0x345   :  { %v1305_v59 = vpop.xlane.xlu0 %1304 }
 0x346   :  { %5311 = vpow2.f32 %v1354_v58  ;;  %v1333_v60 = vsub.f32 %v5798_v6, %v1305_v59  ;;  %2289 = vrot.lane.b32.xlu1 %v5570_v37, %s5421_s2 }
 0x348   :  { %v1358_v0 = vmul.f32 1.442695, %v1333_v60  ;;  %v1619_v60 = vsel %vm1473_vm3, %v5816_v26, 0  ;;  %v1667_v26 = vsel %vm1473_vm3, %v1662_v61, 0 }
 0x349   :  { %v1311_v2 = vpop.xlane.xlu0 %1310 }
 0x34a   :  { %5313 = vpow2.f32 %v1358_v0  ;;  %v1335_v40 = vsub.f32 %v5802_v11, %v1311_v2  ;;  %2287 = vrot.lane.b32.xlu1 %v5570_v37, %s5422_s22 }
 0x34c   :  { %v1362_v3 = vmul.f32 1.442695, %v1335_v40 }
 0x34d   :  { %v1317_v41 = vpop.xlane.xlu0 %1316 }
 0x34e   :  { %5315 = vpow2.f32 %v1362_v3  ;;  %v1337_v7 = vsub.f32 %v5806_v15, %v1317_v41  ;;  %2389 = vrot.lane.b32.xlu1 %v5568_v35, %s5421_s2 }
 0x350   :  { %v5903_v6 = vpop.eup %5311  ;;  %v1366_v16 = vmul.f32 1.442695, %v1337_v7 }
 0x351   :  { %v1393_v23 = vsel %vm493_vm2, %v5903_v6, 0.0  ;;  %v1323_v36 = vpop.xlane.xlu0 %1322 }
 0x352   :  { %5317 = vpow2.f32 %v1366_v16  ;;  %1394 = vadd.xlane.f32.xlu0 %v1393_v23  ;;  %2387 = vrot.lane.b32.xlu1 %v5568_v35, %s5422_s22  ;;  %v1339_v42 = vsub.f32 %v5810_v21, %v1323_v36 }
 0x354   :  { %v5909_v11 = vpop.eup %5313  ;;  %v1370_v44 = vmul.f32 1.442695, %v1339_v42 }
 0x355   :  { %v1399_v27 = vsel %vm493_vm2, %v5909_v11, 0.0 }
 0x356   :  { %1400 = vadd.xlane.f32.xlu0 %v1399_v27  ;;  %2489 = vrot.lane.b32.xlu1 %v5582_v49, %s5421_s2 }
 0x358   :  { %v5915_v15 = vpop.eup %5315 }
 0x359   :  { %v1405_v55 = vsel %vm493_vm2, %v5915_v15, 0.0 }
 0x35a   :  { %1406 = vadd.xlane.f32.xlu0 %v1405_v55  ;;  %2487 = vrot.lane.b32.xlu1 %v5582_v49, %s5422_s22 }
 0x35c   :  { %v5921_v29 = vpop.eup %5317 }
 0x35d   :  { %v1411_v31 = vsel %vm493_vm2, %v5921_v29, 0.0 }
 0x35e   :  { %1412 = vadd.xlane.f32.xlu0 %v1411_v31  ;;  %2589 = vrot.lane.b32.xlu1 %v5592_v57, %s5421_s2 }
 0x362   :  { %2587 = vrot.lane.b32.xlu1 %v5592_v57, %s5422_s22 }
 0x366   :  { %2689 = vrot.lane.b32.xlu1 %v5602_v1, %s5421_s2 }
 0x36a   :  { %2687 = vrot.lane.b32.xlu1 %v5602_v1, %s5422_s22 }
 0x36e   :  { %2789 = vrot.lane.b32.xlu1 %v5612_v9, %s5421_s2 }
 0x372   :  { %2787 = vrot.lane.b32.xlu1 %v5612_v9, %s5422_s22 }
 0x374   :  { %2141 = vrot.lane.b32.xlu0 %v5626_v20, %s5420_s4 }
 0x376   :  { %2889 = vrot.lane.b32.xlu1 %v5622_v17, %s5421_s2 }
 0x37a   :  { %2887 = vrot.lane.b32.xlu1 %v5622_v17, %s5422_s22 }
 0x37e   :  { %2989 = vrot.lane.b32.xlu1 %v5630_v19, %s5421_s2  ;;  %v1374_v43 = vpop.xlane.xlu1 %1373 }
 0x37f   :  { %5319 = vrcp.f32 %v1374_v43 }
 0x380   :  { %5321 = vpow2.f32 %v1370_v44 }
 0x382   :  { %2987 = vrot.lane.b32.xlu1 %v5630_v19, %s5422_s22 }
 0x386   :  { %v1377_v10 = vpop.xlane.xlu0 %1376  ;;  %3245 = vrot.lane.b32.xlu1 %v5562_v32, %s5423_s23 }
 0x387   :  { %5323 = vrcp.f32 %v1377_v10 }
 0x389   :  { %v5320_v45 = vpop.eup %5319 }
 0x38a   :  { %3341 = vrot.lane.b32.xlu1 %v5560_v30, %s5423_s23  ;;  %v1436_v21 = vmul.f32 %v5320_v45, %v5822_v39  ;;  %v5960_v56 = vpop.eup %5321 }
 0x38b   :  { %v1417_v33 = vsel %vm493_vm2, %v5960_v56, 0.0 }
 0x38c   :  { %v1452_v48 = vpack.c.bf16 %v1436_v21, %v1436_v21 }
 0x38e   :  { %3437 = vrot.lane.b32.xlu1 %v5580_v46, %s5423_s23  ;;  %4884 = vmatmul.mubr.msk.bf16.vlgmr.msra.gmra.mrb[32].mxu0 %vm493_vm2, %v1452_v48  ;;  %v1380_v51 = vpop.xlane.xlu1 %1379 }
 0x38f   :  { %4894 = vmatpush3.bf16.msra.mxu0 %v1571_v28  ;;  %5325 = vrcp.f32 %v1380_v51  ;;  %4895 = vmatprep.mubr.msk.bf16.mxu0 %vm5418_vm1, %v5417_v18 }
 0x390   :  { %4905 = vmatprep.subr.bf16.mxu0 %v5417_v18 }
 0x391   :  { %v5324_v39 = vpop.eup %5323 }
 0x392   :  { %3533 = vrot.lane.b32.xlu1 %v5586_v52, %s5423_s23  ;;  %v1437_v24 = vmul.f32 %v5324_v39, %v5828_v50  ;;  %v1398_v58 = vpop.xlane.xlu1 %1397 }
 0x393   :  { %1418 = vadd.xlane.f32.xlu0 %v1417_v33 }
 0x394   :  { %v1453_v59 = vpack.c.bf16 %v1437_v24, %v1437_v24 }
 0x396   :  { %4890 = vmatmul.mubr.msk.bf16.vlgmr.msra.gmra.mrb[48].mxu1 %vm493_vm2, %v1453_v59  ;;  %v1383_v0 = vpop.xlane.xlu0 %1382  ;;  %3629 = vrot.lane.b32.xlu1 %v5598_v62, %s5423_s23 }
 0x397   :  { %4900 = vmatpush3.bf16.msra.mxu1 %v1619_v60  ;;  %5327 = vrcp.f32 %v1383_v0  ;;  %4901 = vmatprep.mubr.msk.bf16.mxu1 %vm5418_vm1, %v5417_v18  ;;  %v1404_v2 = vpop.xlane.xlu1 %1403 }
 0x398   :  { %4911 = vmatprep.subr.bf16.mxu1 %v5417_v18 }
 0x399   :  { %v5326_v50 = vpop.eup %5325 }
 0x39a   :  { %v1438_v40 = vmul.f32 %v5326_v50, %v5834_v25  ;;  %v1715_v25 = vsel %vm1473_vm3, %v5883_v53, 0  ;;  %v1763_v53 = vsel %vm1473_vm3, %v5941_v34, 0  ;;  %v1811_v34 = vsel %vm1473_vm3, %v5887_v54, 0 }
 0x39c   :  { %v1454_v3 = vpack.c.bf16 %v1438_v40, %v1438_v40 }
 0x39e   :  { %4896 = vmatmul.mubr.msk.bf16.vlgmr.msra.gmra.mrb[36].mxu0 %vm493_vm2, %v1454_v3  ;;  %v1386_v41 = vpop.xlane.xlu1 %1385 }
 0x39f   :  { %4906 = vmatpush3.bf16.msra.mxu0 %v1667_v26  ;;  %5329 = vrcp.f32 %v1386_v41  ;;  %4907 = vmatprep.mubr.msk.bf16.mxu0 %vm5418_vm1, %v5417_v18 }
 0x3a0   :  { %4917 = vmatprep.subr.bf16.mxu0 %v5417_v18 }
 0x3a1   :  { %v5328_v7 = vpop.eup %5327 }
 0x3a2   :  { %v1439_v16 = vmul.f32 %v5328_v7, %v5844_v13  ;;  %v1410_v23 = vpop.xlane.xlu1 %1409 }
 0x3a4   :  { %v1455_v27 = vpack.c.bf16 %v1439_v16, %v1439_v16 }
 0x3a6   :  { %4902 = vmatmul.mubr.msk.bf16.vlgmr.msra.gmra.mrb[52].mxu1 %vm493_vm2, %v1455_v27  ;;  %v1389_v55 = vpop.xlane.xlu0 %1388 }
 0x3a7   :  { %4912 = vmatpush3.bf16.msra.mxu1 %v1715_v25  ;;  %5331 = vrcp.f32 %v1389_v55  ;;  %4913 = vmatprep.mubr.msk.bf16.mxu1 %vm5418_vm1, %v5417_v18  ;;  %v5993_v13 = vpop.xlane.xlu1 %1415 }
 0x3a8   :  { %4923 = vmatprep.subr.bf16.mxu1 %v5417_v18 }
 0x3a9   :  { %v5330_v31 = vpop.eup %5329  ;;  %2239 = vrot.lane.b32.xlu0 %v5562_v32, %s5421_s2 }
 0x3aa   :  { %v1440_v61 = vmul.f32 %v5330_v31, %v5854_v38 }
 0x3ac   :  { %v1456_v36 = vpack.c.bf16 %v1440_v61, %v1440_v61 }
 0x3ad   :  { %2237 = vrot.lane.b32.xlu0 %v5562_v32, %s5422_s22 }
 0x3ae   :  { %4908 = vmatmul.mubr.msk.bf16.vlgmr.msra.gmra.mrb[40].mxu0 %vm493_vm2, %v1456_v36  ;;  %v1392_v42 = vpop.xlane.xlu1 %1391 }
 0x3af   :  { %4918 = vmatpush3.bf16.msra.mxu0 %v1763_v53  ;;  %5333 = vrcp.f32 %v1392_v42  ;;  %4919 = vmatprep.mubr.msk.bf16.mxu0 %vm5418_vm1, %v5417_v18 }
 0x3b0   :  { %4929 = vmatprep.subr.bf16.mxu0 %v5417_v18  ;;  %5335 = vrcp.f32 %v1398_v58 }
 0x3b1   :  { %v5332_v43 = vpop.eup %5331  ;;  %2339 = vrot.lane.b32.xlu0 %v5560_v30, %s5421_s2  ;;  %5337 = vrcp.f32 %v1404_v2 }
 0x3b2   :  { %v1441_v38 = vmul.f32 %v5332_v43, %v5863_v5  ;;  %v1854_v10 = vpop.permute.xlu1 %1853  ;;  %5339 = vrcp.f32 %v1410_v23 }
 0x3b3   :  { %v1859_v54 = vsel %vm1473_vm3, %v1854_v10, 0 }
 0x3b4   :  { %v1457_v32 = vpack.c.bf16 %v1441_v38, %v1441_v38 }
 0x3b5   :  { %2337 = vrot.lane.b32.xlu0 %v5560_v30, %s5422_s22 }
 0x3b6   :  { %4914 = vmatmul.mubr.msk.bf16.vlgmr.msra.gmra.mrb[56].mxu1 %vm493_vm2, %v1457_v32 }
 0x3b7   :  { %4924 = vmatpush3.bf16.msra.mxu1 %v1811_v34  ;;  %4925 = vmatprep.mubr.msk.bf16.mxu1 %vm5418_vm1, %v5417_v18 }
 0x3b8   :  { %4935 = vmatprep.subr.bf16.mxu1 %v5417_v18 }
 0x3b9   :  { %v5334_v44 = vpop.eup %5333  ;;  %2439 = vrot.lane.b32.xlu0 %v5580_v46, %s5421_s2 }
 0x3ba   :  { %v1442_v5 = vmul.f32 %v5334_v44, %v5871_v12  ;;  %v5336_v45 = vpop.eup %5335  ;;  %v1950_v12 = vpop.permute.xlu1 %1949 }
 0x3bb   :  { %v1444_v21 = vmul.f32 %v5336_v45, %v5838_v63  ;;  %v5338_v28 = vpop.eup %5337  ;;  %v1955_v51 = vsel %vm1473_vm3, %v1950_v12, 0 }
 0x3bc   :  { %v1458_v30 = vpack.c.bf16 %v1442_v5, %v1442_v5  ;;  %v1446_v63 = vmul.f32 %v5338_v28, %v5846_v22  ;;  %v5340_v24 = vpop.eup %5339 }
 0x3bd   :  { %2437 = vrot.lane.b32.xlu0 %v5580_v46, %s5422_s22  ;;  %v1460_v48 = vpack.c.bf16 %v1444_v21, %v1444_v21  ;;  %v1902_v46 = vpop.permute.xlu0 %1901  ;;  %v1448_v58 = vmul.f32 %v5340_v24, %v5859_v8 }
 0x3be   :  { %4920 = vmatmul.mubr.msk.bf16.vlgmr.msra.gmra.mrb[44].mxu0 %vm493_vm2, %v1458_v30  ;;  %v1462_v33 = vpack.c.bf16 %v1446_v63, %v1446_v63  ;;  %v1907_v41 = vsel %vm1473_vm3, %v1902_v46, 0  ;;  %v1998_v16 = vpop.permute.xlu1 %1997 }
 0x3bf   :  { %4930 = vmatpush3.bf16.msra.mxu0 %v1859_v54  ;;  %4931 = vmatprep.mubr.msk.bf16.mxu0 %vm5418_vm1, %v5417_v18  ;;  %v1464_v22 = vpack.c.bf16 %v1448_v58, %v1448_v58 }
 0x3c0   :  { %4941 = vmatprep.subr.bf16.mxu0 %v5417_v18 }
 0x3c1   :  { %2539 = vrot.lane.b32.xlu0 %v5586_v52, %s5421_s2  ;;  %v2046_v39 = vpop.permute.xlu0 %2045 }
 0x3c2   :  { %v2094_v23 = vpop.permute.xlu1 %2093 }
 0x3c3   :  { %v2099_v31 = vsel %vm1473_vm3, %v2094_v23, 0 }
 0x3c5   :  { %2537 = vrot.lane.b32.xlu0 %v5586_v52, %s5422_s22  ;;  %v2051_v52 = vsel %vm1473_vm3, %v2046_v39, 0 }
 0x3c6   :  { %4932 = vmatmul.mubr.msk.bf16.vlgmr.msra.gmra.mrb[48].mxu0 %vm493_vm2, %v1460_v48  ;;  %v2190_v25 = vpop.permute.xlu1 %2189 }
 0x3c7   :  { %4942 = vmatpush3.bf16.msra.mxu0 %v1955_v51  ;;  %4943 = vmatprep.mubr.msk.bf16.mxu0 %vm5418_vm1, %v5417_v18 }
 0x3c8   :  { %4953 = vmatprep.subr.bf16.mxu0 %v5417_v18 }
 0x3c9   :  { %2639 = vrot.lane.b32.xlu0 %v5598_v62, %s5421_s2 }
 0x3ca   :  { %v2290_v61 = vpop.permute.xlu1 %2289 }
 0x3cb   :  { %v2295_v28 = vsel %vm493_vm2, %v2290_v61, 0 }
 0x3cd   :  { %2637 = vrot.lane.b32.xlu0 %v5598_v62, %s5422_s22 }
 0x3ce   :  { %4944 = vmatmul.mubr.msk.bf16.vlgmr.msra.gmra.mrb[52].mxu0 %vm493_vm2, %v1462_v33  ;;  %v2288_v53 = vpop.permute.xlu1 %2287 }
 0x3cf   :  { %4954 = vmatpush3.bf16.msra.mxu0 %v2051_v52  ;;  %4955 = vmatprep.mubr.msk.bf16.mxu0 %vm5418_vm1, %v5417_v18 }
 0x3d0   :  { %4965 = vmatprep.subr.bf16.mxu0 %v5417_v18 }
 0x3d1   :  { %2739 = vrot.lane.b32.xlu0 %v5606_v4, %s5421_s2 }
 0x3d2   :  { %v2390_v42 = vpop.permute.xlu1 %2389 }
 0x3d3   :  { %v2395_v39 = vsel %vm493_vm2, %v2390_v42, 0 }
 0x3d5   :  { %2737 = vrot.lane.b32.xlu0 %v5606_v4, %s5422_s22 }
 0x3d6   :  { %4956 = vmatmul.mubr.msk.bf16.vlgmr.msra.gmra.mrb[56].mxu0 %vm493_vm2, %v1464_v22  ;;  %v2388_v43 = vpop.permute.xlu1 %2387 }
 0x3d7   :  { %4967 = vmatprep.mubr.msk.bf16.mxu0 %vm5418_vm1, %v5417_v18 }
 0x3d9   :  { %2839 = vrot.lane.b32.xlu0 %v5618_v14, %s5421_s2 }
 0x3da   :  { %v2490_v38 = vpop.permute.xlu1 %2489 }
 0x3dd   :  { %2837 = vrot.lane.b32.xlu0 %v5618_v14, %s5422_s22 }
 0x3de   :  { %v2488_v32 = vpop.permute.xlu1 %2487 }
 0x3df   :  { %v1395_v62 = vpop.xlane.xlu0 %1394 }
 0x3e0   :  { %5341 = vrcp.f32 %v1395_v62  ;;  %v2495_v62 = vsel %vm493_vm2, %v2490_v38, 0 }
 0x3e1   :  { %5343 = vrcp.f32 %v5993_v13  ;;  %2939 = vrot.lane.b32.xlu0 %v5626_v20, %s5421_s2 }
 0x3e2   :  { %v2590_v5 = vpop.permute.xlu1 %2589 }
 0x3e3   :  { %v1401_v8 = vpop.xlane.xlu0 %1400 }
 0x3e4   :  { %5345 = vrcp.f32 %v1401_v8 }
 0x3e5   :  { %2937 = vrot.lane.b32.xlu0 %v5626_v20, %s5422_s22 }
 0x3e6   :  { %v6102_v45 = vpop.permute.xlu1 %2587 }
 0x3e7   :  { %v1407_v59 = vpop.xlane.xlu0 %1406 }
 0x3e8   :  { %5347 = vrcp.f32 %v1407_v59 }
 0x3e9   :  { %3293 = vrot.lane.b32.xlu0 %v5570_v37, %s5423_s23 }
 0x3ea   :  { %v5342_v60 = vpop.eup %5341 }
 0x3eb   :  { %v5344_v0 = vpop.eup %5343  ;;  %v1413_v50 = vpop.xlane.xlu0 %1412  ;;  %v1443_v2 = vmul.f32 %v5342_v60, %v5903_v6 }
 0x3ec   :  { %v1450_v26 = vmul.f32 %v5344_v0, %v5865_v47  ;;  %5349 = vrcp.f32 %v1413_v50  ;;  %v2595_v50 = vsel %vm493_vm2, %v2590_v5, 0 }
 0x3ed   :  { %3389 = vrot.lane.b32.xlu0 %v5568_v35, %s5423_s23  ;;  %v1459_v40 = vpack.c.bf16 %v1443_v2, %v1443_v2 }
 0x3ee   :  { %v5346_v3 = vpop.eup %5345  ;;  %v1466_v35 = vpack.c.bf16 %v1450_v26, %v1450_v26 }
 0x3ef   :  { %4926 = vmatmul.mubr.msk.bf16.vlgmr.msra.gmra.mrb[60].mxu1 %vm493_vm2, %v1459_v40  ;;  %v2142_v7 = vpop.permute.xlu0 %2141  ;;  %v1445_v6 = vmul.f32 %v5346_v3, %v5909_v11 }
 0x3f0   :  { %4936 = vmatpush3.bf16.msra.mxu1 %v1907_v41  ;;  %v2147_v37 = vsel %vm1473_vm3, %v2142_v7, 0  ;;  %4937 = vmatprep.mubr.msk.bf16.mxu1 %vm5418_vm1, %v5417_v18 }
 0x3f1   :  { %3485 = vrot.lane.b32.xlu0 %v5582_v49, %s5423_s23  ;;  %4966 = vmatpush3.bf16.msra.mxu0 %v2147_v37  ;;  %v1461_v47 = vpack.c.bf16 %v1445_v6, %v1445_v6  ;;  %v2003_v49 = vsel %vm1473_vm3, %v1998_v16, 0 }
 0x3f2   :  { %4947 = vmatprep.subr.bf16.mxu1 %v5417_v18  ;;  %4977 = vmatprep.subr.bf16.mxu0 %v5417_v18  ;;  %v5348_v11 = vpop.eup %5347 }
 0x3f3   :  { %v1447_v27 = vmul.f32 %v5348_v11, %v5915_v15  ;;  %v2195_v15 = vsel %vm1473_vm3, %v2190_v25, 0 }
 0x3f4   :  { %4968 = vmatmul.mubr.msk.bf16.vlgmr.msra.gmra.mrb[60].mxu0 %vm493_vm2, %v1466_v35 }
 0x3f5   :  { %3581 = vrot.lane.b32.xlu0 %v5592_v57, %s5423_s23  ;;  %4979 = vmatprep.mubr.msk.bf16.mxu0 %vm5418_vm1, %v5417_v18  ;;  %v1463_v57 = vpack.c.bf16 %v1447_v27, %v1447_v27 }
 0x3f6   :  { %v5350_v55 = vpop.eup %5349 }
 0x3f7   :  { %4938 = vmatmul.mubr.msk.bf16.vlgmr.msra.gmra.mrb[64].mxu1 %vm493_vm2, %v1461_v47  ;;  %v1449_v13 = vmul.f32 %v5350_v55, %v5921_v29 }
 0x3f8   :  { %4948 = vmatpush3.bf16.msra.mxu1 %v2003_v49  ;;  %4949 = vmatprep.mubr.msk.bf16.mxu1 %vm5418_vm1, %v5417_v18 }
 0x3f9   :  { %4959 = vmatprep.subr.bf16.mxu1 %v5417_v18  ;;  %v1465_v36 = vpack.c.bf16 %v1449_v13, %v1449_v13 }
 0x3ff   :  { %4950 = vmatmul.mubr.msk.bf16.vlgmr.msra.gmra.mrb[68].mxu1 %vm493_vm2, %v1463_v57 }
 0x400   :  { %4960 = vmatpush3.bf16.msra.mxu1 %v2099_v31  ;;  %4961 = vmatprep.mubr.msk.bf16.mxu1 %vm5418_vm1, %v5417_v18 }
 0x401   :  { %4971 = vmatprep.subr.bf16.mxu1 %v5417_v18 }
 0x407   :  { %4962 = vmatmul.mubr.msk.bf16.vlgmr.msra.gmra.mrb[72].mxu1 %vm493_vm2, %v1465_v36 }
 0x408   :  { %4972 = vmatpush3.bf16.msra.mxu1 %v2195_v15  ;;  %4973 = vmatprep.mubr.msk.bf16.mxu1 %vm5418_vm1, %v5417_v18 }
 0x409   :  { %4983 = vmatprep.subr.bf16.mxu1 %v5417_v18 }
 0x420   :  { %v1419_v29 = vpop.xlane.xlu0 %1418 }
 0x421   :  { %5351 = vrcp.f32 %v1419_v29 }
 0x424   :  { %v2240_v34 = vpop.permute.xlu0 %2239 }
 0x425   :  { %v2245_v44 = vsel %vm493_vm2, %v2240_v34, 0 }
 0x426   :  { %4978 = vmatpush3.bf16.xpose.msra.mxu0 %v2245_v44 }
 0x427   :  { %4989 = vmatprep.subr.bf16.mxu0 %v5417_v18 }
 0x428   :  { %v2238_v10 = vpop.permute.xlu0 %2237 }
 0x42b   :  { %v5352_v30 = vpop.eup %5351 }
 0x42c   :  { %v1451_v54 = vmul.f32 %v5352_v30, %v5960_v56  ;;  %v2340_v21 = vpop.permute.xlu0 %2339  ;;  %v2690_v56 = vpop.permute.xlu1 %2689 }
 0x42d   :  { %v2345_v12 = vsel %vm493_vm2, %v2340_v21, 0  ;;  %4980 = vmatmul.mubr.msk.bf16.vlgmr.msra.gmra.mrb[64].mxu0 %vm493_vm2, %v2238_v10  ;;  %v2695_v41 = vsel %vm493_vm2, %v2690_v56, 0 }
 0x42e   :  { %4990 = vmatpush3.bf16.xpose.msra.mxu0 %v2345_v12  ;;  %v1467_v48 = vpack.c.bf16 %v1451_v54, %v1451_v54  ;;  %4991 = vmatprep.mubr.msk.bf16.mxu0 %vm5418_vm1, %v5417_v18 }
 0x42f   :  { %5001 = vmatprep.subr.bf16.mxu0 %v5417_v18 }
 0x430   :  { %v2338_v46 = vpop.permute.xlu0 %2337  ;;  %4974 = vmatmul.mubr.msk.bf16.vlgmr.msra.gmra.mrb[76].mxu1 %vm493_vm2, %v1467_v48  ;;  %v2688_v33 = vpop.permute.xlu1 %2687 }
 0x431   :  { %4984 = vmatpush3.bf16.xpose.msra.mxu1 %v2295_v28  ;;  %4985 = vmatprep.mubr.msk.bf16.mxu1 %vm5418_vm1, %v5417_v18 }
 0x432   :  { %4995 = vmatprep.subr.bf16.mxu1 %v5417_v18 }
 0x434   :  { %v2440_v51 = vpop.permute.xlu0 %2439  ;;  %v2790_v22 = vpop.permute.xlu1 %2789 }
 0x435   :  { %v2445_v63 = vsel %vm493_vm2, %v2440_v51, 0  ;;  %4992 = vmatmul.mubr.msk.bf16.vlgmr.msra.gmra.mrb[68].mxu0 %vm493_vm2, %v2338_v46  ;;  %v2795_v47 = vsel %vm493_vm2, %v2790_v22, 0 }
 0x436   :  { %5002 = vmatpush3.bf16.xpose.msra.mxu0 %v2445_v63  ;;  %5003 = vmatprep.mubr.msk.bf16.mxu0 %vm5418_vm1, %v5417_v18 }
 0x437   :  { %5013 = vmatprep.subr.bf16.mxu0 %v5417_v18 }
 0x438   :  { %v2438_v24 = vpop.permute.xlu0 %2437  ;;  %4986 = vmatmul.mubr.msk.bf16.vlgmr.msra.gmra.mrb[80].mxu1 %vm493_vm2, %v2288_v53  ;;  %v2788_v59 = vpop.permute.xlu1 %2787 }
 0x439   :  { %4996 = vmatpush3.bf16.xpose.msra.mxu1 %v2395_v39  ;;  %4997 = vmatprep.mubr.msk.bf16.mxu1 %vm5418_vm1, %v5417_v18 }
 0x43a   :  { %5007 = vmatprep.subr.bf16.mxu1 %v5417_v18 }
 0x43c   :  { %v2540_v52 = vpop.permute.xlu0 %2539  ;;  %v2890_v40 = vpop.permute.xlu1 %2889 }
 0x43d   :  { %v2545_v58 = vsel %vm493_vm2, %v2540_v52, 0  ;;  %5004 = vmatmul.mubr.msk.bf16.vlgmr.msra.gmra.mrb[72].mxu0 %vm493_vm2, %v2438_v24  ;;  %v2895_v25 = vsel %vm493_vm2, %v2890_v40, 0 }
 0x43e   :  { %5014 = vmatpush3.bf16.xpose.msra.mxu0 %v2545_v58  ;;  %5015 = vmatprep.mubr.msk.bf16.mxu0 %vm5418_vm1, %v5417_v18 }
 0x43f   :  { %5025 = vmatprep.subr.bf16.mxu0 %v5417_v18 }
 0x440   :  { %v2538_v8 = vpop.permute.xlu0 %2537  ;;  %4998 = vmatmul.mubr.msk.bf16.vlgmr.msra.gmra.mrb[84].mxu1 %vm493_vm2, %v2388_v43  ;;  %v2888_v7 = vpop.permute.xlu1 %2887 }
 0x441   :  { %5008 = vmatpush3.bf16.xpose.msra.mxu1 %v2495_v62  ;;  %5009 = vmatprep.mubr.msk.bf16.mxu1 %vm5418_vm1, %v5417_v18 }
 0x442   :  { %5019 = vmatprep.subr.bf16.mxu1 %v5417_v18 }
 0x444   :  { %v2640_v60 = vpop.permute.xlu0 %2639  ;;  %v2990_v35 = vpop.permute.xlu1 %2989 }
 0x445   :  { %v2645_v0 = vsel %vm493_vm2, %v2640_v60, 0  ;;  %5016 = vmatmul.mubr.msk.bf16.vlgmr.msra.gmra.mrb[76].mxu0 %vm493_vm2, %v2538_v8  ;;  %v2995_v53 = vsel %vm493_vm2, %v2990_v35, 0 }
 0x446   :  { %5026 = vmatpush3.bf16.xpose.msra.mxu0 %v2645_v0  ;;  %5027 = vmatprep.mubr.msk.bf16.mxu0 %vm5418_vm1, %v5417_v18 }
 0x447   :  { %5037 = vmatprep.subr.bf16.mxu0 %v5417_v18 }
 0x448   :  { %v2638_v2 = vpop.permute.xlu0 %2637  ;;  %5010 = vmatmul.mubr.msk.bf16.vlgmr.msra.gmra.mrb[88].mxu1 %vm493_vm2, %v2488_v32  ;;  %v2988_v23 = vpop.permute.xlu1 %2987 }
 0x449   :  { %5020 = vmatpush3.bf16.xpose.msra.mxu1 %v2595_v50  ;;  %5021 = vmatprep.mubr.msk.bf16.mxu1 %vm5418_vm1, %v5417_v18 }
 0x44a   :  { %5031 = vmatprep.subr.bf16.mxu1 %v5417_v18 }
 0x44c   :  { %v2740_v3 = vpop.permute.xlu0 %2739  ;;  %v3246_v55 = vpop.permute.xlu1 %3245 }
 0x44d   :  { %v2745_v26 = vsel %vm493_vm2, %v2740_v3, 0  ;;  %5028 = vmatmul.mubr.msk.bf16.vlgmr.msra.gmra.mrb[80].mxu0 %vm493_vm2, %v2638_v2  ;;  %v3251_v15 = vsel %vm1473_vm3, %v3246_v55, 0 }
 0x44e   :  { %5038 = vmatpush3.bf16.xpose.msra.mxu0 %v2745_v26  ;;  %5039 = vmatprep.mubr.msk.bf16.mxu0 %vm5418_vm1, %v5417_v18 }
 0x44f   :  { %5049 = vmatprep.subr.bf16.mxu0 %v5417_v18 }
 0x450   :  { %v2738_v16 = vpop.permute.xlu0 %2737  ;;  %5022 = vmatmul.mubr.msk.bf16.vlgmr.msra.gmra.mrb[92].mxu1 %vm493_vm2, %v6102_v45 }
 0x451   :  { %5032 = vmatpush3.bf16.xpose.msra.mxu1 %v2695_v41  ;;  %5033 = vmatprep.mubr.msk.bf16.mxu1 %vm5418_vm1, %v5417_v18 }
 0x452   :  { %5043 = vmatprep.subr.bf16.mxu1 %v5417_v18 }
 0x454   :  { %v2840_v37 = vpop.permute.xlu0 %2839 }
 0x455   :  { %v2845_v6 = vsel %vm493_vm2, %v2840_v37, 0  ;;  %5040 = vmatmul.mubr.msk.bf16.vlgmr.msra.gmra.mrb[84].mxu0 %vm493_vm2, %v2738_v16 }
 0x456   :  { %5050 = vmatpush3.bf16.xpose.msra.mxu0 %v2845_v6  ;;  %5051 = vmatprep.mubr.msk.bf16.mxu0 %vm5418_vm1, %v5417_v18 }
 0x457   :  { %5061 = vmatprep.subr.bf16.mxu0 %v5417_v18 }
 0x458   :  { %v2838_v11 = vpop.permute.xlu0 %2837  ;;  %5034 = vmatmul.mubr.msk.bf16.vlgmr.msra.gmra.mrb[96].mxu1 %vm493_vm2, %v2688_v33 }
 0x459   :  { %5044 = vmatpush3.bf16.xpose.msra.mxu1 %v2795_v47  ;;  %5045 = vmatprep.mubr.msk.bf16.mxu1 %vm5418_vm1, %v5417_v18 }
 0x45a   :  { %5055 = vmatprep.subr.bf16.mxu1 %v5417_v18 }
 0x45c   :  { %v2940_v49 = vpop.permute.xlu0 %2939 }
 0x45d   :  { %v2945_v27 = vsel %vm493_vm2, %v2940_v49, 0  ;;  %5052 = vmatmul.mubr.msk.bf16.vlgmr.msra.gmra.mrb[88].mxu0 %vm493_vm2, %v2838_v11 }
 0x45e   :  { %5062 = vmatpush3.bf16.xpose.msra.mxu0 %v2945_v27  ;;  %5063 = vmatprep.mubr.msk.bf16.mxu0 %vm5418_vm1, %v5417_v18 }
 0x45f   :  { %5073 = vmatprep.subr.bf16.mxu0 %v5417_v18 }
 0x460   :  { %5046 = vmatmul.mubr.msk.bf16.vlgmr.msra.gmra.mrb[100].mxu1 %vm493_vm2, %v2788_v59  ;;  %v2938_v61 = vpop.permute.xlu0 %2937 }
 0x461   :  { %5056 = vmatpush3.bf16.xpose.msra.mxu1 %v2895_v25  ;;  %v6173_v57 = vpop.f32.mrb[32].mxu0  ;;  %5057 = vmatprep.mubr.msk.bf16.mxu1 %vm5418_vm1, %v5417_v18 }
 0x462   :  { %v4885_v31 = vpop.f32.mrb[33].mxu0  ;;  %5067 = vmatprep.subr.bf16.mxu1 %v5417_v18 }
 0x463   :  { %v1514_v13 = vpop.f32.mrb[34].mxu0 }
 0x464   :  { %v4886_v36 = vpop.f32.mrb[35].mxu0  ;;  %v3294_v29 = vpop.permute.xlu0 %3293 }
 0x465   :  { %5064 = vmatmul.mubr.msk.bf16.vlgmr.msra.gmra.mrb[92].mxu0 %vm493_vm2, %v2938_v61  ;;  %v3299_v34 = vsel %vm1473_vm3, %v3294_v29, 0 }
 0x466   :  { %5074 = vmatpush3.bf16.msra.mxu0 %v3251_v15  ;;  %5075 = vmatprep.mubr.msk.bf16.mxu0 %vm5418_vm1, %v5417_v18 }
 0x467   :  { %5085 = vmatprep.subr.bf16.mxu0 %v5417_v18 }
 0x468   :  { %5058 = vmatmul.mubr.msk.bf16.vlgmr.msra.gmra.mrb[104].mxu1 %vm493_vm2, %v2888_v7 }
 0x469   :  { %5068 = vmatpush3.bf16.xpose.msra.mxu1 %v2995_v53  ;;  %v6185_v42 = vpop.f32.mrb[48].mxu1  ;;  %5069 = vmatprep.mubr.msk.bf16.mxu1 %vm5418_vm1, %v5417_v18 }
 0x46a   :  { %v4891_v43 = vpop.f32.mrb[49].mxu1  ;;  %5079 = vmatprep.subr.bf16.mxu1 %v5417_v18 }
 0x46b   :  { %v1562_v38 = vpop.f32.mrb[50].mxu1 }
 0x46c   :  { %v4892_v32 = vpop.f32.mrb[51].mxu1 }
 0x470   :  { %5070 = vmatmul.mubr.msk.bf16.vlgmr.msra.gmra.mrb[108].mxu1 %vm493_vm2, %v2988_v23 }
 0x471   :  { %5080 = vmatpush3.bf16.msra.mxu1 %v3299_v34  ;;  %v6192_v44 = vpop.f32.mrb[36].mxu0  ;;  %5081 = vmatprep.mubr.msk.bf16.mxu1 %vm5418_vm1, %v5417_v18 }
 0x472   :  { %v4897_v5 = vpop.f32.mrb[37].mxu0  ;;  %5091 = vmatprep.subr.bf16.mxu1 %v5417_v18 }
 0x473   :  { %v1610_v10 = vpop.f32.mrb[38].mxu0 }
 0x474   :  { %v4898_v30 = vpop.f32.mrb[39].mxu0 }
 0x479   :  { %v6197_v45 = vpop.f32.mrb[52].mxu1 }
 0x47a   :  { %v4903_v54 = vpop.f32.mrb[53].mxu1 }
 0x47b   :  { %v1658_v21 = vpop.f32.mrb[54].mxu1 }
 0x47c   :  { %v4904_v12 = vpop.f32.mrb[55].mxu1 }
 0x481   :  { %v6199_v48 = vpop.f32.mrb[40].mxu0 }
 0x482   :  { %v4909_v28 = vpop.f32.mrb[41].mxu0 }
 0x483   :  { %v1706_v46 = vpop.f32.mrb[42].mxu0 }
 0x484   :  { %v4910_v56 = vpop.f32.mrb[43].mxu0 }
 0x489   :  { %v6201_v51 = vpop.f32.mrb[56].mxu1 }
 0x48a   :  { %v4915_v63 = vpop.f32.mrb[57].mxu1 }
 0x48b   :  { %v1754_v39 = vpop.f32.mrb[58].mxu1 }
 0x48c   :  { %v4916_v33 = vpop.f32.mrb[59].mxu1 }
 0x491   :  { %v6203_v24 = vpop.f32.mrb[44].mxu0 }
 0x492   :  { %v4921_v52 = vpop.f32.mrb[45].mxu0 }
 0x493   :  { %v1802_v58 = vpop.f32.mrb[46].mxu0 }
 0x494   :  { %v4922_v22 = vpop.f32.mrb[47].mxu0 }
 0x499   :  { %v6205_v62 = vpop.f32.mrb[48].mxu0 }
 0x49a   :  { %v4933_v8 = vpop.f32.mrb[49].mxu0 }
 0x49b   :  { %v1898_v59 = vpop.f32.mrb[50].mxu0 }
 0x49c   :  { %v4934_v60 = vpop.f32.mrb[51].mxu0 }
 0x4a1   :  { %v6207_v0 = vpop.f32.mrb[52].mxu0 }
 0x4a2   :  { %v4945_v50 = vpop.f32.mrb[53].mxu0 }
 0x4a3   :  { %v1994_v2 = vpop.f32.mrb[54].mxu0 }
 0x4a4   :  { %v4946_v40 = vpop.f32.mrb[55].mxu0 }
 0x4a9   :  { %v6209_v3 = vpop.f32.mrb[56].mxu0 }
 0x4aa   :  { %v4957_v26 = vpop.f32.mrb[57].mxu0 }
 0x4ab   :  { %v2090_v41 = vpop.f32.mrb[58].mxu0 }
 0x4ac   :  { %v4958_v7 = vpop.f32.mrb[59].mxu0 }
 0x4c2   :  { %v6211_v16 = vpop.f32.mrb[60].mxu1 }
 0x4c3   :  { %v4927_v37 = vpop.f32.mrb[61].mxu1 }
 0x4c4   :  { %v1850_v6 = vpop.f32.mrb[62].mxu1 }
 0x4c5   :  { %v4928_v35 = vpop.f32.mrb[63].mxu1 }
 0x4c7   :  { %v6213_v47 = vpop.f32.mrb[60].mxu0 }
 0x4c8   :  { %v4969_v11 = vpop.f32.mrb[61].mxu0 }
 0x4c9   :  { %v2186_v23 = vpop.f32.mrb[62].mxu0 }
 0x4ca   :  { %v6215_v49 = vpop.f32.mrb[64].mxu1  ;;  %v4970_v27 = vpop.f32.mrb[63].mxu0 }
 0x4cb   :  { %v4939_v25 = vpop.f32.mrb[65].mxu1 }
 0x4cc   :  { %v1946_v55 = vpop.f32.mrb[66].mxu1 }
 0x4cd   :  { %v4940_v31 = vpop.f32.mrb[67].mxu1 }
 0x4d2   :  { %v6217_v13 = vpop.f32.mrb[68].mxu1 }
 0x4d3   :  { %v4951_v61 = vpop.f32.mrb[69].mxu1 }
 0x4d4   :  { %v2042_v36 = vpop.f32.mrb[70].mxu1 }
 0x4d5   :  { %v4952_v15 = vpop.f32.mrb[71].mxu1 }
 0x4da   :  { %v6219_v53 = vpop.f32.mrb[72].mxu1 }
 0x4db   :  { %v4963_v43 = vpop.f32.mrb[73].mxu1 }
 0x4dc   :  { %v2138_v38 = vpop.f32.mrb[74].mxu1 }
 0x4dd   :  { %v4964_v32 = vpop.f32.mrb[75].mxu1 }
 0x500   :  { %v2281_v29 = vpop.f32.mrb[64].mxu0 }
 0x501   :  { %v6221_v34 = vmul.f32 0.35355338, %v2281_v29  ;;  %v4981_v5 = vpop.f32.mrb[65].mxu0 }
 0x502   :  { %v2284_v10 = vpop.f32.mrb[66].mxu0 }
 0x503   :  { %v6223_v30 = vpop.f32.mrb[76].mxu1  ;;  %v4982_v54 = vpop.f32.mrb[67].mxu0  ;;  %v3053_v21 = vsel %vm493_vm2, %v6221_v34, -inf }
 0x504   :  { %3054 = vmax.xlane.f32.xlu0 %v3053_v21  ;;  %v4975_v12 = vpop.f32.mrb[77].mxu1 }
 0x505   :  { %v2234_v28 = vpop.f32.mrb[78].mxu1 }
 0x506   :  { %v4976_v46 = vpop.f32.mrb[79].mxu1 }
 0x508   :  { %v2381_v56 = vpop.f32.mrb[68].mxu0 }
 0x509   :  { %v6227_v63 = vmul.f32 0.35355338, %v2381_v56  ;;  %v4993_v39 = vpop.f32.mrb[69].mxu0 }
 0x50a   :  { %v2384_v33 = vpop.f32.mrb[70].mxu0 }
 0x50b   :  { %v2331_v52 = vpop.f32.mrb[80].mxu1  ;;  %v4994_v58 = vpop.f32.mrb[71].mxu0  ;;  %v3059_v22 = vsel %vm493_vm2, %v6227_v63, -inf }
 0x50c   :  { %v6231_v8 = vmul.f32 0.35355338, %v2331_v52  ;;  %3060 = vmax.xlane.f32.xlu0 %v3059_v22  ;;  %v4987_v59 = vpop.f32.mrb[81].mxu1 }
 0x50d   :  { %v2334_v60 = vpop.f32.mrb[82].mxu1 }
 0x50e   :  { %v4988_v50 = vpop.f32.mrb[83].mxu1  ;;  %v3056_v2 = vsel %vm493_vm2, %v6231_v8, -inf }
 0x50f   :  { %3057 = vmax.xlane.f32.xlu1 %v3056_v2 }
 0x510   :  { %v2481_v40 = vpop.f32.mrb[72].mxu0 }
 0x511   :  { %v6235_v26 = vmul.f32 0.35355338, %v2481_v40  ;;  %v5005_v41 = vpop.f32.mrb[73].mxu0 }
 0x512   :  { %v2484_v7 = vpop.f32.mrb[74].mxu0 }
 0x513   :  { %v2431_v37 = vpop.f32.mrb[84].mxu1  ;;  %v5006_v6 = vpop.f32.mrb[75].mxu0  ;;  %v3065_v35 = vsel %vm493_vm2, %v6235_v26, -inf }
 0x514   :  { %v6239_v11 = vmul.f32 0.35355338, %v2431_v37  ;;  %3066 = vmax.xlane.f32.xlu1 %v3065_v35  ;;  %v4999_v23 = vpop.f32.mrb[85].mxu1 }
 0x515   :  { %v2434_v27 = vpop.f32.mrb[86].mxu1 }
 0x516   :  { %v5000_v25 = vpop.f32.mrb[87].mxu1  ;;  %v3062_v55 = vsel %vm493_vm2, %v6239_v11, -inf }
 0x517   :  { %3063 = vmax.xlane.f32.xlu0 %v3062_v55 }
 0x518   :  { %v2581_v31 = vpop.f32.mrb[76].mxu0 }
 0x519   :  { %v6243_v61 = vmul.f32 0.35355338, %v2581_v31  ;;  %v5017_v36 = vpop.f32.mrb[77].mxu0 }
 0x51a   :  { %v2584_v15 = vpop.f32.mrb[78].mxu0 }
 0x51b   :  { %v2531_v43 = vpop.f32.mrb[88].mxu1  ;;  %v5018_v38 = vpop.f32.mrb[79].mxu0  ;;  %v3071_v32 = vsel %vm493_vm2, %v6243_v61, -inf }
 0x51c   :  { %v6247_v29 = vmul.f32 0.35355338, %v2531_v43  ;;  %3072 = vmax.xlane.f32.xlu1 %v3071_v32  ;;  %v5011_v5 = vpop.f32.mrb[89].mxu1 }
 0x51d   :  { %v2534_v10 = vpop.f32.mrb[90].mxu1 }
 0x51e   :  { %v5012_v54 = vpop.f32.mrb[91].mxu1  ;;  %v3068_v21 = vsel %vm493_vm2, %v6247_v29, -inf }
 0x51f   :  { %3069 = vmax.xlane.f32.xlu0 %v3068_v21 }
 0x520   :  { %v2681_v12 = vpop.f32.mrb[80].mxu0 }
 0x521   :  { %v6251_v28 = vmul.f32 0.35355338, %v2681_v12  ;;  %v5029_v46 = vpop.f32.mrb[81].mxu0 }
 0x522   :  { %v2684_v56 = vpop.f32.mrb[82].mxu0 }
 0x523   :  { %v2631_v39 = vpop.f32.mrb[92].mxu1  ;;  %v5030_v33 = vpop.f32.mrb[83].mxu0  ;;  %v3077_v52 = vsel %vm493_vm2, %v6251_v28, -inf }
 0x524   :  { %v6255_v58 = vmul.f32 0.35355338, %v2631_v39  ;;  %3078 = vmax.xlane.f32.xlu1 %v3077_v52  ;;  %v5023_v22 = vpop.f32.mrb[93].mxu1 }
 0x525   :  { %v2634_v59 = vpop.f32.mrb[94].mxu1 }
 0x526   :  { %v5024_v60 = vpop.f32.mrb[95].mxu1  ;;  %v3074_v50 = vsel %vm493_vm2, %v6255_v58, -inf }
 0x527   :  { %3075 = vmax.xlane.f32.xlu0 %v3074_v50 }
 0x528   :  { %v2781_v2 = vpop.f32.mrb[84].mxu0 }
 0x529   :  { %v6259_v40 = vmul.f32 0.35355338, %v2781_v2  ;;  %v5041_v41 = vpop.f32.mrb[85].mxu0 }
 0x52a   :  { %v2784_v7 = vpop.f32.mrb[86].mxu0 }
 0x52b   :  { %v2731_v37 = vpop.f32.mrb[96].mxu1  ;;  %v5042_v6 = vpop.f32.mrb[87].mxu0  ;;  %v3083_v35 = vsel %vm493_vm2, %v6259_v40, -inf }
 0x52c   :  { %v6263_v23 = vmul.f32 0.35355338, %v2731_v37  ;;  %3084 = vmax.xlane.f32.xlu1 %v3083_v35  ;;  %v5035_v27 = vpop.f32.mrb[97].mxu1 }
 0x52d   :  { %v2734_v25 = vpop.f32.mrb[98].mxu1 }
 0x52e   :  { %v5036_v55 = vpop.f32.mrb[99].mxu1  ;;  %v3080_v31 = vsel %vm493_vm2, %v6263_v23, -inf }
 0x52f   :  { %3081 = vmax.xlane.f32.xlu0 %v3080_v31 }
 0x530   :  { %v2881_v36 = vpop.f32.mrb[88].mxu0 }
 0x531   :  { %v6267_v15 = vmul.f32 0.35355338, %v2881_v36  ;;  %v5053_v43 = vpop.f32.mrb[89].mxu0 }
 0x532   :  { %v2884_v38 = vpop.f32.mrb[90].mxu0  ;;  %v6293_v43 = vpop.permute.xlu0 %3389 }
 0x533   :  { %v2831_v32 = vpop.f32.mrb[100].mxu1  ;;  %v5054_v5 = vpop.f32.mrb[91].mxu0  ;;  %v3089_v10 = vsel %vm493_vm2, %v6267_v15, -inf }
 0x534   :  { %v6271_v54 = vmul.f32 0.35355338, %v2831_v32  ;;  %3090 = vmax.xlane.f32.xlu1 %v3089_v10  ;;  %v5047_v21 = vpop.f32.mrb[101].mxu1  ;;  %v6295_v38 = vpop.permute.xlu1 %3341 }
 0x535   :  { %v2834_v12 = vpop.f32.mrb[102].mxu1 }
 0x536   :  { %v5048_v46 = vpop.f32.mrb[103].mxu1  ;;  %v3086_v56 = vsel %vm493_vm2, %v6271_v54, -inf  ;;  %v6297_v32 = vpop.permute.xlu0 %3485 }
 0x537   :  { %3087 = vmax.xlane.f32.xlu0 %v3086_v56 }
 0x538   :  { %v2981_v39 = vpop.f32.mrb[92].mxu0  ;;  %v6299_v5 = vpop.permute.xlu1 %3437 }
 0x539   :  { %v6275_v33 = vmul.f32 0.35355338, %v2981_v39  ;;  %v5065_v52 = vpop.f32.mrb[93].mxu0 }
 0x53a   :  { %v2984_v22 = vpop.f32.mrb[94].mxu0  ;;  %v6301_v10 = vpop.permute.xlu0 %3581 }
 0x53b   :  { %v2931_v59 = vpop.f32.mrb[104].mxu1  ;;  %v5066_v60 = vpop.f32.mrb[95].mxu0  ;;  %v3095_v50 = vsel %vm493_vm2, %v6275_v33, -inf }
 0x53c   :  { %v6279_v2 = vmul.f32 0.35355338, %v2931_v59  ;;  %3096 = vmax.xlane.f32.xlu1 %v3095_v50  ;;  %v5059_v41 = vpop.f32.mrb[105].mxu1  ;;  %v6303_v12 = vpop.permute.xlu1 %3533 }
 0x53d   :  { %v2934_v7 = vpop.f32.mrb[106].mxu1 }
 0x53e   :  { %v5060_v37 = vpop.f32.mrb[107].mxu1  ;;  %v3092_v6 = vsel %vm493_vm2, %v6279_v2, -inf }
 0x53f   :  { %3093 = vmax.xlane.f32.xlu0 %v3092_v6 }
 0x543   :  { %v3031_v35 = vpop.f32.mrb[108].mxu1 }
 0x544   :  { %v6283_v27 = vmul.f32 0.35355338, %v3031_v35  ;;  %v5071_v25 = vpop.f32.mrb[109].mxu1 }
 0x545   :  { %v3034_v55 = vpop.f32.mrb[110].mxu1 }
 0x546   :  { %v5072_v31 = vpop.f32.mrb[111].mxu1  ;;  %v3098_v36 = vsel %vm493_vm2, %v6283_v27, -inf }
 0x547   :  { %3099 = vmax.xlane.f32.xlu0 %v3098_v36 }
 0x54d   :  { %3725 = vrot.lane.b32.xlu1 %v5606_v4, %s5423_s23 }
 0x551   :  { %3773 = vrot.lane.b32.xlu1 %v5612_v9, %s5423_s23  ;;  %v6306_v9 = vpop.permute.xlu1 %3629 }
 0x55d   :  { %3677 = vrot.lane.b32.xlu0 %v5602_v1, %s5423_s23 }
 0x591   :  { %v3055_v21 = vpop.xlane.xlu0 %3054 }
 0x592   :  { %v3101_v4 = vsub.f32 %v6221_v34, %v3055_v21 }
 0x594   :  { %v3117_v46 = vmul.f32 1.442695, %v3101_v4 }
 0x596   :  { %5353 = vpow2.f32 %v3117_v46 }
 0x599   :  { %v3061_v1 = vpop.xlane.xlu0 %3060 }
 0x59a   :  { %v3103_v56 = vsub.f32 %v6227_v63, %v3061_v1 }
 0x59c   :  { %v3121_v39 = vmul.f32 1.442695, %v3103_v56  ;;  %v3058_v52 = vpop.xlane.xlu1 %3057 }
 0x59d   :  { %v3102_v22 = vsub.f32 %v6231_v8, %v3058_v52 }
 0x59e   :  { %5355 = vpow2.f32 %v3121_v39 }
 0x59f   :  { %v3119_v59 = vmul.f32 1.442695, %v3102_v22 }
 0x5a0   :  { %v6310_v60 = vpop.eup %5353 }
 0x5a1   :  { %5357 = vpow2.f32 %v3119_v59  ;;  %v3067_v50 = vpop.xlane.xlu1 %3066  ;;  %v3149_v34 = vsel %vm493_vm2, %v6310_v60, 0.0 }
 0x5a2   :  { %v3105_v41 = vsub.f32 %v6235_v26, %v3067_v50  ;;  %3150 = vadd.xlane.f32.xlu1 %v3149_v34 }
 0x5a4   :  { %v3125_v7 = vmul.f32 1.442695, %v3105_v41  ;;  %v3064_v37 = vpop.xlane.xlu0 %3063 }
 0x5a5   :  { %v3104_v63 = vsub.f32 %v6239_v11, %v3064_v37 }
 0x5a6   :  { %5359 = vpow2.f32 %v3125_v7 }
 0x5a7   :  { %v3123_v6 = vmul.f32 1.442695, %v3104_v63 }
 0x5a8   :  { %v6316_v35 = vpop.eup %5355 }
 0x5a9   :  { %5361 = vpow2.f32 %v3123_v6  ;;  %v3073_v8 = vpop.xlane.xlu1 %3072  ;;  %v3155_v25 = vsel %vm493_vm2, %v6316_v35, 0.0 }
 0x5aa   :  { %v3107_v55 = vsub.f32 %v6243_v61, %v3073_v8  ;;  %3156 = vadd.xlane.f32.xlu1 %v3155_v25 }
 0x5ab   :  { %v6321_v31 = vpop.eup %5357 }
 0x5ac   :  { %v3129_v26 = vmul.f32 1.442695, %v3107_v55  ;;  %v3070_v36 = vpop.xlane.xlu0 %3069  ;;  %v3152_v21 = vsel %vm493_vm2, %v6321_v31, 0.0 }
 0x5ad   :  { %v3106_v11 = vsub.f32 %v6247_v29, %v3070_v36  ;;  %3153 = vadd.xlane.f32.xlu0 %v3152_v21 }
 0x5ae   :  { %5363 = vpow2.f32 %v3129_v26 }
 0x5af   :  { %v3127_v4 = vmul.f32 1.442695, %v3106_v11 }
 0x5b0   :  { %v6326_v46 = vpop.eup %5359 }
 0x5b1   :  { %5365 = vpow2.f32 %v3127_v4  ;;  %v3079_v1 = vpop.xlane.xlu1 %3078  ;;  %v3161_v61 = vsel %vm493_vm2, %v6326_v46, 0.0 }
 0x5b2   :  { %v3109_v56 = vsub.f32 %v6251_v28, %v3079_v1  ;;  %3162 = vadd.xlane.f32.xlu1 %v3161_v61 }
 0x5b3   :  { %v6331_v39 = vpop.eup %5361 }
 0x5b4   :  { %v3133_v52 = vmul.f32 1.442695, %v3109_v56  ;;  %v3076_v22 = vpop.xlane.xlu0 %3075  ;;  %v3158_v29 = vsel %vm493_vm2, %v6331_v39, 0.0 }
 0x5b5   :  { %v3108_v59 = vsub.f32 %v6255_v58, %v3076_v22  ;;  %3159 = vadd.xlane.f32.xlu0 %v3158_v29 }
 0x5b6   :  { %5367 = vpow2.f32 %v3133_v52 }
 0x5b7   :  { %v3131_v50 = vmul.f32 1.442695, %v3108_v59 }
 0x5b8   :  { %v6336_v34 = vpop.eup %5363 }
 0x5b9   :  { %5369 = vpow2.f32 %v3131_v50  ;;  %v3085_v41 = vpop.xlane.xlu1 %3084  ;;  %v3167_v28 = vsel %vm493_vm2, %v6336_v34, 0.0 }
 0x5ba   :  { %v3111_v7 = vsub.f32 %v6259_v40, %v3085_v41  ;;  %3168 = vadd.xlane.f32.xlu1 %v3167_v28 }
 0x5bb   :  { %v6341_v37 = vpop.eup %5365 }
 0x5bc   :  { %v3137_v63 = vmul.f32 1.442695, %v3111_v7  ;;  %v3082_v6 = vpop.xlane.xlu0 %3081  ;;  %v3164_v58 = vsel %vm493_vm2, %v6341_v37, 0.0 }
 0x5bd   :  { %v3110_v8 = vsub.f32 %v6263_v23, %v3082_v6  ;;  %3165 = vadd.xlane.f32.xlu0 %v3164_v58 }
 0x5be   :  { %5371 = vpow2.f32 %v3137_v63 }
 0x5bf   :  { %v3135_v25 = vmul.f32 1.442695, %v3110_v8 }
 0x5c0   :  { %v6346_v55 = vpop.eup %5367 }
 0x5c1   :  { %5373 = vpow2.f32 %v3135_v25  ;;  %v3173_v26 = vsel %vm493_vm2, %v6346_v55, 0.0  ;;  %v3091_v22 = vpop.xlane.xlu1 %3090 }
 0x5c2   :  { %3174 = vadd.xlane.f32.xlu1 %v3173_v26  ;;  %v3113_v29 = vsub.f32 %v6267_v15, %v3091_v22 }
 0x5c3   :  { %v6350_v40 = vpop.eup %5369 }
 0x5c4   :  { %v3088_v36 = vpop.xlane.xlu0 %3087  ;;  %v3170_v21 = vsel %vm493_vm2, %v6350_v40, 0.0  ;;  %v3141_v50 = vmul.f32 1.442695, %v3113_v29 }
 0x5c5   :  { %v3112_v11 = vsub.f32 %v6271_v54, %v3088_v36  ;;  %3171 = vadd.xlane.f32.xlu0 %v3170_v21 }
 0x5c7   :  { %v3139_v23 = vmul.f32 1.442695, %v3112_v11 }
 0x5c8   :  { %v6355_v4 = vpop.eup %5371 }
 0x5c9   :  { %5375 = vpow2.f32 %v3139_v23  ;;  %v3179_v1 = vsel %vm493_vm2, %v6355_v4, 0.0  ;;  %v3097_v59 = vpop.xlane.xlu1 %3096 }
 0x5ca   :  { %3180 = vadd.xlane.f32.xlu1 %v3179_v1  ;;  %v3115_v41 = vsub.f32 %v6275_v33, %v3097_v59  ;;  %5377 = vpow2.f32 %v3141_v50 }
 0x5cb   :  { %v6359_v61 = vpop.eup %5373 }
 0x5cc   :  { %v3176_v56 = vsel %vm493_vm2, %v6359_v61, 0.0  ;;  %v3145_v28 = vmul.f32 1.442695, %v3115_v41  ;;  %v3094_v7 = vpop.xlane.xlu0 %3093 }
 0x5cd   :  { %3177 = vadd.xlane.f32.xlu0 %v3176_v56  ;;  %v3114_v63 = vsub.f32 %v6279_v2, %v3094_v7  ;;  %v6395_v21 = vpop.permute.xlu1 %3725 }
 0x5ce   :  { %5379 = vpow2.f32 %v3145_v28 }
 0x5cf   :  { %v3143_v58 = vmul.f32 1.442695, %v3114_v63 }
 0x5d1   :  { %5381 = vpow2.f32 %v3143_v58  ;;  %v6397_v11 = vpop.permute.xlu1 %3773 }
 0x5d3   :  { %v6363_v52 = vpop.eup %5375 }
 0x5d4   :  { %v3182_v54 = vsel %vm493_vm2, %v6363_v52, 0.0  ;;  %v3100_v6 = vpop.xlane.xlu0 %3099  ;;  %v6375_v8 = vpop.eup %5377 }
 0x5d5   :  { %3183 = vadd.xlane.f32.xlu0 %v3182_v54 }
 0x5d8   :  { %v6379_v25 = vpop.eup %5379  ;;  %v6399_v1 = vpop.permute.xlu0 %3677 }
 0x5d9   :  { %v3191_v33 = vsel %vm493_vm2, %v6379_v25, 0.0 }
 0x5db   :  { %3869 = vrot.lane.b32.xlu1 %v5622_v17, %s5423_s23  ;;  %v3116_v17 = vsub.f32 %v6283_v27, %v3100_v6  ;;  %v6383_v2 = vpop.eup %5381 }
 0x5dc   :  { %v3188_v27 = vsel %vm493_vm2, %v6383_v2, 0.0 }
 0x5dd   :  { %v3147_v15 = vmul.f32 1.442695, %v3116_v17  ;;  %v3395_v17 = vsel %vm1473_vm3, %v6293_v43, 0 }
 0x5df   :  { %5383 = vpow2.f32 %v3147_v15 }
 0x5e9   :  { %v6387_v26 = vpop.eup %5383 }
 0x5ea   :  { %v3194_v36 = vsel %vm493_vm2, %v6387_v26, 0.0 }
 0x5eb   :  { %3821 = vrot.lane.b32.xlu0 %v5618_v14, %s5423_s23  ;;  %v3185_v14 = vsel %vm493_vm2, %v6375_v8, 0.0 }
 0x5ff   :  { %3186 = vadd.xlane.f32.xlu1 %v3185_v14 }
 0x603   :  { %3192 = vadd.xlane.f32.xlu1 %v3191_v33 }
 0x60a   :  { %3189 = vadd.xlane.f32.xlu0 %v3188_v27  ;;  %v3539_v27 = vsel %vm1473_vm3, %v6303_v12, 0 }
 0x60e   :  { %3195 = vadd.xlane.f32.xlu0 %v3194_v36 }
 0x614   :  { %3965 = vrot.lane.b32.xlu1 %v5630_v19, %s5423_s23  ;;  %v3347_v19 = vsel %vm1473_vm3, %v6295_v38, 0  ;;  %v3443_v38 = vsel %vm1473_vm3, %v6299_v5, 0 }
 0x624   :  { %3917 = vrot.lane.b32.xlu0 %v5626_v20, %s5423_s23 }
 0x62f   :  { %v3151_v23 = vpop.xlane.xlu1 %3150 }
 0x630   :  { %5385 = vrcp.f32 %v3151_v23  ;;  %v3491_v23 = vsel %vm1473_vm3, %v6297_v32, 0 }
 0x637   :  { %v3157_v56 = vpop.xlane.xlu1 %3156 }
 0x638   :  { %5387 = vrcp.f32 %v3157_v56 }
 0x63a   :  { %v5386_v54 = vpop.eup %5385  ;;  %v3154_v22 = vpop.xlane.xlu0 %3153 }
 0x63b   :  { %v3213_v29 = vmul.f32 %v5386_v54, %v6310_v60  ;;  %5389 = vrcp.f32 %v3154_v22 }
 0x63d   :  { %v3229_v59 = vpack.c.bf16 %v3213_v29, %v3213_v29  ;;  %v3635_v29 = vsel %vm1473_vm3, %v6306_v9, 0 }
 0x63f   :  { %5076 = vmatmul.mubr.msk.bf16.vlgmr.msra.gmra.mrb[96].mxu0 %vm493_vm2, %v3229_v59  ;;  %v3163_v20 = vpop.xlane.xlu1 %3162 }
 0x640   :  { %5086 = vmatpush3.bf16.msra.mxu0 %v3347_v19  ;;  %5391 = vrcp.f32 %v3163_v20  ;;  %5087 = vmatprep.mubr.msk.bf16.mxu0 %vm5418_vm1, %v5417_v18  ;;  %v3587_v19 = vsel %vm1473_vm3, %v6301_v10, 0 }
 0x641   :  { %5097 = vmatprep.subr.bf16.mxu0 %v5417_v18 }
 0x642   :  { %v5388_v50 = vpop.eup %5387  ;;  %v3160_v41 = vpop.xlane.xlu0 %3159 }
 0x643   :  { %v3215_v28 = vmul.f32 %v5388_v50, %v6316_v35  ;;  %5393 = vrcp.f32 %v3160_v41 }
 0x645   :  { %v5390_v60 = vpop.eup %5389  ;;  %v3231_v7 = vpack.c.bf16 %v3215_v28, %v3215_v28  ;;  %v3731_v28 = vsel %vm1473_vm3, %v6395_v21, 0 }
 0x646   :  { %v3214_v63 = vmul.f32 %v5390_v60, %v6321_v31  ;;  %v3683_v60 = vsel %vm1473_vm3, %v6399_v1, 0 }
 0x647   :  { %5088 = vmatmul.mubr.msk.bf16.vlgmr.msra.gmra.mrb[100].mxu0 %vm493_vm2, %v3231_v7  ;;  %v3169_v6 = vpop.xlane.xlu1 %3168 }
 0x648   :  { %5098 = vmatpush3.bf16.msra.mxu0 %v3443_v38  ;;  %5395 = vrcp.f32 %v3169_v6  ;;  %v3230_v58 = vpack.c.bf16 %v3214_v63, %v3214_v63  ;;  %5099 = vmatprep.mubr.msk.bf16.mxu0 %vm5418_vm1, %v5417_v18 }
 0x649   :  { %5109 = vmatprep.subr.bf16.mxu0 %v5417_v18 }
 0x64a   :  { %v5392_v35 = vpop.eup %5391  ;;  %5082 = vmatmul.mubr.msk.bf16.vlgmr.msra.gmra.mrb[112].mxu1 %vm493_vm2, %v3230_v58  ;;  %v3166_v31 = vpop.xlane.xlu0 %3165 }
 0x64b   :  { %v3217_v5 = vmul.f32 %v5392_v35, %v6326_v46  ;;  %5092 = vmatpush3.bf16.msra.mxu1 %v3395_v17  ;;  %5397 = vrcp.f32 %v3166_v31  ;;  %5093 = vmatprep.mubr.msk.bf16.mxu1 %vm5418_vm1, %v5417_v18 }
 0x64c   :  { %5103 = vmatprep.subr.bf16.mxu1 %v5417_v18 }
 0x64d   :  { %v5394_v15 = vpop.eup %5393  ;;  %v3233_v14 = vpack.c.bf16 %v3217_v5, %v3217_v5 }
 0x64e   :  { %v3216_v33 = vmul.f32 %v5394_v15, %v6331_v39 }
 0x64f   :  { %5100 = vmatmul.mubr.msk.bf16.vlgmr.msra.gmra.mrb[104].mxu0 %vm493_vm2, %v3233_v14  ;;  %v3175_v43 = vpop.xlane.xlu1 %3174 }
 0x650   :  { %5110 = vmatpush3.bf16.msra.mxu0 %v3539_v27  ;;  %5399 = vrcp.f32 %v3175_v43  ;;  %v3232_v46 = vpack.c.bf16 %v3216_v33, %v3216_v33  ;;  %5111 = vmatprep.mubr.msk.bf16.mxu0 %vm5418_vm1, %v5417_v18 }
 0x651   :  { %5121 = vmatprep.subr.bf16.mxu0 %v5417_v18 }
 0x652   :  { %v5396_v36 = vpop.eup %5395  ;;  %5094 = vmatmul.mubr.msk.bf16.vlgmr.msra.gmra.mrb[116].mxu1 %vm493_vm2, %v3232_v46  ;;  %v3172_v39 = vpop.xlane.xlu0 %3171 }
 0x653   :  { %v3219_v12 = vmul.f32 %v5396_v36, %v6336_v34  ;;  %5104 = vmatpush3.bf16.msra.mxu1 %v3491_v23  ;;  %5401 = vrcp.f32 %v3172_v39  ;;  %5105 = vmatprep.mubr.msk.bf16.mxu1 %vm5418_vm1, %v5417_v18 }
 0x654   :  { %5115 = vmatprep.subr.bf16.mxu1 %v5417_v18 }
 0x655   :  { %v5398_v56 = vpop.eup %5397  ;;  %v3235_v54 = vpack.c.bf16 %v3219_v12, %v3219_v12 }
 0x656   :  { %v3218_v22 = vmul.f32 %v5398_v56, %v6341_v37 }
 0x657   :  { %5112 = vmatmul.mubr.msk.bf16.vlgmr.msra.gmra.mrb[108].mxu0 %vm493_vm2, %v3235_v54  ;;  %v3181_v32 = vpop.xlane.xlu1 %3180 }
 0x658   :  { %5122 = vmatpush3.bf16.msra.mxu0 %v3635_v29  ;;  %5403 = vrcp.f32 %v3181_v32  ;;  %v3234_v34 = vpack.c.bf16 %v3218_v22, %v3218_v22  ;;  %5123 = vmatprep.mubr.msk.bf16.mxu0 %vm5418_vm1, %v5417_v18 }
 0x659   :  { %5133 = vmatprep.subr.bf16.mxu0 %v5417_v18 }
 0x65a   :  { %v5400_v59 = vpop.eup %5399  ;;  %5106 = vmatmul.mubr.msk.bf16.vlgmr.msra.gmra.mrb[120].mxu1 %vm493_vm2, %v3234_v34  ;;  %v3178_v37 = vpop.xlane.xlu0 %3177 }
 0x65b   :  { %v3221_v9 = vmul.f32 %v5400_v59, %v6346_v55  ;;  %5116 = vmatpush3.bf16.msra.mxu1 %v3587_v19  ;;  %5405 = vrcp.f32 %v3178_v37  ;;  %5117 = vmatprep.mubr.msk.bf16.mxu1 %vm5418_vm1, %v5417_v18  ;;  %v3870_v17 = vpop.permute.xlu1 %3869 }
 0x65c   :  { %5127 = vmatprep.subr.bf16.mxu1 %v5417_v18  ;;  %v3875_v5 = vsel %vm1473_vm3, %v3870_v17, 0 }
 0x65d   :  { %v5402_v20 = vpop.eup %5401  ;;  %v3237_v50 = vpack.c.bf16 %v3221_v9, %v3221_v9 }
 0x65e   :  { %v3220_v41 = vmul.f32 %v5402_v20, %v6350_v40 }
 0x65f   :  { %5124 = vmatmul.mubr.msk.bf16.vlgmr.msra.gmra.mrb[112].mxu0 %vm493_vm2, %v3237_v50  ;;  %v5287_v50 = vld [vmem:[%s6634_s5] sm:$0xff]  }
 0x660   :  { %5134 = vmatpush3.bf16.msra.mxu0 %v3731_v28  ;;  %v3236_v10 = vpack.c.bf16 %v3220_v41, %v3220_v41  ;;  %5135 = vmatprep.mubr.msk.bf16.mxu0 %vm5418_vm1, %v5417_v18 }
 0x661   :  { %5145 = vmatprep.subr.bf16.mxu0 %v5417_v18 }
 0x662   :  { %v5404_v55 = vpop.eup %5403  ;;  %5118 = vmatmul.mubr.msk.bf16.vlgmr.msra.gmra.mrb[124].mxu1 %vm493_vm2, %v3236_v10  ;;  %v3184_v7 = vpop.xlane.xlu0 %3183 }
 0x663   :  { %v3223_v40 = vmul.f32 %v5404_v55, %v6355_v4  ;;  %5128 = vmatpush3.bf16.msra.mxu1 %v3683_v60  ;;  %5407 = vrcp.f32 %v3184_v7  ;;  %5129 = vmatprep.mubr.msk.bf16.mxu1 %vm5418_vm1, %v5417_v18  ;;  %v3779_v4 = vsel %vm1473_vm3, %v6397_v11, 0 }
 0x664   :  { %5139 = vmatprep.subr.bf16.mxu1 %v5417_v18 }
 0x665   :  { %v5406_v21 = vpop.eup %5405  ;;  %v3239_v63 = vpack.c.bf16 %v3223_v40, %v3223_v40 }
 0x666   :  { %v3222_v38 = vmul.f32 %v5406_v21, %v6359_v61  ;;  %v3822_v6 = vpop.permute.xlu0 %3821 }
 0x667   :  { %v3827_v58 = vsel %vm1473_vm3, %v3822_v6, 0  ;;  %5136 = vmatmul.mubr.msk.bf16.vlgmr.msra.gmra.mrb[116].mxu0 %vm493_vm2, %v3239_v63 }
 0x668   :  { %5146 = vmatpush3.bf16.msra.mxu0 %v3827_v58  ;;  %v3238_v1 = vpack.c.bf16 %v3222_v38, %v3222_v38  ;;  %5147 = vmatprep.mubr.msk.bf16.mxu0 %vm5418_vm1, %v5417_v18 }
 0x669   :  { %5157 = vmatprep.subr.bf16.mxu0 %v5417_v18 }
 0x66a   :  { %5130 = vmatmul.mubr.msk.bf16.vlgmr.msra.gmra.mrb[128].mxu1 %vm493_vm2, %v3238_v1 }
 0x66b   :  { %5140 = vmatpush3.bf16.msra.mxu1 %v3779_v4  ;;  %5141 = vmatprep.mubr.msk.bf16.mxu1 %vm5418_vm1, %v5417_v18 }
 0x66c   :  { %5151 = vmatprep.subr.bf16.mxu1 %v5417_v18 }
 0x66d   :  { %v5408_v61 = vpop.eup %5407 }
 0x66e   :  { %v3224_v35 = vmul.f32 %v5408_v61, %v6363_v52 }
 0x670   :  { %v3240_v31 = vpack.c.bf16 %v3224_v35, %v3224_v35 }
 0x672   :  { %5142 = vmatmul.mubr.msk.bf16.vlgmr.msra.gmra.mrb[132].mxu1 %vm493_vm2, %v3240_v31 }
 0x673   :  { %5152 = vmatpush3.bf16.msra.mxu1 %v3875_v5  ;;  %5153 = vmatprep.mubr.msk.bf16.mxu1 %vm5418_vm1, %v5417_v18 }
 0x674   :  { %5163 = vmatprep.subr.bf16.mxu1 %v5417_v18 }
 0x68c   :  { %v3187_v11 = vpop.xlane.xlu1 %3186 }
 0x68d   :  { %5409 = vrcp.f32 %v3187_v11 }
 0x690   :  { %v3193_v15 = vpop.xlane.xlu1 %3192 }
 0x691   :  { %5411 = vrcp.f32 %v3193_v15 }
 0x694   :  { %v3966_v54 = vpop.permute.xlu1 %3965 }
 0x695   :  { %v3971_v32 = vsel %vm1473_vm3, %v3966_v54, 0 }
 0x697   :  { %v5410_v14 = vpop.eup %5409  ;;  %v3190_v33 = vpop.xlane.xlu0 %3189 }
 0x698   :  { %v3225_v52 = vmul.f32 %v5410_v14, %v6375_v8  ;;  %5413 = vrcp.f32 %v3190_v33 }
 0x69a   :  { %v3241_v27 = vpack.c.bf16 %v3225_v52, %v3225_v52 }
 0x69b   :  { %v5412_v43 = vpop.eup %5411  ;;  %v3196_v46 = vpop.xlane.xlu0 %3195 }
 0x69c   :  { %5415 = vrcp.f32 %v3196_v46  ;;  %5148 = vmatmul.mubr.msk.bf16.vlgmr.msra.gmra.mrb[120].mxu0 %vm493_vm2, %v3241_v27  ;;  %v3227_v36 = vmul.f32 %v5412_v43, %v6379_v25 }
 0x69d   :  { %5159 = vmatprep.mubr.msk.bf16.mxu0 %vm5418_vm1, %v5417_v18 }
 0x69e   :  { %v3243_v56 = vpack.c.bf16 %v3227_v36, %v3227_v36 }
 0x69f   :  { %v3918_v23 = vpop.permute.xlu0 %3917 }
 0x6a0   :  { %v3923_v39 = vsel %vm1473_vm3, %v3918_v23, 0 }
 0x6a1   :  { %5158 = vmatpush3.bf16.msra.mxu0 %v3923_v39 }
 0x6a2   :  { %v5414_v12 = vpop.eup %5413  ;;  %5169 = vmatprep.subr.bf16.mxu0 %v5287_v50 }
 0x6a3   :  { %v3226_v8 = vmul.f32 %v5414_v12, %v6383_v2 }
 0x6a4   :  { %5160 = vmatmul.mubr.msk.bf16.vlgmr.msra.gmra.mrb[124].mxu0 %vm493_vm2, %v3243_v56 }
 0x6a5   :  { %v3242_v22 = vpack.c.bf16 %v3226_v8, %v3226_v8  ;;  %5170 = vmatpush3.bf16.msra.mxu0 %v5287_v50 }
 0x6a6   :  { %v5416_v29 = vpop.eup %5415 }
 0x6a7   :  { %5154 = vmatmul.mubr.msk.bf16.vlgmr.msra.gmra.mrb[136].mxu1 %vm493_vm2, %v3242_v22  ;;  %v3228_v25 = vmul.f32 %v5416_v29, %v6387_v26 }
 0x6a8   :  { %5164 = vmatpush3.bf16.msra.mxu1 %v3971_v32  ;;  %5165 = vmatprep.mubr.msk.bf16.mxu1 %vm5418_vm1, %v5417_v18 }
 0x6a9   :  { %v3244_v34 = vpack.c.bf16 %v3228_v25, %v3228_v25 }
 0x6af   :  { %5166 = vmatmul.mubr.msk.bf16.vlgmr.msra.gmra.mrb[140].mxu1 %vm493_vm2, %v3244_v34 }
 0x712   :  { %v3287_v59 = vpop.f32.mrb[96].mxu0 }
 0x713   :  { %v5077_v2 = vpop.f32.mrb[97].mxu0 }
 0x714   :  { %v3290_v19 = vpop.f32.mrb[98].mxu0 }
 0x715   :  { %v5078_v37 = vpop.f32.mrb[99].mxu0 }
 0x71a   :  { %v3383_v9 = vpop.f32.mrb[100].mxu0 }
 0x71b   :  { %v5089_v20 = vpop.f32.mrb[101].mxu0 }
 0x71c   :  { %v3386_v41 = vpop.f32.mrb[102].mxu0 }
 0x71d   :  { %v3335_v28 = vpop.f32.mrb[112].mxu1  ;;  %v5090_v10 = vpop.f32.mrb[103].mxu0 }
 0x71e   :  { %v5229_v18 = vpack.i.bf16 %v3335_v28, %v3287_v59  ;;  %v5083_v55 = vpop.f32.mrb[113].mxu1 }
 0x71f   :  { %v3338_v26 = vpop.f32.mrb[114].mxu1 }
 0x720   :  { %v5084_v60 = vpop.f32.mrb[115].mxu1  ;;  %5230 = vrot.lane.b32.xlu0 %v5229_v18, %s5424_s26 }
 0x722   :  { %v3479_v7 = vpop.f32.mrb[104].mxu0 }
 0x723   :  { %v5101_v40 = vpop.f32.mrb[105].mxu0 }
 0x724   :  { %v3482_v21 = vpop.f32.mrb[106].mxu0 }
 0x725   :  { %v3431_v63 = vpop.f32.mrb[116].mxu1  ;;  %v5102_v38 = vpop.f32.mrb[107].mxu0 }
 0x726   :  { %v5234_v6 = vpack.i.bf16 %v3431_v63, %v3383_v9  ;;  %v5095_v58 = vpop.f32.mrb[117].mxu1 }
 0x727   :  { %v3434_v1 = vpop.f32.mrb[118].mxu1 }
 0x728   :  { %v5096_v4 = vpop.f32.mrb[119].mxu1  ;;  %5235 = vrot.lane.b32.xlu1 %v5234_v6, %s5424_s26 }
 0x72a   :  { %v3575_v61 = vpop.f32.mrb[108].mxu0 }
 0x72b   :  { %v5113_v35 = vpop.f32.mrb[109].mxu0 }
 0x72c   :  { %v3578_v17 = vpop.f32.mrb[110].mxu0 }
 0x72d   :  { %v3527_v31 = vpop.f32.mrb[120].mxu1  ;;  %v5114_v5 = vpop.f32.mrb[111].mxu0 }
 0x72e   :  { %v5239_v11 = vpack.i.bf16 %v3527_v31, %v3479_v7  ;;  %v5107_v15 = vpop.f32.mrb[121].mxu1 }
 0x72f   :  { %v3530_v14 = vpop.f32.mrb[122].mxu1 }
 0x730   :  { %v5108_v33 = vpop.f32.mrb[123].mxu1  ;;  %5240 = vrot.lane.b32.xlu0 %v5239_v11, %s5424_s26 }
 0x732   :  { %v3671_v52 = vpop.f32.mrb[112].mxu0 }
 0x733   :  { %v5125_v27 = vpop.f32.mrb[113].mxu0 }
 0x734   :  { %v3674_v43 = vpop.f32.mrb[114].mxu0 }
 0x735   :  { %v3623_v46 = vpop.f32.mrb[124].mxu1  ;;  %v5126_v36 = vpop.f32.mrb[115].mxu0 }
 0x736   :  { %v5244_v23 = vpack.i.bf16 %v3623_v46, %v3575_v61  ;;  %v5119_v39 = vpop.f32.mrb[125].mxu1 }
 0x737   :  { %v3626_v12 = vpop.f32.mrb[126].mxu1 }
 0x738   :  { %v5120_v56 = vpop.f32.mrb[127].mxu1  ;;  %5245 = vrot.lane.b32.xlu1 %v5244_v23, %s5424_s26 }
 0x73a   :  { %v3767_v8 = vpop.f32.mrb[116].mxu0 }
 0x73b   :  { %v5137_v54 = vpop.f32.mrb[117].mxu0 }
 0x73c   :  { %v3770_v22 = vpop.f32.mrb[118].mxu0 }
 0x73d   :  { %v3719_v29 = vpop.f32.mrb[128].mxu1  ;;  %v5138_v32 = vpop.f32.mrb[119].mxu0 }
 0x73e   :  { %v5249_v25 = vpack.i.bf16 %v3719_v29, %v3671_v52  ;;  %v5131_v34 = vpop.f32.mrb[129].mxu1 }
 0x73f   :  { %v3722_v59 = vpop.f32.mrb[130].mxu1 }
 0x740   :  { %v5132_v2 = vpop.f32.mrb[131].mxu1  ;;  %5250 = vrot.lane.b32.xlu0 %v5249_v25, %s5424_s26 }
 0x745   :  { %v3815_v19 = vpop.f32.mrb[132].mxu1 }
 0x746   :  { %v5254_v37 = vpack.i.bf16 %v3815_v19, %v3767_v8  ;;  %v5143_v9 = vpop.f32.mrb[133].mxu1 }
 0x747   :  { %v3818_v20 = vpop.f32.mrb[134].mxu1 }
 0x748   :  { %v5144_v50 = vpop.f32.mrb[135].mxu1  ;;  %5255 = vrot.lane.b32.xlu1 %v5254_v37, %s5424_s26 }
 0x76f   :  { %v3863_v41 = vpop.f32.mrb[120].mxu0 }
 0x770   :  { %v5149_v28 = vpop.f32.mrb[121].mxu0 }
 0x771   :  { %v3866_v10 = vpop.f32.mrb[122].mxu0 }
 0x772   :  { %v5150_v18 = vpop.f32.mrb[123].mxu0 }
 0x777   :  { %v3959_v55 = vpop.f32.mrb[124].mxu0 }
 0x778   :  { %v5161_v26 = vpop.f32.mrb[125].mxu0 }
 0x779   :  { %v3962_v60 = vpop.f32.mrb[126].mxu0 }
 0x77a   :  { %v3911_v7 = vpop.f32.mrb[136].mxu1  ;;  %v5162_v40 = vpop.f32.mrb[127].mxu0 }
 0x77b   :  { %v5259_v21 = vpack.i.bf16 %v3911_v7, %v3863_v41  ;;  %v5155_v63 = vpop.f32.mrb[137].mxu1 }
 0x77c   :  { %v3914_v38 = vpop.f32.mrb[138].mxu1 }
 0x77d   :  { %v5156_v6 = vpop.f32.mrb[139].mxu1  ;;  %5260 = vrot.lane.b32.xlu0 %v5259_v21, %s5424_s26 }
 0x782   :  { %v4007_v58 = vpop.f32.mrb[140].mxu1 }
 0x783   :  { %v5264_v1 = vpack.i.bf16 %v4007_v58, %v3959_v55  ;;  %v5167_v4 = vpop.f32.mrb[141].mxu1 }
 0x784   :  { %v4010_v61 = vpop.f32.mrb[142].mxu1 }
 0x785   :  { %5265 = vrot.lane.b32.xlu1 %v5264_v1, %s5424_s26  ;;  %v5168_v35 = vpop.f32.mrb[143].mxu1 }
 0x792   :  { %v5231_v17 = vpop.permute.xlu0 %5230 }
 0x793   :  { %v5233_v31 = vunpack.i.h.bf16 %v5231_v17  ;;  %v5232_v5 = vunpack.i.l.bf16 %v5231_v17 }
 0x795   :  { %v4078_v11 = vsel %vm493_vm2, %v6185_v42, %v5233_v31  ;;  %v4077_v15 = vsel %vm493_vm2, %v6173_v57, %v5232_v5 }
 0x796   :  { %v4093_v14 = vpack.c.bf16 %v4078_v11, %v4077_v15 }
 0x798   :  { %5171 = vmatprep.mubr.msk.bf16.mxu0 %vm115_vm0, %v4093_v14 }
 0x79a   :  { %v5236_v33 = vpop.permute.xlu1 %5235 }
 0x79b   :  { %v5238_v52 = vunpack.i.h.bf16 %v5236_v33  ;;  %v5237_v27 = vunpack.i.l.bf16 %v5236_v33 }
 0x79d   :  { %v4080_v43 = vsel %vm493_vm2, %v6197_v45, %v5238_v52  ;;  %v4079_v46 = vsel %vm493_vm2, %v6192_v44, %v5237_v27 }
 0x79e   :  { %v4094_v36 = vpack.c.bf16 %v4080_v43, %v4079_v46 }
 0x7a0   :  { %5172 = vmatmul.mubr.msk.bf16.vlgmr.msra.gmra.mrb[128].mxu0 %vm115_vm0, %v4094_v36 }
 0x7a2   :  { %v5241_v23 = vpop.permute.xlu0 %5240 }
 0x7a3   :  { %v5243_v42 = vunpack.i.h.bf16 %v5241_v23  ;;  %v5242_v39 = vunpack.i.l.bf16 %v5241_v23 }
 0x7a5   :  { %v4082_v57 = vsel %vm493_vm2, %v6201_v51, %v5243_v42  ;;  %v4081_v12 = vsel %vm493_vm2, %v6199_v48, %v5242_v39 }
 0x7a6   :  { %v4095_v56 = vpack.c.bf16 %v4082_v57, %v4081_v12 }
 0x7a8   :  { %5175 = vmatprep.mubr.msk.bf16.mxu0 %vm115_vm0, %v4095_v56 }
 0x7aa   :  { %v5246_v8 = vpop.permute.xlu1 %5245 }
 0x7ab   :  { %v5248_v45 = vunpack.i.h.bf16 %v5246_v8  ;;  %v5247_v54 = vunpack.i.l.bf16 %v5246_v8 }
 0x7ad   :  { %v4084_v44 = vsel %vm493_vm2, %v6211_v16, %v5248_v45  ;;  %v4083_v22 = vsel %vm493_vm2, %v6203_v24, %v5247_v54 }
 0x7ae   :  { %v4096_v29 = vpack.c.bf16 %v4084_v44, %v4083_v22 }
 0x7b0   :  { %5176 = vmatmul.mubr.msk.bf16.gmra.mrb[132].mxu0 %vm115_vm0, %v4096_v29 }
 0x7b2   :  { %v5251_v32 = vpop.permute.xlu0 %5250 }
 0x7b3   :  { %v5253_v51 = vunpack.i.h.bf16 %v5251_v32  ;;  %v5252_v25 = vunpack.i.l.bf16 %v5251_v32 }
 0x7b5   :  { %v4086_v48 = vsel %vm493_vm2, %v6215_v49, %v5253_v51  ;;  %v4085_v34 = vsel %vm493_vm2, %v6205_v62, %v5252_v25 }
 0x7b6   :  { %v4097_v59 = vpack.c.bf16 %v4086_v48, %v4085_v34 }
 0x7b8   :  { %5179 = vmatprep.mubr.msk.bf16.mxu0 %vm115_vm0, %v4097_v59 }
 0x7ba   :  { %v5256_v2 = vpop.permute.xlu1 %5255 }
 0x7bb   :  { %v5258_v16 = vunpack.i.h.bf16 %v5256_v2  ;;  %v5257_v19 = vunpack.i.l.bf16 %v5256_v2 }
 0x7bd   :  { %v4088_v24 = vsel %vm493_vm2, %v6217_v13, %v5258_v16  ;;  %v4087_v37 = vsel %vm493_vm2, %v6207_v0, %v5257_v19  ;;  %v5288_v0 = vld [vmem:[%s6635_s7] sm:$0xff]  }
 0x7be   :  { %v4098_v9 = vpack.c.bf16 %v4088_v24, %v4087_v37  ;;  %5187 = vmatprep.subr.bf16.mxu1 %v5288_v0 }
 0x7bf   :  { %5188 = vmatpush3.bf16.msra.mxu1 %v5288_v0 }
 0x7c0   :  { %5180 = vmatmul.mubr.msk.bf16.gmra.mrb[136].mxu0 %vm115_vm0, %v4098_v9 }
 0x7ef   :  { %v5261_v20 = vpop.permute.xlu0 %5260 }
 0x7f0   :  { %v5263_v49 = vunpack.i.h.bf16 %v5261_v20  ;;  %v5262_v50 = vunpack.i.l.bf16 %v5261_v20 }
 0x7f2   :  { %v4090_v62 = vsel %vm493_vm2, %v6219_v53, %v5263_v49  ;;  %v4089_v41 = vsel %vm493_vm2, %v6209_v3, %v5262_v50  ;;  %v4549_v3 = vld [vmem:[%s6636_s6] ss:$0 sm:$0xff] }
 0x7f3   :  { %v4099_v28 = vpack.c.bf16 %v4090_v62, %v4089_v41 }
 0x7f5   :  { %5183 = vmatprep.mubr.msk.bf16.mxu0 %vm115_vm0, %v4099_v28 }
 0x7f7   :  { %v5266_v10 = vpop.permute.xlu1 %5265 }
 0x7f8   :  { %v5268_v13 = vunpack.i.h.bf16 %v5266_v10  ;;  %v5267_v18 = vunpack.i.l.bf16 %v5266_v10  ;;  %v4559_v10 = vld [vmem:[%s6637_s8] ss:$0 sm:$0xff] }
 0x7fa   :  { %v4092_v55 = vsel %vm493_vm2, %v6223_v30, %v5268_v13  ;;  %v4091_v26 = vsel %vm493_vm2, %v6213_v47, %v5267_v18 }
 0x7fb   :  { %v4100_v53 = vpack.c.bf16 %v4092_v55, %v4091_v26 }
 0x7fd   :  { %5184 = vmatmul.mubr.msk.bf16.gmra.mrb[140].mxu0 %vm115_vm0, %v4100_v53 }
 0x873   :  { %v5173_v60 = vpop.f32.mrb[128].mxu0 }
 0x874   :  { %v4183_v7 = vadd.f32 %v5173_v60, %v4549_v3  ;;  %v4174_v40 = vpop.f32.mrb[129].mxu0 }
 0x875   :  { %v4175_v21 = vadd.f32 %v4549_v3, %v4174_v40  ;;  %v5174_v63 = vpop.f32.mrb[130].mxu0 }
 0x876   :  { %v4186_v38 = vadd.f32 %v5174_v63, %v4549_v3  ;;  %v4177_v6 = vpop.f32.mrb[131].mxu0  ;;  %v4239_v58 = vmax.f32 %v4183_v7, 0.0 }
 0x877   :  { %v4178_v30 = vadd.f32 %v4549_v3, %v4177_v6  ;;  %v4237_v47 = vmax.f32 %v4175_v21, 0.0 }
 0x878   :  { %v4240_v1 = vmax.f32 %v4186_v38, 0.0 }
 0x879   :  { %v4238_v4 = vmax.f32 %v4178_v30, 0.0 }
 0x87a   :  { %v4254_v61 = vpack.c.bf16 %v4240_v1, %v4239_v58 }
 0x87b   :  { %v4253_v35 = vpack.c.bf16 %v4238_v4, %v4237_v47 }
 0x87d   :  { %5189 = vmatprep.mubr.msk.bf16.mxu1 %vm115_vm0, %v4253_v35 }
 0x87e   :  { %5190 = vmatmul.mubr.msk.bf16.vlgmr.msra.gmra.mrb[144].mxu1 %vm115_vm0, %v4254_v61 }
 0x883   :  { %v5177_v17 = vpop.f32.mrb[132].mxu0 }
 0x884   :  { %v4199_v31 = vadd.f32 %v5177_v17, %v4549_v3  ;;  %v4190_v5 = vpop.f32.mrb[133].mxu0 }
 0x885   :  { %v4191_v11 = vadd.f32 %v4549_v3, %v4190_v5  ;;  %v5178_v15 = vpop.f32.mrb[134].mxu0 }
 0x886   :  { %v4202_v14 = vadd.f32 %v5178_v15, %v4549_v3  ;;  %v4193_v33 = vpop.f32.mrb[135].mxu0  ;;  %v4243_v27 = vmax.f32 %v4199_v31, 0.0 }
 0x887   :  { %v4194_v52 = vadd.f32 %v4549_v3, %v4193_v33  ;;  %v4241_v46 = vmax.f32 %v4191_v11, 0.0 }
 0x888   :  { %v4244_v43 = vmax.f32 %v4202_v14, 0.0 }
 0x889   :  { %v4242_v36 = vmax.f32 %v4194_v52, 0.0 }
 0x88a   :  { %v4256_v23 = vpack.c.bf16 %v4244_v43, %v4243_v27 }
 0x88b   :  { %v4255_v42 = vpack.c.bf16 %v4242_v36, %v4241_v46 }
 0x88d   :  { %5193 = vmatprep.mubr.msk.bf16.mxu1 %vm115_vm0, %v4255_v42 }
 0x88e   :  { %5194 = vmatmul.mubr.msk.bf16.gmra.mrb[148].mxu1 %vm115_vm0, %v4256_v23 }
 0x893   :  { %v5181_v39 = vpop.f32.mrb[136].mxu0 }
 0x894   :  { %v4215_v57 = vadd.f32 %v5181_v39, %v4549_v3  ;;  %v4206_v12 = vpop.f32.mrb[137].mxu0 }
 0x895   :  { %v4207_v56 = vadd.f32 %v4549_v3, %v4206_v12  ;;  %v5182_v8 = vpop.f32.mrb[138].mxu0 }
 0x896   :  { %v4218_v45 = vadd.f32 %v5182_v8, %v4549_v3  ;;  %v4209_v54 = vpop.f32.mrb[139].mxu0  ;;  %v4247_v22 = vmax.f32 %v4215_v57, 0.0 }
 0x897   :  { %v4210_v44 = vadd.f32 %v4549_v3, %v4209_v54  ;;  %v4245_v32 = vmax.f32 %v4207_v56, 0.0 }
 0x898   :  { %v4248_v29 = vmax.f32 %v4218_v45, 0.0 }
 0x899   :  { %v4246_v51 = vmax.f32 %v4210_v44, 0.0 }
 0x89a   :  { %v4258_v25 = vpack.c.bf16 %v4248_v29, %v4247_v22 }
 0x89b   :  { %v4257_v48 = vpack.c.bf16 %v4246_v51, %v4245_v32 }
 0x89d   :  { %5197 = vmatprep.mubr.msk.bf16.mxu1 %vm115_vm0, %v4257_v48 }
 0x89e   :  { %5198 = vmatmul.mubr.msk.bf16.gmra.mrb[152].mxu1 %vm115_vm0, %v4258_v25 }
 0x8d0   :  { %v5185_v34 = vpop.f32.mrb[140].mxu0 }
 0x8d1   :  { %v4231_v59 = vadd.f32 %v5185_v34, %v4549_v3  ;;  %v4222_v2 = vpop.f32.mrb[141].mxu0 }
 0x8d2   :  { %v4223_v16 = vadd.f32 %v4549_v3, %v4222_v2  ;;  %v5186_v19 = vpop.f32.mrb[142].mxu0 }
 0x8d3   :  { %v4234_v24 = vadd.f32 %v5186_v19, %v4549_v3  ;;  %v4225_v37 = vpop.f32.mrb[143].mxu0  ;;  %v4251_v20 = vmax.f32 %v4231_v59, 0.0 }
 0x8d4   :  { %v4226_v9 = vadd.f32 %v4549_v3, %v4225_v37  ;;  %v4249_v50 = vmax.f32 %v4223_v16, 0.0 }
 0x8d5   :  { %v4252_v49 = vmax.f32 %v4234_v24, 0.0 }
 0x8d6   :  { %v4250_v62 = vmax.f32 %v4226_v9, 0.0 }
 0x8d7   :  { %v4260_v41 = vpack.c.bf16 %v4252_v49, %v4251_v20 }
 0x8d8   :  { %v4259_v28 = vpack.c.bf16 %v4250_v62, %v4249_v50 }
 0x8da   :  { %5201 = vmatprep.mubr.msk.bf16.mxu1 %vm115_vm0, %v4259_v28 }
 0x8db   :  { %5202 = vmatmul.mubr.msk.bf16.gmra.mrb[156].mxu1 %vm115_vm0, %v4260_v41 }
 0x951   :  { %v5191_v13 = vpop.f32.mrb[144].mxu1 }
 0x952   :  { %v4343_v18 = vadd.f32 %v5191_v13, %v4559_v10  ;;  %v4334_v0 = vpop.f32.mrb[145].mxu1 }
 0x953   :  { %v4335_v55 = vadd.f32 %v4559_v10, %v4334_v0  ;;  %v5192_v26 = vpop.f32.mrb[146].mxu1 }
 0x954   :  { %v4399_v53 = vpack.c.bf16 %v4343_v18, %v4343_v18  ;;  %v4346_v3 = vadd.f32 %v5192_v26, %v4559_v10  ;;  %v4337_v60 = vpop.f32.mrb[147].mxu1 }
 0x955   :  { %v4397_v7 = vpack.c.bf16 %v4335_v55, %v4335_v55  ;;  %v4338_v40 = vadd.f32 %v4559_v10, %v4337_v60 }
 0x956   :  { %4416 = vst.msk [vmem:[%s6638_s9 + $0x8] sm:$0xf] %vm4413_vm4, %v4399_v53  ;;  %v4400_v21 = vpack.c.bf16 %v4346_v3, %v4346_v3 }
 0x957   :  { %4414 = vst.msk [vmem:[%s6638_s9] sm:$0xf] %vm4413_vm4, %v4397_v7  ;;  %v4398_v63 = vpack.c.bf16 %v4338_v40, %v4338_v40 }
 0x958   :  { %4417 = vst.msk [vmem:[%s6638_s9 + $0xc] sm:$0xf] %vm4413_vm4, %v4400_v21 }
 0x959   :  { %4415 = vst.msk [vmem:[%s6638_s9 + $0x4] sm:$0xf] %vm4413_vm4, %v4398_v63 }
 0x961   :  { %v5195_v38 = vpop.f32.mrb[148].mxu1 }
 0x962   :  { %v4359_v6 = vadd.f32 %v5195_v38, %v4559_v10  ;;  %v4350_v30 = vpop.f32.mrb[149].mxu1 }
 0x963   :  { %v4351_v58 = vadd.f32 %v4559_v10, %v4350_v30  ;;  %v5196_v1 = vpop.f32.mrb[150].mxu1 }
 0x964   :  { %v4403_v47 = vpack.c.bf16 %v4359_v6, %v4359_v6  ;;  %v4362_v4 = vadd.f32 %v5196_v1, %v4559_v10  ;;  %v4353_v61 = vpop.f32.mrb[151].mxu1 }
 0x965   :  { %v4401_v35 = vpack.c.bf16 %v4351_v58, %v4351_v58  ;;  %v4354_v17 = vadd.f32 %v4559_v10, %v4353_v61 }
 0x966   :  { %4420 = vst.msk [vmem:[%s6638_s9 + $0x18] sm:$0xf] %vm4413_vm4, %v4403_v47  ;;  %v4404_v31 = vpack.c.bf16 %v4362_v4, %v4362_v4 }
 0x967   :  { %4418 = vst.msk [vmem:[%s6638_s9 + $0x10] sm:$0xf] %vm4413_vm4, %v4401_v35  ;;  %v4402_v5 = vpack.c.bf16 %v4354_v17, %v4354_v17 }
 0x968   :  { %4421 = vst.msk [vmem:[%s6638_s9 + $0x1c] sm:$0xf] %vm4413_vm4, %v4404_v31 }
 0x969   :  { %4419 = vst.msk [vmem:[%s6638_s9 + $0x14] sm:$0xf] %vm4413_vm4, %v4402_v5 }
 0x971   :  { %v5199_v11 = vpop.f32.mrb[152].mxu1 }
 0x972   :  { %v4375_v15 = vadd.f32 %v5199_v11, %v4559_v10  ;;  %v4366_v14 = vpop.f32.mrb[153].mxu1 }
 0x973   :  { %v4367_v33 = vadd.f32 %v4559_v10, %v4366_v14  ;;  %v5200_v52 = vpop.f32.mrb[154].mxu1 }
 0x974   :  { %v4407_v27 = vpack.c.bf16 %v4375_v15, %v4375_v15  ;;  %v4378_v43 = vadd.f32 %v5200_v52, %v4559_v10  ;;  %v4369_v46 = vpop.f32.mrb[155].mxu1 }
 0x975   :  { %v4405_v36 = vpack.c.bf16 %v4367_v33, %v4367_v33  ;;  %v4370_v23 = vadd.f32 %v4559_v10, %v4369_v46 }
 0x976   :  { %4424 = vst.msk [vmem:[%s6638_s9 + $0x28] sm:$0xf] %vm4413_vm4, %v4407_v27  ;;  %v4408_v42 = vpack.c.bf16 %v4378_v43, %v4378_v43 }
 0x977   :  { %4422 = vst.msk [vmem:[%s6638_s9 + $0x20] sm:$0xf] %vm4413_vm4, %v4405_v36  ;;  %v4406_v39 = vpack.c.bf16 %v4370_v23, %v4370_v23 }
 0x978   :  { %4425 = vst.msk [vmem:[%s6638_s9 + $0x2c] sm:$0xf] %vm4413_vm4, %v4408_v42 }
 0x979   :  { %4423 = vst.msk [vmem:[%s6638_s9 + $0x24] sm:$0xf] %vm4413_vm4, %v4406_v39 }
 0x9ae   :  { %v5203_v57 = vpop.f32.mrb[156].mxu1 }
 0x9af   :  { %v4391_v12 = vadd.f32 %v5203_v57, %v4559_v10  ;;  %v4382_v56 = vpop.f32.mrb[157].mxu1 }
 0x9b0   :  { %v4383_v8 = vadd.f32 %v4559_v10, %v4382_v56  ;;  %v5204_v45 = vpop.f32.mrb[158].mxu1 }
 0x9b1   :  { %v4411_v54 = vpack.c.bf16 %v4391_v12, %v4391_v12  ;;  %v4394_v44 = vadd.f32 %v5204_v45, %v4559_v10  ;;  %v4385_v22 = vpop.f32.mrb[159].mxu1 }
 0x9b2   :  { %v4409_v29 = vpack.c.bf16 %v4383_v8, %v4383_v8  ;;  %v4386_v32 = vadd.f32 %v4559_v10, %v4385_v22 }
 0x9b3   :  { %4428 = vst.msk [vmem:[%s6638_s9 + $0x38] sm:$0xf] %vm4413_vm4, %v4411_v54  ;;  %v4412_v51 = vpack.c.bf16 %v4394_v44, %v4394_v44 }
 0x9b4   :  { %4426 = vst.msk [vmem:[%s6638_s9 + $0x30] sm:$0xf] %vm4413_vm4, %v4409_v29  ;;  %v4410_v25 = vpack.c.bf16 %v4386_v32, %v4386_v32 }
 0x9b5   :  { %4429 = vst.msk [vmem:[%s6638_s9 + $0x3c] sm:$0xf] %vm4413_vm4, %v4412_v51 }
 0x9b6   :  { %4427 = vst.msk [vmem:[%s6638_s9 + $0x34] sm:$0xf] %vm4413_vm4, %v4410_v25 }

// kernel: _lambda_.33
= control target key start
LH: loop header
LB: loop body
LE: loop exit
PB: predicated region body
PF: predicated region fallthrough
CT: control target
= control target key end

     0   :  { %vm66_vm0 = vcmask 130048   ;;  %vm248_vm1 = vcmask 7168   ;;  %s407_s1 = inlined_call_operand.vmem [shape: bf16[16,16], index: 1, kind: input, shape index: {}]   ;;  %s408_s0 = inlined_call_operand.vmem [shape: bf16[64,16], index: 0, kind: input, shape index: {}]   ;;  %s409_s3 = inlined_call_operand.vmem [shape: bf16[16,1], index: 3, kind: input, shape index: {}]   ;;  %s410_s4 = inlined_call_operand.<no memory space> [shape: f32[1,1], index: 4, kind: input, shape index: {}]   ;;  %s411_s2 = inlined_call_operand.vmem [shape: f32[1,16], index: 2, kind: input, shape index: {}]   ;;  %s412_s5 = inlined_call_operand.vmem [shape: f32[64,1], index: 5, kind: output, shape index: {}]  }
   0x1   :  { %v307_v0 = vld [vmem:[%s407_s1] sm:$0xff]   ;;  %v309_v2 = vld [vmem:[%s408_s0 + $0x8] sm:$0xff]   ;;  %v310_v3 = vld [vmem:[%s408_s0 + $0x10] sm:$0xff]   ;;  %v10_v6 = vstv %s410_s4 }
   0x2   :  { %v308_v1 = vld [vmem:[%s408_s0] sm:$0xff]   ;;  %287 = vmatprep.subr.bf16.mxu0 %v307_v0  ;;  %v311_v4 = vld [vmem:[%s408_s0 + $0x18] sm:$0xff]   ;;  %11 = vst [vmem:[#allocation2] sm:$0x1] %v10_v6 }
   0x3   :  { %288 = vmatpush3.bf16.msra.mxu0 %v307_v0  ;;  %289 = vmatprep.mubr.msk.bf16.mxu0 %vm66_vm0, %v308_v1  ;;  %v312_v5 = vld [vmem:[%s409_s3] sm:$0xff]  }
   0x4   :  { %297 = vmatprep.subr.bf16.mxu1 %v312_v5  ;;  %v261_v7 = vld [vmem:[%s411_s2] ss:$0 sm:$0xff] }
   0x5   :  { %298 = vmatpush3.bf16.msra.mxu1 %v312_v5 }
   0x6   :  { %290 = vmatmul.mubr.msk.bf16.vlgmr.msra.gmra.mrb[0].mxu0 %vm66_vm0, %v309_v2 }
   0x7   :  { %293 = vmatprep.mubr.msk.bf16.mxu0 %vm66_vm0, %v310_v3 }
   0x9   :  { %v271_v36 = vld [vmem:[#allocation2] ss:$0 sm:$0xff] }
   0xe   :  { %294 = vmatmul.mubr.msk.bf16.gmra.mrb[4].mxu0 %vm66_vm0, %v311_v4 }
  0xd9   :  { %v291_v8 = vpop.f32.mrb[0].mxu0 }
  0xda   :  { %v122_v9 = vadd.f32 %v291_v8, %v261_v7  ;;  %v113_v10 = vpop.f32.mrb[1].mxu0 }
  0xdb   :  { %v114_v11 = vadd.f32 %v261_v7, %v113_v10  ;;  %v292_v12 = vpop.f32.mrb[2].mxu0 }
  0xdc   :  { %v125_v13 = vadd.f32 %v292_v12, %v261_v7  ;;  %v116_v14 = vpop.f32.mrb[3].mxu0  ;;  %v146_v16 = vmax.f32 %v122_v9, 0.0 }
  0xdd   :  { %v117_v15 = vadd.f32 %v261_v7, %v116_v14  ;;  %v144_v18 = vmax.f32 %v114_v11, 0.0 }
  0xde   :  { %v147_v17 = vmax.f32 %v125_v13, 0.0 }
  0xdf   :  { %v145_v19 = vmax.f32 %v117_v15, 0.0 }
  0xe0   :  { %v153_v20 = vpack.c.bf16 %v147_v17, %v146_v16 }
  0xe1   :  { %v295_v21 = vpop.f32.mrb[4].mxu0  ;;  %v152_v22 = vpack.c.bf16 %v145_v19, %v144_v18 }
  0xe2   :  { %v138_v23 = vadd.f32 %v295_v21, %v261_v7  ;;  %v129_v24 = vpop.f32.mrb[5].mxu0 }
  0xe3   :  { %v130_v25 = vadd.f32 %v261_v7, %v129_v24  ;;  %v296_v26 = vpop.f32.mrb[6].mxu0  ;;  %299 = vmatprep.mubr.msk.bf16.mxu1 %vm66_vm0, %v152_v22 }
  0xe4   :  { %v141_v27 = vadd.f32 %v296_v26, %v261_v7  ;;  %v132_v28 = vpop.f32.mrb[7].mxu0  ;;  %300 = vmatmul.mubr.msk.bf16.vlgmr.msra.gmra.mrb[0].mxu1 %vm66_vm0, %v153_v20  ;;  %v150_v30 = vmax.f32 %v138_v23, 0.0 }
  0xe5   :  { %v133_v29 = vadd.f32 %v261_v7, %v132_v28  ;;  %v148_v32 = vmax.f32 %v130_v25, 0.0 }
  0xe6   :  { %v151_v31 = vmax.f32 %v141_v27, 0.0 }
  0xe7   :  { %v149_v33 = vmax.f32 %v133_v29, 0.0 }
  0xe8   :  { %v155_v34 = vpack.c.bf16 %v151_v31, %v150_v30 }
  0xe9   :  { %v154_v35 = vpack.c.bf16 %v149_v33, %v148_v32 }
  0xeb   :  { %303 = vmatprep.mubr.msk.bf16.mxu1 %vm66_vm0, %v154_v35 }
  0xec   :  { %304 = vmatmul.mubr.msk.bf16.gmra.mrb[4].mxu1 %vm66_vm0, %v155_v34 }
 0x1b7   :  { %v301_v37 = vpop.f32.mrb[0].mxu1 }
 0x1b8   :  { %v226_v38 = vadd.f32 %v301_v37, %v271_v36  ;;  %v217_v39 = vpop.f32.mrb[1].mxu1 }
 0x1b9   :  { %v218_v40 = vadd.f32 %v271_v36, %v217_v39  ;;  %v302_v41 = vpop.f32.mrb[2].mxu1 }
 0x1ba   :  { %251 = vst.msk [vmem:[%s412_s5 + $0x10] sm:$0xff] %vm248_vm1, %v226_v38  ;;  %v229_v42 = vadd.f32 %v302_v41, %v271_v36  ;;  %v220_v43 = vpop.f32.mrb[3].mxu1 }
 0x1bb   :  { %249 = vst.msk [vmem:[%s412_s5] sm:$0xff] %vm248_vm1, %v218_v40  ;;  %v221_v44 = vadd.f32 %v271_v36, %v220_v43 }
 0x1bc   :  { %252 = vst.msk [vmem:[%s412_s5 + $0x18] sm:$0xff] %vm248_vm1, %v229_v42 }
 0x1bd   :  { %250 = vst.msk [vmem:[%s412_s5 + $0x8] sm:$0xff] %vm248_vm1, %v221_v44 }
 0x1bf   :  { %v305_v45 = vpop.f32.mrb[4].mxu1 }
 0x1c0   :  { %v242_v46 = vadd.f32 %v305_v45, %v271_v36  ;;  %v233_v47 = vpop.f32.mrb[5].mxu1 }
 0x1c1   :  { %v234_v48 = vadd.f32 %v271_v36, %v233_v47  ;;  %v306_v49 = vpop.f32.mrb[6].mxu1 }
 0x1c2   :  { %255 = vst.msk [vmem:[%s412_s5 + $0x30] sm:$0xff] %vm248_vm1, %v242_v46  ;;  %v245_v50 = vadd.f32 %v306_v49, %v271_v36  ;;  %v236_v51 = vpop.f32.mrb[7].mxu1 }
 0x1c3   :  { %253 = vst.msk [vmem:[%s412_s5 + $0x20] sm:$0xff] %vm248_vm1, %v234_v48  ;;  %v237_v52 = vadd.f32 %v271_v36, %v236_v51 }
 0x1c4   :  { %256 = vst.msk [vmem:[%s412_s5 + $0x38] sm:$0xff] %vm248_vm1, %v245_v50 }
 0x1c5   :  { %254 = vst.msk [vmem:[%s412_s5 + $0x28] sm:$0xff] %vm248_vm1, %v237_v52 }

// kernel: _lambda_.28
= control target key start
LH: loop header
LB: loop body
LE: loop exit
PB: predicated region body
PF: predicated region fallthrough
CT: control target
= control target key end

     0   :  { %vm107_vm0 = vcmask 130048   ;;  %v6763_v18 = vmov 0.0   ;;  %vm5459_vm1 = vmmov 0   ;;  %vm549_vm2 = vcmask 64512   ;;  %s5462_s27 = smov 104   ;;  %s5463_s30 = smov 8   ;;  %s6752_s4 = inlined_call_operand.vmem [shape: bf16[16,32], index: 4, kind: input, shape index: {}]   ;;  %s6753_s1 = inlined_call_operand.vmem [shape: bf16[16,8,16], index: 1, kind: input, shape index: {}]   ;;  %s6754_s2 = inlined_call_operand.vmem [shape: bf16[16,16], index: 2, kind: input, shape index: {}]   ;;  %s6755_s0 = inlined_call_operand.vmem [shape: bf16[16,8,16], index: 0, kind: input, shape index: {}]   ;;  %s6756_s5 = inlined_call_operand.vmem [shape: f32[1,32], index: 5, kind: input, shape index: {}]   ;;  %s6757_s3 = inlined_call_operand.vmem [shape: f32[1,16], index: 3, kind: input, shape index: {}]   ;;  %s6758_s6 = inlined_call_operand.vmem [shape: bf16[16,16], index: 6, kind: input, shape index: {}]   ;;  %s6759_s8 = inlined_call_operand.vmem [shape: bf16[16,16], index: 8, kind: input, shape index: {}]   ;;  %s6760_s7 = inlined_call_operand.vmem [shape: f32[1,16], index: 7, kind: input, shape index: {}]   ;;  %s6761_s9 = inlined_call_operand.vmem [shape: f32[1,16], index: 9, kind: input, shape index: {}]   ;;  %s6762_s10 = inlined_call_operand.vmem [shape: bf16[16,8,16], index: 10, kind: output, shape index: {}]  }
   0x1   :  { %v5310_v0 = vld [vmem:[%s6752_s4] sm:$0xff]   ;;  %v5312_v2 = vld [vmem:[%s6753_s1 + $0x8] sm:$0xff]   ;;  %v5316_v6 = vld [vmem:[%s6753_s1 + $0x10] sm:$0xff]   ;;  %vm1499_vm3 = vcmask 1043456   ;;  %vm4439_vm4 = vcmask 125952  }
   0x2   :  { %v5311_v1 = vld [vmem:[%s6753_s1] sm:$0xff]   ;;  %4826 = vmatprep.subr.bf16.mxu1 %v5310_v0  ;;  %v5315_v5 = vld [vmem:[%s6755_s0 + $0x8] sm:$0xff]   ;;  %v5318_v7 = vld [vmem:[%s6755_s0 + $0x10] sm:$0xff]  }
   0x3   :  { %4827 = vmatpush3.bf16.msra.mxu1 %v5310_v0  ;;  %4828 = vmatprep.mubr.msk.bf16.mxu1 %vm107_vm0, %v5311_v1  ;;  %v5313_v3 = vld [vmem:[%s6754_s2] sm:$0xff]   ;;  %v5317_v8 = vld [vmem:[%s6753_s1 + $0x18] sm:$0xff]   ;;  %v5321_v12 = vld [vmem:[%s6753_s1 + $0x28] sm:$0xff]  }
   0x4   :  { %v5314_v4 = vld [vmem:[%s6755_s0] sm:$0xff]   ;;  %4808 = vmatprep.subr.bf16.mxu0 %v5313_v3  ;;  %v5319_v10 = vld [vmem:[%s6755_s0 + $0x18] sm:$0xff]   ;;  %v5324_v13 = vld [vmem:[%s6753_s1 + $0x30] sm:$0xff]   ;;  %4850 = vmatprep.subr.bf16.mxu1 %v6763_v18 }
   0x5   :  { %4809 = vmatpush3.bf16.msra.mxu0 %v5313_v3  ;;  %4810 = vmatprep.mubr.msk.bf16.mxu0 %vm107_vm0, %v5314_v4  ;;  %v5320_v9 = vld [vmem:[%s6753_s1 + $0x20] sm:$0xff]   ;;  %v5323_v14 = vld [vmem:[%s6755_s0 + $0x28] sm:$0xff]   ;;  %v5326_v15 = vld [vmem:[%s6755_s0 + $0x30] sm:$0xff]  }
   0x6   :  { %4829 = vmatmul.mubr.msk.bf16.vlgmr.msra.gmra.mrb[0].mxu1 %vm107_vm0, %v5312_v2  ;;  %v5322_v11 = vld [vmem:[%s6755_s0 + $0x20] sm:$0xff]   ;;  %v5325_v16 = vld [vmem:[%s6753_s1 + $0x38] sm:$0xff]   ;;  %4844 = vmatprep.subr.bf16.mxu0 %v6763_v18 }
   0x7   :  { %4832 = vmatprep.mubr.msk.bf16.mxu1 %vm107_vm0, %v5316_v6  ;;  %v5327_v17 = vld [vmem:[%s6755_s0 + $0x38] sm:$0xff]   ;;  %v5598_v19 = vld [vmem:[%s6756_s5] ss:$0 sm:$0xff]  ;;  %s5461_s5 = smov 120  }
   0x8   :  { %4811 = vmatmul.mubr.msk.bf16.vlgmr.msra.gmra.mrb[0].mxu0 %vm107_vm0, %v5315_v5  ;;  %v5605_v25 = vld [vmem:[%s6757_s3] ss:$0 sm:$0xff]  ;;  %s5460_s3 = smov 112  }
   0x9   :  { %4814 = vmatprep.mubr.msk.bf16.mxu0 %vm107_vm0, %v5318_v7 }
   0xe   :  { %4833 = vmatmul.mubr.msk.bf16.gmra.mrb[4].mxu1 %vm107_vm0, %v5317_v8 }
   0xf   :  { %4836 = vmatprep.mubr.msk.bf16.mxu1 %vm107_vm0, %v5320_v9 }
  0x10   :  { %4815 = vmatmul.mubr.msk.bf16.gmra.mrb[4].mxu0 %vm107_vm0, %v5319_v10 }
  0x11   :  { %4818 = vmatprep.mubr.msk.bf16.mxu0 %vm107_vm0, %v5322_v11 }
  0x16   :  { %4837 = vmatmul.mubr.msk.bf16.gmra.mrb[8].mxu1 %vm107_vm0, %v5321_v12 }
  0x17   :  { %4840 = vmatprep.mubr.msk.bf16.mxu1 %vm107_vm0, %v5324_v13 }
  0x18   :  { %4819 = vmatmul.mubr.msk.bf16.gmra.mrb[8].mxu0 %vm107_vm0, %v5323_v14 }
  0x19   :  { %4822 = vmatprep.mubr.msk.bf16.mxu0 %vm107_vm0, %v5326_v15 }
  0x1e   :  { %4841 = vmatmul.mubr.msk.bf16.gmra.mrb[12].mxu1 %vm107_vm0, %v5325_v16 }
  0x1f   :  { %4852 = vmatprep.mubr.msk.bf16.mxu1 %vm5459_vm1, %v6763_v18 }
  0x20   :  { %4823 = vmatmul.mubr.msk.bf16.gmra.mrb[12].mxu0 %vm107_vm0, %v5327_v17 }
  0x21   :  { %4846 = vmatprep.mubr.msk.bf16.mxu0 %vm5459_vm1, %v6763_v18 }
  0xd9   :  { %v4830_v20 = vpop.f32.mrb[0].mxu1 }
  0xda   :  { %v431_v21 = vadd.f32 %v4830_v20, %v5598_v19  ;;  %v422_v22 = vpop.f32.mrb[1].mxu1 }
  0xdb   :  { %v423_v23 = vadd.f32 %v5598_v19, %v422_v22  ;;  %v4831_v24 = vpop.f32.mrb[2].mxu1  ;;  %v4812_v29 = vpop.f32.mrb[0].mxu0 }
  0xdc   :  { %v487_v26 = vmax.f32 %v431_v21, 0.0  ;;  %v434_v27 = vadd.f32 %v4831_v24, %v5598_v19  ;;  %v425_v28 = vpop.f32.mrb[3].mxu1  ;;  %v166_v32 = vpop.f32.mrb[1].mxu0  ;;  %v175_v63 = vadd.f32 %v4812_v29, %v5605_v25 }
  0xdd   :  { %v485_v30 = vmax.f32 %v423_v23, 0.0  ;;  %v426_v31 = vadd.f32 %v5598_v19, %v425_v28  ;;  %v167_v35 = vadd.f32 %v5605_v25, %v166_v32  ;;  %v4813_v36 = vpop.f32.mrb[2].mxu0 }
  0xde   :  { %v5609_v33 = vpack.c.bf16 %v487_v26, %v487_v26  ;;  %v488_v34 = vmax.f32 %v434_v27, 0.0  ;;  %v169_v39 = vpop.f32.mrb[3].mxu0  ;;  %v178_v1 = vadd.f32 %v4813_v36, %v5605_v25  ;;  %v231_v10 = vmax.f32 %v175_v63, 0.0 }
  0xdf   :  { %v5612_v37 = vpack.c.bf16 %v485_v30, %v485_v30  ;;  %v486_v38 = vmax.f32 %v426_v31, 0.0  ;;  %v229_v42 = vmax.f32 %v167_v35, 0.0  ;;  %v170_v44 = vadd.f32 %v5605_v25, %v169_v39 }
  0xe0   :  { %v5614_v40 = vpack.c.bf16 %v488_v34, %v488_v34  ;;  %1591 = vrot.lane.b32.xlu0 %v5609_v33, %s5460_s3  ;;  %v646_v3 = vsel %vm549_vm2, %v5609_v33, 0  ;;  %v232_v14 = vmax.f32 %v178_v1, 0.0  ;;  %v5683_v27 = vpack.c.bf16 %v231_v10, %v231_v10 }
  0xe1   :  { %v5618_v41 = vpack.c.bf16 %v486_v38, %v486_v38  ;;  %v554_v43 = vsel %vm549_vm2, %v5612_v37, 0  ;;  %v4834_v45 = vpop.f32.mrb[4].mxu1  ;;  %v5635_v55 = vpack.c.bf16 %v229_v42, %v229_v42  ;;  %v230_v56 = vmax.f32 %v170_v44, 0.0 }
  0xe2   :  { %1639 = vrot.lane.b32.xlu1 %v5614_v40, %s5460_s3  ;;  %4845 = vmatpush3.bf16.xpose.msra.mxu0 %v554_v43  ;;  %v447_v46 = vadd.f32 %v4834_v45, %v5598_v19  ;;  %v438_v47 = vpop.f32.mrb[5].mxu1  ;;  %v692_v11 = vsel %vm549_vm2, %v5614_v40, 0  ;;  %v5687_v30 = vpack.c.bf16 %v232_v14, %v232_v14 }
  0xe3   :  { %v600_v48 = vsel %vm549_vm2, %v5618_v41, 0  ;;  %4856 = vmatprep.subr.bf16.mxu0 %v6763_v18  ;;  %v439_v49 = vadd.f32 %v5598_v19, %v438_v47  ;;  %v4835_v50 = vpop.f32.mrb[6].mxu1  ;;  %v5633_v54 = vpop.f32.mrb[4].mxu0  ;;  %v5649_v2 = vpack.c.bf16 %v230_v56, %v230_v56 }
  0xe4   :  { %4851 = vmatpush3.bf16.xpose.msra.mxu1 %v600_v48  ;;  %1494 = vrot.lane.b32.xlu0 %v5612_v37, %s5460_s3  ;;  %v491_v51 = vmax.f32 %v447_v46, 0.0  ;;  %v450_v52 = vadd.f32 %v4835_v50, %v5598_v19  ;;  %v441_v53 = vpop.f32.mrb[7].mxu1  ;;  %v182_v58 = vpop.f32.mrb[5].mxu0 }
  0xe5   :  { %4862 = vmatprep.subr.bf16.mxu1 %v6763_v18  ;;  %v442_v57 = vadd.f32 %v5598_v19, %v441_v53  ;;  %v489_v60 = vmax.f32 %v439_v49, 0.0  ;;  %v5643_v62 = vpop.f32.mrb[6].mxu0  ;;  %v183_v15 = vadd.f32 %v5605_v25, %v182_v58  ;;  %v191_v53 = vadd.f32 %v5633_v54, %v5605_v25 }
  0xe6   :  { %1543 = vrot.lane.b32.xlu1 %v5618_v41, %s5460_s3  ;;  %v5641_v59 = vpack.c.bf16 %v491_v51, %v491_v51  ;;  %v492_v61 = vmax.f32 %v450_v52, 0.0  ;;  %v185_v0 = vpop.f32.mrb[7].mxu0 }
  0xe7   :  { %v490_v5 = vmax.f32 %v442_v57, 0.0  ;;  %v5657_v7 = vpack.c.bf16 %v489_v60, %v489_v60  ;;  %v233_v31 = vmax.f32 %v183_v15, 0.0  ;;  %v186_v32 = vadd.f32 %v5605_v25, %v185_v0 }
  0xe8   :  { %1783 = vrot.lane.b32.xlu0 %v5641_v59, %s5460_s3  ;;  %v5655_v4 = vpack.c.bf16 %v492_v61, %v492_v61  ;;  %v194_v57 = vadd.f32 %v5643_v62, %v5605_v25  ;;  %v830_v60 = vsel %vm549_vm2, %v5641_v59, 0  ;;  %v235_v54 = vmax.f32 %v191_v53, 0.0 }
  0xe9   :  { %4847 = vmatmul.mubr.msk.bf16.vlgmr.msra.gmra.mrb[16].mxu0 %vm549_vm2, %v5635_v55  ;;  %v4838_v6 = vpop.f32.mrb[8].mxu1  ;;  %v5673_v20 = vpack.c.bf16 %v490_v5, %v490_v5  ;;  %v738_v28 = vsel %vm549_vm2, %v5657_v7, 0  ;;  %v5714_v47 = vpack.c.bf16 %v233_v31, %v233_v31  ;;  %v234_v48 = vmax.f32 %v186_v32, 0.0 }
  0xea   :  { %4857 = vmatpush3.bf16.xpose.msra.mxu0 %v646_v3  ;;  %4858 = vmatprep.mubr.msk.bf16.mxu0 %vm5459_vm1, %v6763_v18  ;;  %v463_v8 = vadd.f32 %v4838_v6, %v5598_v19  ;;  %v454_v9 = vpop.f32.mrb[9].mxu1  ;;  %v876_v62 = vsel %vm549_vm2, %v5655_v4, 0  ;;  %v236_v63 = vmax.f32 %v194_v57, 0.0  ;;  %v5754_v1 = vpack.c.bf16 %v235_v54, %v235_v54 }
  0xeb   :  { %4853 = vmatmul.mubr.msk.bf16.vlgmr.msra.gmra.mrb[16].mxu1 %vm549_vm2, %v5649_v2  ;;  %4868 = vmatprep.subr.bf16.mxu0 %v6763_v18  ;;  %v455_v12 = vadd.f32 %v5598_v19, %v454_v9  ;;  %v4839_v13 = vpop.f32.mrb[10].mxu1  ;;  %v5671_v17 = vpop.f32.mrb[8].mxu0  ;;  %v784_v43 = vsel %vm549_vm2, %v5673_v20, 0  ;;  %v5731_v58 = vpack.c.bf16 %v234_v48, %v234_v48 }
  0xec   :  { %4863 = vmatpush3.bf16.xpose.msra.mxu1 %v692_v11  ;;  %4864 = vmatprep.mubr.msk.bf16.mxu1 %vm5459_vm1, %v6763_v18  ;;  %v457_v16 = vpop.f32.mrb[11].mxu1  ;;  %v495_v21 = vmax.f32 %v463_v8, 0.0  ;;  %v466_v22 = vadd.f32 %v4839_v13, %v5598_v19  ;;  %v198_v23 = vpop.f32.mrb[9].mxu0  ;;  %v5758_v5 = vpack.c.bf16 %v236_v63, %v236_v63  ;;  %v207_v13 = vadd.f32 %v5671_v17, %v5605_v25 }
  0xed   :  { %4874 = vmatprep.subr.bf16.mxu1 %v6763_v18  ;;  %1831 = vrot.lane.b32.xlu1 %v5655_v4, %s5460_s3  ;;  %v493_v24 = vmax.f32 %v455_v12, 0.0  ;;  %v5679_v26 = vpop.f32.mrb[10].mxu0  ;;  %v458_v36 = vadd.f32 %v5598_v19, %v457_v16  ;;  %v199_v0 = vadd.f32 %v5605_v25, %v198_v23 }
  0xee   :  { %1687 = vrot.lane.b32.xlu0 %v5657_v7, %s5460_s3  ;;  %v201_v29 = vpop.f32.mrb[11].mxu0  ;;  %v5692_v34 = vpack.c.bf16 %v495_v21, %v495_v21  ;;  %v496_v35 = vmax.f32 %v466_v22, 0.0  ;;  %v210_v16 = vadd.f32 %v5679_v26, %v5605_v25  ;;  %v239_v23 = vmax.f32 %v207_v13, 0.0 }
  0xef   :  { %v5701_v39 = vpack.c.bf16 %v493_v24, %v493_v24  ;;  %v494_v50 = vmax.f32 %v458_v36, 0.0  ;;  %v237_v6 = vmax.f32 %v199_v0, 0.0  ;;  %v202_v8 = vadd.f32 %v5605_v25, %v201_v29 }
  0xf0   :  { %v5716_v49 = vpack.c.bf16 %v496_v35, %v496_v35  ;;  %v1014_v22 = vsel %vm549_vm2, %v5692_v34, 0  ;;  %v5802_v32 = vpack.c.bf16 %v239_v23, %v239_v23 }
  0xf1   :  { %4859 = vmatmul.mubr.msk.bf16.vlgmr.msra.gmra.mrb[20].mxu0 %vm549_vm2, %v5683_v27  ;;  %1735 = vrot.lane.b32.xlu1 %v5673_v20, %s5460_s3  ;;  %v5697_v38 = vpop.f32.mrb[12].mxu1  ;;  %v5737_v61 = vpack.c.bf16 %v494_v50, %v494_v50  ;;  %v922_v3 = vsel %vm549_vm2, %v5701_v39, 0  ;;  %v5773_v11 = vpack.c.bf16 %v237_v6, %v237_v6  ;;  %v238_v12 = vmax.f32 %v202_v8, 0.0 }
  0xf2   :  { %4869 = vmatpush3.bf16.xpose.msra.mxu0 %v738_v28  ;;  %4870 = vmatprep.mubr.msk.bf16.mxu0 %vm5459_vm1, %v6763_v18  ;;  %v470_v42 = vpop.f32.mrb[13].mxu1  ;;  %v1060_v26 = vsel %vm549_vm2, %v5716_v49, 0  ;;  %v240_v28 = vmax.f32 %v210_v16, 0.0  ;;  %v479_v29 = vadd.f32 %v5697_v38, %v5598_v19 }
  0xf3   :  { %4865 = vmatmul.mubr.msk.bf16.vlgmr.msra.gmra.mrb[20].mxu1 %vm549_vm2, %v5687_v30  ;;  %4880 = vmatprep.subr.bf16.mxu0 %v6763_v18  ;;  %v5708_v44 = vpop.f32.mrb[14].mxu1  ;;  %v5712_v46 = vpop.f32.mrb[12].mxu0  ;;  %v968_v9 = vsel %vm549_vm2, %v5737_v61, 0  ;;  %v471_v10 = vadd.f32 %v5598_v19, %v470_v42  ;;  %v5781_v21 = vpack.c.bf16 %v238_v12, %v238_v12 }
  0xf4   :  { %4875 = vmatpush3.bf16.xpose.msra.mxu1 %v784_v43  ;;  %4876 = vmatprep.mubr.msk.bf16.mxu1 %vm5459_vm1, %v6763_v18  ;;  %v473_v45 = vpop.f32.mrb[15].mxu1  ;;  %v214_v51 = vpop.f32.mrb[13].mxu0  ;;  %v482_v35 = vadd.f32 %v5708_v44, %v5598_v19  ;;  %v5810_v43 = vpack.c.bf16 %v240_v28, %v240_v28  ;;  %v223_v57 = vadd.f32 %v5712_v46, %v5605_v25 }
  0xf5   :  { %4886 = vmatprep.subr.bf16.mxu1 %v6763_v18  ;;  %1975 = vrot.lane.b32.xlu1 %v5692_v34, %s5460_s3  ;;  %v5721_v52 = vpop.f32.mrb[14].mxu0  ;;  %v497_v14 = vmax.f32 %v471_v10, 0.0  ;;  %v474_v15 = vadd.f32 %v5598_v19, %v473_v45  ;;  %v215_v31 = vadd.f32 %v5605_v25, %v214_v51  ;;  %v499_v45 = vmax.f32 %v479_v29, 0.0 }
  0xf6   :  { %1879 = vrot.lane.b32.xlu0 %v5701_v39, %s5460_s3  ;;  %v5727_v56 = vpop.f32.mrb[15].mxu0  ;;  %v500_v19 = vmax.f32 %v482_v35, 0.0  ;;  %v243_v63 = vmax.f32 %v223_v57, 0.0 }
  0xf7   :  { %v5789_v17 = vpack.c.bf16 %v497_v14, %v497_v14  ;;  %v498_v24 = vmax.f32 %v474_v15, 0.0  ;;  %v241_v38 = vmax.f32 %v215_v31, 0.0  ;;  %v218_v48 = vadd.f32 %v5605_v25, %v5727_v56 }
  0xf8   :  { %v5825_v50 = vpack.c.bf16 %v499_v45, %v499_v45  ;;  %v5830_v56 = vpack.c.bf16 %v500_v19, %v500_v19 }
  0xf9   :  { %4871 = vmatmul.mubr.msk.bf16.vlgmr.msra.gmra.mrb[24].mxu0 %vm549_vm2, %v5714_v47  ;;  %2023 = vrot.lane.b32.xlu1 %v5716_v49, %s5460_s3  ;;  %v5806_v36 = vpack.c.bf16 %v498_v24, %v498_v24  ;;  %v1106_v42 = vsel %vm549_vm2, %v5789_v17, 0  ;;  %v5827_v51 = vpack.c.bf16 %v241_v38, %v241_v38  ;;  %v242_v53 = vmax.f32 %v218_v48, 0.0 }
  0xfa   :  { %4881 = vmatpush3.bf16.xpose.msra.mxu0 %v830_v60  ;;  %4882 = vmatprep.mubr.msk.bf16.mxu0 %vm5459_vm1, %v6763_v18  ;;  %v226_v60 = vadd.f32 %v5721_v52, %v5605_v25  ;;  %v1244_v46 = vsel %vm549_vm2, %v5830_v56, 0  ;;  %v5852_v52 = vpack.c.bf16 %v243_v63, %v243_v63 }
  0xfb   :  { %4877 = vmatmul.mubr.msk.bf16.vlgmr.msra.gmra.mrb[24].mxu1 %vm549_vm2, %v5731_v58  ;;  %4892 = vmatprep.subr.bf16.mxu0 %v6763_v18  ;;  %v1152_v44 = vsel %vm549_vm2, %v5806_v36, 0  ;;  %6768 = vst [vmem:[#allocation2_spill] sm:$0xff] %v5827_v51  ;;  %v5836_v54 = vpack.c.bf16 %v242_v53, %v242_v53 }
  0xfc   :  { %4887 = vmatpush3.bf16.xpose.msra.mxu1 %v876_v62  ;;  %4888 = vmatprep.mubr.msk.bf16.mxu1 %vm5459_vm1, %v6763_v18  ;;  %v1198_v62 = vsel %vm549_vm2, %v5825_v50, 0  ;;  %v244_v25 = vmax.f32 %v226_v60, 0.0  ;;  %6769 = vst [vmem:[#allocation3_spill] sm:$0xff] %v5852_v52 }
  0xfd   :  { %4898 = vmatprep.subr.bf16.mxu1 %v6763_v18  ;;  %1927 = vrot.lane.b32.xlu1 %v5737_v61, %s5460_s3 }
  0xfe   :  { %v5854_v0 = vpack.c.bf16 %v244_v25, %v244_v25 }
 0x100   :  { %6770 = vst [vmem:[#allocation4_spill] sm:$0xff] %v5854_v0 }
 0x101   :  { %4883 = vmatmul.mubr.msk.bf16.vlgmr.msra.gmra.mrb[28].mxu0 %vm549_vm2, %v5754_v1 }
 0x102   :  { %4893 = vmatpush3.bf16.xpose.msra.mxu0 %v922_v3  ;;  %4894 = vmatprep.mubr.msk.bf16.mxu0 %vm5459_vm1, %v6763_v18 }
 0x103   :  { %4889 = vmatmul.mubr.msk.bf16.vlgmr.msra.gmra.mrb[28].mxu1 %vm549_vm2, %v5758_v5  ;;  %4904 = vmatprep.subr.bf16.mxu0 %v6763_v18 }
 0x104   :  { %4899 = vmatpush3.bf16.xpose.msra.mxu1 %v968_v9  ;;  %4900 = vmatprep.mubr.msk.bf16.mxu1 %vm5459_vm1, %v6763_v18 }
 0x105   :  { %4910 = vmatprep.subr.bf16.mxu1 %v6763_v18 }
 0x109   :  { %4895 = vmatmul.mubr.msk.bf16.vlgmr.msra.gmra.mrb[32].mxu0 %vm549_vm2, %v5773_v11 }
 0x10a   :  { %4905 = vmatpush3.bf16.xpose.msra.mxu0 %v1014_v22  ;;  %4906 = vmatprep.mubr.msk.bf16.mxu0 %vm5459_vm1, %v6763_v18 }
 0x10b   :  { %4901 = vmatmul.mubr.msk.bf16.vlgmr.msra.gmra.mrb[32].mxu1 %vm549_vm2, %v5781_v21  ;;  %4916 = vmatprep.subr.bf16.mxu0 %v6763_v18 }
 0x10c   :  { %4911 = vmatpush3.bf16.xpose.msra.mxu1 %v1060_v26  ;;  %4912 = vmatprep.mubr.msk.bf16.mxu1 %vm5459_vm1, %v6763_v18 }
 0x10d   :  { %4922 = vmatprep.subr.bf16.mxu1 %v6763_v18 }
 0x111   :  { %4907 = vmatmul.mubr.msk.bf16.vlgmr.msra.gmra.mrb[36].mxu0 %vm549_vm2, %v5802_v32 }
 0x112   :  { %4917 = vmatpush3.bf16.xpose.msra.mxu0 %v1106_v42  ;;  %4918 = vmatprep.mubr.msk.bf16.mxu0 %vm5459_vm1, %v6763_v18 }
 0x113   :  { %4913 = vmatmul.mubr.msk.bf16.vlgmr.msra.gmra.mrb[36].mxu1 %vm549_vm2, %v5810_v43  ;;  %4928 = vmatprep.subr.bf16.mxu0 %v6763_v18 }
 0x114   :  { %4923 = vmatpush3.bf16.xpose.msra.mxu1 %v1152_v44  ;;  %4924 = vmatprep.mubr.msk.bf16.mxu1 %vm5459_vm1, %v6763_v18 }
 0x115   :  { %4934 = vmatprep.subr.bf16.mxu1 %v6763_v18 }
 0x119   :  { %4919 = vmatmul.mubr.msk.bf16.vlgmr.msra.gmra.mrb[40].mxu0 %vm549_vm2, %v5827_v51 }
 0x11a   :  { %4929 = vmatpush3.bf16.xpose.msra.mxu0 %v1198_v62  ;;  %4930 = vmatprep.mubr.msk.bf16.mxu0 %vm5459_vm1, %v6763_v18 }
 0x11b   :  { %4925 = vmatmul.mubr.msk.bf16.vlgmr.msra.gmra.mrb[40].mxu1 %vm549_vm2, %v5836_v54  ;;  %4940 = vmatprep.subr.bf16.mxu0 %v6763_v18 }
 0x11c   :  { %4935 = vmatpush3.bf16.xpose.msra.mxu1 %v1244_v46  ;;  %4936 = vmatprep.mubr.msk.bf16.mxu1 %vm5459_vm1, %v6763_v18 }
 0x11d   :  { %4946 = vmatprep.subr.bf16.mxu1 %v6763_v18 }
 0x121   :  { %4931 = vmatmul.mubr.msk.bf16.vlgmr.msra.gmra.mrb[44].mxu0 %vm549_vm2, %v5852_v52 }
 0x122   :  { %4942 = vmatprep.mubr.msk.bf16.mxu0 %vm5459_vm1, %v6763_v18 }
 0x123   :  { %4937 = vmatmul.mubr.msk.bf16.vlgmr.msra.gmra.mrb[44].mxu1 %vm549_vm2, %v5854_v0 }
 0x124   :  { %4948 = vmatprep.mubr.msk.bf16.mxu1 %vm5459_vm1, %v6763_v18 }
 0x152   :  { %v5864_v3 = vpop.permute.xlu0 %1591 }
 0x154   :  { %v5866_v6 = vpop.permute.xlu1 %1639 }
 0x156   :  { %v1495_v8 = vpop.permute.xlu0 %1494 }
 0x157   :  { %v1501_v9 = vsel %vm1499_vm3, %v1495_v8, 0 }
 0x158   :  { %v1544_v10 = vpop.permute.xlu1 %1543  ;;  %4941 = vmatpush3.bf16.msra.mxu0 %v1501_v9 }
 0x159   :  { %v1549_v12 = vsel %vm1499_vm3, %v1544_v10, 0  ;;  %4952 = vmatprep.subr.bf16.mxu0 %v6763_v18 }
 0x15a   :  { %4947 = vmatpush3.bf16.msra.mxu1 %v1549_v12 }
 0x15b   :  { %4958 = vmatprep.subr.bf16.mxu1 %v6763_v18 }
 0x1bc   :  { %v590_v13 = vpop.f32.mrb[16].mxu0 }
 0x1bd   :  { %v5872_v14 = vmul.f32 0.35355338, %v590_v13  ;;  %v4848_v15 = vpop.f32.mrb[17].mxu0 }
 0x1be   :  { %v636_v16 = vpop.f32.mrb[16].mxu1  ;;  %v593_v22 = vpop.f32.mrb[18].mxu0 }
 0x1bf   :  { %v5874_v23 = vmul.f32 0.35355338, %v636_v16  ;;  %v1302_v24 = vsel %vm549_vm2, %v5872_v14, -inf  ;;  %v4849_v26 = vpop.f32.mrb[19].mxu0  ;;  %v4854_v28 = vpop.f32.mrb[17].mxu1 }
 0x1c0   :  { %1303 = vmax.xlane.f32.xlu0 %v1302_v24  ;;  %v639_v29 = vpop.f32.mrb[18].mxu1 }
 0x1c1   :  { %v4855_v31 = vpop.f32.mrb[19].mxu1  ;;  %v1305_v35 = vsel %vm549_vm2, %v5874_v23, -inf }
 0x1c4   :  { %1306 = vmax.xlane.f32.xlu0 %v1305_v35  ;;  %v682_v42 = vpop.f32.mrb[20].mxu0 }
 0x1c5   :  { %v5880_v45 = vmul.f32 0.35355338, %v682_v42  ;;  %v4860_v38 = vpop.f32.mrb[21].mxu0 }
 0x1c6   :  { %v728_v48 = vpop.f32.mrb[20].mxu1  ;;  %v685_v19 = vpop.f32.mrb[22].mxu0 }
 0x1c7   :  { %v5882_v44 = vmul.f32 0.35355338, %v728_v48  ;;  %v1308_v53 = vsel %vm549_vm2, %v5880_v45, -inf  ;;  %v4861_v57 = vpop.f32.mrb[23].mxu0  ;;  %v4866_v60 = vpop.f32.mrb[21].mxu1 }
 0x1c8   :  { %1309 = vmax.xlane.f32.xlu1 %v1308_v53  ;;  %v731_v62 = vpop.f32.mrb[22].mxu1 }
 0x1c9   :  { %v4867_v63 = vpop.f32.mrb[23].mxu1  ;;  %v1311_v46 = vsel %vm549_vm2, %v5882_v44, -inf }
 0x1cc   :  { %1312 = vmax.xlane.f32.xlu1 %v1311_v46  ;;  %v774_v25 = vpop.f32.mrb[24].mxu0 }
 0x1cd   :  { %v5888_v8 = vmul.f32 0.35355338, %v774_v25  ;;  %v4872_v9 = vpop.f32.mrb[25].mxu0 }
 0x1ce   :  { %v820_v10 = vpop.f32.mrb[24].mxu1  ;;  %v777_v12 = vpop.f32.mrb[26].mxu0 }
 0x1cf   :  { %v5890_v13 = vmul.f32 0.35355338, %v820_v10  ;;  %v1314_v15 = vsel %vm549_vm2, %v5888_v8, -inf  ;;  %v4873_v16 = vpop.f32.mrb[27].mxu0  ;;  %v4878_v22 = vpop.f32.mrb[25].mxu1 }
 0x1d0   :  { %1315 = vmax.xlane.f32.xlu0 %v1314_v15  ;;  %v823_v24 = vpop.f32.mrb[26].mxu1 }
 0x1d1   :  { %v1317_v26 = vsel %vm549_vm2, %v5890_v13, -inf  ;;  %v4879_v28 = vpop.f32.mrb[27].mxu1 }
 0x1d2   :  { %1318 = vmax.xlane.f32.xlu1 %v1317_v26 }
 0x1d4   :  { %v866_v29 = vpop.f32.mrb[28].mxu0 }
 0x1d5   :  { %v5896_v31 = vmul.f32 0.35355338, %v866_v29  ;;  %v4884_v35 = vpop.f32.mrb[29].mxu0 }
 0x1d6   :  { %v912_v42 = vpop.f32.mrb[28].mxu1  ;;  %v869_v38 = vpop.f32.mrb[30].mxu0 }
 0x1d7   :  { %v5898_v48 = vmul.f32 0.35355338, %v912_v42  ;;  %v1320_v19 = vsel %vm549_vm2, %v5896_v31, -inf  ;;  %v4885_v53 = vpop.f32.mrb[31].mxu0  ;;  %v4890_v57 = vpop.f32.mrb[29].mxu1 }
 0x1d8   :  { %1321 = vmax.xlane.f32.xlu0 %v1320_v19  ;;  %v915_v60 = vpop.f32.mrb[30].mxu1 }
 0x1d9   :  { %v1323_v62 = vsel %vm549_vm2, %v5898_v48, -inf  ;;  %v4891_v63 = vpop.f32.mrb[31].mxu1 }
 0x1da   :  { %1324 = vmax.xlane.f32.xlu1 %v1323_v62 }
 0x1dc   :  { %v958_v46 = vpop.f32.mrb[32].mxu0 }
 0x1dd   :  { %v5904_v25 = vmul.f32 0.35355338, %v958_v46  ;;  %v4896_v9 = vpop.f32.mrb[33].mxu0 }
 0x1de   :  { %v1004_v10 = vpop.f32.mrb[32].mxu1  ;;  %v961_v12 = vpop.f32.mrb[34].mxu0 }
 0x1df   :  { %v5906_v15 = vmul.f32 0.35355338, %v1004_v10  ;;  %v1326_v16 = vsel %vm549_vm2, %v5904_v25, -inf  ;;  %v4897_v22 = vpop.f32.mrb[35].mxu0  ;;  %v4902_v24 = vpop.f32.mrb[33].mxu1 }
 0x1e0   :  { %1327 = vmax.xlane.f32.xlu0 %v1326_v16  ;;  %v1007_v26 = vpop.f32.mrb[34].mxu1 }
 0x1e1   :  { %v1329_v28 = vsel %vm549_vm2, %v5906_v15, -inf  ;;  %v4903_v29 = vpop.f32.mrb[35].mxu1 }
 0x1e2   :  { %1330 = vmax.xlane.f32.xlu1 %v1329_v28 }
 0x1e4   :  { %v1050_v35 = vpop.f32.mrb[36].mxu0 }
 0x1e5   :  { %v5912_v42 = vmul.f32 0.35355338, %v1050_v35  ;;  %v4908_v38 = vpop.f32.mrb[37].mxu0 }
 0x1e6   :  { %v1096_v19 = vpop.f32.mrb[36].mxu1  ;;  %v1053_v53 = vpop.f32.mrb[38].mxu0 }
 0x1e7   :  { %v5914_v57 = vmul.f32 0.35355338, %v1096_v19  ;;  %v1332_v60 = vsel %vm549_vm2, %v5912_v42, -inf  ;;  %v4909_v62 = vpop.f32.mrb[39].mxu0  ;;  %v4914_v63 = vpop.f32.mrb[37].mxu1 }
 0x1e8   :  { %1333 = vmax.xlane.f32.xlu0 %v1332_v60  ;;  %v1099_v46 = vpop.f32.mrb[38].mxu1 }
 0x1e9   :  { %v1335_v9 = vsel %vm549_vm2, %v5914_v57, -inf  ;;  %v4915_v10 = vpop.f32.mrb[39].mxu1 }
 0x1ea   :  { %1336 = vmax.xlane.f32.xlu1 %v1335_v9 }
 0x1ec   :  { %v1142_v12 = vpop.f32.mrb[40].mxu0 }
 0x1ed   :  { %v5920_v16 = vmul.f32 0.35355338, %v1142_v12  ;;  %v4920_v22 = vpop.f32.mrb[41].mxu0 }
 0x1ee   :  { %v1188_v24 = vpop.f32.mrb[40].mxu1  ;;  %v1145_v26 = vpop.f32.mrb[42].mxu0 }
 0x1ef   :  { %v5922_v28 = vmul.f32 0.35355338, %v1188_v24  ;;  %v1338_v29 = vsel %vm549_vm2, %v5920_v16, -inf  ;;  %v4921_v35 = vpop.f32.mrb[43].mxu0  ;;  %v4926_v38 = vpop.f32.mrb[41].mxu1 }
 0x1f0   :  { %1339 = vmax.xlane.f32.xlu0 %v1338_v29  ;;  %v1191_v19 = vpop.f32.mrb[42].mxu1 }
 0x1f1   :  { %v1341_v53 = vsel %vm549_vm2, %v5922_v28, -inf  ;;  %v4927_v60 = vpop.f32.mrb[43].mxu1  ;;  %v5940_v19 = vpop.permute.xlu1 %1831 }
 0x1f2   :  { %1342 = vmax.xlane.f32.xlu1 %v1341_v53  ;;  %v5942_v53 = vpop.permute.xlu0 %1783 }
 0x1f4   :  { %v1234_v62 = vpop.f32.mrb[44].mxu0 }
 0x1f5   :  { %v5928_v63 = vmul.f32 0.35355338, %v1234_v62  ;;  %v4932_v46 = vpop.f32.mrb[45].mxu0  ;;  %v5944_v60 = vpop.permute.xlu1 %1735 }
 0x1f6   :  { %v1280_v9 = vpop.f32.mrb[44].mxu1  ;;  %v1237_v10 = vpop.f32.mrb[46].mxu0 }
 0x1f7   :  { %v1344_v12 = vsel %vm549_vm2, %v5928_v63, -inf  ;;  %v4938_v22 = vpop.f32.mrb[45].mxu1  ;;  %v4933_v24 = vpop.f32.mrb[47].mxu0  ;;  %v5936_v35 = vmul.f32 0.35355338, %v1280_v9 }
 0x1f8   :  { %1345 = vmax.xlane.f32.xlu0 %v1344_v12  ;;  %v1283_v26 = vpop.f32.mrb[46].mxu1  ;;  %v5946_v62 = vpop.permute.xlu0 %1687 }
 0x1f9   :  { %v4939_v29 = vpop.f32.mrb[47].mxu1  ;;  %v1347_v38 = vsel %vm549_vm2, %v5936_v35, -inf  ;;  %v5948_v46 = vpop.permute.xlu1 %1975 }
 0x1fa   :  { %6771 = vst [vmem:[#allocation5_spill] sm:$0xff] %v5948_v46 }
 0x1fc   :  { %v5950_v10 = vpop.permute.xlu0 %1879 }
 0x1fd   :  { %6772 = vst [vmem:[#allocation6_spill] sm:$0xff] %v5950_v10  ;;  %v5952_v12 = vpop.permute.xlu1 %2023 }
 0x1fe   :  { %6773 = vst [vmem:[#allocation7_spill] sm:$0xff] %v5952_v12 }
 0x201   :  { %v5955_v26 = vpop.permute.xlu1 %1927 }
 0x203   :  { %2119 = vrot.lane.b32.xlu1 %v5806_v36, %s5460_s3 }
 0x20e   :  { %2071 = vrot.lane.b32.xlu0 %v5789_v17, %s5460_s3 }
 0x227   :  { %1348 = vmax.xlane.f32.xlu1 %v1347_v38 }
 0x24d   :  { %v1304_v9 = vpop.xlane.xlu0 %1303 }
 0x24e   :  { %v1350_v22 = vsub.f32 %v5872_v14, %v1304_v9 }
 0x250   :  { %v1366_v24 = vmul.f32 1.442695, %v1350_v22 }
 0x251   :  { %v1307_v29 = vpop.xlane.xlu0 %1306 }
 0x252   :  { %5330 = vpow2.f32 %v1366_v24  ;;  %v1351_v38 = vsub.f32 %v5874_v23, %v1307_v29 }
 0x254   :  { %v1368_v18 = vmul.f32 1.442695, %v1351_v38 }
 0x255   :  { %v1310_v52 = vpop.xlane.xlu1 %1309 }
 0x256   :  { %5332 = vpow2.f32 %v1368_v18  ;;  %v1352_v0 = vsub.f32 %v5880_v45, %v1310_v52 }
 0x258   :  { %v1370_v46 = vmul.f32 1.442695, %v1352_v0 }
 0x259   :  { %v1313_v51 = vpop.xlane.xlu1 %1312 }
 0x25a   :  { %5334 = vpow2.f32 %v1370_v46  ;;  %v1353_v12 = vsub.f32 %v5882_v44, %v1313_v51 }
 0x25c   :  { %v5960_v10 = vpop.eup %5330  ;;  %v1372_v14 = vmul.f32 1.442695, %v1353_v12 }
 0x25d   :  { %v1316_v9 = vpop.xlane.xlu0 %1315  ;;  %v1398_v22 = vsel %vm549_vm2, %v5960_v10, 0.0 }
 0x25e   :  { %5336 = vpow2.f32 %v1372_v14  ;;  %v1354_v23 = vsub.f32 %v5888_v8, %v1316_v9  ;;  %1399 = vadd.xlane.f32.xlu0 %v1398_v22 }
 0x25f   :  { %v1319_v24 = vpop.xlane.xlu1 %1318 }
 0x260   :  { %v5965_v18 = vpop.eup %5332  ;;  %v1374_v52 = vmul.f32 1.442695, %v1354_v23  ;;  %v1355_v0 = vsub.f32 %v5890_v13, %v1319_v24 }
 0x261   :  { %v1401_v51 = vsel %vm549_vm2, %v5965_v18, 0.0 }
 0x262   :  { %5338 = vpow2.f32 %v1374_v52  ;;  %v1376_v45 = vmul.f32 1.442695, %v1355_v0  ;;  %1402 = vadd.xlane.f32.xlu1 %v1401_v51 }
 0x264   :  { %v5970_v44 = vpop.eup %5334  ;;  %5340 = vpow2.f32 %v1376_v45 }
 0x265   :  { %v1322_v46 = vpop.xlane.xlu0 %1321  ;;  %v1404_v8 = vsel %vm549_vm2, %v5970_v44, 0.0 }
 0x266   :  { %v1356_v12 = vsub.f32 %v5896_v31, %v1322_v46  ;;  %1405 = vadd.xlane.f32.xlu0 %v1404_v8 }
 0x267   :  { %v1325_v29 = vpop.xlane.xlu1 %1324 }
 0x268   :  { %v5975_v38 = vpop.eup %5336  ;;  %v1378_v13 = vmul.f32 1.442695, %v1356_v12  ;;  %v1357_v14 = vsub.f32 %v5898_v48, %v1325_v29 }
 0x269   :  { %v1407_v9 = vsel %vm549_vm2, %v5975_v38, 0.0 }
 0x26a   :  { %5342 = vpow2.f32 %v1378_v13  ;;  %v1380_v22 = vmul.f32 1.442695, %v1357_v14  ;;  %1408 = vadd.xlane.f32.xlu1 %v1407_v9 }
 0x26c   :  { %v5980_v23 = vpop.eup %5338  ;;  %5344 = vpow2.f32 %v1380_v22 }
 0x26d   :  { %v1328_v24 = vpop.xlane.xlu0 %1327  ;;  %v1410_v31 = vsel %vm549_vm2, %v5980_v23, 0.0 }
 0x26e   :  { %v5984_v52 = vpop.eup %5340  ;;  %v1358_v0 = vsub.f32 %v5904_v25, %v1328_v24  ;;  %1411 = vadd.xlane.f32.xlu0 %v1410_v31 }
 0x26f   :  { %v1331_v51 = vpop.xlane.xlu1 %1330  ;;  %v1413_v48 = vsel %vm549_vm2, %v5984_v52, 0.0 }
 0x270   :  { %v1382_v45 = vmul.f32 1.442695, %v1358_v0  ;;  %v1359_v46 = vsub.f32 %v5906_v15, %v1331_v51  ;;  %1414 = vadd.xlane.f32.xlu1 %v1413_v48 }
 0x272   :  { %5346 = vpow2.f32 %v1382_v45  ;;  %v1384_v8 = vmul.f32 1.442695, %v1359_v46 }
 0x274   :  { %v5990_v12 = vpop.eup %5342  ;;  %5348 = vpow2.f32 %v1384_v8 }
 0x275   :  { %v1334_v29 = vpop.xlane.xlu0 %1333  ;;  %v1416_v13 = vsel %vm549_vm2, %v5990_v12, 0.0 }
 0x276   :  { %v5994_v14 = vpop.eup %5344  ;;  %v1360_v25 = vsub.f32 %v5912_v42, %v1334_v29  ;;  %1417 = vadd.xlane.f32.xlu0 %v1416_v13 }
 0x277   :  { %v1337_v9 = vpop.xlane.xlu1 %1336  ;;  %v1419_v22 = vsel %vm549_vm2, %v5994_v14, 0.0 }
 0x278   :  { %v1386_v15 = vmul.f32 1.442695, %v1360_v25  ;;  %v1361_v24 = vsub.f32 %v5914_v57, %v1337_v9  ;;  %1420 = vadd.xlane.f32.xlu1 %v1419_v22 }
 0x27a   :  { %5350 = vpow2.f32 %v1386_v15  ;;  %v1388_v31 = vmul.f32 1.442695, %v1361_v24 }
 0x27c   :  { %v6000_v0 = vpop.eup %5346  ;;  %5352 = vpow2.f32 %v1388_v31 }
 0x27d   :  { %v1340_v51 = vpop.xlane.xlu0 %1339  ;;  %v1422_v48 = vsel %vm549_vm2, %v6000_v0, 0.0 }
 0x27e   :  { %v6004_v45 = vpop.eup %5348  ;;  %v1362_v42 = vsub.f32 %v5920_v16, %v1340_v51  ;;  %1423 = vadd.xlane.f32.xlu1 %v1422_v48 }
 0x27f   :  { %v1343_v46 = vpop.xlane.xlu1 %1342  ;;  %v1425_v8 = vsel %vm549_vm2, %v6004_v45, 0.0 }
 0x280   :  { %v1390_v57 = vmul.f32 1.442695, %v1362_v42  ;;  %v1363_v29 = vsub.f32 %v5922_v28, %v1343_v46  ;;  %1426 = vadd.xlane.f32.xlu0 %v1425_v8 }
 0x282   :  { %5354 = vpow2.f32 %v1390_v57  ;;  %v1392_v13 = vmul.f32 1.442695, %v1363_v29 }
 0x283   :  { %v6031_v42 = vpop.permute.xlu1 %2119 }
 0x284   :  { %v6010_v25 = vpop.eup %5350  ;;  %5356 = vpow2.f32 %v1392_v13 }
 0x285   :  { %v1428_v9 = vsel %vm549_vm2, %v6010_v25, 0.0  ;;  %v1346_v51 = vpop.xlane.xlu0 %1345 }
 0x286   :  { %v6014_v22 = vpop.eup %5352  ;;  %1429 = vadd.xlane.f32.xlu1 %v1428_v9  ;;  %v1364_v48 = vsub.f32 %v5928_v63, %v1346_v51 }
 0x287   :  { %v1431_v16 = vsel %vm549_vm2, %v6014_v22, 0.0 }
 0x288   :  { %1432 = vadd.xlane.f32.xlu0 %v1431_v16  ;;  %v1394_v46 = vmul.f32 1.442695, %v1364_v48 }
 0x28a   :  { %5358 = vpow2.f32 %v1394_v46  ;;  %v1645_v46 = vsel %vm1499_vm3, %v5866_v6, 0  ;;  %v1693_v6 = vsel %vm1499_vm3, %v5946_v62, 0 }
 0x28c   :  { %v6018_v15 = vpop.eup %5354 }
 0x28d   :  { %v1434_v28 = vsel %vm549_vm2, %v6018_v15, 0.0 }
 0x28e   :  { %v6022_v24 = vpop.eup %5356  ;;  %1435 = vadd.xlane.f32.xlu1 %v1434_v28 }
 0x28f   :  { %v1437_v31 = vsel %vm549_vm2, %v6022_v24, 0.0 }
 0x290   :  { %1438 = vadd.xlane.f32.xlu0 %v1437_v31  ;;  %v1597_v31 = vsel %vm1499_vm3, %v5864_v3, 0 }
 0x294   :  { %v6034_v13 = vpop.eup %5358 }
 0x295   :  { %v1440_v9 = vsel %vm549_vm2, %v6034_v13, 0.0 }
 0x29f   :  { %2215 = vrot.lane.b32.xlu1 %v5830_v56, %s5460_s3 }
 0x2a6   :  { %2167 = vrot.lane.b32.xlu0 %v5825_v50, %s5460_s3 }
 0x2b4   :  { %v1349_v8 = vpop.xlane.xlu1 %1348 }
 0x2b5   :  { %v1365_v57 = vsub.f32 %v5936_v35, %v1349_v8  ;;  %v6058_v35 = vpop.permute.xlu0 %2071 }
 0x2b7   :  { %v1396_v29 = vmul.f32 1.442695, %v1365_v57 }
 0x2b9   :  { %5360 = vpow2.f32 %v1396_v29 }
 0x2c3   :  { %v6038_v16 = vpop.eup %5360  ;;  %1441 = vadd.xlane.f32.xlu1 %v1440_v9  ;;  %v1741_v9 = vsel %vm1499_vm3, %v5944_v60, 0 }
 0x2c4   :  { %v1443_v63 = vsel %vm549_vm2, %v6038_v16, 0.0 }
 0x2c5   :  { %1444 = vadd.xlane.f32.xlu0 %v1443_v63 }
 0x2d4   :  { %2315 = vrot.lane.b32.xlu1 %v5618_v41, %s5461_s5 }
 0x2d8   :  { %2313 = vrot.lane.b32.xlu1 %v5649_v2, %s5461_s5 }
 0x2db   :  { %2265 = vrot.lane.b32.xlu0 %v5612_v37, %s5461_s5 }
 0x2dc   :  { %2415 = vrot.lane.b32.xlu1 %v5614_v40, %s5461_s5 }
 0x2df   :  { %2263 = vrot.lane.b32.xlu0 %v5635_v55, %s5461_s5 }
 0x2e0   :  { %2413 = vrot.lane.b32.xlu1 %v5687_v30, %s5461_s5 }
 0x2e3   :  { %2365 = vrot.lane.b32.xlu0 %v5609_v33, %s5461_s5 }
 0x2e4   :  { %2515 = vrot.lane.b32.xlu1 %v5673_v20, %s5461_s5 }
 0x2e7   :  { %2363 = vrot.lane.b32.xlu0 %v5683_v27, %s5461_s5 }
 0x2e8   :  { %2513 = vrot.lane.b32.xlu1 %v5731_v58, %s5461_s5 }
 0x2eb   :  { %2465 = vrot.lane.b32.xlu0 %v5657_v7, %s5461_s5  ;;  %v1400_v55 = vpop.xlane.xlu0 %1399 }
 0x2ec   :  { %5362 = vrcp.f32 %v1400_v55  ;;  %2615 = vrot.lane.b32.xlu1 %v5655_v4, %s5461_s5 }
 0x2ef   :  { %v1403_v2 = vpop.xlane.xlu1 %1402  ;;  %2463 = vrot.lane.b32.xlu0 %v5714_v47, %s5461_s5 }
 0x2f0   :  { %5364 = vrcp.f32 %v1403_v2  ;;  %2613 = vrot.lane.b32.xlu1 %v5758_v5, %s5461_s5  ;;  %v1789_v2 = vsel %vm1499_vm3, %v5942_v53, 0  ;;  %v1837_v53 = vsel %vm1499_vm3, %v5940_v19, 0 }
 0x2f3   :  { %2565 = vrot.lane.b32.xlu0 %v5641_v59, %s5461_s5  ;;  %v1406_v27 = vpop.xlane.xlu0 %1405 }
 0x2f4   :  { %5366 = vrcp.f32 %v1406_v27  ;;  %2715 = vrot.lane.b32.xlu1 %v5737_v61, %s5461_s5 }
 0x2f6   :  { %v5363_v30 = vpop.eup %5362 }
 0x2f7   :  { %v1409_v58 = vpop.xlane.xlu1 %1408  ;;  %2563 = vrot.lane.b32.xlu0 %v5754_v1, %s5461_s5  ;;  %v1462_v28 = vmul.f32 %v5363_v30, %v5960_v10  ;;  %v6774_v10 = vmov 0.0  }
 0x2f8   :  { %5368 = vrcp.f32 %v1409_v58  ;;  %2713 = vrot.lane.b32.xlu1 %v5781_v21, %s5461_s5 }
 0x2f9   :  { %v1478_v47 = vpack.c.bf16 %v1462_v28, %v1462_v28  ;;  %v6776_v28 = vld [vmem:[#allocation4_spill] sm:$0xff] }
 0x2fa   :  { %v5365_v5 = vpop.eup %5364 }
 0x2fb   :  { %2665 = vrot.lane.b32.xlu0 %v5701_v39, %s5461_s5  ;;  %4943 = vmatmul.mubr.msk.bf16.vlgmr.msra.gmra.mrb[48].mxu0 %vm549_vm2, %v1478_v47  ;;  %v1412_v51 = vpop.xlane.xlu0 %1411  ;;  %v1463_v48 = vmul.f32 %v5365_v5, %v5965_v18  ;;  %v6777_v5 = vld [vmem:[#allocation6_spill] sm:$0xff] }
 0x2fc   :  { %4953 = vmatpush3.bf16.msra.mxu0 %v1597_v31  ;;  %5370 = vrcp.f32 %v1412_v51  ;;  %2815 = vrot.lane.b32.xlu1 %v5716_v49, %s5461_s5  ;;  %v1885_v31 = vsel %vm1499_vm3, %v6777_v5, 0 }
 0x2fd   :  { %v1415_v1 = vpop.xlane.xlu1 %1414  ;;  %v1479_v21 = vpack.c.bf16 %v1463_v48, %v1463_v48  ;;  %4954 = vmatprep.mubr.msk.bf16.mxu0 %vm5459_vm1, %v6774_v10  ;;  %4964 = vmatprep.subr.bf16.mxu0 %v6774_v10 }
 0x2fe   :  { %v5367_v3 = vpop.eup %5366  ;;  %5372 = vrcp.f32 %v1415_v1  ;;  %v1933_v1 = vsel %vm1499_vm3, %v5955_v26, 0  ;;  %v6779_v26 = vld [vmem:[#allocation5_spill] sm:$0xff] }
 0x2ff   :  { %4949 = vmatmul.mubr.msk.bf16.vlgmr.msra.gmra.mrb[48].mxu1 %vm549_vm2, %v1479_v21  ;;  %2663 = vrot.lane.b32.xlu0 %v5773_v11, %s5461_s5  ;;  %v1464_v18 = vmul.f32 %v5367_v3, %v5970_v44  ;;  %v6778_v3 = vld [vmem:[#allocation3_spill] sm:$0xff] }
 0x300   :  { %4959 = vmatpush3.bf16.msra.mxu1 %v1645_v46  ;;  %2813 = vrot.lane.b32.xlu1 %v5810_v43, %s5461_s5 }
 0x301   :  { %v1480_v8 = vpack.c.bf16 %v1464_v18, %v1464_v18  ;;  %4960 = vmatprep.mubr.msk.bf16.mxu1 %vm5459_vm1, %v6774_v10  ;;  %4970 = vmatprep.subr.bf16.mxu1 %v6774_v10 }
 0x302   :  { %v5369_v57 = vpop.eup %5368 }
 0x303   :  { %2765 = vrot.lane.b32.xlu0 %v5692_v34, %s5461_s5  ;;  %4955 = vmatmul.mubr.msk.bf16.vlgmr.msra.gmra.mrb[52].mxu0 %vm549_vm2, %v1480_v8  ;;  %v1418_v11 = vpop.xlane.xlu0 %1417  ;;  %v1465_v44 = vmul.f32 %v5369_v57, %v5975_v38 }
 0x304   :  { %4965 = vmatpush3.bf16.msra.mxu0 %v1693_v6  ;;  %5374 = vrcp.f32 %v1418_v11  ;;  %2915 = vrot.lane.b32.xlu1 %v5806_v36, %s5461_s5  ;;  %v6780_v6 = vld [vmem:[#allocation7_spill] sm:$0xff] }
 0x305   :  { %v1421_v43 = vpop.xlane.xlu1 %1420  ;;  %v1481_v29 = vpack.c.bf16 %v1465_v44, %v1465_v44  ;;  %4966 = vmatprep.mubr.msk.bf16.mxu0 %vm5459_vm1, %v6774_v10  ;;  %4976 = vmatprep.subr.bf16.mxu0 %v6774_v10  ;;  %v2029_v11 = vsel %vm1499_vm3, %v6780_v6, 0 }
 0x306   :  { %v5371_v62 = vpop.eup %5370  ;;  %5376 = vrcp.f32 %v1421_v43 }
 0x307   :  { %4961 = vmatmul.mubr.msk.bf16.vlgmr.msra.gmra.mrb[52].mxu1 %vm549_vm2, %v1481_v29  ;;  %2763 = vrot.lane.b32.xlu0 %v5802_v32, %s5461_s5  ;;  %v1466_v38 = vmul.f32 %v5371_v62, %v5980_v23 }
 0x308   :  { %v5373_v63 = vpop.eup %5372  ;;  %4971 = vmatpush3.bf16.msra.mxu1 %v1741_v9  ;;  %2913 = vrot.lane.b32.xlu1 %v5836_v54, %s5461_s5 }
 0x309   :  { %v1482_v55 = vpack.c.bf16 %v1466_v38, %v1466_v38  ;;  %4972 = vmatprep.mubr.msk.bf16.mxu1 %vm5459_vm1, %v6774_v10  ;;  %4982 = vmatprep.subr.bf16.mxu1 %v6774_v10  ;;  %v1467_v60 = vmul.f32 %v5373_v63, %v5984_v52  ;;  %v6775_v52 = vld [vmem:[#allocation2_spill] sm:$0xff] }
 0x30b   :  { %v1424_v27 = vpop.xlane.xlu1 %1423  ;;  %2865 = vrot.lane.b32.xlu0 %v5789_v17, %s5461_s5  ;;  %4967 = vmatmul.mubr.msk.bf16.vlgmr.msra.gmra.mrb[56].mxu0 %vm549_vm2, %v1482_v55  ;;  %v1483_v54 = vpack.c.bf16 %v1467_v60, %v1467_v60 }
 0x30c   :  { %5378 = vrcp.f32 %v1424_v27  ;;  %4977 = vmatpush3.bf16.msra.mxu0 %v1789_v2  ;;  %3015 = vrot.lane.b32.xlu1 %v5830_v56, %s5461_s5 }
 0x30d   :  { %v1427_v32 = vpop.xlane.xlu0 %1426  ;;  %4978 = vmatprep.mubr.msk.bf16.mxu0 %vm5459_vm1, %v6774_v10  ;;  %4988 = vmatprep.subr.bf16.mxu0 %v6774_v10 }
 0x30e   :  { %v5375_v23 = vpop.eup %5374  ;;  %5380 = vrcp.f32 %v1427_v32 }
 0x30f   :  { %4973 = vmatmul.mubr.msk.bf16.vlgmr.msra.gmra.mrb[56].mxu1 %vm549_vm2, %v1483_v54  ;;  %2863 = vrot.lane.b32.xlu0 %v6775_v52, %s5461_s5  ;;  %v1468_v30 = vmul.f32 %v5375_v23, %v5990_v12 }
 0x310   :  { %v5377_v58 = vpop.eup %5376  ;;  %4983 = vmatpush3.bf16.msra.mxu1 %v1837_v53  ;;  %3013 = vrot.lane.b32.xlu1 %v6776_v28, %s5461_s5 }
 0x311   :  { %v1484_v47 = vpack.c.bf16 %v1468_v30, %v1468_v30  ;;  %4984 = vmatprep.mubr.msk.bf16.mxu1 %vm5459_vm1, %v6774_v10  ;;  %4994 = vmatprep.subr.bf16.mxu1 %v6774_v10  ;;  %v1469_v19 = vmul.f32 %v5377_v58, %v5994_v14 }
 0x313   :  { %v1430_v51 = vpop.xlane.xlu1 %1429  ;;  %2965 = vrot.lane.b32.xlu0 %v5825_v50, %s5461_s5  ;;  %4979 = vmatmul.mubr.msk.bf16.vlgmr.msra.gmra.mrb[60].mxu0 %vm549_vm2, %v1484_v47  ;;  %v1485_v48 = vpack.c.bf16 %v1469_v19, %v1469_v19 }
 0x314   :  { %5382 = vrcp.f32 %v1430_v51  ;;  %4989 = vmatpush3.bf16.msra.mxu0 %v1885_v31  ;;  %3319 = vrot.lane.b32.xlu1 %v5618_v41, %s5462_s27 }
 0x315   :  { %v1433_v12 = vpop.xlane.xlu0 %1432  ;;  %4990 = vmatprep.mubr.msk.bf16.mxu0 %vm5459_vm1, %v6774_v10  ;;  %5000 = vmatprep.subr.bf16.mxu0 %v6774_v10 }
 0x316   :  { %v5379_v14 = vpop.eup %5378  ;;  %5384 = vrcp.f32 %v1433_v12 }
 0x317   :  { %v1470_v21 = vmul.f32 %v5379_v14, %v6000_v0  ;;  %4985 = vmatmul.mubr.msk.bf16.vlgmr.msra.gmra.mrb[60].mxu1 %vm549_vm2, %v1485_v48  ;;  %2963 = vrot.lane.b32.xlu0 %v6778_v3, %s5461_s5  ;;  %v1981_v0 = vsel %vm1499_vm3, %v6779_v26, 0 }
 0x318   :  { %v5381_v41 = vpop.eup %5380  ;;  %4995 = vmatpush3.bf16.msra.mxu1 %v1933_v1  ;;  %3415 = vrot.lane.b32.xlu1 %v5614_v40, %s5462_s27 }
 0x319   :  { %v1471_v46 = vmul.f32 %v5381_v41, %v6004_v45  ;;  %v1486_v18 = vpack.c.bf16 %v1470_v21, %v1470_v21  ;;  %4996 = vmatprep.mubr.msk.bf16.mxu1 %vm5459_vm1, %v6774_v10  ;;  %5006 = vmatprep.subr.bf16.mxu1 %v6774_v10 }
 0x31b   :  { %v1436_v8 = vpop.xlane.xlu1 %1435  ;;  %3271 = vrot.lane.b32.xlu0 %v5612_v37, %s5462_s27  ;;  %4991 = vmatmul.mubr.msk.bf16.vlgmr.msra.gmra.mrb[64].mxu0 %vm549_vm2, %v1486_v18  ;;  %v1487_v45 = vpack.c.bf16 %v1471_v46, %v1471_v46 }
 0x31c   :  { %5386 = vrcp.f32 %v1436_v8  ;;  %5001 = vmatpush3.bf16.msra.mxu0 %v1981_v0  ;;  %3511 = vrot.lane.b32.xlu1 %v5673_v20, %s5462_s27 }
 0x31d   :  { %v1439_v40 = vpop.xlane.xlu0 %1438  ;;  %5002 = vmatprep.mubr.msk.bf16.mxu0 %vm5459_vm1, %v6774_v10  ;;  %5012 = vmatprep.subr.bf16.mxu0 %v6774_v10 }
 0x31e   :  { %v5383_v57 = vpop.eup %5382  ;;  %5388 = vrcp.f32 %v1439_v40 }
 0x31f   :  { %v1472_v37 = vmul.f32 %v5383_v57, %v6010_v25  ;;  %3367 = vrot.lane.b32.xlu0 %v5609_v33, %s5462_s27  ;;  %4997 = vmatmul.mubr.msk.bf16.vlgmr.msra.gmra.mrb[64].mxu1 %vm549_vm2, %v1487_v45  ;;  %v2077_v25 = vsel %vm1499_vm3, %v6058_v35, 0 }
 0x320   :  { %v5385_v20 = vpop.eup %5384  ;;  %5007 = vmatpush3.bf16.msra.mxu1 %v2029_v11  ;;  %3607 = vrot.lane.b32.xlu1 %v5655_v4, %s5462_s27 }
 0x321   :  { %v1473_v44 = vmul.f32 %v5385_v20, %v6014_v22  ;;  %v1488_v43 = vpack.c.bf16 %v1472_v37, %v1472_v37  ;;  %5008 = vmatprep.mubr.msk.bf16.mxu1 %vm5459_vm1, %v6774_v10  ;;  %5018 = vmatprep.subr.bf16.mxu1 %v6774_v10  ;;  %v2125_v22 = vsel %vm1499_vm3, %v6031_v42, 0  ;;  %v2168_v35 = vpop.permute.xlu0 %2167 }
 0x322   :  { %v2173_v42 = vsel %vm1499_vm3, %v2168_v35, 0 }
 0x323   :  { %3463 = vrot.lane.b32.xlu0 %v5657_v7, %s5462_s27  ;;  %5003 = vmatmul.mubr.msk.bf16.vlgmr.msra.gmra.mrb[68].mxu0 %vm549_vm2, %v1488_v43  ;;  %v1489_v33 = vpack.c.bf16 %v1473_v44, %v1473_v44 }
 0x324   :  { %5013 = vmatpush3.bf16.msra.mxu0 %v2077_v25  ;;  %5014 = vmatprep.mubr.msk.bf16.mxu0 %vm5459_vm1, %v6774_v10 }
 0x325   :  { %5024 = vmatprep.subr.bf16.mxu0 %v6774_v10 }
 0x326   :  { %v5387_v4 = vpop.eup %5386 }
 0x327   :  { %v1474_v29 = vmul.f32 %v5387_v4, %v6018_v15  ;;  %3559 = vrot.lane.b32.xlu0 %v5641_v59, %s5462_s27  ;;  %5009 = vmatmul.mubr.msk.bf16.vlgmr.msra.gmra.mrb[68].mxu1 %vm549_vm2, %v1489_v33  ;;  %v2216_v15 = vpop.permute.xlu1 %2215 }
 0x328   :  { %v5389_v7 = vpop.eup %5388  ;;  %5019 = vmatpush3.bf16.msra.mxu1 %v2125_v22  ;;  %5020 = vmatprep.mubr.msk.bf16.mxu1 %vm5459_vm1, %v6774_v10  ;;  %v2221_v38 = vsel %vm1499_vm3, %v2216_v15, 0 }
 0x329   :  { %v1475_v62 = vmul.f32 %v5389_v7, %v6022_v24  ;;  %v1490_v9 = vpack.c.bf16 %v1474_v29, %v1474_v29  ;;  %5030 = vmatprep.subr.bf16.mxu1 %v6774_v10 }
 0x32b   :  { %5015 = vmatmul.mubr.msk.bf16.vlgmr.msra.gmra.mrb[72].mxu0 %vm549_vm2, %v1490_v9  ;;  %v1491_v59 = vpack.c.bf16 %v1475_v62, %v1475_v62 }
 0x32c   :  { %5025 = vmatpush3.bf16.msra.mxu0 %v2173_v42  ;;  %5026 = vmatprep.mubr.msk.bf16.mxu0 %vm5459_vm1, %v6774_v10 }
 0x32d   :  { %5036 = vmatprep.subr.bf16.mxu0 %v6774_v10 }
 0x32f   :  { %5021 = vmatmul.mubr.msk.bf16.vlgmr.msra.gmra.mrb[72].mxu1 %vm549_vm2, %v1491_v59 }
 0x330   :  { %5031 = vmatpush3.bf16.msra.mxu1 %v2221_v38  ;;  %5032 = vmatprep.mubr.msk.bf16.mxu1 %vm5459_vm1, %v6774_v10 }
 0x331   :  { %5042 = vmatprep.subr.bf16.mxu1 %v6774_v10 }
 0x350   :  { %v1442_v24 = vpop.xlane.xlu1 %1441 }
 0x351   :  { %5390 = vrcp.f32 %v1442_v24 }
 0x352   :  { %v1445_v63 = vpop.xlane.xlu0 %1444 }
 0x353   :  { %5392 = vrcp.f32 %v1445_v63 }
 0x354   :  { %v2316_v55 = vpop.permute.xlu1 %2315 }
 0x355   :  { %v2321_v5 = vsel %vm549_vm2, %v2316_v55, 0 }
 0x356   :  { %v2266_v60 = vpop.permute.xlu0 %2265 }
 0x357   :  { %v2271_v28 = vsel %vm549_vm2, %v2266_v60, 0 }
 0x358   :  { %v2314_v2 = vpop.permute.xlu1 %2313 }
 0x35a   :  { %v2264_v27 = vpop.permute.xlu0 %2263 }
 0x35b   :  { %v5391_v32 = vpop.eup %5390 }
 0x35c   :  { %v1476_v54 = vmul.f32 %v5391_v32, %v6034_v13  ;;  %v2416_v23 = vpop.permute.xlu1 %2415 }
 0x35d   :  { %v5393_v53 = vpop.eup %5392  ;;  %v2421_v48 = vsel %vm549_vm2, %v2416_v23, 0 }
 0x35e   :  { %v1477_v52 = vmul.f32 %v5393_v53, %v6038_v16  ;;  %v2366_v30 = vpop.permute.xlu0 %2365  ;;  %v1492_v58 = vpack.c.bf16 %v1476_v54, %v1476_v54 }
 0x35f   :  { %v2371_v51 = vsel %vm549_vm2, %v2366_v30, 0 }
 0x360   :  { %v2414_v47 = vpop.permute.xlu1 %2413  ;;  %5027 = vmatmul.mubr.msk.bf16.vlgmr.msra.gmra.mrb[76].mxu0 %vm549_vm2, %v1492_v58  ;;  %v1493_v19 = vpack.c.bf16 %v1477_v52, %v1477_v52 }
 0x361   :  { %5037 = vmatpush3.bf16.xpose.msra.mxu0 %v2271_v28  ;;  %5038 = vmatprep.mubr.msk.bf16.mxu0 %vm5459_vm1, %v6774_v10 }
 0x362   :  { %5033 = vmatmul.mubr.msk.bf16.vlgmr.msra.gmra.mrb[76].mxu1 %vm549_vm2, %v1493_v19  ;;  %v2364_v13 = vpop.permute.xlu0 %2363  ;;  %5048 = vmatprep.subr.bf16.mxu0 %v6774_v10 }
 0x363   :  { %5043 = vmatpush3.bf16.xpose.msra.mxu1 %v2321_v5  ;;  %5044 = vmatprep.mubr.msk.bf16.mxu1 %vm5459_vm1, %v6774_v10 }
 0x364   :  { %v2516_v16 = vpop.permute.xlu1 %2515  ;;  %5054 = vmatprep.subr.bf16.mxu1 %v6774_v10 }
 0x365   :  { %v2521_v46 = vsel %vm549_vm2, %v2516_v16, 0 }
 0x366   :  { %v2466_v31 = vpop.permute.xlu0 %2465 }
 0x367   :  { %v2471_v3 = vsel %vm549_vm2, %v2466_v31, 0 }
 0x368   :  { %v2514_v12 = vpop.permute.xlu1 %2513  ;;  %5039 = vmatmul.mubr.msk.bf16.vlgmr.msra.gmra.mrb[80].mxu0 %vm549_vm2, %v2264_v27 }
 0x369   :  { %5049 = vmatpush3.bf16.xpose.msra.mxu0 %v2371_v51  ;;  %5050 = vmatprep.mubr.msk.bf16.mxu0 %vm5459_vm1, %v6774_v10 }
 0x36a   :  { %5045 = vmatmul.mubr.msk.bf16.vlgmr.msra.gmra.mrb[80].mxu1 %vm549_vm2, %v2314_v2  ;;  %v2464_v14 = vpop.permute.xlu0 %2463  ;;  %5060 = vmatprep.subr.bf16.mxu0 %v6774_v10 }
 0x36b   :  { %5055 = vmatpush3.bf16.xpose.msra.mxu1 %v2421_v48  ;;  %5056 = vmatprep.mubr.msk.bf16.mxu1 %vm5459_vm1, %v6774_v10 }
 0x36c   :  { %v2616_v1 = vpop.permute.xlu1 %2615  ;;  %5066 = vmatprep.subr.bf16.mxu1 %v6774_v10 }
 0x36d   :  { %v2621_v45 = vsel %vm549_vm2, %v2616_v1, 0 }
 0x36e   :  { %v2566_v21 = vpop.permute.xlu0 %2565 }
 0x36f   :  { %v2571_v8 = vsel %vm549_vm2, %v2566_v21, 0 }
 0x370   :  { %v2614_v41 = vpop.permute.xlu1 %2613  ;;  %5051 = vmatmul.mubr.msk.bf16.vlgmr.msra.gmra.mrb[84].mxu0 %vm549_vm2, %v2364_v13 }
 0x371   :  { %5061 = vmatpush3.bf16.xpose.msra.mxu0 %v2471_v3  ;;  %5062 = vmatprep.mubr.msk.bf16.mxu0 %vm5459_vm1, %v6774_v10 }
 0x372   :  { %5057 = vmatmul.mubr.msk.bf16.vlgmr.msra.gmra.mrb[84].mxu1 %vm549_vm2, %v2414_v47  ;;  %v2564_v18 = vpop.permute.xlu0 %2563  ;;  %5072 = vmatprep.subr.bf16.mxu0 %v6774_v10 }
 0x373   :  { %5067 = vmatpush3.bf16.xpose.msra.mxu1 %v2521_v46  ;;  %5068 = vmatprep.mubr.msk.bf16.mxu1 %vm5459_vm1, %v6774_v10 }
 0x374   :  { %v2716_v26 = vpop.permute.xlu1 %2715  ;;  %5078 = vmatprep.subr.bf16.mxu1 %v6774_v10 }
 0x375   :  { %v2721_v44 = vsel %vm549_vm2, %v2716_v26, 0 }
 0x376   :  { %v2666_v0 = vpop.permute.xlu0 %2665 }
 0x377   :  { %v2671_v37 = vsel %vm549_vm2, %v2666_v0, 0 }
 0x378   :  { %v2714_v40 = vpop.permute.xlu1 %2713  ;;  %5063 = vmatmul.mubr.msk.bf16.vlgmr.msra.gmra.mrb[88].mxu0 %vm549_vm2, %v2464_v14 }
 0x379   :  { %5073 = vmatpush3.bf16.xpose.msra.mxu0 %v2571_v8  ;;  %5074 = vmatprep.mubr.msk.bf16.mxu0 %vm5459_vm1, %v6774_v10 }
 0x37a   :  { %5069 = vmatmul.mubr.msk.bf16.vlgmr.msra.gmra.mrb[88].mxu1 %vm549_vm2, %v2514_v12  ;;  %v2664_v57 = vpop.permute.xlu0 %2663  ;;  %5084 = vmatprep.subr.bf16.mxu0 %v6774_v10 }
 0x37b   :  { %5079 = vmatpush3.bf16.xpose.msra.mxu1 %v2621_v45  ;;  %5080 = vmatprep.mubr.msk.bf16.mxu1 %vm5459_vm1, %v6774_v10 }
 0x37c   :  { %v2816_v6 = vpop.permute.xlu1 %2815  ;;  %5090 = vmatprep.subr.bf16.mxu1 %v6774_v10 }
 0x37d   :  { %v2821_v22 = vsel %vm549_vm2, %v2816_v6, 0 }
 0x37e   :  { %v2766_v11 = vpop.permute.xlu0 %2765 }
 0x37f   :  { %v2771_v4 = vsel %vm549_vm2, %v2766_v11, 0 }
 0x380   :  { %5075 = vmatmul.mubr.msk.bf16.vlgmr.msra.gmra.mrb[92].mxu0 %vm549_vm2, %v2564_v18  ;;  %v2814_v20 = vpop.permute.xlu1 %2813 }
 0x381   :  { %5085 = vmatpush3.bf16.xpose.msra.mxu0 %v2671_v37  ;;  %5086 = vmatprep.mubr.msk.bf16.mxu0 %vm5459_vm1, %v6774_v10 }
 0x382   :  { %5081 = vmatmul.mubr.msk.bf16.vlgmr.msra.gmra.mrb[92].mxu1 %vm549_vm2, %v2614_v41  ;;  %v2764_v43 = vpop.permute.xlu0 %2763  ;;  %5096 = vmatprep.subr.bf16.mxu0 %v6774_v10 }
 0x383   :  { %5091 = vmatpush3.bf16.xpose.msra.mxu1 %v2721_v44  ;;  %5092 = vmatprep.mubr.msk.bf16.mxu1 %vm5459_vm1, %v6774_v10 }
 0x384   :  { %5102 = vmatprep.subr.bf16.mxu1 %v6774_v10  ;;  %v2916_v33 = vpop.permute.xlu1 %2915 }
 0x385   :  { %v2921_v9 = vsel %vm549_vm2, %v2916_v33, 0 }
 0x386   :  { %v2866_v25 = vpop.permute.xlu0 %2865 }
 0x387   :  { %v2871_v35 = vsel %vm549_vm2, %v2866_v25, 0 }
 0x388   :  { %5087 = vmatmul.mubr.msk.bf16.vlgmr.msra.gmra.mrb[96].mxu0 %vm549_vm2, %v2664_v57  ;;  %v2914_v7 = vpop.permute.xlu1 %2913 }
 0x389   :  { %5097 = vmatpush3.bf16.xpose.msra.mxu0 %v2771_v4  ;;  %5098 = vmatprep.mubr.msk.bf16.mxu0 %vm5459_vm1, %v6774_v10 }
 0x38a   :  { %5093 = vmatmul.mubr.msk.bf16.vlgmr.msra.gmra.mrb[96].mxu1 %vm549_vm2, %v2714_v40  ;;  %5108 = vmatprep.subr.bf16.mxu0 %v6774_v10  ;;  %v2864_v29 = vpop.permute.xlu0 %2863 }
 0x38b   :  { %5103 = vmatpush3.bf16.xpose.msra.mxu1 %v2821_v22  ;;  %5104 = vmatprep.mubr.msk.bf16.mxu1 %vm5459_vm1, %v6774_v10 }
 0x38c   :  { %5114 = vmatprep.subr.bf16.mxu1 %v6774_v10  ;;  %v3016_v42 = vpop.permute.xlu1 %3015 }
 0x38d   :  { %v3021_v24 = vsel %vm549_vm2, %v3016_v42, 0 }
 0x38e   :  { %v2966_v62 = vpop.permute.xlu0 %2965 }
 0x38f   :  { %v2971_v59 = vsel %vm549_vm2, %v2966_v62, 0 }
 0x390   :  { %5099 = vmatmul.mubr.msk.bf16.vlgmr.msra.gmra.mrb[100].mxu0 %vm549_vm2, %v2764_v43  ;;  %v3014_v38 = vpop.permute.xlu1 %3013 }
 0x391   :  { %5109 = vmatpush3.bf16.xpose.msra.mxu0 %v2871_v35  ;;  %5110 = vmatprep.mubr.msk.bf16.mxu0 %vm5459_vm1, %v6774_v10 }
 0x392   :  { %5105 = vmatmul.mubr.msk.bf16.vlgmr.msra.gmra.mrb[100].mxu1 %vm549_vm2, %v2814_v20  ;;  %5120 = vmatprep.subr.bf16.mxu0 %v6774_v10  ;;  %v2964_v15 = vpop.permute.xlu0 %2963 }
 0x393   :  { %5115 = vmatpush3.bf16.xpose.msra.mxu1 %v2921_v9  ;;  %5116 = vmatprep.mubr.msk.bf16.mxu1 %vm5459_vm1, %v6774_v10 }
 0x394   :  { %5126 = vmatprep.subr.bf16.mxu1 %v6774_v10  ;;  %v3320_v55 = vpop.permute.xlu1 %3319 }
 0x395   :  { %v3325_v2 = vsel %vm1499_vm3, %v3320_v55, 0 }
 0x396   :  { %v3272_v63 = vpop.permute.xlu0 %3271 }
 0x397   :  { %v3277_v60 = vsel %vm1499_vm3, %v3272_v63, 0 }
 0x398   :  { %5111 = vmatmul.mubr.msk.bf16.vlgmr.msra.gmra.mrb[104].mxu0 %vm549_vm2, %v2864_v29 }
 0x399   :  { %5121 = vmatpush3.bf16.xpose.msra.mxu0 %v2971_v59  ;;  %5122 = vmatprep.mubr.msk.bf16.mxu0 %vm5459_vm1, %v6774_v10 }
 0x39a   :  { %5117 = vmatmul.mubr.msk.bf16.vlgmr.msra.gmra.mrb[104].mxu1 %vm549_vm2, %v2914_v7  ;;  %5132 = vmatprep.subr.bf16.mxu0 %v6774_v10 }
 0x39b   :  { %5127 = vmatpush3.bf16.xpose.msra.mxu1 %v3021_v24  ;;  %5128 = vmatprep.mubr.msk.bf16.mxu1 %vm5459_vm1, %v6774_v10 }
 0x39c   :  { %5138 = vmatprep.subr.bf16.mxu1 %v6774_v10 }
 0x3a0   :  { %5123 = vmatmul.mubr.msk.bf16.vlgmr.msra.gmra.mrb[108].mxu0 %vm549_vm2, %v2964_v15 }
 0x3a1   :  { %5133 = vmatpush3.bf16.msra.mxu0 %v3277_v60  ;;  %5134 = vmatprep.mubr.msk.bf16.mxu0 %vm5459_vm1, %v6774_v10 }
 0x3a2   :  { %5129 = vmatmul.mubr.msk.bf16.vlgmr.msra.gmra.mrb[108].mxu1 %vm549_vm2, %v3014_v38  ;;  %5144 = vmatprep.subr.bf16.mxu0 %v6774_v10 }
 0x3a3   :  { %5139 = vmatpush3.bf16.msra.mxu1 %v3325_v2  ;;  %5140 = vmatprep.mubr.msk.bf16.mxu1 %vm5459_vm1, %v6774_v10 }
 0x3a4   :  { %5150 = vmatprep.subr.bf16.mxu1 %v6774_v10 }
 0x3ce   :  { %v6312_v27 = vpop.f32.mrb[48].mxu0 }
 0x3cf   :  { %v4944_v32 = vpop.f32.mrb[49].mxu0 }
 0x3d0   :  { %v1540_v54 = vpop.f32.mrb[50].mxu0 }
 0x3d1   :  { %v4945_v23 = vpop.f32.mrb[51].mxu0 }
 0x3d2   :  { %v6314_v53 = vpop.f32.mrb[48].mxu1 }
 0x3d3   :  { %v4950_v52 = vpop.f32.mrb[49].mxu1 }
 0x3d4   :  { %v1588_v30 = vpop.f32.mrb[50].mxu1 }
 0x3d5   :  { %v4951_v58 = vpop.f32.mrb[51].mxu1 }
 0x3d6   :  { %v6316_v28 = vpop.f32.mrb[52].mxu0 }
 0x3d7   :  { %v4956_v47 = vpop.f32.mrb[53].mxu0 }
 0x3d8   :  { %v1636_v19 = vpop.f32.mrb[54].mxu0 }
 0x3d9   :  { %v4957_v5 = vpop.f32.mrb[55].mxu0 }
 0x3da   :  { %v6318_v13 = vpop.f32.mrb[52].mxu1 }
 0x3db   :  { %v4962_v16 = vpop.f32.mrb[53].mxu1 }
 0x3dc   :  { %v1684_v31 = vpop.f32.mrb[54].mxu1 }
 0x3dd   :  { %v4963_v51 = vpop.f32.mrb[55].mxu1 }
 0x3de   :  { %v6320_v12 = vpop.f32.mrb[56].mxu0 }
 0x3df   :  { %v4968_v48 = vpop.f32.mrb[57].mxu0 }
 0x3e0   :  { %v1732_v14 = vpop.f32.mrb[58].mxu0 }
 0x3e1   :  { %v4969_v1 = vpop.f32.mrb[59].mxu0 }
 0x3e2   :  { %v6322_v21 = vpop.f32.mrb[56].mxu1 }
 0x3e3   :  { %v4974_v3 = vpop.f32.mrb[57].mxu1 }
 0x3e4   :  { %v1780_v41 = vpop.f32.mrb[58].mxu1 }
 0x3e5   :  { %v4975_v46 = vpop.f32.mrb[59].mxu1 }
 0x3e6   :  { %v6324_v18 = vpop.f32.mrb[60].mxu0 }
 0x3e7   :  { %v4980_v26 = vpop.f32.mrb[61].mxu0 }
 0x3e8   :  { %v1828_v0 = vpop.f32.mrb[62].mxu0 }
 0x3e9   :  { %v4981_v8 = vpop.f32.mrb[63].mxu0 }
 0x3ea   :  { %v6326_v40 = vpop.f32.mrb[60].mxu1 }
 0x3eb   :  { %v4986_v45 = vpop.f32.mrb[61].mxu1 }
 0x3ec   :  { %v1876_v57 = vpop.f32.mrb[62].mxu1 }
 0x3ed   :  { %v4987_v6 = vpop.f32.mrb[63].mxu1 }
 0x3ee   :  { %v6328_v11 = vpop.f32.mrb[64].mxu0 }
 0x3ef   :  { %v4992_v37 = vpop.f32.mrb[65].mxu0 }
 0x3f0   :  { %v1924_v20 = vpop.f32.mrb[66].mxu0 }
 0x3f1   :  { %v4993_v44 = vpop.f32.mrb[67].mxu0 }
 0x3f2   :  { %v6330_v43 = vpop.f32.mrb[64].mxu1 }
 0x3f3   :  { %v4998_v25 = vpop.f32.mrb[65].mxu1 }
 0x3f4   :  { %v1972_v33 = vpop.f32.mrb[66].mxu1 }
 0x3f5   :  { %v4999_v4 = vpop.f32.mrb[67].mxu1 }
 0x3f6   :  { %v6332_v22 = vpop.f32.mrb[68].mxu0 }
 0x3f7   :  { %v5004_v29 = vpop.f32.mrb[69].mxu0 }
 0x3f8   :  { %v2020_v7 = vpop.f32.mrb[70].mxu0 }
 0x3f9   :  { %v5005_v35 = vpop.f32.mrb[71].mxu0 }
 0x3fa   :  { %v6334_v62 = vpop.f32.mrb[68].mxu1 }
 0x3fb   :  { %v5010_v9 = vpop.f32.mrb[69].mxu1 }
 0x3fc   :  { %v2068_v42 = vpop.f32.mrb[70].mxu1 }
 0x3fd   :  { %v5011_v15 = vpop.f32.mrb[71].mxu1 }
 0x3fe   :  { %v6336_v59 = vpop.f32.mrb[72].mxu0 }
 0x3ff   :  { %v5016_v38 = vpop.f32.mrb[73].mxu0 }
 0x400   :  { %v2116_v24 = vpop.f32.mrb[74].mxu0 }
 0x401   :  { %v5017_v63 = vpop.f32.mrb[75].mxu0 }
 0x402   :  { %v6338_v55 = vpop.f32.mrb[72].mxu1 }
 0x403   :  { %v5022_v60 = vpop.f32.mrb[73].mxu1 }
 0x404   :  { %v2164_v2 = vpop.f32.mrb[74].mxu1 }
 0x405   :  { %v5023_v32 = vpop.f32.mrb[75].mxu1 }
 0x433   :  { %v6340_v54 = vpop.f32.mrb[76].mxu0 }
 0x434   :  { %v5028_v23 = vpop.f32.mrb[77].mxu0 }
 0x435   :  { %v2212_v52 = vpop.f32.mrb[78].mxu0  ;;  %v6342_v30 = vpop.f32.mrb[76].mxu1 }
 0x436   :  { %v5029_v58 = vpop.f32.mrb[79].mxu0  ;;  %v5034_v47 = vpop.f32.mrb[77].mxu1 }
 0x437   :  { %v2260_v19 = vpop.f32.mrb[78].mxu1 }
 0x438   :  { %v5035_v5 = vpop.f32.mrb[79].mxu1 }
 0x43b   :  { %v2307_v16 = vpop.f32.mrb[80].mxu0 }
 0x43c   :  { %v6344_v31 = vmul.f32 0.35355338, %v2307_v16  ;;  %v5040_v51 = vpop.f32.mrb[81].mxu0 }
 0x43d   :  { %v2310_v48 = vpop.f32.mrb[82].mxu0  ;;  %v2357_v14 = vpop.f32.mrb[80].mxu1 }
 0x43e   :  { %v6346_v1 = vmul.f32 0.35355338, %v2357_v14  ;;  %v5041_v3 = vpop.f32.mrb[83].mxu0  ;;  %v5046_v41 = vpop.f32.mrb[81].mxu1  ;;  %v3079_v46 = vsel %vm549_vm2, %v6344_v31, -inf }
 0x43f   :  { %v2360_v26 = vpop.f32.mrb[82].mxu1  ;;  %3080 = vmax.xlane.f32.xlu0 %v3079_v46 }
 0x440   :  { %v5047_v0 = vpop.f32.mrb[83].mxu1  ;;  %v3082_v8 = vsel %vm549_vm2, %v6346_v1, -inf }
 0x441   :  { %3083 = vmax.xlane.f32.xlu1 %v3082_v8 }
 0x443   :  { %v2407_v45 = vpop.f32.mrb[84].mxu0 }
 0x444   :  { %v6352_v57 = vmul.f32 0.35355338, %v2407_v45  ;;  %v5052_v6 = vpop.f32.mrb[85].mxu0 }
 0x445   :  { %v2410_v37 = vpop.f32.mrb[86].mxu0  ;;  %v2457_v20 = vpop.f32.mrb[84].mxu1 }
 0x446   :  { %v6354_v44 = vmul.f32 0.35355338, %v2457_v20  ;;  %v5053_v25 = vpop.f32.mrb[87].mxu0  ;;  %v5058_v33 = vpop.f32.mrb[85].mxu1  ;;  %v3085_v4 = vsel %vm549_vm2, %v6352_v57, -inf }
 0x447   :  { %v2460_v29 = vpop.f32.mrb[86].mxu1  ;;  %3086 = vmax.xlane.f32.xlu0 %v3085_v4 }
 0x448   :  { %v5059_v7 = vpop.f32.mrb[87].mxu1  ;;  %v3088_v35 = vsel %vm549_vm2, %v6354_v44, -inf }
 0x44b   :  { %3089 = vmax.xlane.f32.xlu0 %v3088_v35  ;;  %v2507_v9 = vpop.f32.mrb[88].mxu0 }
 0x44c   :  { %v6360_v42 = vmul.f32 0.35355338, %v2507_v9  ;;  %v5064_v15 = vpop.f32.mrb[89].mxu0 }
 0x44d   :  { %v2510_v38 = vpop.f32.mrb[90].mxu0  ;;  %v2557_v24 = vpop.f32.mrb[88].mxu1 }
 0x44e   :  { %v6362_v63 = vmul.f32 0.35355338, %v2557_v24  ;;  %v5065_v60 = vpop.f32.mrb[91].mxu0  ;;  %v5070_v2 = vpop.f32.mrb[89].mxu1  ;;  %v3091_v32 = vsel %vm549_vm2, %v6360_v42, -inf }
 0x44f   :  { %v2560_v23 = vpop.f32.mrb[90].mxu1  ;;  %3092 = vmax.xlane.f32.xlu0 %v3091_v32 }
 0x450   :  { %v5071_v52 = vpop.f32.mrb[91].mxu1  ;;  %v3094_v58 = vsel %vm549_vm2, %v6362_v63, -inf }
 0x451   :  { %3095 = vmax.xlane.f32.xlu1 %v3094_v58 }
 0x453   :  { %v2607_v47 = vpop.f32.mrb[92].mxu0 }
 0x454   :  { %v6368_v19 = vmul.f32 0.35355338, %v2607_v47  ;;  %v5076_v5 = vpop.f32.mrb[93].mxu0 }
 0x455   :  { %v2610_v16 = vpop.f32.mrb[94].mxu0  ;;  %v2657_v51 = vpop.f32.mrb[92].mxu1 }
 0x456   :  { %v6370_v48 = vmul.f32 0.35355338, %v2657_v51  ;;  %v5077_v14 = vpop.f32.mrb[95].mxu0  ;;  %v5082_v3 = vpop.f32.mrb[93].mxu1  ;;  %v3097_v41 = vsel %vm549_vm2, %v6368_v19, -inf }
 0x457   :  { %v2660_v46 = vpop.f32.mrb[94].mxu1  ;;  %3098 = vmax.xlane.f32.xlu0 %v3097_v41 }
 0x458   :  { %v5083_v26 = vpop.f32.mrb[95].mxu1  ;;  %v3100_v0 = vsel %vm549_vm2, %v6370_v48, -inf }
 0x459   :  { %3101 = vmax.xlane.f32.xlu1 %v3100_v0 }
 0x45b   :  { %v2707_v8 = vpop.f32.mrb[96].mxu0 }
 0x45c   :  { %v6376_v45 = vmul.f32 0.35355338, %v2707_v8  ;;  %v5088_v6 = vpop.f32.mrb[97].mxu0 }
 0x45d   :  { %v2710_v37 = vpop.f32.mrb[98].mxu0  ;;  %v2757_v20 = vpop.f32.mrb[96].mxu1 }
 0x45e   :  { %v6378_v25 = vmul.f32 0.35355338, %v2757_v20  ;;  %v5089_v33 = vpop.f32.mrb[99].mxu0  ;;  %v5094_v4 = vpop.f32.mrb[97].mxu1  ;;  %v3103_v29 = vsel %vm549_vm2, %v6376_v45, -inf }
 0x45f   :  { %v2760_v7 = vpop.f32.mrb[98].mxu1  ;;  %3104 = vmax.xlane.f32.xlu0 %v3103_v29 }
 0x460   :  { %v5095_v35 = vpop.f32.mrb[99].mxu1  ;;  %v3106_v9 = vsel %vm549_vm2, %v6378_v25, -inf }
 0x461   :  { %3107 = vmax.xlane.f32.xlu1 %v3106_v9 }
 0x463   :  { %v2807_v15 = vpop.f32.mrb[100].mxu0 }
 0x464   :  { %v6384_v38 = vmul.f32 0.35355338, %v2807_v15  ;;  %v5100_v24 = vpop.f32.mrb[101].mxu0 }
 0x465   :  { %v2810_v60 = vpop.f32.mrb[102].mxu0  ;;  %v2857_v2 = vpop.f32.mrb[100].mxu1 }
 0x466   :  { %v6386_v32 = vmul.f32 0.35355338, %v2857_v2  ;;  %v5101_v23 = vpop.f32.mrb[103].mxu0  ;;  %v5106_v52 = vpop.f32.mrb[101].mxu1  ;;  %v3109_v58 = vsel %vm549_vm2, %v6384_v38, -inf }
 0x467   :  { %v2860_v47 = vpop.f32.mrb[102].mxu1  ;;  %3110 = vmax.xlane.f32.xlu0 %v3109_v58 }
 0x468   :  { %v5107_v5 = vpop.f32.mrb[103].mxu1  ;;  %v3112_v16 = vsel %vm549_vm2, %v6386_v32, -inf  ;;  %v6416_v47 = vpop.permute.xlu0 %3367 }
 0x469   :  { %3113 = vmax.xlane.f32.xlu1 %v3112_v16  ;;  %v6418_v5 = vpop.permute.xlu1 %3415 }
 0x46b   :  { %v2907_v51 = vpop.f32.mrb[104].mxu0 }
 0x46c   :  { %v6392_v14 = vmul.f32 0.35355338, %v2907_v51  ;;  %v5112_v3 = vpop.f32.mrb[105].mxu0 }
 0x46d   :  { %v2910_v41 = vpop.f32.mrb[106].mxu0  ;;  %v2957_v46 = vpop.f32.mrb[104].mxu1 }
 0x46e   :  { %v6394_v26 = vmul.f32 0.35355338, %v2957_v46  ;;  %v5113_v0 = vpop.f32.mrb[107].mxu0  ;;  %v5118_v8 = vpop.f32.mrb[105].mxu1  ;;  %v3115_v6 = vsel %vm549_vm2, %v6392_v14, -inf }
 0x46f   :  { %v2960_v37 = vpop.f32.mrb[106].mxu1  ;;  %3116 = vmax.xlane.f32.xlu0 %v3115_v6  ;;  %v6422_v16 = vpop.permute.xlu1 %3511 }
 0x470   :  { %v5119_v20 = vpop.f32.mrb[107].mxu1  ;;  %v3118_v33 = vsel %vm549_vm2, %v6394_v26, -inf }
 0x471   :  { %3119 = vmax.xlane.f32.xlu1 %v3118_v33 }
 0x473   :  { %v3007_v4 = vpop.f32.mrb[108].mxu0 }
 0x474   :  { %v6400_v29 = vmul.f32 0.35355338, %v3007_v4  ;;  %v5124_v7 = vpop.f32.mrb[109].mxu0 }
 0x475   :  { %v3010_v35 = vpop.f32.mrb[110].mxu0  ;;  %v3057_v9 = vpop.f32.mrb[108].mxu1 }
 0x476   :  { %v5125_v15 = vpop.f32.mrb[111].mxu0  ;;  %v5130_v24 = vpop.f32.mrb[109].mxu1  ;;  %v3121_v60 = vsel %vm549_vm2, %v6400_v29, -inf  ;;  %v6412_v52 = vmul.f32 0.35355338, %v3057_v9 }
 0x477   :  { %v3060_v2 = vpop.f32.mrb[110].mxu1  ;;  %3122 = vmax.xlane.f32.xlu0 %v3121_v60 }
 0x478   :  { %v5131_v23 = vpop.f32.mrb[111].mxu1  ;;  %v3124_v58 = vsel %vm549_vm2, %v6412_v52, -inf }
 0x482   :  { %3703 = vrot.lane.b32.xlu1 %v5737_v61, %s5462_s27  ;;  %v6420_v61 = vpop.permute.xlu0 %3463 }
 0x486   :  { %3751 = vrot.lane.b32.xlu1 %v5692_v34, %s5462_s27  ;;  %v6424_v34 = vpop.permute.xlu0 %3559 }
 0x48a   :  { %3799 = vrot.lane.b32.xlu1 %v5716_v49, %s5462_s27  ;;  %v6426_v49 = vpop.permute.xlu1 %3607 }
 0x48d   :  { %3655 = vrot.lane.b32.xlu0 %v5701_v39, %s5462_s27 }
 0x4ae   :  { %3125 = vmax.xlane.f32.xlu1 %v3124_v58 }
 0x4cc   :  { %v3081_v51 = vpop.xlane.xlu0 %3080 }
 0x4cd   :  { %v3127_v39 = vsub.f32 %v6344_v31, %v3081_v51 }
 0x4ce   :  { %v3084_v3 = vpop.xlane.xlu1 %3083 }
 0x4cf   :  { %v3143_v41 = vmul.f32 1.442695, %v3127_v39  ;;  %v3128_v46 = vsub.f32 %v6346_v1, %v3084_v3 }
 0x4d1   :  { %5394 = vpow2.f32 %v3143_v41  ;;  %v3145_v0 = vmul.f32 1.442695, %v3128_v46 }
 0x4d3   :  { %5396 = vpow2.f32 %v3145_v0 }
 0x4d4   :  { %v3087_v8 = vpop.xlane.xlu0 %3086 }
 0x4d5   :  { %v3129_v6 = vsub.f32 %v6352_v57, %v3087_v8 }
 0x4d7   :  { %v3147_v37 = vmul.f32 1.442695, %v3129_v6 }
 0x4d8   :  { %v3090_v20 = vpop.xlane.xlu0 %3089 }
 0x4d9   :  { %5398 = vpow2.f32 %v3147_v37  ;;  %v3130_v33 = vsub.f32 %v6354_v44, %v3090_v20 }
 0x4db   :  { %v6432_v4 = vpop.eup %5394  ;;  %v3149_v7 = vmul.f32 1.442695, %v3130_v33 }
 0x4dc   :  { %v3093_v35 = vpop.xlane.xlu0 %3092  ;;  %v3175_v31 = vsel %vm549_vm2, %v6432_v4, 0.0 }
 0x4dd   :  { %v6436_v9 = vpop.eup %5396  ;;  %5400 = vpow2.f32 %v3149_v7  ;;  %v3131_v1 = vsub.f32 %v6360_v42, %v3093_v35  ;;  %3176 = vadd.xlane.f32.xlu0 %v3175_v31 }
 0x4de   :  { %v3096_v15 = vpop.xlane.xlu1 %3095  ;;  %v3178_v57 = vsel %vm549_vm2, %v6436_v9, 0.0 }
 0x4df   :  { %v3151_v24 = vmul.f32 1.442695, %v3131_v1  ;;  %v3132_v44 = vsub.f32 %v6362_v63, %v3096_v15  ;;  %3179 = vadd.xlane.f32.xlu1 %v3178_v57 }
 0x4e1   :  { %5402 = vpow2.f32 %v3151_v24  ;;  %v3153_v60 = vmul.f32 1.442695, %v3132_v44 }
 0x4e3   :  { %v6442_v2 = vpop.eup %5398  ;;  %5404 = vpow2.f32 %v3153_v60 }
 0x4e4   :  { %v3099_v23 = vpop.xlane.xlu0 %3098  ;;  %v3181_v58 = vsel %vm549_vm2, %v6442_v2, 0.0 }
 0x4e5   :  { %v3133_v42 = vsub.f32 %v6368_v19, %v3099_v23  ;;  %3182 = vadd.xlane.f32.xlu0 %v3181_v58 }
 0x4e6   :  { %v3102_v51 = vpop.xlane.xlu1 %3101 }
 0x4e7   :  { %v6447_v39 = vpop.eup %5400  ;;  %v3155_v3 = vmul.f32 1.442695, %v3133_v42  ;;  %v3134_v41 = vsub.f32 %v6370_v48, %v3102_v51 }
 0x4e8   :  { %v3184_v63 = vsel %vm549_vm2, %v6447_v39, 0.0 }
 0x4e9   :  { %5406 = vpow2.f32 %v3155_v3  ;;  %v3157_v46 = vmul.f32 1.442695, %v3134_v41  ;;  %3185 = vadd.xlane.f32.xlu1 %v3184_v63 }
 0x4eb   :  { %v6452_v0 = vpop.eup %5402  ;;  %5408 = vpow2.f32 %v3157_v46 }
 0x4ec   :  { %v3105_v8 = vpop.xlane.xlu0 %3104  ;;  %v3187_v19 = vsel %vm549_vm2, %v6452_v0, 0.0 }
 0x4ed   :  { %v6456_v6 = vpop.eup %5404  ;;  %v3135_v37 = vsub.f32 %v6376_v45, %v3105_v8  ;;  %3188 = vadd.xlane.f32.xlu0 %v3187_v19 }
 0x4ee   :  { %v3108_v20 = vpop.xlane.xlu1 %3107  ;;  %v3190_v48 = vsel %vm549_vm2, %v6456_v6, 0.0 }
 0x4ef   :  { %v3159_v33 = vmul.f32 1.442695, %v3135_v37  ;;  %v3136_v7 = vsub.f32 %v6378_v25, %v3108_v20  ;;  %3191 = vadd.xlane.f32.xlu1 %v3190_v48 }
 0x4f1   :  { %5410 = vpow2.f32 %v3159_v33  ;;  %v3161_v35 = vmul.f32 1.442695, %v3136_v7 }
 0x4f3   :  { %v6462_v31 = vpop.eup %5406  ;;  %5412 = vpow2.f32 %v3161_v35 }
 0x4f4   :  { %v3111_v1 = vpop.xlane.xlu0 %3110  ;;  %v3193_v15 = vsel %vm549_vm2, %v6462_v31, 0.0 }
 0x4f5   :  { %v6466_v57 = vpop.eup %5408  ;;  %v3137_v45 = vsub.f32 %v6384_v38, %v3111_v1  ;;  %3194 = vadd.xlane.f32.xlu0 %v3193_v15 }
 0x4f6   :  { %v3114_v24 = vpop.xlane.xlu1 %3113  ;;  %v3196_v44 = vsel %vm549_vm2, %v6466_v57, 0.0 }
 0x4f7   :  { %v3163_v25 = vmul.f32 1.442695, %v3137_v45  ;;  %v3138_v60 = vsub.f32 %v6386_v32, %v3114_v24  ;;  %3197 = vadd.xlane.f32.xlu1 %v3196_v44 }
 0x4f9   :  { %5414 = vpow2.f32 %v3163_v25  ;;  %v3165_v23 = vmul.f32 1.442695, %v3138_v60 }
 0x4fb   :  { %v6472_v58 = vpop.eup %5410  ;;  %5416 = vpow2.f32 %v3165_v23 }
 0x4fc   :  { %v3199_v42 = vsel %vm549_vm2, %v6472_v58, 0.0  ;;  %v3117_v46 = vpop.xlane.xlu0 %3116 }
 0x4fd   :  { %v6476_v51 = vpop.eup %5412  ;;  %3200 = vadd.xlane.f32.xlu1 %v3199_v42  ;;  %v3139_v19 = vsub.f32 %v6392_v14, %v3117_v46 }
 0x4fe   :  { %v3202_v38 = vsel %vm549_vm2, %v6476_v51, 0.0  ;;  %v3120_v8 = vpop.xlane.xlu1 %3119 }
 0x4ff   :  { %3203 = vadd.xlane.f32.xlu0 %v3202_v38  ;;  %v3140_v20 = vsub.f32 %v6394_v26, %v3120_v8  ;;  %v3167_v48 = vmul.f32 1.442695, %v3139_v19 }
 0x501   :  { %v3169_v7 = vmul.f32 1.442695, %v3140_v20  ;;  %5418 = vpow2.f32 %v3167_v48 }
 0x502   :  { %v6495_v35 = vpop.permute.xlu1 %3703 }
 0x503   :  { %v6480_v3 = vpop.eup %5414  ;;  %5420 = vpow2.f32 %v3169_v7 }
 0x504   :  { %v3205_v32 = vsel %vm549_vm2, %v6480_v3, 0.0  ;;  %v3123_v37 = vpop.xlane.xlu0 %3122 }
 0x505   :  { %v6484_v41 = vpop.eup %5416  ;;  %3206 = vadd.xlane.f32.xlu1 %v3205_v32  ;;  %v3141_v33 = vsub.f32 %v6400_v29, %v3123_v37 }
 0x506   :  { %v3208_v63 = vsel %vm549_vm2, %v6484_v41, 0.0 }
 0x507   :  { %3209 = vadd.xlane.f32.xlu0 %v3208_v63  ;;  %v3171_v1 = vmul.f32 1.442695, %v3141_v33 }
 0x509   :  { %5422 = vpow2.f32 %v3171_v1 }
 0x516   :  { %3895 = vrot.lane.b32.xlu1 %v5806_v36, %s5462_s27  ;;  %v6497_v36 = vpop.permute.xlu1 %3751 }
 0x51a   :  { %v6501_v15 = vpop.permute.xlu1 %3799 }
 0x51d   :  { %3847 = vrot.lane.b32.xlu0 %v5789_v17, %s5462_s27  ;;  %v6499_v17 = vpop.eup %5418 }
 0x51e   :  { %v6503_v14 = vpop.eup %5420  ;;  %v3211_v26 = vsel %vm549_vm2, %v6499_v17, 0.0 }
 0x51f   :  { %v6507_v45 = vpop.eup %5422  ;;  %v3214_v24 = vsel %vm549_vm2, %v6503_v14, 0.0 }
 0x520   :  { %v3217_v25 = vsel %vm549_vm2, %v6507_v45, 0.0 }
 0x53a   :  { %3212 = vadd.xlane.f32.xlu1 %v3211_v26 }
 0x53b   :  { %v3126_v29 = vpop.xlane.xlu1 %3125 }
 0x53c   :  { %v3142_v44 = vsub.f32 %v6412_v52, %v3126_v29  ;;  %3215 = vadd.xlane.f32.xlu0 %v3214_v24  ;;  %v6522_v52 = vpop.permute.xlu0 %3655 }
 0x53e   :  { %v3173_v60 = vmul.f32 1.442695, %v3142_v44  ;;  %3218 = vadd.xlane.f32.xlu1 %v3217_v25 }
 0x540   :  { %5424 = vpow2.f32 %v3173_v60  ;;  %v3517_v60 = vsel %vm1499_vm3, %v6422_v16, 0 }
 0x54a   :  { %v6514_v23 = vpop.eup %5424 }
 0x54b   :  { %v3220_v42 = vsel %vm549_vm2, %v6514_v23, 0.0 }
 0x54c   :  { %3221 = vadd.xlane.f32.xlu0 %v3220_v42 }
 0x54f   :  { %3991 = vrot.lane.b32.xlu1 %v5830_v56, %s5462_s27 }
 0x562   :  { %3943 = vrot.lane.b32.xlu0 %v5825_v50, %s5462_s27  ;;  %v3373_v50 = vsel %vm1499_vm3, %v6416_v47, 0 }
 0x56a   :  { %v3177_v38 = vpop.xlane.xlu0 %3176 }
 0x56b   :  { %5426 = vrcp.f32 %v3177_v38 }
 0x56c   :  { %v3180_v32 = vpop.xlane.xlu1 %3179 }
 0x56d   :  { %5428 = vrcp.f32 %v3180_v32  ;;  %v3565_v32 = vsel %vm1499_vm3, %v6424_v34, 0 }
 0x572   :  { %v3183_v63 = vpop.xlane.xlu0 %3182 }
 0x573   :  { %5430 = vrcp.f32 %v3183_v63 }
 0x575   :  { %v5427_v46 = vpop.eup %5426 }
 0x576   :  { %v3239_v8 = vmul.f32 %v5427_v46, %v6432_v4  ;;  %v3186_v19 = vpop.xlane.xlu1 %3185  ;;  %v3421_v4 = vsel %vm1499_vm3, %v6418_v5, 0  ;;  %v3469_v5 = vsel %vm1499_vm3, %v6420_v61, 0 }
 0x577   :  { %v5429_v37 = vpop.eup %5428  ;;  %5432 = vrcp.f32 %v3186_v19 }
 0x578   :  { %v3240_v20 = vmul.f32 %v5429_v37, %v6436_v9  ;;  %v3255_v56 = vpack.c.bf16 %v3239_v8, %v3239_v8 }
 0x57a   :  { %5135 = vmatmul.mubr.msk.bf16.vlgmr.msra.gmra.mrb[112].mxu0 %vm549_vm2, %v3255_v56  ;;  %v3189_v48 = vpop.xlane.xlu0 %3188  ;;  %v3256_v33 = vpack.c.bf16 %v3240_v20, %v3240_v20  ;;  %v3661_v20 = vsel %vm1499_vm3, %v6522_v52, 0 }
 0x57b   :  { %5145 = vmatpush3.bf16.msra.mxu0 %v3373_v50  ;;  %5434 = vrcp.f32 %v3189_v48  ;;  %5146 = vmatprep.mubr.msk.bf16.mxu0 %vm5459_vm1, %v6774_v10 }
 0x57c   :  { %5141 = vmatmul.mubr.msk.bf16.vlgmr.msra.gmra.mrb[112].mxu1 %vm549_vm2, %v3256_v33  ;;  %v3192_v7 = vpop.xlane.xlu1 %3191  ;;  %5156 = vmatprep.subr.bf16.mxu0 %v6774_v10 }
 0x57d   :  { %v5431_v9 = vpop.eup %5430  ;;  %5151 = vmatpush3.bf16.msra.mxu1 %v3421_v4  ;;  %5436 = vrcp.f32 %v3192_v7  ;;  %5152 = vmatprep.mubr.msk.bf16.mxu1 %vm5459_vm1, %v6774_v10  ;;  %v3757_v7 = vsel %vm1499_vm3, %v6497_v36, 0 }
 0x57e   :  { %v3241_v47 = vmul.f32 %v5431_v9, %v6442_v2  ;;  %5162 = vmatprep.subr.bf16.mxu1 %v6774_v10  ;;  %v3805_v9 = vsel %vm1499_vm3, %v6501_v15, 0 }
 0x580   :  { %v3257_v1 = vpack.c.bf16 %v3241_v47, %v3241_v47 }
 0x581   :  { %v5433_v26 = vpop.eup %5432 }
 0x582   :  { %v3242_v29 = vmul.f32 %v5433_v26, %v6447_v39  ;;  %5147 = vmatmul.mubr.msk.bf16.vlgmr.msra.gmra.mrb[116].mxu0 %vm549_vm2, %v3257_v1  ;;  %v3195_v24 = vpop.xlane.xlu0 %3194 }
 0x583   :  { %5157 = vmatpush3.bf16.msra.mxu0 %v3469_v5  ;;  %5438 = vrcp.f32 %v3195_v24  ;;  %5158 = vmatprep.mubr.msk.bf16.mxu0 %vm5459_vm1, %v6774_v10 }
 0x584   :  { %v3198_v44 = vpop.xlane.xlu1 %3197  ;;  %v3258_v25 = vpack.c.bf16 %v3242_v29, %v3242_v29  ;;  %5168 = vmatprep.subr.bf16.mxu0 %v6774_v10 }
 0x585   :  { %v5435_v2 = vpop.eup %5434  ;;  %5440 = vrcp.f32 %v3198_v44 }
 0x586   :  { %v3243_v61 = vmul.f32 %v5435_v2, %v6452_v0  ;;  %5153 = vmatmul.mubr.msk.bf16.vlgmr.msra.gmra.mrb[116].mxu1 %vm549_vm2, %v3258_v25 }
 0x587   :  { %v5437_v39 = vpop.eup %5436  ;;  %5163 = vmatpush3.bf16.msra.mxu1 %v3517_v60  ;;  %5164 = vmatprep.mubr.msk.bf16.mxu1 %vm5459_vm1, %v6774_v10 }
 0x588   :  { %v3244_v42 = vmul.f32 %v5437_v39, %v6456_v6  ;;  %v3259_v38 = vpack.c.bf16 %v3243_v61, %v3243_v61  ;;  %5174 = vmatprep.subr.bf16.mxu1 %v6774_v10  ;;  %v3613_v6 = vsel %vm1499_vm3, %v6426_v49, 0 }
 0x58a   :  { %v3201_v63 = vpop.xlane.xlu1 %3200  ;;  %5159 = vmatmul.mubr.msk.bf16.vlgmr.msra.gmra.mrb[120].mxu0 %vm549_vm2, %v3259_v38  ;;  %v3260_v0 = vpack.c.bf16 %v3244_v42, %v3244_v42 }
 0x58b   :  { %5442 = vrcp.f32 %v3201_v63  ;;  %5169 = vmatpush3.bf16.msra.mxu0 %v3565_v32  ;;  %5170 = vmatprep.mubr.msk.bf16.mxu0 %vm5459_vm1, %v6774_v10 }
 0x58c   :  { %v3204_v16 = vpop.xlane.xlu0 %3203  ;;  %5180 = vmatprep.subr.bf16.mxu0 %v6774_v10 }
 0x58d   :  { %v5439_v46 = vpop.eup %5438  ;;  %5444 = vrcp.f32 %v3204_v16 }
 0x58e   :  { %v3245_v8 = vmul.f32 %v5439_v46, %v6462_v31  ;;  %5165 = vmatmul.mubr.msk.bf16.vlgmr.msra.gmra.mrb[120].mxu1 %vm549_vm2, %v3260_v0 }
 0x58f   :  { %v5441_v34 = vpop.eup %5440  ;;  %5175 = vmatpush3.bf16.msra.mxu1 %v3613_v6  ;;  %5176 = vmatprep.mubr.msk.bf16.mxu1 %vm5459_vm1, %v6774_v10 }
 0x590   :  { %v3246_v19 = vmul.f32 %v5441_v34, %v6466_v57  ;;  %v3261_v37 = vpack.c.bf16 %v3245_v8, %v3245_v8  ;;  %5186 = vmatprep.subr.bf16.mxu1 %v6774_v10  ;;  %v3709_v57 = vsel %vm1499_vm3, %v6495_v35, 0 }
 0x592   :  { %v3207_v56 = vpop.xlane.xlu1 %3206  ;;  %5171 = vmatmul.mubr.msk.bf16.vlgmr.msra.gmra.mrb[124].mxu0 %vm549_vm2, %v3261_v37  ;;  %v3262_v31 = vpack.c.bf16 %v3246_v19, %v3246_v19 }
 0x593   :  { %5446 = vrcp.f32 %v3207_v56  ;;  %5181 = vmatpush3.bf16.msra.mxu0 %v3661_v20  ;;  %5182 = vmatprep.mubr.msk.bf16.mxu0 %vm5459_vm1, %v6774_v10 }
 0x594   :  { %v3210_v49 = vpop.xlane.xlu0 %3209  ;;  %5192 = vmatprep.subr.bf16.mxu0 %v6774_v10 }
 0x595   :  { %v5443_v50 = vpop.eup %5442  ;;  %5448 = vrcp.f32 %v3210_v49 }
 0x596   :  { %v3247_v48 = vmul.f32 %v5443_v50, %v6472_v58  ;;  %5177 = vmatmul.mubr.msk.bf16.vlgmr.msra.gmra.mrb[124].mxu1 %vm549_vm2, %v3262_v31  ;;  %v3896_v15 = vpop.permute.xlu1 %3895  ;;  %v5328_v31 = vld [vmem:[%s6758_s6] sm:$0xff]  }
 0x597   :  { %v5445_v52 = vpop.eup %5444  ;;  %5187 = vmatpush3.bf16.msra.mxu1 %v3709_v57  ;;  %5188 = vmatprep.mubr.msk.bf16.mxu1 %vm5459_vm1, %v6774_v10  ;;  %v3901_v29 = vsel %vm1499_vm3, %v3896_v15, 0 }
 0x598   :  { %v3248_v33 = vmul.f32 %v5445_v52, %v6476_v51  ;;  %v3263_v4 = vpack.c.bf16 %v3247_v48, %v3247_v48  ;;  %5198 = vmatprep.subr.bf16.mxu1 %v6774_v10  ;;  %v3848_v1 = vpop.permute.xlu0 %3847 }
 0x599   :  { %v3853_v5 = vsel %vm1499_vm3, %v3848_v1, 0 }
 0x59a   :  { %5183 = vmatmul.mubr.msk.bf16.vlgmr.msra.gmra.mrb[128].mxu0 %vm549_vm2, %v3263_v4  ;;  %v3264_v58 = vpack.c.bf16 %v3248_v33, %v3248_v33 }
 0x59b   :  { %5193 = vmatpush3.bf16.msra.mxu0 %v3757_v7  ;;  %5194 = vmatprep.mubr.msk.bf16.mxu0 %vm5459_vm1, %v6774_v10 }
 0x59c   :  { %5204 = vmatprep.subr.bf16.mxu0 %v6774_v10 }
 0x59d   :  { %v5447_v35 = vpop.eup %5446 }
 0x59e   :  { %v3249_v51 = vmul.f32 %v5447_v35, %v6480_v3  ;;  %5189 = vmatmul.mubr.msk.bf16.vlgmr.msra.gmra.mrb[128].mxu1 %vm549_vm2, %v3264_v58 }
 0x59f   :  { %v5449_v47 = vpop.eup %5448  ;;  %5199 = vmatpush3.bf16.msra.mxu1 %v3805_v9  ;;  %5200 = vmatprep.mubr.msk.bf16.mxu1 %vm5459_vm1, %v6774_v10 }
 0x5a0   :  { %v3250_v36 = vmul.f32 %v5449_v47, %v6484_v41  ;;  %v3265_v26 = vpack.c.bf16 %v3249_v51, %v3249_v51  ;;  %5210 = vmatprep.subr.bf16.mxu1 %v6774_v10 }
 0x5a2   :  { %5195 = vmatmul.mubr.msk.bf16.vlgmr.msra.gmra.mrb[132].mxu0 %vm549_vm2, %v3265_v26  ;;  %v3266_v3 = vpack.c.bf16 %v3250_v36, %v3250_v36 }
 0x5a3   :  { %5205 = vmatpush3.bf16.msra.mxu0 %v3853_v5  ;;  %5206 = vmatprep.mubr.msk.bf16.mxu0 %vm5459_vm1, %v6774_v10 }
 0x5a4   :  { %5216 = vmatprep.subr.bf16.mxu0 %v6774_v10 }
 0x5a6   :  { %5201 = vmatmul.mubr.msk.bf16.vlgmr.msra.gmra.mrb[132].mxu1 %vm549_vm2, %v3266_v3 }
 0x5a7   :  { %5211 = vmatpush3.bf16.msra.mxu1 %v3901_v29  ;;  %5212 = vmatprep.mubr.msk.bf16.mxu1 %vm5459_vm1, %v6774_v10 }
 0x5a8   :  { %5222 = vmatprep.subr.bf16.mxu1 %v6774_v10 }
 0x5c7   :  { %v3213_v41 = vpop.xlane.xlu1 %3212 }
 0x5c8   :  { %5450 = vrcp.f32 %v3213_v41 }
 0x5c9   :  { %v3216_v24 = vpop.xlane.xlu0 %3215 }
 0x5ca   :  { %5452 = vrcp.f32 %v3216_v24 }
 0x5cb   :  { %v3219_v44 = vpop.xlane.xlu1 %3218 }
 0x5cc   :  { %5454 = vrcp.f32 %v3219_v44 }
 0x5cf   :  { %v3992_v42 = vpop.permute.xlu1 %3991 }
 0x5d0   :  { %v3997_v63 = vsel %vm1499_vm3, %v3992_v42, 0 }
 0x5d2   :  { %v5451_v25 = vpop.eup %5450 }
 0x5d3   :  { %v3251_v2 = vmul.f32 %v5451_v25, %v6499_v17 }
 0x5d4   :  { %v5453_v60 = vpop.eup %5452 }
 0x5d5   :  { %v3252_v61 = vmul.f32 %v5453_v60, %v6503_v14  ;;  %v3267_v39 = vpack.c.bf16 %v3251_v2, %v3251_v2 }
 0x5d6   :  { %v5455_v32 = vpop.eup %5454 }
 0x5d7   :  { %5207 = vmatmul.mubr.msk.bf16.vlgmr.msra.gmra.mrb[136].mxu0 %vm549_vm2, %v3267_v39  ;;  %v3268_v38 = vpack.c.bf16 %v3252_v61, %v3252_v61  ;;  %v3253_v17 = vmul.f32 %v5455_v32, %v6507_v45 }
 0x5d8   :  { %5218 = vmatprep.mubr.msk.bf16.mxu0 %vm5459_vm1, %v6774_v10 }
 0x5d9   :  { %5213 = vmatmul.mubr.msk.bf16.vlgmr.msra.gmra.mrb[136].mxu1 %vm549_vm2, %v3268_v38  ;;  %v3222_v16 = vpop.xlane.xlu0 %3221  ;;  %v3269_v46 = vpack.c.bf16 %v3253_v17, %v3253_v17 }
 0x5da   :  { %5223 = vmatpush3.bf16.msra.mxu1 %v3997_v63  ;;  %5456 = vrcp.f32 %v3222_v16  ;;  %5224 = vmatprep.mubr.msk.bf16.mxu1 %vm5459_vm1, %v6774_v10 }
 0x5dd   :  { %v3944_v14 = vpop.permute.xlu0 %3943 }
 0x5de   :  { %v3949_v0 = vsel %vm1499_vm3, %v3944_v14, 0 }
 0x5df   :  { %5217 = vmatpush3.bf16.msra.mxu0 %v3949_v0 }
 0x5e0   :  { %5228 = vmatprep.subr.bf16.mxu0 %v5328_v31 }
 0x5e2   :  { %5219 = vmatmul.mubr.msk.bf16.vlgmr.msra.gmra.mrb[140].mxu0 %vm549_vm2, %v3269_v46 }
 0x5e3   :  { %5229 = vmatpush3.bf16.msra.mxu0 %v5328_v31 }
 0x5e4   :  { %v5457_v6 = vpop.eup %5456 }
 0x5e5   :  { %v3254_v8 = vmul.f32 %v5457_v6, %v6514_v23 }
 0x5e7   :  { %v3270_v34 = vpack.c.bf16 %v3254_v8, %v3254_v8 }
 0x5e9   :  { %5225 = vmatmul.mubr.msk.bf16.vlgmr.msra.gmra.mrb[140].mxu1 %vm549_vm2, %v3270_v34 }
 0x64d   :  { %v3313_v19 = vpop.f32.mrb[112].mxu0 }
 0x64e   :  { %v5136_v37 = vpop.f32.mrb[113].mxu0 }
 0x64f   :  { %v3316_v20 = vpop.f32.mrb[114].mxu0  ;;  %v3361_v56 = vpop.f32.mrb[112].mxu1 }
 0x650   :  { %v5270_v10 = vpack.i.bf16 %v3361_v56, %v3313_v19  ;;  %v5137_v49 = vpop.f32.mrb[115].mxu0  ;;  %v5142_v45 = vpop.f32.mrb[113].mxu1 }
 0x651   :  { %v3364_v50 = vpop.f32.mrb[114].mxu1 }
 0x652   :  { %v5143_v57 = vpop.f32.mrb[115].mxu1  ;;  %5271 = vrot.lane.b32.xlu0 %v5270_v10, %s5463_s30 }
 0x655   :  { %v3409_v23 = vpop.f32.mrb[116].mxu0 }
 0x656   :  { %v5148_v48 = vpop.f32.mrb[117].mxu0 }
 0x657   :  { %v3412_v52 = vpop.f32.mrb[118].mxu0 }
 0x658   :  { %v5149_v33 = vpop.f32.mrb[119].mxu0 }
 0x659   :  { %v3457_v4 = vpop.f32.mrb[116].mxu1 }
 0x65a   :  { %v5275_v7 = vpack.i.bf16 %v3457_v4, %v3409_v23  ;;  %v5154_v58 = vpop.f32.mrb[117].mxu1 }
 0x65b   :  { %v3460_v35 = vpop.f32.mrb[118].mxu1 }
 0x65c   :  { %v5155_v9 = vpop.f32.mrb[119].mxu1  ;;  %5276 = vrot.lane.b32.xlu1 %v5275_v7, %s5463_s30 }
 0x65d   :  { %v3505_v51 = vpop.f32.mrb[120].mxu0 }
 0x65e   :  { %v5160_v47 = vpop.f32.mrb[121].mxu0 }
 0x65f   :  { %v3508_v1 = vpop.f32.mrb[122].mxu0 }
 0x660   :  { %v5161_v36 = vpop.f32.mrb[123].mxu0 }
 0x661   :  { %v3553_v26 = vpop.f32.mrb[120].mxu1 }
 0x662   :  { %v5280_v5 = vpack.i.bf16 %v3553_v26, %v3505_v51  ;;  %v5166_v15 = vpop.f32.mrb[121].mxu1 }
 0x663   :  { %v3556_v3 = vpop.f32.mrb[122].mxu1 }
 0x664   :  { %v5167_v29 = vpop.f32.mrb[123].mxu1  ;;  %5281 = vrot.lane.b32.xlu0 %v5280_v5, %s5463_s30 }
 0x665   :  { %v3601_v41 = vpop.f32.mrb[124].mxu0 }
 0x666   :  { %v5172_v24 = vpop.f32.mrb[125].mxu0 }
 0x667   :  { %v3604_v44 = vpop.f32.mrb[126].mxu0 }
 0x668   :  { %v5173_v25 = vpop.f32.mrb[127].mxu0 }
 0x669   :  { %v3649_v2 = vpop.f32.mrb[124].mxu1 }
 0x66a   :  { %v5285_v60 = vpack.i.bf16 %v3649_v2, %v3601_v41  ;;  %v5178_v61 = vpop.f32.mrb[125].mxu1 }
 0x66b   :  { %v3652_v39 = vpop.f32.mrb[126].mxu1 }
 0x66c   :  { %v5179_v42 = vpop.f32.mrb[127].mxu1  ;;  %5286 = vrot.lane.b32.xlu1 %v5285_v60, %s5463_s30 }
 0x66d   :  { %v3697_v38 = vpop.f32.mrb[128].mxu0 }
 0x66e   :  { %v5184_v32 = vpop.f32.mrb[129].mxu0 }
 0x66f   :  { %v3700_v63 = vpop.f32.mrb[130].mxu0 }
 0x670   :  { %v5185_v16 = vpop.f32.mrb[131].mxu0 }
 0x671   :  { %v3745_v17 = vpop.f32.mrb[128].mxu1 }
 0x672   :  { %v5290_v14 = vpack.i.bf16 %v3745_v17, %v3697_v38  ;;  %v5190_v0 = vpop.f32.mrb[129].mxu1 }
 0x673   :  { %v3748_v46 = vpop.f32.mrb[130].mxu1 }
 0x674   :  { %v5191_v6 = vpop.f32.mrb[131].mxu1  ;;  %5291 = vrot.lane.b32.xlu0 %v5290_v14, %s5463_s30 }
 0x675   :  { %v3793_v8 = vpop.f32.mrb[132].mxu0 }
 0x676   :  { %v5196_v34 = vpop.f32.mrb[133].mxu0 }
 0x677   :  { %v3796_v19 = vpop.f32.mrb[134].mxu0 }
 0x678   :  { %v5197_v37 = vpop.f32.mrb[135].mxu0 }
 0x679   :  { %v3841_v20 = vpop.f32.mrb[132].mxu1 }
 0x67a   :  { %v5295_v56 = vpack.i.bf16 %v3841_v20, %v3793_v8  ;;  %v5202_v10 = vpop.f32.mrb[133].mxu1 }
 0x67b   :  { %v3844_v49 = vpop.f32.mrb[134].mxu1 }
 0x67c   :  { %v5203_v45 = vpop.f32.mrb[135].mxu1  ;;  %5296 = vrot.lane.b32.xlu1 %v5295_v56, %s5463_s30 }
 0x6aa   :  { %v3889_v31 = vpop.f32.mrb[136].mxu0 }
 0x6ab   :  { %v5208_v50 = vpop.f32.mrb[137].mxu0 }
 0x6ac   :  { %v3892_v57 = vpop.f32.mrb[138].mxu0  ;;  %v3937_v23 = vpop.f32.mrb[136].mxu1 }
 0x6ad   :  { %v5300_v48 = vpack.i.bf16 %v3937_v23, %v3889_v31  ;;  %v5209_v52 = vpop.f32.mrb[139].mxu0  ;;  %v5214_v33 = vpop.f32.mrb[137].mxu1 }
 0x6ae   :  { %v3940_v4 = vpop.f32.mrb[138].mxu1 }
 0x6af   :  { %v5215_v7 = vpop.f32.mrb[139].mxu1  ;;  %5301 = vrot.lane.b32.xlu0 %v5300_v48, %s5463_s30 }
 0x6b5   :  { %v3985_v58 = vpop.f32.mrb[140].mxu0 }
 0x6b6   :  { %v5220_v35 = vpop.f32.mrb[141].mxu0 }
 0x6b7   :  { %v3988_v9 = vpop.f32.mrb[142].mxu0 }
 0x6b8   :  { %v5221_v51 = vpop.f32.mrb[143].mxu0 }
 0x6bc   :  { %v4033_v47 = vpop.f32.mrb[140].mxu1 }
 0x6bd   :  { %v5305_v1 = vpack.i.bf16 %v4033_v47, %v3985_v58  ;;  %v5226_v36 = vpop.f32.mrb[141].mxu1 }
 0x6be   :  { %v4036_v26 = vpop.f32.mrb[142].mxu1 }
 0x6bf   :  { %v5227_v5 = vpop.f32.mrb[143].mxu1  ;;  %5306 = vrot.lane.b32.xlu1 %v5305_v1, %s5463_s30 }
 0x6c4   :  { %v5272_v15 = vpop.permute.xlu0 %5271 }
 0x6c5   :  { %v5274_v3 = vunpack.i.h.bf16 %v5272_v15  ;;  %v5273_v29 = vunpack.i.l.bf16 %v5272_v15 }
 0x6c7   :  { %v4104_v41 = vsel %vm549_vm2, %v6314_v53, %v5274_v3  ;;  %v4103_v24 = vsel %vm549_vm2, %v6312_v27, %v5273_v29 }
 0x6c8   :  { %v4119_v44 = vpack.c.bf16 %v4104_v41, %v4103_v24 }
 0x6ca   :  { %5230 = vmatprep.mubr.msk.bf16.mxu0 %vm107_vm0, %v4119_v44 }
 0x6ce   :  { %v5277_v25 = vpop.permute.xlu1 %5276 }
 0x6cf   :  { %v5279_v2 = vunpack.i.h.bf16 %v5277_v25  ;;  %v5278_v60 = vunpack.i.l.bf16 %v5277_v25 }
 0x6d1   :  { %v4106_v61 = vsel %vm549_vm2, %v6318_v13, %v5279_v2  ;;  %v4105_v39 = vsel %vm549_vm2, %v6316_v28, %v5278_v60 }
 0x6d2   :  { %v4120_v42 = vpack.c.bf16 %v4106_v61, %v4105_v39 }
 0x6d4   :  { %5231 = vmatmul.mubr.msk.bf16.vlgmr.msra.gmra.mrb[144].mxu0 %vm107_vm0, %v4120_v42 }
 0x6d6   :  { %v5282_v38 = vpop.permute.xlu0 %5281 }
 0x6d7   :  { %v5284_v53 = vunpack.i.h.bf16 %v5282_v38  ;;  %v5283_v32 = vunpack.i.l.bf16 %v5282_v38 }
 0x6d9   :  { %v4108_v27 = vsel %vm549_vm2, %v6322_v21, %v5284_v53  ;;  %v4107_v63 = vsel %vm549_vm2, %v6320_v12, %v5283_v32 }
 0x6da   :  { %v4121_v16 = vpack.c.bf16 %v4108_v27, %v4107_v63 }
 0x6dc   :  { %5234 = vmatprep.mubr.msk.bf16.mxu0 %vm107_vm0, %v4121_v16 }
 0x6de   :  { %v5287_v17 = vpop.permute.xlu1 %5286 }
 0x6df   :  { %v5289_v13 = vunpack.i.h.bf16 %v5287_v17  ;;  %v5288_v14 = vunpack.i.l.bf16 %v5287_v17 }
 0x6e1   :  { %v4110_v28 = vsel %vm549_vm2, %v6326_v40, %v5289_v13  ;;  %v4109_v0 = vsel %vm549_vm2, %v6324_v18, %v5288_v14 }
 0x6e2   :  { %v4122_v46 = vpack.c.bf16 %v4110_v28, %v4109_v0 }
 0x6e4   :  { %5235 = vmatmul.mubr.msk.bf16.gmra.mrb[148].mxu0 %vm107_vm0, %v4122_v46 }
 0x6e6   :  { %v5292_v6 = vpop.permute.xlu0 %5291 }
 0x6e7   :  { %v5294_v21 = vunpack.i.h.bf16 %v5292_v6  ;;  %v5293_v8 = vunpack.i.l.bf16 %v5292_v6 }
 0x6e9   :  { %v4112_v12 = vsel %vm549_vm2, %v6330_v43, %v5294_v21  ;;  %v4111_v34 = vsel %vm549_vm2, %v6328_v11, %v5293_v8 }
 0x6ea   :  { %v4123_v19 = vpack.c.bf16 %v4112_v12, %v4111_v34 }
 0x6ec   :  { %5238 = vmatprep.mubr.msk.bf16.mxu0 %vm107_vm0, %v4123_v19 }
 0x6ee   :  { %v5297_v37 = vpop.permute.xlu1 %5296 }
 0x6ef   :  { %v5299_v40 = vunpack.i.h.bf16 %v5297_v37  ;;  %v5298_v20 = vunpack.i.l.bf16 %v5297_v37 }
 0x6f1   :  { %v4114_v18 = vsel %vm549_vm2, %v6334_v62, %v5299_v40  ;;  %v4113_v56 = vsel %vm549_vm2, %v6332_v22, %v5298_v20  ;;  %v5329_v62 = vld [vmem:[%s6759_s8] sm:$0xff]  }
 0x6f2   :  { %v4124_v10 = vpack.c.bf16 %v4114_v18, %v4113_v56  ;;  %5246 = vmatprep.subr.bf16.mxu1 %v5329_v62 }
 0x6f3   :  { %5247 = vmatpush3.bf16.msra.mxu1 %v5329_v62  ;;  %v4602_v62 = vld [vmem:[%s6761_s9] ss:$0 sm:$0xff] }
 0x6f4   :  { %5239 = vmatmul.mubr.msk.bf16.gmra.mrb[152].mxu0 %vm107_vm0, %v4124_v10 }
 0x721   :  { %v5302_v49 = vpop.permute.xlu0 %5301 }
 0x722   :  { %v5304_v43 = vunpack.i.h.bf16 %v5302_v49  ;;  %v5303_v45 = vunpack.i.l.bf16 %v5302_v49 }
 0x724   :  { %v4116_v11 = vsel %vm549_vm2, %v6338_v55, %v5304_v43  ;;  %v4115_v31 = vsel %vm549_vm2, %v6336_v59, %v5303_v45  ;;  %v4592_v59 = vld [vmem:[%s6760_s7] ss:$0 sm:$0xff] }
 0x725   :  { %v4125_v50 = vpack.c.bf16 %v4116_v11, %v4115_v31 }
 0x727   :  { %5242 = vmatprep.mubr.msk.bf16.mxu0 %vm107_vm0, %v4125_v50 }
 0x731   :  { %v5307_v22 = vpop.permute.xlu1 %5306 }
 0x732   :  { %v5309_v57 = vunpack.i.h.bf16 %v5307_v22  ;;  %v5308_v23 = vunpack.i.l.bf16 %v5307_v22 }
 0x734   :  { %v4118_v48 = vsel %vm549_vm2, %v6342_v30, %v5309_v57  ;;  %v4117_v55 = vsel %vm549_vm2, %v6340_v54, %v5308_v23 }
 0x735   :  { %v4126_v52 = vpack.c.bf16 %v4118_v48, %v4117_v55 }
 0x737   :  { %5243 = vmatmul.mubr.msk.bf16.gmra.mrb[156].mxu0 %vm107_vm0, %v4126_v52 }
 0x7a7   :  { %v5232_v33 = vpop.f32.mrb[144].mxu0 }
 0x7a8   :  { %v4209_v4 = vadd.f32 %v5232_v33, %v4592_v59  ;;  %v4200_v7 = vpop.f32.mrb[145].mxu0 }
 0x7a9   :  { %v4201_v58 = vadd.f32 %v4592_v59, %v4200_v7  ;;  %v5233_v35 = vpop.f32.mrb[146].mxu0 }
 0x7aa   :  { %v4212_v9 = vadd.f32 %v5233_v35, %v4592_v59  ;;  %v4203_v51 = vpop.f32.mrb[147].mxu0  ;;  %v4265_v1 = vmax.f32 %v4209_v4, 0.0 }
 0x7ab   :  { %v4204_v47 = vadd.f32 %v4592_v59, %v4203_v51  ;;  %v4263_v36 = vmax.f32 %v4201_v58, 0.0 }
 0x7ac   :  { %v4266_v30 = vmax.f32 %v4212_v9, 0.0 }
 0x7ad   :  { %v4264_v26 = vmax.f32 %v4204_v47, 0.0 }
 0x7ae   :  { %v4280_v54 = vpack.c.bf16 %v4266_v30, %v4265_v1 }
 0x7af   :  { %v4279_v5 = vpack.c.bf16 %v4264_v26, %v4263_v36 }
 0x7b1   :  { %5248 = vmatprep.mubr.msk.bf16.mxu1 %vm107_vm0, %v4279_v5 }
 0x7b2   :  { %5249 = vmatmul.mubr.msk.bf16.vlgmr.msra.gmra.mrb[144].mxu1 %vm107_vm0, %v4280_v54 }
 0x7b7   :  { %v5236_v15 = vpop.f32.mrb[148].mxu0 }
 0x7b8   :  { %v4225_v3 = vadd.f32 %v5236_v15, %v4592_v59  ;;  %v4216_v29 = vpop.f32.mrb[149].mxu0 }
 0x7b9   :  { %v4217_v41 = vadd.f32 %v4592_v59, %v4216_v29  ;;  %v5237_v24 = vpop.f32.mrb[150].mxu0 }
 0x7ba   :  { %v4228_v44 = vadd.f32 %v5237_v24, %v4592_v59  ;;  %v4219_v25 = vpop.f32.mrb[151].mxu0  ;;  %v4269_v60 = vmax.f32 %v4225_v3, 0.0 }
 0x7bb   :  { %v4220_v2 = vadd.f32 %v4592_v59, %v4219_v25  ;;  %v4267_v39 = vmax.f32 %v4217_v41, 0.0 }
 0x7bc   :  { %v4270_v61 = vmax.f32 %v4228_v44, 0.0 }
 0x7bd   :  { %v4268_v42 = vmax.f32 %v4220_v2, 0.0 }
 0x7be   :  { %v4282_v38 = vpack.c.bf16 %v4270_v61, %v4269_v60 }
 0x7bf   :  { %v4281_v53 = vpack.c.bf16 %v4268_v42, %v4267_v39 }
 0x7c1   :  { %5252 = vmatprep.mubr.msk.bf16.mxu1 %vm107_vm0, %v4281_v53 }
 0x7c2   :  { %5253 = vmatmul.mubr.msk.bf16.gmra.mrb[148].mxu1 %vm107_vm0, %v4282_v38 }
 0x7c7   :  { %v5240_v32 = vpop.f32.mrb[152].mxu0 }
 0x7c8   :  { %v4241_v27 = vadd.f32 %v5240_v32, %v4592_v59  ;;  %v4232_v63 = vpop.f32.mrb[153].mxu0 }
 0x7c9   :  { %v4233_v16 = vadd.f32 %v4592_v59, %v4232_v63  ;;  %v5241_v17 = vpop.f32.mrb[154].mxu0 }
 0x7ca   :  { %v4244_v13 = vadd.f32 %v5241_v17, %v4592_v59  ;;  %v4235_v14 = vpop.f32.mrb[155].mxu0  ;;  %v4273_v0 = vmax.f32 %v4241_v27, 0.0 }
 0x7cb   :  { %v4236_v28 = vadd.f32 %v4592_v59, %v4235_v14  ;;  %v4271_v6 = vmax.f32 %v4233_v16, 0.0 }
 0x7cc   :  { %v4274_v46 = vmax.f32 %v4244_v13, 0.0 }
 0x7cd   :  { %v4272_v21 = vmax.f32 %v4236_v28, 0.0 }
 0x7ce   :  { %v4284_v8 = vpack.c.bf16 %v4274_v46, %v4273_v0 }
 0x7cf   :  { %v4283_v12 = vpack.c.bf16 %v4272_v21, %v4271_v6 }
 0x7d1   :  { %5256 = vmatprep.mubr.msk.bf16.mxu1 %vm107_vm0, %v4283_v12 }
 0x7d2   :  { %5257 = vmatmul.mubr.msk.bf16.gmra.mrb[152].mxu1 %vm107_vm0, %v4284_v8 }
 0x80a   :  { %v5244_v34 = vpop.f32.mrb[156].mxu0 }
 0x80b   :  { %v4257_v19 = vadd.f32 %v5244_v34, %v4592_v59  ;;  %v4248_v37 = vpop.f32.mrb[157].mxu0 }
 0x80c   :  { %v4249_v40 = vadd.f32 %v4592_v59, %v4248_v37  ;;  %v5245_v20 = vpop.f32.mrb[158].mxu0 }
 0x80d   :  { %v4260_v18 = vadd.f32 %v5245_v20, %v4592_v59  ;;  %v4251_v56 = vpop.f32.mrb[159].mxu0  ;;  %v4277_v49 = vmax.f32 %v4257_v19, 0.0 }
 0x80e   :  { %v4252_v10 = vadd.f32 %v4592_v59, %v4251_v56  ;;  %v4275_v45 = vmax.f32 %v4249_v40, 0.0 }
 0x80f   :  { %v4278_v43 = vmax.f32 %v4260_v18, 0.0 }
 0x810   :  { %v4276_v11 = vmax.f32 %v4252_v10, 0.0 }
 0x811   :  { %v4286_v31 = vpack.c.bf16 %v4278_v43, %v4277_v49 }
 0x812   :  { %v4285_v50 = vpack.c.bf16 %v4276_v11, %v4275_v45 }
 0x814   :  { %5260 = vmatprep.mubr.msk.bf16.mxu1 %vm107_vm0, %v4285_v50 }
 0x815   :  { %5261 = vmatmul.mubr.msk.bf16.gmra.mrb[156].mxu1 %vm107_vm0, %v4286_v31 }
 0x885   :  { %v5250_v22 = vpop.f32.mrb[144].mxu1 }
 0x886   :  { %v4369_v57 = vadd.f32 %v5250_v22, %v4602_v62  ;;  %v4360_v23 = vpop.f32.mrb[145].mxu1 }
 0x887   :  { %v4361_v48 = vadd.f32 %v4602_v62, %v4360_v23  ;;  %v5251_v55 = vpop.f32.mrb[146].mxu1 }
 0x888   :  { %v4425_v52 = vpack.c.bf16 %v4369_v57, %v4369_v57  ;;  %v4372_v59 = vadd.f32 %v5251_v55, %v4602_v62  ;;  %v4363_v33 = vpop.f32.mrb[147].mxu1 }
 0x889   :  { %v4423_v4 = vpack.c.bf16 %v4361_v48, %v4361_v48  ;;  %v4364_v7 = vadd.f32 %v4602_v62, %v4363_v33 }
 0x88a   :  { %4442 = vst.msk [vmem:[%s6762_s10 + $0x8] sm:$0xf] %vm4439_vm4, %v4425_v52  ;;  %v4426_v58 = vpack.c.bf16 %v4372_v59, %v4372_v59 }
 0x88b   :  { %4440 = vst.msk [vmem:[%s6762_s10] sm:$0xf] %vm4439_vm4, %v4423_v4  ;;  %v4424_v35 = vpack.c.bf16 %v4364_v7, %v4364_v7 }
 0x88c   :  { %4443 = vst.msk [vmem:[%s6762_s10 + $0xc] sm:$0xf] %vm4439_vm4, %v4426_v58 }
 0x88d   :  { %4441 = vst.msk [vmem:[%s6762_s10 + $0x4] sm:$0xf] %vm4439_vm4, %v4424_v35 }
 0x895   :  { %v5254_v9 = vpop.f32.mrb[148].mxu1 }
 0x896   :  { %v4385_v51 = vadd.f32 %v5254_v9, %v4602_v62  ;;  %v4376_v47 = vpop.f32.mrb[149].mxu1 }
 0x897   :  { %v4377_v1 = vadd.f32 %v4602_v62, %v4376_v47  ;;  %v5255_v30 = vpop.f32.mrb[150].mxu1 }
 0x898   :  { %v4429_v36 = vpack.c.bf16 %v4385_v51, %v4385_v51  ;;  %v4388_v26 = vadd.f32 %v5255_v30, %v4602_v62  ;;  %v4379_v54 = vpop.f32.mrb[151].mxu1 }
 0x899   :  { %v4427_v5 = vpack.c.bf16 %v4377_v1, %v4377_v1  ;;  %v4380_v15 = vadd.f32 %v4602_v62, %v4379_v54 }
 0x89a   :  { %4446 = vst.msk [vmem:[%s6762_s10 + $0x18] sm:$0xf] %vm4439_vm4, %v4429_v36  ;;  %v4430_v3 = vpack.c.bf16 %v4388_v26, %v4388_v26 }
 0x89b   :  { %4444 = vst.msk [vmem:[%s6762_s10 + $0x10] sm:$0xf] %vm4439_vm4, %v4427_v5  ;;  %v4428_v29 = vpack.c.bf16 %v4380_v15, %v4380_v15 }
 0x89c   :  { %4447 = vst.msk [vmem:[%s6762_s10 + $0x1c] sm:$0xf] %vm4439_vm4, %v4430_v3 }
 0x89d   :  { %4445 = vst.msk [vmem:[%s6762_s10 + $0x14] sm:$0xf] %vm4439_vm4, %v4428_v29 }
 0x8a5   :  { %v5258_v41 = vpop.f32.mrb[152].mxu1 }
 0x8a6   :  { %v4401_v24 = vadd.f32 %v5258_v41, %v4602_v62  ;;  %v4392_v44 = vpop.f32.mrb[153].mxu1 }
 0x8a7   :  { %v4393_v25 = vadd.f32 %v4602_v62, %v4392_v44  ;;  %v5259_v2 = vpop.f32.mrb[154].mxu1 }
 0x8a8   :  { %v4433_v60 = vpack.c.bf16 %v4401_v24, %v4401_v24  ;;  %v4404_v61 = vadd.f32 %v5259_v2, %v4602_v62  ;;  %v4395_v39 = vpop.f32.mrb[155].mxu1 }
 0x8a9   :  { %v4431_v42 = vpack.c.bf16 %v4393_v25, %v4393_v25  ;;  %v4396_v38 = vadd.f32 %v4602_v62, %v4395_v39 }
 0x8aa   :  { %4450 = vst.msk [vmem:[%s6762_s10 + $0x28] sm:$0xf] %vm4439_vm4, %v4433_v60  ;;  %v4434_v53 = vpack.c.bf16 %v4404_v61, %v4404_v61 }
 0x8ab   :  { %4448 = vst.msk [vmem:[%s6762_s10 + $0x20] sm:$0xf] %vm4439_vm4, %v4431_v42  ;;  %v4432_v32 = vpack.c.bf16 %v4396_v38, %v4396_v38 }
 0x8ac   :  { %4451 = vst.msk [vmem:[%s6762_s10 + $0x2c] sm:$0xf] %vm4439_vm4, %v4434_v53 }
 0x8ad   :  { %4449 = vst.msk [vmem:[%s6762_s10 + $0x24] sm:$0xf] %vm4439_vm4, %v4432_v32 }
 0x8e8   :  { %v5262_v27 = vpop.f32.mrb[156].mxu1 }
 0x8e9   :  { %v4417_v63 = vadd.f32 %v5262_v27, %v4602_v62  ;;  %v4408_v16 = vpop.f32.mrb[157].mxu1 }
 0x8ea   :  { %v4409_v17 = vadd.f32 %v4602_v62, %v4408_v16  ;;  %v5263_v13 = vpop.f32.mrb[158].mxu1 }
 0x8eb   :  { %v4437_v14 = vpack.c.bf16 %v4417_v63, %v4417_v63  ;;  %v4420_v28 = vadd.f32 %v5263_v13, %v4602_v62  ;;  %v4411_v0 = vpop.f32.mrb[159].mxu1 }
 0x8ec   :  { %v4435_v46 = vpack.c.bf16 %v4409_v17, %v4409_v17  ;;  %v4412_v6 = vadd.f32 %v4602_v62, %v4411_v0 }
 0x8ed   :  { %4454 = vst.msk [vmem:[%s6762_s10 + $0x38] sm:$0xf] %vm4439_vm4, %v4437_v14  ;;  %v4438_v21 = vpack.c.bf16 %v4420_v28, %v4420_v28 }
 0x8ee   :  { %4452 = vst.msk [vmem:[%s6762_s10 + $0x30] sm:$0xf] %vm4439_vm4, %v4435_v46  ;;  %v4436_v8 = vpack.c.bf16 %v4412_v6, %v4412_v6 }
 0x8ef   :  { %4455 = vst.msk [vmem:[%s6762_s10 + $0x3c] sm:$0xf] %vm4439_vm4, %v4438_v21 }
 0x8f0   :  { %4453 = vst.msk [vmem:[%s6762_s10 + $0x34] sm:$0xf] %vm4439_vm4, %v4436_v8 }

</bundles_post_ra>
